<compile_context>
chip_gen: v6e
topology: v6e:2x2x1
jax: 0.10.0
libtpu: 0.0.40
codegen_flags: <defaults>
</compile_context>

<pallas_src>
import functools

import numpy as np
import jax
import jax.numpy as jnp
from jax import lax
from jax.experimental import pallas as pl
from jax.experimental.pallas import tpu as pltpu

GN_EPS = float(np.finfo(np.float32).eps)   # nn.GroupNorm eps used by TAC
LN_EPS = 1e-8                              # GlobLN eps used by UConvBlock
PAD = 128                                  # lane padding of the tap scratch (>= 2**(depth-1))


def _prelu(x, alpha):
    return jnp.maximum(x, 0.0) + alpha * jnp.minimum(x, 0.0)


# --------------------------------------------------------------------------------------
# Fused TAC + UConvBlock kernel: one batch element per grid step.
# x_ref / out_ref tiles are (Npg, G*L): channels-per-group on sublanes, group folded
# into the lane/time axis.
# --------------------------------------------------------------------------------------
def _gc_kernel(x_ref,
               gng_ref, gnb_ref,
               w1_ref, b1_ref, a1_ref,
               w2_ref, b2_ref, a2_ref,
               w3a_ref, w3b_ref, b3_ref, a3_ref,
               pw_ref, pb_ref, pg_ref, pbeta_ref, ap_ref,
               dww_ref, dwb_ref, dwg_ref, dwbeta_ref,
               fg_ref, fb_ref, af_ref,
               rw_ref, rb_ref,
               out_ref,
               xpad_ref,
               *, G, Npg, H, Cexp, depth, L):
    f32 = jnp.float32
    bf16 = jnp.bfloat16
    GL = G * L

    # zero the pad regions of the tap scratch (cheap, and correct under any sharding of
    # the "parallel" grid axis across TensorCores; the middle is rewritten every level)
    zpad = jnp.zeros((Cexp, PAD), f32)
    xpad_ref[:, 0:PAD] = zpad
    xpad_ref[:, PAD + L:PAD + L + PAD] = zpad

    x = x_ref[...].astype(f32)                                      # (Npg, G*L)

    # ------------------------------- TAC -------------------------------
    # GroupNorm(1, Npg) per group: each group is one L-wide lane block.
    lane_gl = lax.broadcasted_iota(jnp.int32, (1, GL), 1)
    inv_n = 1.0 / float(Npg * L)
    mu_cols = jnp.zeros((1, GL), f32)
    rstd_cols = jnp.zeros((1, GL), f32)
    for g in range(G):
        xs = x[:, g * L:(g + 1) * L]
        mu_g = jnp.sum(xs) * inv_n
        var_g = jnp.sum((xs - mu_g) ** 2) * inv_n
        r_g = lax.rsqrt(var_g + GN_EPS)
        sel_g = ((lane_gl >= g * L) & (lane_gl < (g + 1) * L)).astype(f32)
        mu_cols = mu_cols + mu_g * sel_g
        rstd_cols = rstd_cols + r_g * sel_g
    nrm = (x - mu_cols) * rstd_cols * gng_ref[...] + gnb_ref[...]   # (Npg, G*L)

    a1 = a1_ref[...]
    a2 = a2_ref[...]
    a3 = a3_ref[...]

    # transform: Linear(Npg -> H) shared across groups (groups folded into lanes) + PReLU
    h1 = jnp.dot(w1_ref[...], nrm.astype(bf16), preferred_element_type=f32) + b1_ref[...]
    h1 = _prelu(h1, a1)                                             # (H, G*L)

    # average over groups (static lane-block sum), Linear(H -> H) + PReLU
    m = h1[:, 0:L]
    for g in range(1, G):
        m = m + h1[:, g * L:(g + 1) * L]
    m = m * (1.0 / G)
    h2 = jnp.dot(w2_ref[...], m.astype(bf16), preferred_element_type=f32) + b2_ref[...]
    h2 = _prelu(h2, a2)                                             # (H, L)

    # concat Linear(2H -> Npg): per-group half + shared (group-mean) half
    z = jnp.dot(w3a_ref[...], h1.astype(bf16), preferred_element_type=f32)   # (Npg, G*L)
    zb = (jnp.dot(w3b_ref[...], h2.astype(bf16), preferred_element_type=f32)
          + b3_ref[...])                                            # (Npg, L)

    # hoisted UConvBlock parameters (read once per grid step)
    Wp = pw_ref[...]
    bp = pb_ref[...]
    pg = pg_ref[...]
    pbeta = pbeta_ref[...]
    ap = ap_ref[...]
    fg = fg_ref[...]
    fb = fb_ref[...]
    af = af_ref[...]
    Wr = rw_ref[...]
    br = rb_ref[...]
    dww = dww_ref[...]                                              # (Cexp, depth*5)
    dwb = dwb_ref[...]                                              # (Cexp, depth)
    dwg = dwg_ref[...]
    dwbeta = dwbeta_ref[...]

    lane = lax.broadcasted_iota(jnp.int32, (1, L), 1)

    # -------------------------- UConvBlock (per group) --------------------------
    for g in range(G):
        c0, c1 = g * L, (g + 1) * L
        tac_g = x[:, c0:c1] + _prelu(z[:, c0:c1] + zb, a3)          # (Npg, L)

        # proj_1x1: 1x1 conv + GlobLN + PReLU
        y = jnp.dot(Wp, tac_g.astype(bf16), preferred_element_type=f32) + bp   # (Cexp, L)
        mu0 = jnp.mean(y)
        d0 = y - mu0
        y = _prelu(d0 * lax.rsqrt(jnp.mean(d0 * d0) + LN_EPS) * pg + pbeta, ap)

        # depthwise k=5 pyramid in a dilated (undecimated) layout: the level-k feature of
        # logical length L/2^k keeps full physical length L with its valid samples at
        # lane positions that are multiples of 2^k (other lanes are don't-care).
        feats = []
        cur = y
        for k in range(depth):
            dil = 1 << max(k - 1, 0)                 # tap dilation at this level
            xpad_ref[:, PAD:PAD + L] = cur
            acc = jnp.zeros((Cexp, L), f32)
            for j in range(5):
                off = PAD + dil * (j - 2)
                acc = acc + dww[:, 5 * k + j:5 * k + j + 1] * xpad_ref[:, off:off + L]
            acc = acc + dwb[:, k:k + 1]
            # GlobLN over the valid samples only
            cnt = float(Cexp * (L >> k))
            if k == 0:
                mu_k = jnp.sum(acc) / cnt
                d_k = acc - mu_k
                var_k = jnp.sum(d_k * d_k) / cnt
            else:
                msk = ((lane & ((1 << k) - 1)) == 0).astype(f32)
                mu_k = jnp.sum(acc * msk) / cnt
                d_k = acc - mu_k
                var_k = jnp.sum(d_k * d_k * msk) / cnt
            nk = (d_k * lax.rsqrt(var_k + LN_EPS) * dwg[:, k:k + 1]
                  + dwbeta[:, k:k + 1])
            feats.append(nk)
            cur = nk

        # nearest-x2 upsample + fusion: in the dilated layout, upsampling level k onto
        # level k-1 is a select between A_k (even logical index) and A_k shifted by the
        # level-(k-1) stride (odd logical index).  No O(L^2) matmul, no strided access.
        for k in range(depth - 1, 0, -1):
            sk = 1 << (k - 1)
            xpad_ref[:, PAD:PAD + L] = feats[k]
            shifted = xpad_ref[:, PAD - sk:PAD - sk + L]
            sel = (lane & (2 * sk - 1)) == 0
            feats[k - 1] = feats[k - 1] + jnp.where(sel, feats[k], shifted)

        # final GlobLN + PReLU, 1x1 res conv + residual
        e = feats[0]
        mu_f = jnp.mean(e)
        d_f = e - mu_f
        e = _prelu(d_f * lax.rsqrt(jnp.mean(d_f * d_f) + LN_EPS) * fg + fb, af)
        res = jnp.dot(Wr, e.astype(bf16), preferred_element_type=f32) + br      # (Npg, L)
        out_ref[:, c0:c1] = (res + tac_g).astype(out_ref.dtype)


def gc_uconvblock_pallas(x, params, *, G, Npg, H, depth):
    B, N, L = x.shape
    assert N == G * Npg
    assert L % (1 << (depth - 1)) == 0, "L must be divisible by 2**(depth-1)"
    assert (1 << (depth - 1)) <= PAD
    # TODO(synk): if a model config has Npg / H / Cexp not multiples of 8, pad the
    # channel dims here so in-kernel sublane splits stay tile-aligned (this config is).
    tp, up = params['tac'], params['uconv']
    Cexp = up['Wp'].shape[0]
    GL = G * L
    f32, bf16 = jnp.float32, jnp.bfloat16

    # fold the group axis into the lane/time axis: (B, G*Npg, L) -> (B, Npg, G*L)
    xf = x.reshape(B, G, Npg, L).transpose(0, 2, 1, 3).reshape(B, Npg, GL)

    # per-level depthwise params packed with the (level, tap) index on the lane axis
    dww = jnp.transpose(up['dww'], (1, 0, 2)).reshape(Cexp, depth * 5).astype(f32)
    dwb = jnp.transpose(up['dwb'], (1, 0)).astype(f32)          # (Cexp, depth)
    dwg = jnp.transpose(up['dwg'], (1, 0)).astype(f32)
    dwbeta = jnp.transpose(up['dwbeta'], (1, 0)).astype(f32)

    args = (
        xf,
        tp['gn_g'].reshape(Npg, 1).astype(f32), tp['gn_b'].reshape(Npg, 1).astype(f32),
        tp['W1'].astype(bf16), tp['b1'].reshape(H, 1).astype(f32),
        tp['a1'].reshape(1, 1).astype(f32),
        tp['W2'].astype(bf16), tp['b2'].reshape(H, 1).astype(f32),
        tp['a2'].reshape(1, 1).astype(f32),
        tp['W3'][:, :H].astype(bf16), tp['W3'][:, H:].astype(bf16),
        tp['b3'].reshape(Npg, 1).astype(f32), tp['a3'].reshape(1, 1).astype(f32),
        up['Wp'].astype(bf16), up['bp'].reshape(Cexp, 1).astype(f32),
        up['pg'].reshape(Cexp, 1).astype(f32), up['pb_n'].reshape(Cexp, 1).astype(f32),
        up['ap'].reshape(1, 1).astype(f32),
        dww, dwb, dwg, dwbeta,
        up['fg'].reshape(Cexp, 1).astype(f32), up['fb'].reshape(Cexp, 1).astype(f32),
        up['af'].reshape(1, 1).astype(f32),
        up['Wr'].astype(bf16), up['br'].reshape(Npg, 1).astype(f32),
    )

    def cspec(arr):
        nd = arr.ndim
        return pl.BlockSpec(arr.shape, lambda b, _nd=nd: (0,) * _nd)

    in_specs = ([pl.BlockSpec((None, Npg, GL), lambda b: (b, 0, 0))]
                + [cspec(a) for a in args[1:]])

    out = pl.pallas_call(
        functools.partial(_gc_kernel, G=G, Npg=Npg, H=H, Cexp=Cexp, depth=depth, L=L),
        out_shape=jax.ShapeDtypeStruct((B, Npg, GL), x.dtype),
        grid=(B,),
        in_specs=in_specs,
        out_specs=pl.BlockSpec((None, Npg, GL), lambda b: (b, 0, 0)),
        scratch_shapes=[pltpu.VMEM((Cexp, L + 2 * PAD), jnp.float32)],
        compiler_params=pltpu.CompilerParams(
            dimension_semantics=("parallel",),        # batch grid sharded across TCs
            vmem_limit_bytes=32 * 1024 * 1024),
    )(*args)

    # unfold back to (B, N, L) with channel index g*Npg + n (matches the torch .view)
    return out.reshape(B, Npg, G, L).transpose(0, 2, 1, 3).reshape(B, N, L)


# --------------------------------------------------------------------------------------
# Pure-JAX reference (mirrors the torch semantics) for a correctness check
# --------------------------------------------------------------------------------------
def _tac_ref(x, p, *, G, Npg, H):
    B, GN, T = x.shape
    xg = x.reshape(B, G, Npg, T)
    mu = xg.mean(axis=(2, 3), keepdims=True)
    var = ((xg - mu) ** 2).mean(axis=(2, 3), keepdims=True)
    nrm = (xg - mu) / jnp.sqrt(var + GN_EPS) * p['gn_g'][None, None, :, None] \
        + p['gn_b'][None, None, :, None]
    h1 = jnp.einsum('hn,bgnt->bght', p['W1'], nrm) + p['b1'][None, None, :, None]
    h1 = _prelu(h1, p['a1'][0])
    m = h1.mean(axis=1)
    h2 = _prelu(jnp.einsum('kh,bht->bkt', p['W2'], m) + p['b2'][None, :, None], p['a2'][0])
    z = (jnp.einsum('nh,bght->bgnt', p['W3'][:, :H], h1)
         + jnp.einsum('nh,bht->bnt', p['W3'][:, H:], h2)[:, None]
         + p['b3'][None, None, :, None])
    z = _prelu(z, p['a3'][0])
    return x + z.reshape(B, GN, T)


def _glob_ln_ref(x, g, b):
    mu = x.mean(axis=(1, 2), keepdims=True)
    var = ((x - mu) ** 2).mean(axis=(1, 2), keepdims=True)
    return (x - mu) / jnp.sqrt(var + LN_EPS) * g[None, :, None] + b[None, :, None]


def _uconv_ref(x, p, *, depth):
    y = jnp.einsum('oc,bcl->bol', p['Wp'], x) + p['bp'][None, :, None]
    y = _prelu(_glob_ln_ref(y, p['pg'], p['pb_n']), p['ap'][0])
    feats = []
    cur = y
    for k in range(depth):
        w, b = p['dww'][k], p['dwb'][k]
        Lc = cur.shape[-1]
        xp = jnp.pad(cur, ((0, 0), (0, 0), (2, 2)))
        acc = sum(w[None, :, j:j + 1] * xp[:, :, j:j + Lc] for j in range(5)) \
            + b[None, :, None]
        if k > 0:
            acc = acc[:, :, ::2]
        acc = _glob_ln_ref(acc, p['dwg'][k], p['dwbeta'][k])
        feats.append(acc)
        cur = acc
    for k in range(depth - 1, 0, -1):
        feats[k - 1] = feats[k - 1] + jnp.repeat(feats[k], 2, axis=-1)
    e = _prelu(_glob_ln_ref(feats[0], p['fg'], p['fb']), p['af'][0])
    return jnp.einsum('oc,bcl->bol', p['Wr'], e) + p['br'][None, :, None] + x


def gc_uconvblock_ref(x, params, *, G, Npg, H, depth):
    B, N, L = x.shape
    t = _tac_ref(x, params['tac'], G=G, Npg=Npg, H=H)
    y = t.reshape(B * G, Npg, L)
    return _uconv_ref(y, params['uconv'], depth=depth).reshape(B, N, L)


# --------------------------------------------------------------------------------------
# Deterministic parameter init (norm gains 1 / bias 0, PReLU alpha 0.25, dense/conv
# weights from PRNGKey-derived normals).
# --------------------------------------------------------------------------------------
def init_params(key, *, out_channels, in_channels, num_group, depth):
    G = num_group
    Npg = out_channels // G
    H = (out_channels * 3) // G
    Cexp = in_channels // G
    f32 = jnp.float32
    ks = jax.random.split(key, 12)

    def nrm(k, shape, scale=0.1):
        return (scale * jax.random.normal(k, shape)).astype(f32)

    tac = dict(
        gn_g=jnp.ones((Npg,), f32), gn_b=jnp.zeros((Npg,), f32),
        W1=nrm(ks[0], (H, Npg)), b1=nrm(ks[1], (H,), 0.02), a1=jnp.full((1,), 0.25, f32),
        W2=nrm(ks[2], (H, H)), b2=nrm(ks[3], (H,), 0.02), a2=jnp.full((1,), 0.25, f32),
        W3=nrm(ks[4], (Npg, 2 * H)), b3=nrm(ks[5], (Npg,), 0.02), a3=jnp.full((1,), 0.25, f32),
    )
    uconv = dict(
        Wp=nrm(ks[6], (Cexp, Npg)), bp=nrm(ks[7], (Cexp,), 0.02),
        pg=jnp.ones((Cexp,), f32), pb_n=jnp.zeros((Cexp,), f32),
        ap=jnp.full((1,), 0.25, f32),
        dww=nrm(ks[8], (depth, Cexp, 5)), dwb=nrm(ks[9], (depth, Cexp), 0.02),
        dwg=jnp.ones((depth, Cexp), f32), dwbeta=jnp.zeros((depth, Cexp), f32),
        fg=jnp.ones((Cexp,), f32), fb=jnp.zeros((Cexp,), f32),
        af=jnp.full((1,), 0.25, f32),
        Wr=nrm(ks[10], (Npg, Cexp)), br=nrm(ks[11], (Npg,), 0.02),
    )
    return dict(tac=tac, uconv=uconv)


if __name__ == "__main__":
    # Small config consistent with GC_UConvBlock(out_channels, in_channels, depth, num_group)
    B = 2
    out_channels = 32
    in_channels = 64
    num_group = 4
    depth = 3
    L = 64                      # divisible by 2**(depth-1) so the U-Conv pyramid fuses cleanly

    G = num_group
    Npg = out_channels // G
    H = out_channels * 3 // G

    key = jax.random.PRNGKey(0)
    kx, kp = jax.random.split(key)
    x = jax.random.normal(kx, (B, out_channels, L), dtype=jnp.float32)
    params = init_params(kp, out_channels=out_channels, in_channels=in_channels,
                         num_group=num_group, depth=depth)

    out = gc_uconvblock_pallas(x, params, G=G, Npg=Npg, H=H, depth=depth)
    out = jax.block_until_ready(out)

    ref = gc_uconvblock_ref(x, params, G=G, Npg=Npg, H=H, depth=depth)
    # kernel matmul operands run in bf16 (f32 accumulation); tolerance admits that rounding
    np.testing.assert_allclose(np.asarray(out), np.asarray(ref), rtol=3e-2, atol=3e-2)
    print("KERNEL_OK")
</pallas_src>

<mosaic_0001>
module attributes {stable_mosaic.version = 11 : i64} {
  func.func @_gc_kernel(%arg0: i32, %arg1: memref<1x8x256xf32, #tpu.memory_space<vmem>>, %arg2: memref<8x1xf32, #tpu.memory_space<vmem>>, %arg3: memref<8x1xf32, #tpu.memory_space<vmem>>, %arg4: memref<24x8xbf16, #tpu.memory_space<vmem>>, %arg5: memref<24x1xf32, #tpu.memory_space<vmem>>, %arg6: memref<1x1xf32, #tpu.memory_space<vmem>>, %arg7: memref<24x24xbf16, #tpu.memory_space<vmem>>, %arg8: memref<24x1xf32, #tpu.memory_space<vmem>>, %arg9: memref<1x1xf32, #tpu.memory_space<vmem>>, %arg10: memref<8x24xbf16, #tpu.memory_space<vmem>>, %arg11: memref<8x24xbf16, #tpu.memory_space<vmem>>, %arg12: memref<8x1xf32, #tpu.memory_space<vmem>>, %arg13: memref<1x1xf32, #tpu.memory_space<vmem>>, %arg14: memref<16x8xbf16, #tpu.memory_space<vmem>>, %arg15: memref<16x1xf32, #tpu.memory_space<vmem>>, %arg16: memref<16x1xf32, #tpu.memory_space<vmem>>, %arg17: memref<16x1xf32, #tpu.memory_space<vmem>>, %arg18: memref<1x1xf32, #tpu.memory_space<vmem>>, %arg19: memref<16x15xf32, #tpu.memory_space<vmem>>, %arg20: memref<16x3xf32, #tpu.memory_space<vmem>>, %arg21: memref<16x3xf32, #tpu.memory_space<vmem>>, %arg22: memref<16x3xf32, #tpu.memory_space<vmem>>, %arg23: memref<16x1xf32, #tpu.memory_space<vmem>>, %arg24: memref<16x1xf32, #tpu.memory_space<vmem>>, %arg25: memref<1x1xf32, #tpu.memory_space<vmem>>, %arg26: memref<8x16xbf16, #tpu.memory_space<vmem>>, %arg27: memref<8x1xf32, #tpu.memory_space<vmem>>, %arg28: memref<1x8x256xf32, #tpu.memory_space<vmem>>, %arg29: memref<16x320xf32, #tpu.memory_space<vmem>>) attributes {dimension_semantics = [#tpu.dimension_semantics<parallel>], iteration_bounds = array<i64: 2>, scalar_prefetch = 0 : i64, scratch_operands = 1 : i64, tpu.core_type = #tpu.core_type<tc>, window_params = [{transform_indices = @transform_0, window_bounds = array<i64: 1, 8, 256>}, {pipeline_mode = #tpu.pipeline_mode<synchronous>, transform_indices = @transform_1, window_bounds = array<i64: 8, 1>}, {pipeline_mode = #tpu.pipeline_mode<synchronous>, transform_indices = @transform_2, window_bounds = array<i64: 8, 1>}, {pipeline_mode = #tpu.pipeline_mode<synchronous>, transform_indices = @transform_3, window_bounds = array<i64: 24, 8>}, {pipeline_mode = #tpu.pipeline_mode<synchronous>, transform_indices = @transform_4, window_bounds = array<i64: 24, 1>}, {pipeline_mode = #tpu.pipeline_mode<synchronous>, transform_indices = @transform_5, window_bounds = array<i64: 1, 1>}, {pipeline_mode = #tpu.pipeline_mode<synchronous>, transform_indices = @transform_6, window_bounds = array<i64: 24, 24>}, {pipeline_mode = #tpu.pipeline_mode<synchronous>, transform_indices = @transform_7, window_bounds = array<i64: 24, 1>}, {pipeline_mode = #tpu.pipeline_mode<synchronous>, transform_indices = @transform_8, window_bounds = array<i64: 1, 1>}, {pipeline_mode = #tpu.pipeline_mode<synchronous>, transform_indices = @transform_9, window_bounds = array<i64: 8, 24>}, {pipeline_mode = #tpu.pipeline_mode<synchronous>, transform_indices = @transform_10, window_bounds = array<i64: 8, 24>}, {pipeline_mode = #tpu.pipeline_mode<synchronous>, transform_indices = @transform_11, window_bounds = array<i64: 8, 1>}, {pipeline_mode = #tpu.pipeline_mode<synchronous>, transform_indices = @transform_12, window_bounds = array<i64: 1, 1>}, {pipeline_mode = #tpu.pipeline_mode<synchronous>, transform_indices = @transform_13, window_bounds = array<i64: 16, 8>}, {pipeline_mode = #tpu.pipeline_mode<synchronous>, transform_indices = @transform_14, window_bounds = array<i64: 16, 1>}, {pipeline_mode = #tpu.pipeline_mode<synchronous>, transform_indices = @transform_15, window_bounds = array<i64: 16, 1>}, {pipeline_mode = #tpu.pipeline_mode<synchronous>, transform_indices = @transform_16, window_bounds = array<i64: 16, 1>}, {pipeline_mode = #tpu.pipeline_mode<synchronous>, transform_indices = @transform_17, window_bounds = array<i64: 1, 1>}, {pipeline_mode = #tpu.pipeline_mode<synchronous>, transform_indices = @transform_18, window_bounds = array<i64: 16, 15>}, {pipeline_mode = #tpu.pipeline_mode<synchronous>, transform_indices = @transform_19, window_bounds = array<i64: 16, 3>}, {pipeline_mode = #tpu.pipeline_mode<synchronous>, transform_indices = @transform_20, window_bounds = array<i64: 16, 3>}, {pipeline_mode = #tpu.pipeline_mode<synchronous>, transform_indices = @transform_21, window_bounds = array<i64: 16, 3>}, {pipeline_mode = #tpu.pipeline_mode<synchronous>, transform_indices = @transform_22, window_bounds = array<i64: 16, 1>}, {pipeline_mode = #tpu.pipeline_mode<synchronous>, transform_indices = @transform_23, window_bounds = array<i64: 16, 1>}, {pipeline_mode = #tpu.pipeline_mode<synchronous>, transform_indices = @transform_24, window_bounds = array<i64: 1, 1>}, {pipeline_mode = #tpu.pipeline_mode<synchronous>, transform_indices = @transform_25, window_bounds = array<i64: 8, 16>}, {pipeline_mode = #tpu.pipeline_mode<synchronous>, transform_indices = @transform_26, window_bounds = array<i64: 8, 1>}, {transform_indices = @transform_27, window_bounds = array<i64: 1, 8, 256>}]} {
    %cst = arith.constant 0.000000e+00 : f32
    %0 = vector.broadcast %cst : f32 to vector<16x128xf32>
    %c0 = arith.constant 0 : index
    %c0_0 = arith.constant 0 : index
    %1 = vector.load %arg29[%c0, %c0_0] : memref<16x320xf32, #tpu.memory_space<vmem>>, vector<16x128xf32>
    tpu.vector_store %arg29[%c0, %c0_0], %0 {strides = array<i32>} : memref<16x320xf32, #tpu.memory_space<vmem>>, vector<16x128xf32>,
    %c0_1 = arith.constant 0 : index
    %c192 = arith.constant 192 : index
    %2 = vector.load %arg29[%c0_1, %c192] : memref<16x320xf32, #tpu.memory_space<vmem>>, vector<16x128xf32>
    tpu.vector_store %arg29[%c0_1, %c192], %0 {strides = array<i32>} : memref<16x320xf32, #tpu.memory_space<vmem>>, vector<16x128xf32>,
    %c0_2 = arith.constant 0 : index
    %c0_3 = arith.constant 0 : index
    %c0_4 = arith.constant 0 : index
    %3 = vector.load %arg1[%c0_2, %c0_3, %c0_4] : memref<1x8x256xf32, #tpu.memory_space<vmem>>, vector<1x8x256xf32>
    %4 = vector.shape_cast %3 : vector<1x8x256xf32> to vector<8x256xf32>
    %5 = tpu.iota {dimensions = array<i32: 1>} : vector<1x256xi32>
    %cst_5 = arith.constant 0.000000e+00 : f32
    %6 = vector.broadcast %cst_5 : f32 to vector<1x256xf32>
    %cst_6 = arith.constant 0.000000e+00 : f32
    %7 = vector.broadcast %cst_6 : f32 to vector<1x256xf32>
    %8 = vector.extract_strided_slice %4 {offsets = [0, 0], sizes = [8, 64], strides = [1, 1]} : vector<8x256xf32> to vector<8x64xf32>
    %9 = vector.shape_cast %8 : vector<8x64xf32> to vector<1x8x64xf32>
    %cst_7 = arith.constant dense<0.000000e+00> : vector<1xf32>
    %10 = vector.multi_reduction <add>, %9, %cst_7 [1, 2] : vector<1x8x64xf32> to vector<1xf32>
    %11 = vector.shape_cast %10 : vector<1xf32> to vector<1x1x1xf32>
    %12 = vector.extract %11[0, 0, 0] : f32 from vector<1x1x1xf32>
    %cst_8 = arith.constant 0.001953125 : f32
    %13 = arith.mulf %12, %cst_8 : f32
    %14 = vector.broadcast %13 : f32 to vector<8x64xf32>
    %15 = arith.subf %8, %14 : vector<8x64xf32>
    %16 = arith.mulf %15, %15 : vector<8x64xf32>
    %17 = vector.shape_cast %16 : vector<8x64xf32> to vector<1x8x64xf32>
    %cst_9 = arith.constant dense<0.000000e+00> : vector<1xf32>
    %18 = vector.multi_reduction <add>, %17, %cst_9 [1, 2] : vector<1x8x64xf32> to vector<1xf32>
    %19 = vector.shape_cast %18 : vector<1xf32> to vector<1x1x1xf32>
    %20 = vector.extract %19[0, 0, 0] : f32 from vector<1x1x1xf32>
    %cst_10 = arith.constant 0.001953125 : f32
    %21 = arith.mulf %20, %cst_10 : f32
    %cst_11 = arith.constant 1.1920929E-7 : f32
    %22 = arith.addf %21, %cst_11 : f32
    %23 = math.rsqrt %22 : f32
    %c0_i32 = arith.constant 0 : i32
    %24 = vector.broadcast %c0_i32 : i32 to vector<1x256xi32>
    %25 = arith.cmpi sge, %5, %24 : vector<1x256xi32>
    %c64_i32 = arith.constant 64 : i32
    %26 = vector.broadcast %c64_i32 : i32 to vector<1x256xi32>
    %27 = arith.cmpi slt, %5, %26 : vector<1x256xi32>
    %28 = arith.andi %25, %27 : vector<1x256xi1>
    %29 = arith.extui %28 : vector<1x256xi1> to vector<1x256xi32>
    %30 = arith.sitofp %29 : vector<1x256xi32> to vector<1x256xf32>
    %31 = vector.broadcast %13 : f32 to vector<1x256xf32>
    %32 = arith.mulf %31, %30 : vector<1x256xf32>
    %33 = arith.addf %6, %32 : vector<1x256xf32>
    %34 = vector.broadcast %23 : f32 to vector<1x256xf32>
    %35 = arith.mulf %34, %30 : vector<1x256xf32>
    %36 = arith.addf %7, %35 : vector<1x256xf32>
    %37 = vector.extract_strided_slice %4 {offsets = [0, 64], sizes = [8, 64], strides = [1, 1]} : vector<8x256xf32> to vector<8x64xf32>
    %38 = vector.shape_cast %37 : vector<8x64xf32> to vector<1x8x64xf32>
    %cst_12 = arith.constant dense<0.000000e+00> : vector<1xf32>
    %39 = vector.multi_reduction <add>, %38, %cst_12 [1, 2] : vector<1x8x64xf32> to vector<1xf32>
    %40 = vector.shape_cast %39 : vector<1xf32> to vector<1x1x1xf32>
    %41 = vector.extract %40[0, 0, 0] : f32 from vector<1x1x1xf32>
    %cst_13 = arith.constant 0.001953125 : f32
    %42 = arith.mulf %41, %cst_13 : f32
    %43 = vector.broadcast %42 : f32 to vector<8x64xf32>
    %44 = arith.subf %37, %43 : vector<8x64xf32>
    %45 = arith.mulf %44, %44 : vector<8x64xf32>
    %46 = vector.shape_cast %45 : vector<8x64xf32> to vector<1x8x64xf32>
    %cst_14 = arith.constant dense<0.000000e+00> : vector<1xf32>
    %47 = vector.multi_reduction <add>, %46, %cst_14 [1, 2] : vector<1x8x64xf32> to vector<1xf32>
    %48 = vector.shape_cast %47 : vector<1xf32> to vector<1x1x1xf32>
    %49 = vector.extract %48[0, 0, 0] : f32 from vector<1x1x1xf32>
    %cst_15 = arith.constant 0.001953125 : f32
    %50 = arith.mulf %49, %cst_15 : f32
    %cst_16 = arith.constant 1.1920929E-7 : f32
    %51 = arith.addf %50, %cst_16 : f32
    %52 = math.rsqrt %51 : f32
    %c64_i32_17 = arith.constant 64 : i32
    %53 = vector.broadcast %c64_i32_17 : i32 to vector<1x256xi32>
    %54 = arith.cmpi sge, %5, %53 : vector<1x256xi32>
    %c128_i32 = arith.constant 128 : i32
    %55 = vector.broadcast %c128_i32 : i32 to vector<1x256xi32>
    %56 = arith.cmpi slt, %5, %55 : vector<1x256xi32>
    %57 = arith.andi %54, %56 : vector<1x256xi1>
    %58 = arith.extui %57 : vector<1x256xi1> to vector<1x256xi32>
    %59 = arith.sitofp %58 : vector<1x256xi32> to vector<1x256xf32>
    %60 = vector.broadcast %42 : f32 to vector<1x256xf32>
    %61 = arith.mulf %60, %59 : vector<1x256xf32>
    %62 = arith.addf %33, %61 : vector<1x256xf32>
    %63 = vector.broadcast %52 : f32 to vector<1x256xf32>
    %64 = arith.mulf %63, %59 : vector<1x256xf32>
    %65 = arith.addf %36, %64 : vector<1x256xf32>
    %66 = vector.extract_strided_slice %4 {offsets = [0, 128], sizes = [8, 64], strides = [1, 1]} : vector<8x256xf32> to vector<8x64xf32>
    %67 = vector.shape_cast %66 : vector<8x64xf32> to vector<1x8x64xf32>
    %cst_18 = arith.constant dense<0.000000e+00> : vector<1xf32>
    %68 = vector.multi_reduction <add>, %67, %cst_18 [1, 2] : vector<1x8x64xf32> to vector<1xf32>
    %69 = vector.shape_cast %68 : vector<1xf32> to vector<1x1x1xf32>
    %70 = vector.extract %69[0, 0, 0] : f32 from vector<1x1x1xf32>
    %cst_19 = arith.constant 0.001953125 : f32
    %71 = arith.mulf %70, %cst_19 : f32
    %72 = vector.broadcast %71 : f32 to vector<8x64xf32>
    %73 = arith.subf %66, %72 : vector<8x64xf32>
    %74 = arith.mulf %73, %73 : vector<8x64xf32>
    %75 = vector.shape_cast %74 : vector<8x64xf32> to vector<1x8x64xf32>
    %cst_20 = arith.constant dense<0.000000e+00> : vector<1xf32>
    %76 = vector.multi_reduction <add>, %75, %cst_20 [1, 2] : vector<1x8x64xf32> to vector<1xf32>
    %77 = vector.shape_cast %76 : vector<1xf32> to vector<1x1x1xf32>
    %78 = vector.extract %77[0, 0, 0] : f32 from vector<1x1x1xf32>
    %cst_21 = arith.constant 0.001953125 : f32
    %79 = arith.mulf %78, %cst_21 : f32
    %cst_22 = arith.constant 1.1920929E-7 : f32
    %80 = arith.addf %79, %cst_22 : f32
    %81 = math.rsqrt %80 : f32
    %c128_i32_23 = arith.constant 128 : i32
    %82 = vector.broadcast %c128_i32_23 : i32 to vector<1x256xi32>
    %83 = arith.cmpi sge, %5, %82 : vector<1x256xi32>
    %c192_i32 = arith.constant 192 : i32
    %84 = vector.broadcast %c192_i32 : i32 to vector<1x256xi32>
    %85 = arith.cmpi slt, %5, %84 : vector<1x256xi32>
    %86 = arith.andi %83, %85 : vector<1x256xi1>
    %87 = arith.extui %86 : vector<1x256xi1> to vector<1x256xi32>
    %88 = arith.sitofp %87 : vector<1x256xi32> to vector<1x256xf32>
    %89 = vector.broadcast %71 : f32 to vector<1x256xf32>
    %90 = arith.mulf %89, %88 : vector<1x256xf32>
    %91 = arith.addf %62, %90 : vector<1x256xf32>
    %92 = vector.broadcast %81 : f32 to vector<1x256xf32>
    %93 = arith.mulf %92, %88 : vector<1x256xf32>
    %94 = arith.addf %65, %93 : vector<1x256xf32>
    %95 = vector.extract_strided_slice %4 {offsets = [0, 192], sizes = [8, 64], strides = [1, 1]} : vector<8x256xf32> to vector<8x64xf32>
    %96 = vector.shape_cast %95 : vector<8x64xf32> to vector<1x8x64xf32>
    %cst_24 = arith.constant dense<0.000000e+00> : vector<1xf32>
    %97 = vector.multi_reduction <add>, %96, %cst_24 [1, 2] : vector<1x8x64xf32> to vector<1xf32>
    %98 = vector.shape_cast %97 : vector<1xf32> to vector<1x1x1xf32>
    %99 = vector.extract %98[0, 0, 0] : f32 from vector<1x1x1xf32>
    %cst_25 = arith.constant 0.001953125 : f32
    %100 = arith.mulf %99, %cst_25 : f32
    %101 = vector.broadcast %100 : f32 to vector<8x64xf32>
    %102 = arith.subf %95, %101 : vector<8x64xf32>
    %103 = arith.mulf %102, %102 : vector<8x64xf32>
    %104 = vector.shape_cast %103 : vector<8x64xf32> to vector<1x8x64xf32>
    %cst_26 = arith.constant dense<0.000000e+00> : vector<1xf32>
    %105 = vector.multi_reduction <add>, %104, %cst_26 [1, 2] : vector<1x8x64xf32> to vector<1xf32>
    %106 = vector.shape_cast %105 : vector<1xf32> to vector<1x1x1xf32>
    %107 = vector.extract %106[0, 0, 0] : f32 from vector<1x1x1xf32>
    %cst_27 = arith.constant 0.001953125 : f32
    %108 = arith.mulf %107, %cst_27 : f32
    %cst_28 = arith.constant 1.1920929E-7 : f32
    %109 = arith.addf %108, %cst_28 : f32
    %110 = math.rsqrt %109 : f32
    %c192_i32_29 = arith.constant 192 : i32
    %111 = vector.broadcast %c192_i32_29 : i32 to vector<1x256xi32>
    %112 = arith.cmpi sge, %5, %111 : vector<1x256xi32>
    %c256_i32 = arith.constant 256 : i32
    %113 = vector.broadcast %c256_i32 : i32 to vector<1x256xi32>
    %114 = arith.cmpi slt, %5, %113 : vector<1x256xi32>
    %115 = arith.andi %112, %114 : vector<1x256xi1>
    %116 = arith.extui %115 : vector<1x256xi1> to vector<1x256xi32>
    %117 = arith.sitofp %116 : vector<1x256xi32> to vector<1x256xf32>
    %118 = vector.broadcast %100 : f32 to vector<1x256xf32>
    %119 = arith.mulf %118, %117 : vector<1x256xf32>
    %120 = arith.addf %91, %119 : vector<1x256xf32>
    %121 = vector.broadcast %110 : f32 to vector<1x256xf32>
    %122 = arith.mulf %121, %117 : vector<1x256xf32>
    %123 = arith.addf %94, %122 : vector<1x256xf32>
    %124 = vector.broadcast %120 : vector<1x256xf32> to vector<8x256xf32>
    %125 = arith.subf %4, %124 : vector<8x256xf32>
    %126 = vector.broadcast %123 : vector<1x256xf32> to vector<8x256xf32>
    %127 = arith.mulf %125, %126 : vector<8x256xf32>
    %c0_30 = arith.constant 0 : index
    %c0_31 = arith.constant 0 : index
    %128 = vector.load %arg2[%c0_30, %c0_31] : memref<8x1xf32, #tpu.memory_space<vmem>>, vector<8x1xf32>
    %129 = vector.broadcast %128 : vector<8x1xf32> to vector<8x256xf32>
    %130 = arith.mulf %127, %129 : vector<8x256xf32>
    %c0_32 = arith.constant 0 : index
    %c0_33 = arith.constant 0 : index
    %131 = vector.load %arg3[%c0_32, %c0_33] : memref<8x1xf32, #tpu.memory_space<vmem>>, vector<8x1xf32>
    %132 = vector.broadcast %131 : vector<8x1xf32> to vector<8x256xf32>
    %133 = arith.addf %130, %132 : vector<8x256xf32>
    %c0_34 = arith.constant 0 : index
    %c0_35 = arith.constant 0 : index
    %134 = vector.load %arg6[%c0_34, %c0_35] : memref<1x1xf32, #tpu.memory_space<vmem>>, vector<1x1xf32>
    %c0_36 = arith.constant 0 : index
    %c0_37 = arith.constant 0 : index
    %135 = vector.load %arg9[%c0_36, %c0_37] : memref<1x1xf32, #tpu.memory_space<vmem>>, vector<1x1xf32>
    %c0_38 = arith.constant 0 : index
    %c0_39 = arith.constant 0 : index
    %136 = vector.load %arg13[%c0_38, %c0_39] : memref<1x1xf32, #tpu.memory_space<vmem>>, vector<1x1xf32>
    %c0_40 = arith.constant 0 : index
    %c0_41 = arith.constant 0 : index
    %137 = vector.load %arg4[%c0_40, %c0_41] : memref<24x8xbf16, #tpu.memory_space<vmem>>, vector<24x8xbf16>
    %138 = arith.truncf %133 : vector<8x256xf32> to vector<8x256xbf16>
    %cst_42 = arith.constant dense<0.000000e+00> : vector<24x256xf32>
    %139 = tpu.matmul %137, %138, %cst_42 {dimension_numbers = #tpu.dot_dimension_numbers<[1], [0], [0], [1], [0, 0, 1, 1], [], []>} : vector<24x8xbf16>, vector<8x256xbf16>, vector<24x256xf32> -> vector<24x256xf32>
    %c0_43 = arith.constant 0 : index
    %c0_44 = arith.constant 0 : index
    %140 = vector.load %arg5[%c0_43, %c0_44] : memref<24x1xf32, #tpu.memory_space<vmem>>, vector<24x1xf32>
    %141 = vector.broadcast %140 : vector<24x1xf32> to vector<24x256xf32>
    %142 = arith.addf %139, %141 : vector<24x256xf32>
    %cst_45 = arith.constant 0.000000e+00 : f32
    %143 = vector.broadcast %cst_45 : f32 to vector<24x256xf32>
    %144 = arith.maximumf %142, %143 : vector<24x256xf32>
    %cst_46 = arith.constant 0.000000e+00 : f32
    %145 = vector.broadcast %cst_46 : f32 to vector<24x256xf32>
    %146 = arith.minimumf %142, %145 : vector<24x256xf32>
    %147 = vector.broadcast %134 : vector<1x1xf32> to vector<24x256xf32>
    %148 = arith.mulf %147, %146 : vector<24x256xf32>
    %149 = arith.addf %144, %148 : vector<24x256xf32>
    %150 = vector.extract_strided_slice %149 {offsets = [0, 0], sizes = [24, 64], strides = [1, 1]} : vector<24x256xf32> to vector<24x64xf32>
    %151 = vector.extract_strided_slice %149 {offsets = [0, 64], sizes = [24, 64], strides = [1, 1]} : vector<24x256xf32> to vector<24x64xf32>
    %152 = arith.addf %150, %151 : vector<24x64xf32>
    %153 = vector.extract_strided_slice %149 {offsets = [0, 128], sizes = [24, 64], strides = [1, 1]} : vector<24x256xf32> to vector<24x64xf32>
    %154 = arith.addf %152, %153 : vector<24x64xf32>
    %155 = vector.extract_strided_slice %149 {offsets = [0, 192], sizes = [24, 64], strides = [1, 1]} : vector<24x256xf32> to vector<24x64xf32>
    %156 = arith.addf %154, %155 : vector<24x64xf32>
    %cst_47 = arith.constant 2.500000e-01 : f32
    %157 = vector.broadcast %cst_47 : f32 to vector<24x64xf32>
    %158 = arith.mulf %156, %157 : vector<24x64xf32>
    %c0_48 = arith.constant 0 : index
    %c0_49 = arith.constant 0 : index
    %159 = vector.load %arg7[%c0_48, %c0_49] : memref<24x24xbf16, #tpu.memory_space<vmem>>, vector<24x24xbf16>
    %160 = arith.truncf %158 : vector<24x64xf32> to vector<24x64xbf16>
    %cst_50 = arith.constant dense<0.000000e+00> : vector<24x64xf32>
    %161 = tpu.matmul %159, %160, %cst_50 {dimension_numbers = #tpu.dot_dimension_numbers<[1], [0], [0], [1], [0, 0, 1, 1], [], []>} : vector<24x24xbf16>, vector<24x64xbf16>, vector<24x64xf32> -> vector<24x64xf32>
    %c0_51 = arith.constant 0 : index
    %c0_52 = arith.constant 0 : index
    %162 = vector.load %arg8[%c0_51, %c0_52] : memref<24x1xf32, #tpu.memory_space<vmem>>, vector<24x1xf32>
    %163 = vector.broadcast %162 : vector<24x1xf32> to vector<24x64xf32>
    %164 = arith.addf %161, %163 : vector<24x64xf32>
    %cst_53 = arith.constant 0.000000e+00 : f32
    %165 = vector.broadcast %cst_53 : f32 to vector<24x64xf32>
    %166 = arith.maximumf %164, %165 : vector<24x64xf32>
    %cst_54 = arith.constant 0.000000e+00 : f32
    %167 = vector.broadcast %cst_54 : f32 to vector<24x64xf32>
    %168 = arith.minimumf %164, %167 : vector<24x64xf32>
    %169 = vector.broadcast %135 : vector<1x1xf32> to vector<24x64xf32>
    %170 = arith.mulf %169, %168 : vector<24x64xf32>
    %171 = arith.addf %166, %170 : vector<24x64xf32>
    %c0_55 = arith.constant 0 : index
    %c0_56 = arith.constant 0 : index
    %172 = vector.load %arg10[%c0_55, %c0_56] : memref<8x24xbf16, #tpu.memory_space<vmem>>, vector<8x24xbf16>
    %173 = arith.truncf %149 : vector<24x256xf32> to vector<24x256xbf16>
    %cst_57 = arith.constant dense<0.000000e+00> : vector<8x256xf32>
    %174 = tpu.matmul %172, %173, %cst_57 {dimension_numbers = #tpu.dot_dimension_numbers<[1], [0], [0], [1], [0, 0, 1, 1], [], []>} : vector<8x24xbf16>, vector<24x256xbf16>, vector<8x256xf32> -> vector<8x256xf32>
    %c0_58 = arith.constant 0 : index
    %c0_59 = arith.constant 0 : index
    %175 = vector.load %arg11[%c0_58, %c0_59] : memref<8x24xbf16, #tpu.memory_space<vmem>>, vector<8x24xbf16>
    %176 = arith.truncf %171 : vector<24x64xf32> to vector<24x64xbf16>
    %cst_60 = arith.constant dense<0.000000e+00> : vector<8x64xf32>
    %177 = tpu.matmul %175, %176, %cst_60 {dimension_numbers = #tpu.dot_dimension_numbers<[1], [0], [0], [1], [0, 0, 1, 1], [], []>} : vector<8x24xbf16>, vector<24x64xbf16>, vector<8x64xf32> -> vector<8x64xf32>
    %c0_61 = arith.constant 0 : index
    %c0_62 = arith.constant 0 : index
    %178 = vector.load %arg12[%c0_61, %c0_62] : memref<8x1xf32, #tpu.memory_space<vmem>>, vector<8x1xf32>
    %179 = vector.broadcast %178 : vector<8x1xf32> to vector<8x64xf32>
    %180 = arith.addf %177, %179 : vector<8x64xf32>
    %c0_63 = arith.constant 0 : index
    %c0_64 = arith.constant 0 : index
    %181 = vector.load %arg14[%c0_63, %c0_64] : memref<16x8xbf16, #tpu.memory_space<vmem>>, vector<16x8xbf16>
    %c0_65 = arith.constant 0 : index
    %c0_66 = arith.constant 0 : index
    %182 = vector.load %arg15[%c0_65, %c0_66] : memref<16x1xf32, #tpu.memory_space<vmem>>, vector<16x1xf32>
    %c0_67 = arith.constant 0 : index
    %c0_68 = arith.constant 0 : index
    %183 = vector.load %arg16[%c0_67, %c0_68] : memref<16x1xf32, #tpu.memory_space<vmem>>, vector<16x1xf32>
    %c0_69 = arith.constant 0 : index
    %c0_70 = arith.constant 0 : index
    %184 = vector.load %arg17[%c0_69, %c0_70] : memref<16x1xf32, #tpu.memory_space<vmem>>, vector<16x1xf32>
    %c0_71 = arith.constant 0 : index
    %c0_72 = arith.constant 0 : index
    %185 = vector.load %arg18[%c0_71, %c0_72] : memref<1x1xf32, #tpu.memory_space<vmem>>, vector<1x1xf32>
    %c0_73 = arith.constant 0 : index
    %c0_74 = arith.constant 0 : index
    %186 = vector.load %arg23[%c0_73, %c0_74] : memref<16x1xf32, #tpu.memory_space<vmem>>, vector<16x1xf32>
    %c0_75 = arith.constant 0 : index
    %c0_76 = arith.constant 0 : index
    %187 = vector.load %arg24[%c0_75, %c0_76] : memref<16x1xf32, #tpu.memory_space<vmem>>, vector<16x1xf32>
    %c0_77 = arith.constant 0 : index
    %c0_78 = arith.constant 0 : index
    %188 = vector.load %arg25[%c0_77, %c0_78] : memref<1x1xf32, #tpu.memory_space<vmem>>, vector<1x1xf32>
    %c0_79 = arith.constant 0 : index
    %c0_80 = arith.constant 0 : index
    %189 = vector.load %arg26[%c0_79, %c0_80] : memref<8x16xbf16, #tpu.memory_space<vmem>>, vector<8x16xbf16>
    %c0_81 = arith.constant 0 : index
    %c0_82 = arith.constant 0 : index
    %190 = vector.load %arg27[%c0_81, %c0_82] : memref<8x1xf32, #tpu.memory_space<vmem>>, vector<8x1xf32>
    %c0_83 = arith.constant 0 : index
    %c0_84 = arith.constant 0 : index
    %191 = vector.load %arg19[%c0_83, %c0_84] : memref<16x15xf32, #tpu.memory_space<vmem>>, vector<16x15xf32>
    %c0_85 = arith.constant 0 : index
    %c0_86 = arith.constant 0 : index
    %192 = vector.load %arg20[%c0_85, %c0_86] : memref<16x3xf32, #tpu.memory_space<vmem>>, vector<16x3xf32>
    %c0_87 = arith.constant 0 : index
    %c0_88 = arith.constant 0 : index
    %193 = vector.load %arg21[%c0_87, %c0_88] : memref<16x3xf32, #tpu.memory_space<vmem>>, vector<16x3xf32>
    %c0_89 = arith.constant 0 : index
    %c0_90 = arith.constant 0 : index
    %194 = vector.load %arg22[%c0_89, %c0_90] : memref<16x3xf32, #tpu.memory_space<vmem>>, vector<16x3xf32>
    %195 = tpu.iota {dimensions = array<i32: 1>} : vector<1x64xi32>
    %196 = vector.extract_strided_slice %4 {offsets = [0, 0], sizes = [8, 64], strides = [1, 1]} : vector<8x256xf32> to vector<8x64xf32>
    %197 = vector.extract_strided_slice %174 {offsets = [0, 0], sizes = [8, 64], strides = [1, 1]} : vector<8x256xf32> to vector<8x64xf32>
    %198 = arith.addf %197, %180 : vector<8x64xf32>
    %cst_91 = arith.constant 0.000000e+00 : f32
    %199 = vector.broadcast %cst_91 : f32 to vector<8x64xf32>
    %200 = arith.maximumf %198, %199 : vector<8x64xf32>
    %cst_92 = arith.constant 0.000000e+00 : f32
    %201 = vector.broadcast %cst_92 : f32 to vector<8x64xf32>
    %202 = arith.minimumf %198, %201 : vector<8x64xf32>
    %203 = vector.broadcast %136 : vector<1x1xf32> to vector<8x64xf32>
    %204 = arith.mulf %203, %202 : vector<8x64xf32>
    %205 = arith.addf %200, %204 : vector<8x64xf32>
    %206 = arith.addf %196, %205 : vector<8x64xf32>
    %207 = arith.truncf %206 : vector<8x64xf32> to vector<8x64xbf16>
    %cst_93 = arith.constant dense<0.000000e+00> : vector<16x64xf32>
    %208 = tpu.matmul %181, %207, %cst_93 {dimension_numbers = #tpu.dot_dimension_numbers<[1], [0], [0], [1], [0, 0, 1, 1], [], []>} : vector<16x8xbf16>, vector<8x64xbf16>, vector<16x64xf32> -> vector<16x64xf32>
    %209 = vector.broadcast %182 : vector<16x1xf32> to vector<16x64xf32>
    %210 = arith.addf %208, %209 : vector<16x64xf32>
    %211 = vector.shape_cast %210 : vector<16x64xf32> to vector<1x16x64xf32>
    %cst_94 = arith.constant dense<0.000000e+00> : vector<1xf32>
    %212 = vector.multi_reduction <add>, %211, %cst_94 [1, 2] : vector<1x16x64xf32> to vector<1xf32>
    %213 = vector.shape_cast %212 : vector<1xf32> to vector<1x1x1xf32>
    %214 = vector.extract %213[0, 0, 0] : f32 from vector<1x1x1xf32>
    %cst_95 = arith.constant 1.024000e+03 : f32
    %215 = arith.divf %214, %cst_95 : f32
    %216 = vector.broadcast %215 : f32 to vector<16x64xf32>
    %217 = arith.subf %210, %216 : vector<16x64xf32>
    %218 = arith.mulf %217, %217 : vector<16x64xf32>
    %219 = vector.shape_cast %218 : vector<16x64xf32> to vector<1x16x64xf32>
    %cst_96 = arith.constant dense<0.000000e+00> : vector<1xf32>
    %220 = vector.multi_reduction <add>, %219, %cst_96 [1, 2] : vector<1x16x64xf32> to vector<1xf32>
    %221 = vector.shape_cast %220 : vector<1xf32> to vector<1x1x1xf32>
    %222 = vector.extract %221[0, 0, 0] : f32 from vector<1x1x1xf32>
    %cst_97 = arith.constant 1.024000e+03 : f32
    %223 = arith.divf %222, %cst_97 : f32
    %cst_98 = arith.constant 9.99999993E-9 : f32
    %224 = arith.addf %223, %cst_98 : f32
    %225 = math.rsqrt %224 : f32
    %226 = vector.broadcast %225 : f32 to vector<16x64xf32>
    %227 = arith.mulf %217, %226 : vector<16x64xf32>
    %228 = vector.broadcast %183 : vector<16x1xf32> to vector<16x64xf32>
    %229 = arith.mulf %227, %228 : vector<16x64xf32>
    %230 = vector.broadcast %184 : vector<16x1xf32> to vector<16x64xf32>
    %231 = arith.addf %229, %230 : vector<16x64xf32>
    %cst_99 = arith.constant 0.000000e+00 : f32
    %232 = vector.broadcast %cst_99 : f32 to vector<16x64xf32>
    %233 = arith.maximumf %231, %232 : vector<16x64xf32>
    %cst_100 = arith.constant 0.000000e+00 : f32
    %234 = vector.broadcast %cst_100 : f32 to vector<16x64xf32>
    %235 = arith.minimumf %231, %234 : vector<16x64xf32>
    %236 = vector.broadcast %185 : vector<1x1xf32> to vector<16x64xf32>
    %237 = arith.mulf %236, %235 : vector<16x64xf32>
    %238 = arith.addf %233, %237 : vector<16x64xf32>
    %c0_101 = arith.constant 0 : index
    %c128 = arith.constant 128 : index
    %239 = vector.load %arg29[%c0_101, %c128] : memref<16x320xf32, #tpu.memory_space<vmem>>, vector<16x64xf32>
    tpu.vector_store %arg29[%c0_101, %c128], %238 {strides = array<i32>} : memref<16x320xf32, #tpu.memory_space<vmem>>, vector<16x64xf32>,
    %cst_102 = arith.constant 0.000000e+00 : f32
    %240 = vector.broadcast %cst_102 : f32 to vector<16x64xf32>
    %241 = vector.extract_strided_slice %191 {offsets = [0, 0], sizes = [16, 1], strides = [1, 1]} : vector<16x15xf32> to vector<16x1xf32>
    %c0_103 = arith.constant 0 : index
    %c126 = arith.constant 126 : index
    %242 = vector.load %arg29[%c0_103, %c126] : memref<16x320xf32, #tpu.memory_space<vmem>>, vector<16x64xf32>
    %243 = vector.broadcast %241 : vector<16x1xf32> to vector<16x64xf32>
    %244 = arith.mulf %243, %242 : vector<16x64xf32>
    %245 = arith.addf %240, %244 : vector<16x64xf32>
    %246 = vector.extract_strided_slice %191 {offsets = [0, 1], sizes = [16, 1], strides = [1, 1]} : vector<16x15xf32> to vector<16x1xf32>
    %c0_104 = arith.constant 0 : index
    %c127 = arith.constant 127 : index
    %247 = vector.load %arg29[%c0_104, %c127] : memref<16x320xf32, #tpu.memory_space<vmem>>, vector<16x64xf32>
    %248 = vector.broadcast %246 : vector<16x1xf32> to vector<16x64xf32>
    %249 = arith.mulf %248, %247 : vector<16x64xf32>
    %250 = arith.addf %245, %249 : vector<16x64xf32>
    %251 = vector.extract_strided_slice %191 {offsets = [0, 2], sizes = [16, 1], strides = [1, 1]} : vector<16x15xf32> to vector<16x1xf32>
    %c0_105 = arith.constant 0 : index
    %c128_106 = arith.constant 128 : index
    %252 = vector.load %arg29[%c0_105, %c128_106] : memref<16x320xf32, #tpu.memory_space<vmem>>, vector<16x64xf32>
    %253 = vector.broadcast %251 : vector<16x1xf32> to vector<16x64xf32>
    %254 = arith.mulf %253, %252 : vector<16x64xf32>
    %255 = arith.addf %250, %254 : vector<16x64xf32>
    %256 = vector.extract_strided_slice %191 {offsets = [0, 3], sizes = [16, 1], strides = [1, 1]} : vector<16x15xf32> to vector<16x1xf32>
    %c0_107 = arith.constant 0 : index
    %c129 = arith.constant 129 : index
    %257 = vector.load %arg29[%c0_107, %c129] : memref<16x320xf32, #tpu.memory_space<vmem>>, vector<16x64xf32>
    %258 = vector.broadcast %256 : vector<16x1xf32> to vector<16x64xf32>
    %259 = arith.mulf %258, %257 : vector<16x64xf32>
    %260 = arith.addf %255, %259 : vector<16x64xf32>
    %261 = vector.extract_strided_slice %191 {offsets = [0, 4], sizes = [16, 1], strides = [1, 1]} : vector<16x15xf32> to vector<16x1xf32>
    %c0_108 = arith.constant 0 : index
    %c130 = arith.constant 130 : index
    %262 = vector.load %arg29[%c0_108, %c130] : memref<16x320xf32, #tpu.memory_space<vmem>>, vector<16x64xf32>
    %263 = vector.broadcast %261 : vector<16x1xf32> to vector<16x64xf32>
    %264 = arith.mulf %263, %262 : vector<16x64xf32>
    %265 = arith.addf %260, %264 : vector<16x64xf32>
    %266 = vector.extract_strided_slice %192 {offsets = [0, 0], sizes = [16, 1], strides = [1, 1]} : vector<16x3xf32> to vector<16x1xf32>
    %267 = vector.broadcast %266 : vector<16x1xf32> to vector<16x64xf32>
    %268 = arith.addf %265, %267 : vector<16x64xf32>
    %269 = vector.shape_cast %268 : vector<16x64xf32> to vector<1x16x64xf32>
    %cst_109 = arith.constant dense<0.000000e+00> : vector<1xf32>
    %270 = vector.multi_reduction <add>, %269, %cst_109 [1, 2] : vector<1x16x64xf32> to vector<1xf32>
    %271 = vector.shape_cast %270 : vector<1xf32> to vector<1x1x1xf32>
    %272 = vector.extract %271[0, 0, 0] : f32 from vector<1x1x1xf32>
    %cst_110 = arith.constant 1.024000e+03 : f32
    %273 = arith.divf %272, %cst_110 : f32
    %274 = vector.broadcast %273 : f32 to vector<16x64xf32>
    %275 = arith.subf %268, %274 : vector<16x64xf32>
    %276 = arith.mulf %275, %275 : vector<16x64xf32>
    %277 = vector.shape_cast %276 : vector<16x64xf32> to vector<1x16x64xf32>
    %cst_111 = arith.constant dense<0.000000e+00> : vector<1xf32>
    %278 = vector.multi_reduction <add>, %277, %cst_111 [1, 2] : vector<1x16x64xf32> to vector<1xf32>
    %279 = vector.shape_cast %278 : vector<1xf32> to vector<1x1x1xf32>
    %280 = vector.extract %279[0, 0, 0] : f32 from vector<1x1x1xf32>
    %cst_112 = arith.constant 1.024000e+03 : f32
    %281 = arith.divf %280, %cst_112 : f32
    %cst_113 = arith.constant 9.99999993E-9 : f32
    %282 = arith.addf %281, %cst_113 : f32
    %283 = math.rsqrt %282 : f32
    %284 = vector.broadcast %283 : f32 to vector<16x64xf32>
    %285 = arith.mulf %275, %284 : vector<16x64xf32>
    %286 = vector.extract_strided_slice %193 {offsets = [0, 0], sizes = [16, 1], strides = [1, 1]} : vector<16x3xf32> to vector<16x1xf32>
    %287 = vector.broadcast %286 : vector<16x1xf32> to vector<16x64xf32>
    %288 = arith.mulf %285, %287 : vector<16x64xf32>
    %289 = vector.extract_strided_slice %194 {offsets = [0, 0], sizes = [16, 1], strides = [1, 1]} : vector<16x3xf32> to vector<16x1xf32>
    %290 = vector.broadcast %289 : vector<16x1xf32> to vector<16x64xf32>
    %291 = arith.addf %288, %290 : vector<16x64xf32>
    %c0_114 = arith.constant 0 : index
    %c128_115 = arith.constant 128 : index
    %292 = vector.load %arg29[%c0_114, %c128_115] : memref<16x320xf32, #tpu.memory_space<vmem>>, vector<16x64xf32>
    tpu.vector_store %arg29[%c0_114, %c128_115], %291 {strides = array<i32>} : memref<16x320xf32, #tpu.memory_space<vmem>>, vector<16x64xf32>,
    %cst_116 = arith.constant 0.000000e+00 : f32
    %293 = vector.broadcast %cst_116 : f32 to vector<16x64xf32>
    %294 = vector.extract_strided_slice %191 {offsets = [0, 5], sizes = [16, 1], strides = [1, 1]} : vector<16x15xf32> to vector<16x1xf32>
    %c0_117 = arith.constant 0 : index
    %c126_118 = arith.constant 126 : index
    %295 = vector.load %arg29[%c0_117, %c126_118] : memref<16x320xf32, #tpu.memory_space<vmem>>, vector<16x64xf32>
    %296 = vector.broadcast %294 : vector<16x1xf32> to vector<16x64xf32>
    %297 = arith.mulf %296, %295 : vector<16x64xf32>
    %298 = arith.addf %293, %297 : vector<16x64xf32>
    %299 = vector.extract_strided_slice %191 {offsets = [0, 6], sizes = [16, 1], strides = [1, 1]} : vector<16x15xf32> to vector<16x1xf32>
    %c0_119 = arith.constant 0 : index
    %c127_120 = arith.constant 127 : index
    %300 = vector.load %arg29[%c0_119, %c127_120] : memref<16x320xf32, #tpu.memory_space<vmem>>, vector<16x64xf32>
    %301 = vector.broadcast %299 : vector<16x1xf32> to vector<16x64xf32>
    %302 = arith.mulf %301, %300 : vector<16x64xf32>
    %303 = arith.addf %298, %302 : vector<16x64xf32>
    %304 = vector.extract_strided_slice %191 {offsets = [0, 7], sizes = [16, 1], strides = [1, 1]} : vector<16x15xf32> to vector<16x1xf32>
    %c0_121 = arith.constant 0 : index
    %c128_122 = arith.constant 128 : index
    %305 = vector.load %arg29[%c0_121, %c128_122] : memref<16x320xf32, #tpu.memory_space<vmem>>, vector<16x64xf32>
    %306 = vector.broadcast %304 : vector<16x1xf32> to vector<16x64xf32>
    %307 = arith.mulf %306, %305 : vector<16x64xf32>
    %308 = arith.addf %303, %307 : vector<16x64xf32>
    %309 = vector.extract_strided_slice %191 {offsets = [0, 8], sizes = [16, 1], strides = [1, 1]} : vector<16x15xf32> to vector<16x1xf32>
    %c0_123 = arith.constant 0 : index
    %c129_124 = arith.constant 129 : index
    %310 = vector.load %arg29[%c0_123, %c129_124] : memref<16x320xf32, #tpu.memory_space<vmem>>, vector<16x64xf32>
    %311 = vector.broadcast %309 : vector<16x1xf32> to vector<16x64xf32>
    %312 = arith.mulf %311, %310 : vector<16x64xf32>
    %313 = arith.addf %308, %312 : vector<16x64xf32>
    %314 = vector.extract_strided_slice %191 {offsets = [0, 9], sizes = [16, 1], strides = [1, 1]} : vector<16x15xf32> to vector<16x1xf32>
    %c0_125 = arith.constant 0 : index
    %c130_126 = arith.constant 130 : index
    %315 = vector.load %arg29[%c0_125, %c130_126] : memref<16x320xf32, #tpu.memory_space<vmem>>, vector<16x64xf32>
    %316 = vector.broadcast %314 : vector<16x1xf32> to vector<16x64xf32>
    %317 = arith.mulf %316, %315 : vector<16x64xf32>
    %318 = arith.addf %313, %317 : vector<16x64xf32>
    %319 = vector.extract_strided_slice %192 {offsets = [0, 1], sizes = [16, 1], strides = [1, 1]} : vector<16x3xf32> to vector<16x1xf32>
    %320 = vector.broadcast %319 : vector<16x1xf32> to vector<16x64xf32>
    %321 = arith.addf %318, %320 : vector<16x64xf32>
    %c1_i32 = arith.constant 1 : i32
    %322 = vector.broadcast %c1_i32 : i32 to vector<1x64xi32>
    %323 = arith.andi %195, %322 : vector<1x64xi32>
    %c0_i32_127 = arith.constant 0 : i32
    %324 = vector.broadcast %c0_i32_127 : i32 to vector<1x64xi32>
    %325 = arith.cmpi eq, %323, %324 : vector<1x64xi32>
    %326 = arith.extui %325 : vector<1x64xi1> to vector<1x64xi32>
    %327 = arith.sitofp %326 : vector<1x64xi32> to vector<1x64xf32>
    %328 = vector.broadcast %327 : vector<1x64xf32> to vector<16x64xf32>
    %329 = arith.mulf %321, %328 : vector<16x64xf32>
    %330 = vector.shape_cast %329 : vector<16x64xf32> to vector<1x16x64xf32>
    %cst_128 = arith.constant dense<0.000000e+00> : vector<1xf32>
    %331 = vector.multi_reduction <add>, %330, %cst_128 [1, 2] : vector<1x16x64xf32> to vector<1xf32>
    %332 = vector.shape_cast %331 : vector<1xf32> to vector<1x1x1xf32>
    %333 = vector.extract %332[0, 0, 0] : f32 from vector<1x1x1xf32>
    %cst_129 = arith.constant 5.120000e+02 : f32
    %334 = arith.divf %333, %cst_129 : f32
    %335 = vector.broadcast %334 : f32 to vector<16x64xf32>
    %336 = arith.subf %321, %335 : vector<16x64xf32>
    %337 = arith.mulf %336, %336 : vector<16x64xf32>
    %338 = vector.broadcast %327 : vector<1x64xf32> to vector<16x64xf32>
    %339 = arith.mulf %337, %338 : vector<16x64xf32>
    %340 = vector.shape_cast %339 : vector<16x64xf32> to vector<1x16x64xf32>
    %cst_130 = arith.constant dense<0.000000e+00> : vector<1xf32>
    %341 = vector.multi_reduction <add>, %340, %cst_130 [1, 2] : vector<1x16x64xf32> to vector<1xf32>
    %342 = vector.shape_cast %341 : vector<1xf32> to vector<1x1x1xf32>
    %343 = vector.extract %342[0, 0, 0] : f32 from vector<1x1x1xf32>
    %cst_131 = arith.constant 5.120000e+02 : f32
    %344 = arith.divf %343, %cst_131 : f32
    %cst_132 = arith.constant 9.99999993E-9 : f32
    %345 = arith.addf %344, %cst_132 : f32
    %346 = math.rsqrt %345 : f32
    %347 = vector.broadcast %346 : f32 to vector<16x64xf32>
    %348 = arith.mulf %336, %347 : vector<16x64xf32>
    %349 = vector.extract_strided_slice %193 {offsets = [0, 1], sizes = [16, 1], strides = [1, 1]} : vector<16x3xf32> to vector<16x1xf32>
    %350 = vector.broadcast %349 : vector<16x1xf32> to vector<16x64xf32>
    %351 = arith.mulf %348, %350 : vector<16x64xf32>
    %352 = vector.extract_strided_slice %194 {offsets = [0, 1], sizes = [16, 1], strides = [1, 1]} : vector<16x3xf32> to vector<16x1xf32>
    %353 = vector.broadcast %352 : vector<16x1xf32> to vector<16x64xf32>
    %354 = arith.addf %351, %353 : vector<16x64xf32>
    %c0_133 = arith.constant 0 : index
    %c128_134 = arith.constant 128 : index
    %355 = vector.load %arg29[%c0_133, %c128_134] : memref<16x320xf32, #tpu.memory_space<vmem>>, vector<16x64xf32>
    tpu.vector_store %arg29[%c0_133, %c128_134], %354 {strides = array<i32>} : memref<16x320xf32, #tpu.memory_space<vmem>>, vector<16x64xf32>,
    %cst_135 = arith.constant 0.000000e+00 : f32
    %356 = vector.broadcast %cst_135 : f32 to vector<16x64xf32>
    %357 = vector.extract_strided_slice %191 {offsets = [0, 10], sizes = [16, 1], strides = [1, 1]} : vector<16x15xf32> to vector<16x1xf32>
    %c0_136 = arith.constant 0 : index
    %c124 = arith.constant 124 : index
    %358 = vector.load %arg29[%c0_136, %c124] : memref<16x320xf32, #tpu.memory_space<vmem>>, vector<16x64xf32>
    %359 = vector.broadcast %357 : vector<16x1xf32> to vector<16x64xf32>
    %360 = arith.mulf %359, %358 : vector<16x64xf32>
    %361 = arith.addf %356, %360 : vector<16x64xf32>
    %362 = vector.extract_strided_slice %191 {offsets = [0, 11], sizes = [16, 1], strides = [1, 1]} : vector<16x15xf32> to vector<16x1xf32>
    %c0_137 = arith.constant 0 : index
    %c126_138 = arith.constant 126 : index
    %363 = vector.load %arg29[%c0_137, %c126_138] : memref<16x320xf32, #tpu.memory_space<vmem>>, vector<16x64xf32>
    %364 = vector.broadcast %362 : vector<16x1xf32> to vector<16x64xf32>
    %365 = arith.mulf %364, %363 : vector<16x64xf32>
    %366 = arith.addf %361, %365 : vector<16x64xf32>
    %367 = vector.extract_strided_slice %191 {offsets = [0, 12], sizes = [16, 1], strides = [1, 1]} : vector<16x15xf32> to vector<16x1xf32>
    %c0_139 = arith.constant 0 : index
    %c128_140 = arith.constant 128 : index
    %368 = vector.load %arg29[%c0_139, %c128_140] : memref<16x320xf32, #tpu.memory_space<vmem>>, vector<16x64xf32>
    %369 = vector.broadcast %367 : vector<16x1xf32> to vector<16x64xf32>
    %370 = arith.mulf %369, %368 : vector<16x64xf32>
    %371 = arith.addf %366, %370 : vector<16x64xf32>
    %372 = vector.extract_strided_slice %191 {offsets = [0, 13], sizes = [16, 1], strides = [1, 1]} : vector<16x15xf32> to vector<16x1xf32>
    %c0_141 = arith.constant 0 : index
    %c130_142 = arith.constant 130 : index
    %373 = vector.load %arg29[%c0_141, %c130_142] : memref<16x320xf32, #tpu.memory_space<vmem>>, vector<16x64xf32>
    %374 = vector.broadcast %372 : vector<16x1xf32> to vector<16x64xf32>
    %375 = arith.mulf %374, %373 : vector<16x64xf32>
    %376 = arith.addf %371, %375 : vector<16x64xf32>
    %377 = vector.extract_strided_slice %191 {offsets = [0, 14], sizes = [16, 1], strides = [1, 1]} : vector<16x15xf32> to vector<16x1xf32>
    %c0_143 = arith.constant 0 : index
    %c132 = arith.constant 132 : index
    %378 = vector.load %arg29[%c0_143, %c132] : memref<16x320xf32, #tpu.memory_space<vmem>>, vector<16x64xf32>
    %379 = vector.broadcast %377 : vector<16x1xf32> to vector<16x64xf32>
    %380 = arith.mulf %379, %378 : vector<16x64xf32>
    %381 = arith.addf %376, %380 : vector<16x64xf32>
    %382 = vector.extract_strided_slice %192 {offsets = [0, 2], sizes = [16, 1], strides = [1, 1]} : vector<16x3xf32> to vector<16x1xf32>
    %383 = vector.broadcast %382 : vector<16x1xf32> to vector<16x64xf32>
    %384 = arith.addf %381, %383 : vector<16x64xf32>
    %c3_i32 = arith.constant 3 : i32
    %385 = vector.broadcast %c3_i32 : i32 to vector<1x64xi32>
    %386 = arith.andi %195, %385 : vector<1x64xi32>
    %c0_i32_144 = arith.constant 0 : i32
    %387 = vector.broadcast %c0_i32_144 : i32 to vector<1x64xi32>
    %388 = arith.cmpi eq, %386, %387 : vector<1x64xi32>
    %389 = arith.extui %388 : vector<1x64xi1> to vector<1x64xi32>
    %390 = arith.sitofp %389 : vector<1x64xi32> to vector<1x64xf32>
    %391 = vector.broadcast %390 : vector<1x64xf32> to vector<16x64xf32>
    %392 = arith.mulf %384, %391 : vector<16x64xf32>
    %393 = vector.shape_cast %392 : vector<16x64xf32> to vector<1x16x64xf32>
    %cst_145 = arith.constant dense<0.000000e+00> : vector<1xf32>
    %394 = vector.multi_reduction <add>, %393, %cst_145 [1, 2] : vector<1x16x64xf32> to vector<1xf32>
    %395 = vector.shape_cast %394 : vector<1xf32> to vector<1x1x1xf32>
    %396 = vector.extract %395[0, 0, 0] : f32 from vector<1x1x1xf32>
    %cst_146 = arith.constant 2.560000e+02 : f32
    %397 = arith.divf %396, %cst_146 : f32
    %398 = vector.broadcast %397 : f32 to vector<16x64xf32>
    %399 = arith.subf %384, %398 : vector<16x64xf32>
    %400 = arith.mulf %399, %399 : vector<16x64xf32>
    %401 = vector.broadcast %390 : vector<1x64xf32> to vector<16x64xf32>
    %402 = arith.mulf %400, %401 : vector<16x64xf32>
    %403 = vector.shape_cast %402 : vector<16x64xf32> to vector<1x16x64xf32>
    %cst_147 = arith.constant dense<0.000000e+00> : vector<1xf32>
    %404 = vector.multi_reduction <add>, %403, %cst_147 [1, 2] : vector<1x16x64xf32> to vector<1xf32>
    %405 = vector.shape_cast %404 : vector<1xf32> to vector<1x1x1xf32>
    %406 = vector.extract %405[0, 0, 0] : f32 from vector<1x1x1xf32>
    %cst_148 = arith.constant 2.560000e+02 : f32
    %407 = arith.divf %406, %cst_148 : f32
    %cst_149 = arith.constant 9.99999993E-9 : f32
    %408 = arith.addf %407, %cst_149 : f32
    %409 = math.rsqrt %408 : f32
    %410 = vector.broadcast %409 : f32 to vector<16x64xf32>
    %411 = arith.mulf %399, %410 : vector<16x64xf32>
    %412 = vector.extract_strided_slice %193 {offsets = [0, 2], sizes = [16, 1], strides = [1, 1]} : vector<16x3xf32> to vector<16x1xf32>
    %413 = vector.broadcast %412 : vector<16x1xf32> to vector<16x64xf32>
    %414 = arith.mulf %411, %413 : vector<16x64xf32>
    %415 = vector.extract_strided_slice %194 {offsets = [0, 2], sizes = [16, 1], strides = [1, 1]} : vector<16x3xf32> to vector<16x1xf32>
    %416 = vector.broadcast %415 : vector<16x1xf32> to vector<16x64xf32>
    %417 = arith.addf %414, %416 : vector<16x64xf32>
    %c0_150 = arith.constant 0 : index
    %c128_151 = arith.constant 128 : index
    %418 = vector.load %arg29[%c0_150, %c128_151] : memref<16x320xf32, #tpu.memory_space<vmem>>, vector<16x64xf32>
    tpu.vector_store %arg29[%c0_150, %c128_151], %417 {strides = array<i32>} : memref<16x320xf32, #tpu.memory_space<vmem>>, vector<16x64xf32>,
    %c0_152 = arith.constant 0 : index
    %c126_153 = arith.constant 126 : index
    %419 = vector.load %arg29[%c0_152, %c126_153] : memref<16x320xf32, #tpu.memory_space<vmem>>, vector<16x64xf32>
    %c3_i32_154 = arith.constant 3 : i32
    %420 = vector.broadcast %c3_i32_154 : i32 to vector<1x64xi32>
    %421 = arith.andi %195, %420 : vector<1x64xi32>
    %c0_i32_155 = arith.constant 0 : i32
    %422 = vector.broadcast %c0_i32_155 : i32 to vector<1x64xi32>
    %423 = arith.cmpi eq, %421, %422 : vector<1x64xi32>
    %424 = vector.shape_cast %423 : vector<1x64xi1> to vector<1x64xi1>
    %425 = vector.broadcast %424 : vector<1x64xi1> to vector<16x64xi1>
    %426 = arith.select %425, %417, %419 : vector<16x64xi1>, vector<16x64xf32>
    %427 = arith.addf %354, %426 : vector<16x64xf32>
    %c0_156 = arith.constant 0 : index
    %c128_157 = arith.constant 128 : index
    %428 = vector.load %arg29[%c0_156, %c128_157] : memref<16x320xf32, #tpu.memory_space<vmem>>, vector<16x64xf32>
    tpu.vector_store %arg29[%c0_156, %c128_157], %427 {strides = array<i32>} : memref<16x320xf32, #tpu.memory_space<vmem>>, vector<16x64xf32>,
    %c0_158 = arith.constant 0 : index
    %c127_159 = arith.constant 127 : index
    %429 = vector.load %arg29[%c0_158, %c127_159] : memref<16x320xf32, #tpu.memory_space<vmem>>, vector<16x64xf32>
    %c1_i32_160 = arith.constant 1 : i32
    %430 = vector.broadcast %c1_i32_160 : i32 to vector<1x64xi32>
    %431 = arith.andi %195, %430 : vector<1x64xi32>
    %c0_i32_161 = arith.constant 0 : i32
    %432 = vector.broadcast %c0_i32_161 : i32 to vector<1x64xi32>
    %433 = arith.cmpi eq, %431, %432 : vector<1x64xi32>
    %434 = vector.shape_cast %433 : vector<1x64xi1> to vector<1x64xi1>
    %435 = vector.broadcast %434 : vector<1x64xi1> to vector<16x64xi1>
    %436 = arith.select %435, %427, %429 : vector<16x64xi1>, vector<16x64xf32>
    %437 = arith.addf %291, %436 : vector<16x64xf32>
    %438 = vector.shape_cast %437 : vector<16x64xf32> to vector<1x16x64xf32>
    %cst_162 = arith.constant dense<0.000000e+00> : vector<1xf32>
    %439 = vector.multi_reduction <add>, %438, %cst_162 [1, 2] : vector<1x16x64xf32> to vector<1xf32>
    %440 = vector.shape_cast %439 : vector<1xf32> to vector<1x1x1xf32>
    %441 = vector.extract %440[0, 0, 0] : f32 from vector<1x1x1xf32>
    %cst_163 = arith.constant 1.024000e+03 : f32
    %442 = arith.divf %441, %cst_163 : f32
    %443 = vector.broadcast %442 : f32 to vector<16x64xf32>
    %444 = arith.subf %437, %443 : vector<16x64xf32>
    %445 = arith.mulf %444, %444 : vector<16x64xf32>
    %446 = vector.shape_cast %445 : vector<16x64xf32> to vector<1x16x64xf32>
    %cst_164 = arith.constant dense<0.000000e+00> : vector<1xf32>
    %447 = vector.multi_reduction <add>, %446, %cst_164 [1, 2] : vector<1x16x64xf32> to vector<1xf32>
    %448 = vector.shape_cast %447 : vector<1xf32> to vector<1x1x1xf32>
    %449 = vector.extract %448[0, 0, 0] : f32 from vector<1x1x1xf32>
    %cst_165 = arith.constant 1.024000e+03 : f32
    %450 = arith.divf %449, %cst_165 : f32
    %cst_166 = arith.constant 9.99999993E-9 : f32
    %451 = arith.addf %450, %cst_166 : f32
    %452 = math.rsqrt %451 : f32
    %453 = vector.broadcast %452 : f32 to vector<16x64xf32>
    %454 = arith.mulf %444, %453 : vector<16x64xf32>
    %455 = vector.broadcast %186 : vector<16x1xf32> to vector<16x64xf32>
    %456 = arith.mulf %454, %455 : vector<16x64xf32>
    %457 = vector.broadcast %187 : vector<16x1xf32> to vector<16x64xf32>
    %458 = arith.addf %456, %457 : vector<16x64xf32>
    %cst_167 = arith.constant 0.000000e+00 : f32
    %459 = vector.broadcast %cst_167 : f32 to vector<16x64xf32>
    %460 = arith.maximumf %458, %459 : vector<16x64xf32>
    %cst_168 = arith.constant 0.000000e+00 : f32
    %461 = vector.broadcast %cst_168 : f32 to vector<16x64xf32>
    %462 = arith.minimumf %458, %461 : vector<16x64xf32>
    %463 = vector.broadcast %188 : vector<1x1xf32> to vector<16x64xf32>
    %464 = arith.mulf %463, %462 : vector<16x64xf32>
    %465 = arith.addf %460, %464 : vector<16x64xf32>
    %466 = arith.truncf %465 : vector<16x64xf32> to vector<16x64xbf16>
    %cst_169 = arith.constant dense<0.000000e+00> : vector<8x64xf32>
    %467 = tpu.matmul %189, %466, %cst_169 {dimension_numbers = #tpu.dot_dimension_numbers<[1], [0], [0], [1], [0, 0, 1, 1], [], []>} : vector<8x16xbf16>, vector<16x64xbf16>, vector<8x64xf32> -> vector<8x64xf32>
    %468 = vector.broadcast %190 : vector<8x1xf32> to vector<8x64xf32>
    %469 = arith.addf %467, %468 : vector<8x64xf32>
    %470 = arith.addf %469, %206 : vector<8x64xf32>
    %c0_170 = arith.constant 0 : index
    %c0_171 = arith.constant 0 : index
    %c0_172 = arith.constant 0 : index
    %471 = vector.load %arg28[%c0_170, %c0_171, %c0_172] : memref<1x8x256xf32, #tpu.memory_space<vmem>>, vector<1x8x64xf32>
    %472 = vector.shape_cast %471 : vector<1x8x64xf32> to vector<8x64xf32>
    %473 = vector.shape_cast %470 : vector<8x64xf32> to vector<1x8x64xf32>
    tpu.vector_store %arg28[%c0_170, %c0_171, %c0_172], %473 {strides = array<i32>} : memref<1x8x256xf32, #tpu.memory_space<vmem>>, vector<1x8x64xf32>,
    %474 = vector.extract_strided_slice %4 {offsets = [0, 64], sizes = [8, 64], strides = [1, 1]} : vector<8x256xf32> to vector<8x64xf32>
    %475 = vector.extract_strided_slice %174 {offsets = [0, 64], sizes = [8, 64], strides = [1, 1]} : vector<8x256xf32> to vector<8x64xf32>
    %476 = arith.addf %475, %180 : vector<8x64xf32>
    %cst_173 = arith.constant 0.000000e+00 : f32
    %477 = vector.broadcast %cst_173 : f32 to vector<8x64xf32>
    %478 = arith.maximumf %476, %477 : vector<8x64xf32>
    %cst_174 = arith.constant 0.000000e+00 : f32
    %479 = vector.broadcast %cst_174 : f32 to vector<8x64xf32>
    %480 = arith.minimumf %476, %479 : vector<8x64xf32>
    %481 = vector.broadcast %136 : vector<1x1xf32> to vector<8x64xf32>
    %482 = arith.mulf %481, %480 : vector<8x64xf32>
    %483 = arith.addf %478, %482 : vector<8x64xf32>
    %484 = arith.addf %474, %483 : vector<8x64xf32>
    %485 = arith.truncf %484 : vector<8x64xf32> to vector<8x64xbf16>
    %cst_175 = arith.constant dense<0.000000e+00> : vector<16x64xf32>
    %486 = tpu.matmul %181, %485, %cst_175 {dimension_numbers = #tpu.dot_dimension_numbers<[1], [0], [0], [1], [0, 0, 1, 1], [], []>} : vector<16x8xbf16>, vector<8x64xbf16>, vector<16x64xf32> -> vector<16x64xf32>
    %487 = vector.broadcast %182 : vector<16x1xf32> to vector<16x64xf32>
    %488 = arith.addf %486, %487 : vector<16x64xf32>
    %489 = vector.shape_cast %488 : vector<16x64xf32> to vector<1x16x64xf32>
    %cst_176 = arith.constant dense<0.000000e+00> : vector<1xf32>
    %490 = vector.multi_reduction <add>, %489, %cst_176 [1, 2] : vector<1x16x64xf32> to vector<1xf32>
    %491 = vector.shape_cast %490 : vector<1xf32> to vector<1x1x1xf32>
    %492 = vector.extract %491[0, 0, 0] : f32 from vector<1x1x1xf32>
    %cst_177 = arith.constant 1.024000e+03 : f32
    %493 = arith.divf %492, %cst_177 : f32
    %494 = vector.broadcast %493 : f32 to vector<16x64xf32>
    %495 = arith.subf %488, %494 : vector<16x64xf32>
    %496 = arith.mulf %495, %495 : vector<16x64xf32>
    %497 = vector.shape_cast %496 : vector<16x64xf32> to vector<1x16x64xf32>
    %cst_178 = arith.constant dense<0.000000e+00> : vector<1xf32>
    %498 = vector.multi_reduction <add>, %497, %cst_178 [1, 2] : vector<1x16x64xf32> to vector<1xf32>
    %499 = vector.shape_cast %498 : vector<1xf32> to vector<1x1x1xf32>
    %500 = vector.extract %499[0, 0, 0] : f32 from vector<1x1x1xf32>
    %cst_179 = arith.constant 1.024000e+03 : f32
    %501 = arith.divf %500, %cst_179 : f32
    %cst_180 = arith.constant 9.99999993E-9 : f32
    %502 = arith.addf %501, %cst_180 : f32
    %503 = math.rsqrt %502 : f32
    %504 = vector.broadcast %503 : f32 to vector<16x64xf32>
    %505 = arith.mulf %495, %504 : vector<16x64xf32>
    %506 = vector.broadcast %183 : vector<16x1xf32> to vector<16x64xf32>
    %507 = arith.mulf %505, %506 : vector<16x64xf32>
    %508 = vector.broadcast %184 : vector<16x1xf32> to vector<16x64xf32>
    %509 = arith.addf %507, %508 : vector<16x64xf32>
    %cst_181 = arith.constant 0.000000e+00 : f32
    %510 = vector.broadcast %cst_181 : f32 to vector<16x64xf32>
    %511 = arith.maximumf %509, %510 : vector<16x64xf32>
    %cst_182 = arith.constant 0.000000e+00 : f32
    %512 = vector.broadcast %cst_182 : f32 to vector<16x64xf32>
    %513 = arith.minimumf %509, %512 : vector<16x64xf32>
    %514 = vector.broadcast %185 : vector<1x1xf32> to vector<16x64xf32>
    %515 = arith.mulf %514, %513 : vector<16x64xf32>
    %516 = arith.addf %511, %515 : vector<16x64xf32>
    %c0_183 = arith.constant 0 : index
    %c128_184 = arith.constant 128 : index
    %517 = vector.load %arg29[%c0_183, %c128_184] : memref<16x320xf32, #tpu.memory_space<vmem>>, vector<16x64xf32>
    tpu.vector_store %arg29[%c0_183, %c128_184], %516 {strides = array<i32>} : memref<16x320xf32, #tpu.memory_space<vmem>>, vector<16x64xf32>,
    %cst_185 = arith.constant 0.000000e+00 : f32
    %518 = vector.broadcast %cst_185 : f32 to vector<16x64xf32>
    %519 = vector.extract_strided_slice %191 {offsets = [0, 0], sizes = [16, 1], strides = [1, 1]} : vector<16x15xf32> to vector<16x1xf32>
    %c0_186 = arith.constant 0 : index
    %c126_187 = arith.constant 126 : index
    %520 = vector.load %arg29[%c0_186, %c126_187] : memref<16x320xf32, #tpu.memory_space<vmem>>, vector<16x64xf32>
    %521 = vector.broadcast %519 : vector<16x1xf32> to vector<16x64xf32>
    %522 = arith.mulf %521, %520 : vector<16x64xf32>
    %523 = arith.addf %518, %522 : vector<16x64xf32>
    %524 = vector.extract_strided_slice %191 {offsets = [0, 1], sizes = [16, 1], strides = [1, 1]} : vector<16x15xf32> to vector<16x1xf32>
    %c0_188 = arith.constant 0 : index
    %c127_189 = arith.constant 127 : index
    %525 = vector.load %arg29[%c0_188, %c127_189] : memref<16x320xf32, #tpu.memory_space<vmem>>, vector<16x64xf32>
    %526 = vector.broadcast %524 : vector<16x1xf32> to vector<16x64xf32>
    %527 = arith.mulf %526, %525 : vector<16x64xf32>
    %528 = arith.addf %523, %527 : vector<16x64xf32>
    %529 = vector.extract_strided_slice %191 {offsets = [0, 2], sizes = [16, 1], strides = [1, 1]} : vector<16x15xf32> to vector<16x1xf32>
    %c0_190 = arith.constant 0 : index
    %c128_191 = arith.constant 128 : index
    %530 = vector.load %arg29[%c0_190, %c128_191] : memref<16x320xf32, #tpu.memory_space<vmem>>, vector<16x64xf32>
    %531 = vector.broadcast %529 : vector<16x1xf32> to vector<16x64xf32>
    %532 = arith.mulf %531, %530 : vector<16x64xf32>
    %533 = arith.addf %528, %532 : vector<16x64xf32>
    %534 = vector.extract_strided_slice %191 {offsets = [0, 3], sizes = [16, 1], strides = [1, 1]} : vector<16x15xf32> to vector<16x1xf32>
    %c0_192 = arith.constant 0 : index
    %c129_193 = arith.constant 129 : index
    %535 = vector.load %arg29[%c0_192, %c129_193] : memref<16x320xf32, #tpu.memory_space<vmem>>, vector<16x64xf32>
    %536 = vector.broadcast %534 : vector<16x1xf32> to vector<16x64xf32>
    %537 = arith.mulf %536, %535 : vector<16x64xf32>
    %538 = arith.addf %533, %537 : vector<16x64xf32>
    %539 = vector.extract_strided_slice %191 {offsets = [0, 4], sizes = [16, 1], strides = [1, 1]} : vector<16x15xf32> to vector<16x1xf32>
    %c0_194 = arith.constant 0 : index
    %c130_195 = arith.constant 130 : index
    %540 = vector.load %arg29[%c0_194, %c130_195] : memref<16x320xf32, #tpu.memory_space<vmem>>, vector<16x64xf32>
    %541 = vector.broadcast %539 : vector<16x1xf32> to vector<16x64xf32>
    %542 = arith.mulf %541, %540 : vector<16x64xf32>
    %543 = arith.addf %538, %542 : vector<16x64xf32>
    %544 = vector.extract_strided_slice %192 {offsets = [0, 0], sizes = [16, 1], strides = [1, 1]} : vector<16x3xf32> to vector<16x1xf32>
    %545 = vector.broadcast %544 : vector<16x1xf32> to vector<16x64xf32>
    %546 = arith.addf %543, %545 : vector<16x64xf32>
    %547 = vector.shape_cast %546 : vector<16x64xf32> to vector<1x16x64xf32>
    %cst_196 = arith.constant dense<0.000000e+00> : vector<1xf32>
    %548 = vector.multi_reduction <add>, %547, %cst_196 [1, 2] : vector<1x16x64xf32> to vector<1xf32>
    %549 = vector.shape_cast %548 : vector<1xf32> to vector<1x1x1xf32>
    %550 = vector.extract %549[0, 0, 0] : f32 from vector<1x1x1xf32>
    %cst_197 = arith.constant 1.024000e+03 : f32
    %551 = arith.divf %550, %cst_197 : f32
    %552 = vector.broadcast %551 : f32 to vector<16x64xf32>
    %553 = arith.subf %546, %552 : vector<16x64xf32>
    %554 = arith.mulf %553, %553 : vector<16x64xf32>
    %555 = vector.shape_cast %554 : vector<16x64xf32> to vector<1x16x64xf32>
    %cst_198 = arith.constant dense<0.000000e+00> : vector<1xf32>
    %556 = vector.multi_reduction <add>, %555, %cst_198 [1, 2] : vector<1x16x64xf32> to vector<1xf32>
    %557 = vector.shape_cast %556 : vector<1xf32> to vector<1x1x1xf32>
    %558 = vector.extract %557[0, 0, 0] : f32 from vector<1x1x1xf32>
    %cst_199 = arith.constant 1.024000e+03 : f32
    %559 = arith.divf %558, %cst_199 : f32
    %cst_200 = arith.constant 9.99999993E-9 : f32
    %560 = arith.addf %559, %cst_200 : f32
    %561 = math.rsqrt %560 : f32
    %562 = vector.broadcast %561 : f32 to vector<16x64xf32>
    %563 = arith.mulf %553, %562 : vector<16x64xf32>
    %564 = vector.extract_strided_slice %193 {offsets = [0, 0], sizes = [16, 1], strides = [1, 1]} : vector<16x3xf32> to vector<16x1xf32>
    %565 = vector.broadcast %564 : vector<16x1xf32> to vector<16x64xf32>
    %566 = arith.mulf %563, %565 : vector<16x64xf32>
    %567 = vector.extract_strided_slice %194 {offsets = [0, 0], sizes = [16, 1], strides = [1, 1]} : vector<16x3xf32> to vector<16x1xf32>
    %568 = vector.broadcast %567 : vector<16x1xf32> to vector<16x64xf32>
    %569 = arith.addf %566, %568 : vector<16x64xf32>
    %c0_201 = arith.constant 0 : index
    %c128_202 = arith.constant 128 : index
    %570 = vector.load %arg29[%c0_201, %c128_202] : memref<16x320xf32, #tpu.memory_space<vmem>>, vector<16x64xf32>
    tpu.vector_store %arg29[%c0_201, %c128_202], %569 {strides = array<i32>} : memref<16x320xf32, #tpu.memory_space<vmem>>, vector<16x64xf32>,
    %cst_203 = arith.constant 0.000000e+00 : f32
    %571 = vector.broadcast %cst_203 : f32 to vector<16x64xf32>
    %572 = vector.extract_strided_slice %191 {offsets = [0, 5], sizes = [16, 1], strides = [1, 1]} : vector<16x15xf32> to vector<16x1xf32>
    %c0_204 = arith.constant 0 : index
    %c126_205 = arith.constant 126 : index
    %573 = vector.load %arg29[%c0_204, %c126_205] : memref<16x320xf32, #tpu.memory_space<vmem>>, vector<16x64xf32>
    %574 = vector.broadcast %572 : vector<16x1xf32> to vector<16x64xf32>
    %575 = arith.mulf %574, %573 : vector<16x64xf32>
    %576 = arith.addf %571, %575 : vector<16x64xf32>
    %577 = vector.extract_strided_slice %191 {offsets = [0, 6], sizes = [16, 1], strides = [1, 1]} : vector<16x15xf32> to vector<16x1xf32>
    %c0_206 = arith.constant 0 : index
    %c127_207 = arith.constant 127 : index
    %578 = vector.load %arg29[%c0_206, %c127_207] : memref<16x320xf32, #tpu.memory_space<vmem>>, vector<16x64xf32>
    %579 = vector.broadcast %577 : vector<16x1xf32> to vector<16x64xf32>
    %580 = arith.mulf %579, %578 : vector<16x64xf32>
    %581 = arith.addf %576, %580 : vector<16x64xf32>
    %582 = vector.extract_strided_slice %191 {offsets = [0, 7], sizes = [16, 1], strides = [1, 1]} : vector<16x15xf32> to vector<16x1xf32>
    %c0_208 = arith.constant 0 : index
    %c128_209 = arith.constant 128 : index
    %583 = vector.load %arg29[%c0_208, %c128_209] : memref<16x320xf32, #tpu.memory_space<vmem>>, vector<16x64xf32>
    %584 = vector.broadcast %582 : vector<16x1xf32> to vector<16x64xf32>
    %585 = arith.mulf %584, %583 : vector<16x64xf32>
    %586 = arith.addf %581, %585 : vector<16x64xf32>
    %587 = vector.extract_strided_slice %191 {offsets = [0, 8], sizes = [16, 1], strides = [1, 1]} : vector<16x15xf32> to vector<16x1xf32>
    %c0_210 = arith.constant 0 : index
    %c129_211 = arith.constant 129 : index
    %588 = vector.load %arg29[%c0_210, %c129_211] : memref<16x320xf32, #tpu.memory_space<vmem>>, vector<16x64xf32>
    %589 = vector.broadcast %587 : vector<16x1xf32> to vector<16x64xf32>
    %590 = arith.mulf %589, %588 : vector<16x64xf32>
    %591 = arith.addf %586, %590 : vector<16x64xf32>
    %592 = vector.extract_strided_slice %191 {offsets = [0, 9], sizes = [16, 1], strides = [1, 1]} : vector<16x15xf32> to vector<16x1xf32>
    %c0_212 = arith.constant 0 : index
    %c130_213 = arith.constant 130 : index
    %593 = vector.load %arg29[%c0_212, %c130_213] : memref<16x320xf32, #tpu.memory_space<vmem>>, vector<16x64xf32>
    %594 = vector.broadcast %592 : vector<16x1xf32> to vector<16x64xf32>
    %595 = arith.mulf %594, %593 : vector<16x64xf32>
    %596 = arith.addf %591, %595 : vector<16x64xf32>
    %597 = vector.extract_strided_slice %192 {offsets = [0, 1], sizes = [16, 1], strides = [1, 1]} : vector<16x3xf32> to vector<16x1xf32>
    %598 = vector.broadcast %597 : vector<16x1xf32> to vector<16x64xf32>
    %599 = arith.addf %596, %598 : vector<16x64xf32>
    %c1_i32_214 = arith.constant 1 : i32
    %600 = vector.broadcast %c1_i32_214 : i32 to vector<1x64xi32>
    %601 = arith.andi %195, %600 : vector<1x64xi32>
    %c0_i32_215 = arith.constant 0 : i32
    %602 = vector.broadcast %c0_i32_215 : i32 to vector<1x64xi32>
    %603 = arith.cmpi eq, %601, %602 : vector<1x64xi32>
    %604 = arith.extui %603 : vector<1x64xi1> to vector<1x64xi32>
    %605 = arith.sitofp %604 : vector<1x64xi32> to vector<1x64xf32>
    %606 = vector.broadcast %605 : vector<1x64xf32> to vector<16x64xf32>
    %607 = arith.mulf %599, %606 : vector<16x64xf32>
    %608 = vector.shape_cast %607 : vector<16x64xf32> to vector<1x16x64xf32>
    %cst_216 = arith.constant dense<0.000000e+00> : vector<1xf32>
    %609 = vector.multi_reduction <add>, %608, %cst_216 [1, 2] : vector<1x16x64xf32> to vector<1xf32>
    %610 = vector.shape_cast %609 : vector<1xf32> to vector<1x1x1xf32>
    %611 = vector.extract %610[0, 0, 0] : f32 from vector<1x1x1xf32>
    %cst_217 = arith.constant 5.120000e+02 : f32
    %612 = arith.divf %611, %cst_217 : f32
    %613 = vector.broadcast %612 : f32 to vector<16x64xf32>
    %614 = arith.subf %599, %613 : vector<16x64xf32>
    %615 = arith.mulf %614, %614 : vector<16x64xf32>
    %616 = vector.broadcast %605 : vector<1x64xf32> to vector<16x64xf32>
    %617 = arith.mulf %615, %616 : vector<16x64xf32>
    %618 = vector.shape_cast %617 : vector<16x64xf32> to vector<1x16x64xf32>
    %cst_218 = arith.constant dense<0.000000e+00> : vector<1xf32>
    %619 = vector.multi_reduction <add>, %618, %cst_218 [1, 2] : vector<1x16x64xf32> to vector<1xf32>
    %620 = vector.shape_cast %619 : vector<1xf32> to vector<1x1x1xf32>
    %621 = vector.extract %620[0, 0, 0] : f32 from vector<1x1x1xf32>
    %cst_219 = arith.constant 5.120000e+02 : f32
    %622 = arith.divf %621, %cst_219 : f32
    %cst_220 = arith.constant 9.99999993E-9 : f32
    %623 = arith.addf %622, %cst_220 : f32
    %624 = math.rsqrt %623 : f32
    %625 = vector.broadcast %624 : f32 to vector<16x64xf32>
    %626 = arith.mulf %614, %625 : vector<16x64xf32>
    %627 = vector.extract_strided_slice %193 {offsets = [0, 1], sizes = [16, 1], strides = [1, 1]} : vector<16x3xf32> to vector<16x1xf32>
    %628 = vector.broadcast %627 : vector<16x1xf32> to vector<16x64xf32>
    %629 = arith.mulf %626, %628 : vector<16x64xf32>
    %630 = vector.extract_strided_slice %194 {offsets = [0, 1], sizes = [16, 1], strides = [1, 1]} : vector<16x3xf32> to vector<16x1xf32>
    %631 = vector.broadcast %630 : vector<16x1xf32> to vector<16x64xf32>
    %632 = arith.addf %629, %631 : vector<16x64xf32>
    %c0_221 = arith.constant 0 : index
    %c128_222 = arith.constant 128 : index
    %633 = vector.load %arg29[%c0_221, %c128_222] : memref<16x320xf32, #tpu.memory_space<vmem>>, vector<16x64xf32>
    tpu.vector_store %arg29[%c0_221, %c128_222], %632 {strides = array<i32>} : memref<16x320xf32, #tpu.memory_space<vmem>>, vector<16x64xf32>,
    %cst_223 = arith.constant 0.000000e+00 : f32
    %634 = vector.broadcast %cst_223 : f32 to vector<16x64xf32>
    %635 = vector.extract_strided_slice %191 {offsets = [0, 10], sizes = [16, 1], strides = [1, 1]} : vector<16x15xf32> to vector<16x1xf32>
    %c0_224 = arith.constant 0 : index
    %c124_225 = arith.constant 124 : index
    %636 = vector.load %arg29[%c0_224, %c124_225] : memref<16x320xf32, #tpu.memory_space<vmem>>, vector<16x64xf32>
    %637 = vector.broadcast %635 : vector<16x1xf32> to vector<16x64xf32>
    %638 = arith.mulf %637, %636 : vector<16x64xf32>
    %639 = arith.addf %634, %638 : vector<16x64xf32>
    %640 = vector.extract_strided_slice %191 {offsets = [0, 11], sizes = [16, 1], strides = [1, 1]} : vector<16x15xf32> to vector<16x1xf32>
    %c0_226 = arith.constant 0 : index
    %c126_227 = arith.constant 126 : index
    %641 = vector.load %arg29[%c0_226, %c126_227] : memref<16x320xf32, #tpu.memory_space<vmem>>, vector<16x64xf32>
    %642 = vector.broadcast %640 : vector<16x1xf32> to vector<16x64xf32>
    %643 = arith.mulf %642, %641 : vector<16x64xf32>
    %644 = arith.addf %639, %643 : vector<16x64xf32>
    %645 = vector.extract_strided_slice %191 {offsets = [0, 12], sizes = [16, 1], strides = [1, 1]} : vector<16x15xf32> to vector<16x1xf32>
    %c0_228 = arith.constant 0 : index
    %c128_229 = arith.constant 128 : index
    %646 = vector.load %arg29[%c0_228, %c128_229] : memref<16x320xf32, #tpu.memory_space<vmem>>, vector<16x64xf32>
    %647 = vector.broadcast %645 : vector<16x1xf32> to vector<16x64xf32>
    %648 = arith.mulf %647, %646 : vector<16x64xf32>
    %649 = arith.addf %644, %648 : vector<16x64xf32>
    %650 = vector.extract_strided_slice %191 {offsets = [0, 13], sizes = [16, 1], strides = [1, 1]} : vector<16x15xf32> to vector<16x1xf32>
    %c0_230 = arith.constant 0 : index
    %c130_231 = arith.constant 130 : index
    %651 = vector.load %arg29[%c0_230, %c130_231] : memref<16x320xf32, #tpu.memory_space<vmem>>, vector<16x64xf32>
    %652 = vector.broadcast %650 : vector<16x1xf32> to vector<16x64xf32>
    %653 = arith.mulf %652, %651 : vector<16x64xf32>
    %654 = arith.addf %649, %653 : vector<16x64xf32>
    %655 = vector.extract_strided_slice %191 {offsets = [0, 14], sizes = [16, 1], strides = [1, 1]} : vector<16x15xf32> to vector<16x1xf32>
    %c0_232 = arith.constant 0 : index
    %c132_233 = arith.constant 132 : index
    %656 = vector.load %arg29[%c0_232, %c132_233] : memref<16x320xf32, #tpu.memory_space<vmem>>, vector<16x64xf32>
    %657 = vector.broadcast %655 : vector<16x1xf32> to vector<16x64xf32>
    %658 = arith.mulf %657, %656 : vector<16x64xf32>
    %659 = arith.addf %654, %658 : vector<16x64xf32>
    %660 = vector.extract_strided_slice %192 {offsets = [0, 2], sizes = [16, 1], strides = [1, 1]} : vector<16x3xf32> to vector<16x1xf32>
    %661 = vector.broadcast %660 : vector<16x1xf32> to vector<16x64xf32>
    %662 = arith.addf %659, %661 : vector<16x64xf32>
    %c3_i32_234 = arith.constant 3 : i32
    %663 = vector.broadcast %c3_i32_234 : i32 to vector<1x64xi32>
    %664 = arith.andi %195, %663 : vector<1x64xi32>
    %c0_i32_235 = arith.constant 0 : i32
    %665 = vector.broadcast %c0_i32_235 : i32 to vector<1x64xi32>
    %666 = arith.cmpi eq, %664, %665 : vector<1x64xi32>
    %667 = arith.extui %666 : vector<1x64xi1> to vector<1x64xi32>
    %668 = arith.sitofp %667 : vector<1x64xi32> to vector<1x64xf32>
    %669 = vector.broadcast %668 : vector<1x64xf32> to vector<16x64xf32>
    %670 = arith.mulf %662, %669 : vector<16x64xf32>
    %671 = vector.shape_cast %670 : vector<16x64xf32> to vector<1x16x64xf32>
    %cst_236 = arith.constant dense<0.000000e+00> : vector<1xf32>
    %672 = vector.multi_reduction <add>, %671, %cst_236 [1, 2] : vector<1x16x64xf32> to vector<1xf32>
    %673 = vector.shape_cast %672 : vector<1xf32> to vector<1x1x1xf32>
    %674 = vector.extract %673[0, 0, 0] : f32 from vector<1x1x1xf32>
    %cst_237 = arith.constant 2.560000e+02 : f32
    %675 = arith.divf %674, %cst_237 : f32
    %676 = vector.broadcast %675 : f32 to vector<16x64xf32>
    %677 = arith.subf %662, %676 : vector<16x64xf32>
    %678 = arith.mulf %677, %677 : vector<16x64xf32>
    %679 = vector.broadcast %668 : vector<1x64xf32> to vector<16x64xf32>
    %680 = arith.mulf %678, %679 : vector<16x64xf32>
    %681 = vector.shape_cast %680 : vector<16x64xf32> to vector<1x16x64xf32>
    %cst_238 = arith.constant dense<0.000000e+00> : vector<1xf32>
    %682 = vector.multi_reduction <add>, %681, %cst_238 [1, 2] : vector<1x16x64xf32> to vector<1xf32>
    %683 = vector.shape_cast %682 : vector<1xf32> to vector<1x1x1xf32>
    %684 = vector.extract %683[0, 0, 0] : f32 from vector<1x1x1xf32>
    %cst_239 = arith.constant 2.560000e+02 : f32
    %685 = arith.divf %684, %cst_239 : f32
    %cst_240 = arith.constant 9.99999993E-9 : f32
    %686 = arith.addf %685, %cst_240 : f32
    %687 = math.rsqrt %686 : f32
    %688 = vector.broadcast %687 : f32 to vector<16x64xf32>
    %689 = arith.mulf %677, %688 : vector<16x64xf32>
    %690 = vector.extract_strided_slice %193 {offsets = [0, 2], sizes = [16, 1], strides = [1, 1]} : vector<16x3xf32> to vector<16x1xf32>
    %691 = vector.broadcast %690 : vector<16x1xf32> to vector<16x64xf32>
    %692 = arith.mulf %689, %691 : vector<16x64xf32>
    %693 = vector.extract_strided_slice %194 {offsets = [0, 2], sizes = [16, 1], strides = [1, 1]} : vector<16x3xf32> to vector<16x1xf32>
    %694 = vector.broadcast %693 : vector<16x1xf32> to vector<16x64xf32>
    %695 = arith.addf %692, %694 : vector<16x64xf32>
    %c0_241 = arith.constant 0 : index
    %c128_242 = arith.constant 128 : index
    %696 = vector.load %arg29[%c0_241, %c128_242] : memref<16x320xf32, #tpu.memory_space<vmem>>, vector<16x64xf32>
    tpu.vector_store %arg29[%c0_241, %c128_242], %695 {strides = array<i32>} : memref<16x320xf32, #tpu.memory_space<vmem>>, vector<16x64xf32>,
    %c0_243 = arith.constant 0 : index
    %c126_244 = arith.constant 126 : index
    %697 = vector.load %arg29[%c0_243, %c126_244] : memref<16x320xf32, #tpu.memory_space<vmem>>, vector<16x64xf32>
    %c3_i32_245 = arith.constant 3 : i32
    %698 = vector.broadcast %c3_i32_245 : i32 to vector<1x64xi32>
    %699 = arith.andi %195, %698 : vector<1x64xi32>
    %c0_i32_246 = arith.constant 0 : i32
    %700 = vector.broadcast %c0_i32_246 : i32 to vector<1x64xi32>
    %701 = arith.cmpi eq, %699, %700 : vector<1x64xi32>
    %702 = vector.shape_cast %701 : vector<1x64xi1> to vector<1x64xi1>
    %703 = vector.broadcast %702 : vector<1x64xi1> to vector<16x64xi1>
    %704 = arith.select %703, %695, %697 : vector<16x64xi1>, vector<16x64xf32>
    %705 = arith.addf %632, %704 : vector<16x64xf32>
    %c0_247 = arith.constant 0 : index
    %c128_248 = arith.constant 128 : index
    %706 = vector.load %arg29[%c0_247, %c128_248] : memref<16x320xf32, #tpu.memory_space<vmem>>, vector<16x64xf32>
    tpu.vector_store %arg29[%c0_247, %c128_248], %705 {strides = array<i32>} : memref<16x320xf32, #tpu.memory_space<vmem>>, vector<16x64xf32>,
    %c0_249 = arith.constant 0 : index
    %c127_250 = arith.constant 127 : index
    %707 = vector.load %arg29[%c0_249, %c127_250] : memref<16x320xf32, #tpu.memory_space<vmem>>, vector<16x64xf32>
    %c1_i32_251 = arith.constant 1 : i32
    %708 = vector.broadcast %c1_i32_251 : i32 to vector<1x64xi32>
    %709 = arith.andi %195, %708 : vector<1x64xi32>
    %c0_i32_252 = arith.constant 0 : i32
    %710 = vector.broadcast %c0_i32_252 : i32 to vector<1x64xi32>
    %711 = arith.cmpi eq, %709, %710 : vector<1x64xi32>
    %712 = vector.shape_cast %711 : vector<1x64xi1> to vector<1x64xi1>
    %713 = vector.broadcast %712 : vector<1x64xi1> to vector<16x64xi1>
    %714 = arith.select %713, %705, %707 : vector<16x64xi1>, vector<16x64xf32>
    %715 = arith.addf %569, %714 : vector<16x64xf32>
    %716 = vector.shape_cast %715 : vector<16x64xf32> to vector<1x16x64xf32>
    %cst_253 = arith.constant dense<0.000000e+00> : vector<1xf32>
    %717 = vector.multi_reduction <add>, %716, %cst_253 [1, 2] : vector<1x16x64xf32> to vector<1xf32>
    %718 = vector.shape_cast %717 : vector<1xf32> to vector<1x1x1xf32>
    %719 = vector.extract %718[0, 0, 0] : f32 from vector<1x1x1xf32>
    %cst_254 = arith.constant 1.024000e+03 : f32
    %720 = arith.divf %719, %cst_254 : f32
    %721 = vector.broadcast %720 : f32 to vector<16x64xf32>
    %722 = arith.subf %715, %721 : vector<16x64xf32>
    %723 = arith.mulf %722, %722 : vector<16x64xf32>
    %724 = vector.shape_cast %723 : vector<16x64xf32> to vector<1x16x64xf32>
    %cst_255 = arith.constant dense<0.000000e+00> : vector<1xf32>
    %725 = vector.multi_reduction <add>, %724, %cst_255 [1, 2] : vector<1x16x64xf32> to vector<1xf32>
    %726 = vector.shape_cast %725 : vector<1xf32> to vector<1x1x1xf32>
    %727 = vector.extract %726[0, 0, 0] : f32 from vector<1x1x1xf32>
    %cst_256 = arith.constant 1.024000e+03 : f32
    %728 = arith.divf %727, %cst_256 : f32
    %cst_257 = arith.constant 9.99999993E-9 : f32
    %729 = arith.addf %728, %cst_257 : f32
    %730 = math.rsqrt %729 : f32
    %731 = vector.broadcast %730 : f32 to vector<16x64xf32>
    %732 = arith.mulf %722, %731 : vector<16x64xf32>
    %733 = vector.broadcast %186 : vector<16x1xf32> to vector<16x64xf32>
    %734 = arith.mulf %732, %733 : vector<16x64xf32>
    %735 = vector.broadcast %187 : vector<16x1xf32> to vector<16x64xf32>
    %736 = arith.addf %734, %735 : vector<16x64xf32>
    %cst_258 = arith.constant 0.000000e+00 : f32
    %737 = vector.broadcast %cst_258 : f32 to vector<16x64xf32>
    %738 = arith.maximumf %736, %737 : vector<16x64xf32>
    %cst_259 = arith.constant 0.000000e+00 : f32
    %739 = vector.broadcast %cst_259 : f32 to vector<16x64xf32>
    %740 = arith.minimumf %736, %739 : vector<16x64xf32>
    %741 = vector.broadcast %188 : vector<1x1xf32> to vector<16x64xf32>
    %742 = arith.mulf %741, %740 : vector<16x64xf32>
    %743 = arith.addf %738, %742 : vector<16x64xf32>
    %744 = arith.truncf %743 : vector<16x64xf32> to vector<16x64xbf16>
    %cst_260 = arith.constant dense<0.000000e+00> : vector<8x64xf32>
    %745 = tpu.matmul %189, %744, %cst_260 {dimension_numbers = #tpu.dot_dimension_numbers<[1], [0], [0], [1], [0, 0, 1, 1], [], []>} : vector<8x16xbf16>, vector<16x64xbf16>, vector<8x64xf32> -> vector<8x64xf32>
    %746 = vector.broadcast %190 : vector<8x1xf32> to vector<8x64xf32>
    %747 = arith.addf %745, %746 : vector<8x64xf32>
    %748 = arith.addf %747, %484 : vector<8x64xf32>
    %c0_261 = arith.constant 0 : index
    %c0_262 = arith.constant 0 : index
    %c64 = arith.constant 64 : index
    %749 = vector.load %arg28[%c0_261, %c0_262, %c64] : memref<1x8x256xf32, #tpu.memory_space<vmem>>, vector<1x8x64xf32>
    %750 = vector.shape_cast %749 : vector<1x8x64xf32> to vector<8x64xf32>
    %751 = vector.shape_cast %748 : vector<8x64xf32> to vector<1x8x64xf32>
    tpu.vector_store %arg28[%c0_261, %c0_262, %c64], %751 {strides = array<i32>} : memref<1x8x256xf32, #tpu.memory_space<vmem>>, vector<1x8x64xf32>,
    %752 = vector.extract_strided_slice %4 {offsets = [0, 128], sizes = [8, 64], strides = [1, 1]} : vector<8x256xf32> to vector<8x64xf32>
    %753 = vector.extract_strided_slice %174 {offsets = [0, 128], sizes = [8, 64], strides = [1, 1]} : vector<8x256xf32> to vector<8x64xf32>
    %754 = arith.addf %753, %180 : vector<8x64xf32>
    %cst_263 = arith.constant 0.000000e+00 : f32
    %755 = vector.broadcast %cst_263 : f32 to vector<8x64xf32>
    %756 = arith.maximumf %754, %755 : vector<8x64xf32>
    %cst_264 = arith.constant 0.000000e+00 : f32
    %757 = vector.broadcast %cst_264 : f32 to vector<8x64xf32>
    %758 = arith.minimumf %754, %757 : vector<8x64xf32>
    %759 = vector.broadcast %136 : vector<1x1xf32> to vector<8x64xf32>
    %760 = arith.mulf %759, %758 : vector<8x64xf32>
    %761 = arith.addf %756, %760 : vector<8x64xf32>
    %762 = arith.addf %752, %761 : vector<8x64xf32>
    %763 = arith.truncf %762 : vector<8x64xf32> to vector<8x64xbf16>
    %cst_265 = arith.constant dense<0.000000e+00> : vector<16x64xf32>
    %764 = tpu.matmul %181, %763, %cst_265 {dimension_numbers = #tpu.dot_dimension_numbers<[1], [0], [0], [1], [0, 0, 1, 1], [], []>} : vector<16x8xbf16>, vector<8x64xbf16>, vector<16x64xf32> -> vector<16x64xf32>
    %765 = vector.broadcast %182 : vector<16x1xf32> to vector<16x64xf32>
    %766 = arith.addf %764, %765 : vector<16x64xf32>
    %767 = vector.shape_cast %766 : vector<16x64xf32> to vector<1x16x64xf32>
    %cst_266 = arith.constant dense<0.000000e+00> : vector<1xf32>
    %768 = vector.multi_reduction <add>, %767, %cst_266 [1, 2] : vector<1x16x64xf32> to vector<1xf32>
    %769 = vector.shape_cast %768 : vector<1xf32> to vector<1x1x1xf32>
    %770 = vector.extract %769[0, 0, 0] : f32 from vector<1x1x1xf32>
    %cst_267 = arith.constant 1.024000e+03 : f32
    %771 = arith.divf %770, %cst_267 : f32
    %772 = vector.broadcast %771 : f32 to vector<16x64xf32>
    %773 = arith.subf %766, %772 : vector<16x64xf32>
    %774 = arith.mulf %773, %773 : vector<16x64xf32>
    %775 = vector.shape_cast %774 : vector<16x64xf32> to vector<1x16x64xf32>
    %cst_268 = arith.constant dense<0.000000e+00> : vector<1xf32>
    %776 = vector.multi_reduction <add>, %775, %cst_268 [1, 2] : vector<1x16x64xf32> to vector<1xf32>
    %777 = vector.shape_cast %776 : vector<1xf32> to vector<1x1x1xf32>
    %778 = vector.extract %777[0, 0, 0] : f32 from vector<1x1x1xf32>
    %cst_269 = arith.constant 1.024000e+03 : f32
    %779 = arith.divf %778, %cst_269 : f32
    %cst_270 = arith.constant 9.99999993E-9 : f32
    %780 = arith.addf %779, %cst_270 : f32
    %781 = math.rsqrt %780 : f32
    %782 = vector.broadcast %781 : f32 to vector<16x64xf32>
    %783 = arith.mulf %773, %782 : vector<16x64xf32>
    %784 = vector.broadcast %183 : vector<16x1xf32> to vector<16x64xf32>
    %785 = arith.mulf %783, %784 : vector<16x64xf32>
    %786 = vector.broadcast %184 : vector<16x1xf32> to vector<16x64xf32>
    %787 = arith.addf %785, %786 : vector<16x64xf32>
    %cst_271 = arith.constant 0.000000e+00 : f32
    %788 = vector.broadcast %cst_271 : f32 to vector<16x64xf32>
    %789 = arith.maximumf %787, %788 : vector<16x64xf32>
    %cst_272 = arith.constant 0.000000e+00 : f32
    %790 = vector.broadcast %cst_272 : f32 to vector<16x64xf32>
    %791 = arith.minimumf %787, %790 : vector<16x64xf32>
    %792 = vector.broadcast %185 : vector<1x1xf32> to vector<16x64xf32>
    %793 = arith.mulf %792, %791 : vector<16x64xf32>
    %794 = arith.addf %789, %793 : vector<16x64xf32>
    %c0_273 = arith.constant 0 : index
    %c128_274 = arith.constant 128 : index
    %795 = vector.load %arg29[%c0_273, %c128_274] : memref<16x320xf32, #tpu.memory_space<vmem>>, vector<16x64xf32>
    tpu.vector_store %arg29[%c0_273, %c128_274], %794 {strides = array<i32>} : memref<16x320xf32, #tpu.memory_space<vmem>>, vector<16x64xf32>,
    %cst_275 = arith.constant 0.000000e+00 : f32
    %796 = vector.broadcast %cst_275 : f32 to vector<16x64xf32>
    %797 = vector.extract_strided_slice %191 {offsets = [0, 0], sizes = [16, 1], strides = [1, 1]} : vector<16x15xf32> to vector<16x1xf32>
    %c0_276 = arith.constant 0 : index
    %c126_277 = arith.constant 126 : index
    %798 = vector.load %arg29[%c0_276, %c126_277] : memref<16x320xf32, #tpu.memory_space<vmem>>, vector<16x64xf32>
    %799 = vector.broadcast %797 : vector<16x1xf32> to vector<16x64xf32>
    %800 = arith.mulf %799, %798 : vector<16x64xf32>
    %801 = arith.addf %796, %800 : vector<16x64xf32>
    %802 = vector.extract_strided_slice %191 {offsets = [0, 1], sizes = [16, 1], strides = [1, 1]} : vector<16x15xf32> to vector<16x1xf32>
    %c0_278 = arith.constant 0 : index
    %c127_279 = arith.constant 127 : index
    %803 = vector.load %arg29[%c0_278, %c127_279] : memref<16x320xf32, #tpu.memory_space<vmem>>, vector<16x64xf32>
    %804 = vector.broadcast %802 : vector<16x1xf32> to vector<16x64xf32>
    %805 = arith.mulf %804, %803 : vector<16x64xf32>
    %806 = arith.addf %801, %805 : vector<16x64xf32>
    %807 = vector.extract_strided_slice %191 {offsets = [0, 2], sizes = [16, 1], strides = [1, 1]} : vector<16x15xf32> to vector<16x1xf32>
    %c0_280 = arith.constant 0 : index
    %c128_281 = arith.constant 128 : index
    %808 = vector.load %arg29[%c0_280, %c128_281] : memref<16x320xf32, #tpu.memory_space<vmem>>, vector<16x64xf32>
    %809 = vector.broadcast %807 : vector<16x1xf32> to vector<16x64xf32>
    %810 = arith.mulf %809, %808 : vector<16x64xf32>
    %811 = arith.addf %806, %810 : vector<16x64xf32>
    %812 = vector.extract_strided_slice %191 {offsets = [0, 3], sizes = [16, 1], strides = [1, 1]} : vector<16x15xf32> to vector<16x1xf32>
    %c0_282 = arith.constant 0 : index
    %c129_283 = arith.constant 129 : index
    %813 = vector.load %arg29[%c0_282, %c129_283] : memref<16x320xf32, #tpu.memory_space<vmem>>, vector<16x64xf32>
    %814 = vector.broadcast %812 : vector<16x1xf32> to vector<16x64xf32>
    %815 = arith.mulf %814, %813 : vector<16x64xf32>
    %816 = arith.addf %811, %815 : vector<16x64xf32>
    %817 = vector.extract_strided_slice %191 {offsets = [0, 4], sizes = [16, 1], strides = [1, 1]} : vector<16x15xf32> to vector<16x1xf32>
    %c0_284 = arith.constant 0 : index
    %c130_285 = arith.constant 130 : index
    %818 = vector.load %arg29[%c0_284, %c130_285] : memref<16x320xf32, #tpu.memory_space<vmem>>, vector<16x64xf32>
    %819 = vector.broadcast %817 : vector<16x1xf32> to vector<16x64xf32>
    %820 = arith.mulf %819, %818 : vector<16x64xf32>
    %821 = arith.addf %816, %820 : vector<16x64xf32>
    %822 = vector.extract_strided_slice %192 {offsets = [0, 0], sizes = [16, 1], strides = [1, 1]} : vector<16x3xf32> to vector<16x1xf32>
    %823 = vector.broadcast %822 : vector<16x1xf32> to vector<16x64xf32>
    %824 = arith.addf %821, %823 : vector<16x64xf32>
    %825 = vector.shape_cast %824 : vector<16x64xf32> to vector<1x16x64xf32>
    %cst_286 = arith.constant dense<0.000000e+00> : vector<1xf32>
    %826 = vector.multi_reduction <add>, %825, %cst_286 [1, 2] : vector<1x16x64xf32> to vector<1xf32>
    %827 = vector.shape_cast %826 : vector<1xf32> to vector<1x1x1xf32>
    %828 = vector.extract %827[0, 0, 0] : f32 from vector<1x1x1xf32>
    %cst_287 = arith.constant 1.024000e+03 : f32
    %829 = arith.divf %828, %cst_287 : f32
    %830 = vector.broadcast %829 : f32 to vector<16x64xf32>
    %831 = arith.subf %824, %830 : vector<16x64xf32>
    %832 = arith.mulf %831, %831 : vector<16x64xf32>
    %833 = vector.shape_cast %832 : vector<16x64xf32> to vector<1x16x64xf32>
    %cst_288 = arith.constant dense<0.000000e+00> : vector<1xf32>
    %834 = vector.multi_reduction <add>, %833, %cst_288 [1, 2] : vector<1x16x64xf32> to vector<1xf32>
    %835 = vector.shape_cast %834 : vector<1xf32> to vector<1x1x1xf32>
    %836 = vector.extract %835[0, 0, 0] : f32 from vector<1x1x1xf32>
    %cst_289 = arith.constant 1.024000e+03 : f32
    %837 = arith.divf %836, %cst_289 : f32
    %cst_290 = arith.constant 9.99999993E-9 : f32
    %838 = arith.addf %837, %cst_290 : f32
    %839 = math.rsqrt %838 : f32
    %840 = vector.broadcast %839 : f32 to vector<16x64xf32>
    %841 = arith.mulf %831, %840 : vector<16x64xf32>
    %842 = vector.extract_strided_slice %193 {offsets = [0, 0], sizes = [16, 1], strides = [1, 1]} : vector<16x3xf32> to vector<16x1xf32>
    %843 = vector.broadcast %842 : vector<16x1xf32> to vector<16x64xf32>
    %844 = arith.mulf %841, %843 : vector<16x64xf32>
    %845 = vector.extract_strided_slice %194 {offsets = [0, 0], sizes = [16, 1], strides = [1, 1]} : vector<16x3xf32> to vector<16x1xf32>
    %846 = vector.broadcast %845 : vector<16x1xf32> to vector<16x64xf32>
    %847 = arith.addf %844, %846 : vector<16x64xf32>
    %c0_291 = arith.constant 0 : index
    %c128_292 = arith.constant 128 : index
    %848 = vector.load %arg29[%c0_291, %c128_292] : memref<16x320xf32, #tpu.memory_space<vmem>>, vector<16x64xf32>
    tpu.vector_store %arg29[%c0_291, %c128_292], %847 {strides = array<i32>} : memref<16x320xf32, #tpu.memory_space<vmem>>, vector<16x64xf32>,
    %cst_293 = arith.constant 0.000000e+00 : f32
    %849 = vector.broadcast %cst_293 : f32 to vector<16x64xf32>
    %850 = vector.extract_strided_slice %191 {offsets = [0, 5], sizes = [16, 1], strides = [1, 1]} : vector<16x15xf32> to vector<16x1xf32>
    %c0_294 = arith.constant 0 : index
    %c126_295 = arith.constant 126 : index
    %851 = vector.load %arg29[%c0_294, %c126_295] : memref<16x320xf32, #tpu.memory_space<vmem>>, vector<16x64xf32>
    %852 = vector.broadcast %850 : vector<16x1xf32> to vector<16x64xf32>
    %853 = arith.mulf %852, %851 : vector<16x64xf32>
    %854 = arith.addf %849, %853 : vector<16x64xf32>
    %855 = vector.extract_strided_slice %191 {offsets = [0, 6], sizes = [16, 1], strides = [1, 1]} : vector<16x15xf32> to vector<16x1xf32>
    %c0_296 = arith.constant 0 : index
    %c127_297 = arith.constant 127 : index
    %856 = vector.load %arg29[%c0_296, %c127_297] : memref<16x320xf32, #tpu.memory_space<vmem>>, vector<16x64xf32>
    %857 = vector.broadcast %855 : vector<16x1xf32> to vector<16x64xf32>
    %858 = arith.mulf %857, %856 : vector<16x64xf32>
    %859 = arith.addf %854, %858 : vector<16x64xf32>
    %860 = vector.extract_strided_slice %191 {offsets = [0, 7], sizes = [16, 1], strides = [1, 1]} : vector<16x15xf32> to vector<16x1xf32>
    %c0_298 = arith.constant 0 : index
    %c128_299 = arith.constant 128 : index
    %861 = vector.load %arg29[%c0_298, %c128_299] : memref<16x320xf32, #tpu.memory_space<vmem>>, vector<16x64xf32>
    %862 = vector.broadcast %860 : vector<16x1xf32> to vector<16x64xf32>
    %863 = arith.mulf %862, %861 : vector<16x64xf32>
    %864 = arith.addf %859, %863 : vector<16x64xf32>
    %865 = vector.extract_strided_slice %191 {offsets = [0, 8], sizes = [16, 1], strides = [1, 1]} : vector<16x15xf32> to vector<16x1xf32>
    %c0_300 = arith.constant 0 : index
    %c129_301 = arith.constant 129 : index
    %866 = vector.load %arg29[%c0_300, %c129_301] : memref<16x320xf32, #tpu.memory_space<vmem>>, vector<16x64xf32>
    %867 = vector.broadcast %865 : vector<16x1xf32> to vector<16x64xf32>
    %868 = arith.mulf %867, %866 : vector<16x64xf32>
    %869 = arith.addf %864, %868 : vector<16x64xf32>
    %870 = vector.extract_strided_slice %191 {offsets = [0, 9], sizes = [16, 1], strides = [1, 1]} : vector<16x15xf32> to vector<16x1xf32>
    %c0_302 = arith.constant 0 : index
    %c130_303 = arith.constant 130 : index
    %871 = vector.load %arg29[%c0_302, %c130_303] : memref<16x320xf32, #tpu.memory_space<vmem>>, vector<16x64xf32>
    %872 = vector.broadcast %870 : vector<16x1xf32> to vector<16x64xf32>
    %873 = arith.mulf %872, %871 : vector<16x64xf32>
    %874 = arith.addf %869, %873 : vector<16x64xf32>
    %875 = vector.extract_strided_slice %192 {offsets = [0, 1], sizes = [16, 1], strides = [1, 1]} : vector<16x3xf32> to vector<16x1xf32>
    %876 = vector.broadcast %875 : vector<16x1xf32> to vector<16x64xf32>
    %877 = arith.addf %874, %876 : vector<16x64xf32>
    %c1_i32_304 = arith.constant 1 : i32
    %878 = vector.broadcast %c1_i32_304 : i32 to vector<1x64xi32>
    %879 = arith.andi %195, %878 : vector<1x64xi32>
    %c0_i32_305 = arith.constant 0 : i32
    %880 = vector.broadcast %c0_i32_305 : i32 to vector<1x64xi32>
    %881 = arith.cmpi eq, %879, %880 : vector<1x64xi32>
    %882 = arith.extui %881 : vector<1x64xi1> to vector<1x64xi32>
    %883 = arith.sitofp %882 : vector<1x64xi32> to vector<1x64xf32>
    %884 = vector.broadcast %883 : vector<1x64xf32> to vector<16x64xf32>
    %885 = arith.mulf %877, %884 : vector<16x64xf32>
    %886 = vector.shape_cast %885 : vector<16x64xf32> to vector<1x16x64xf32>
    %cst_306 = arith.constant dense<0.000000e+00> : vector<1xf32>
    %887 = vector.multi_reduction <add>, %886, %cst_306 [1, 2] : vector<1x16x64xf32> to vector<1xf32>
    %888 = vector.shape_cast %887 : vector<1xf32> to vector<1x1x1xf32>
    %889 = vector.extract %888[0, 0, 0] : f32 from vector<1x1x1xf32>
    %cst_307 = arith.constant 5.120000e+02 : f32
    %890 = arith.divf %889, %cst_307 : f32
    %891 = vector.broadcast %890 : f32 to vector<16x64xf32>
    %892 = arith.subf %877, %891 : vector<16x64xf32>
    %893 = arith.mulf %892, %892 : vector<16x64xf32>
    %894 = vector.broadcast %883 : vector<1x64xf32> to vector<16x64xf32>
    %895 = arith.mulf %893, %894 : vector<16x64xf32>
    %896 = vector.shape_cast %895 : vector<16x64xf32> to vector<1x16x64xf32>
    %cst_308 = arith.constant dense<0.000000e+00> : vector<1xf32>
    %897 = vector.multi_reduction <add>, %896, %cst_308 [1, 2] : vector<1x16x64xf32> to vector<1xf32>
    %898 = vector.shape_cast %897 : vector<1xf32> to vector<1x1x1xf32>
    %899 = vector.extract %898[0, 0, 0] : f32 from vector<1x1x1xf32>
    %cst_309 = arith.constant 5.120000e+02 : f32
    %900 = arith.divf %899, %cst_309 : f32
    %cst_310 = arith.constant 9.99999993E-9 : f32
    %901 = arith.addf %900, %cst_310 : f32
    %902 = math.rsqrt %901 : f32
    %903 = vector.broadcast %902 : f32 to vector<16x64xf32>
    %904 = arith.mulf %892, %903 : vector<16x64xf32>
    %905 = vector.extract_strided_slice %193 {offsets = [0, 1], sizes = [16, 1], strides = [1, 1]} : vector<16x3xf32> to vector<16x1xf32>
    %906 = vector.broadcast %905 : vector<16x1xf32> to vector<16x64xf32>
    %907 = arith.mulf %904, %906 : vector<16x64xf32>
    %908 = vector.extract_strided_slice %194 {offsets = [0, 1], sizes = [16, 1], strides = [1, 1]} : vector<16x3xf32> to vector<16x1xf32>
    %909 = vector.broadcast %908 : vector<16x1xf32> to vector<16x64xf32>
    %910 = arith.addf %907, %909 : vector<16x64xf32>
    %c0_311 = arith.constant 0 : index
    %c128_312 = arith.constant 128 : index
    %911 = vector.load %arg29[%c0_311, %c128_312] : memref<16x320xf32, #tpu.memory_space<vmem>>, vector<16x64xf32>
    tpu.vector_store %arg29[%c0_311, %c128_312], %910 {strides = array<i32>} : memref<16x320xf32, #tpu.memory_space<vmem>>, vector<16x64xf32>,
    %cst_313 = arith.constant 0.000000e+00 : f32
    %912 = vector.broadcast %cst_313 : f32 to vector<16x64xf32>
    %913 = vector.extract_strided_slice %191 {offsets = [0, 10], sizes = [16, 1], strides = [1, 1]} : vector<16x15xf32> to vector<16x1xf32>
    %c0_314 = arith.constant 0 : index
    %c124_315 = arith.constant 124 : index
    %914 = vector.load %arg29[%c0_314, %c124_315] : memref<16x320xf32, #tpu.memory_space<vmem>>, vector<16x64xf32>
    %915 = vector.broadcast %913 : vector<16x1xf32> to vector<16x64xf32>
    %916 = arith.mulf %915, %914 : vector<16x64xf32>
    %917 = arith.addf %912, %916 : vector<16x64xf32>
    %918 = vector.extract_strided_slice %191 {offsets = [0, 11], sizes = [16, 1], strides = [1, 1]} : vector<16x15xf32> to vector<16x1xf32>
    %c0_316 = arith.constant 0 : index
    %c126_317 = arith.constant 126 : index
    %919 = vector.load %arg29[%c0_316, %c126_317] : memref<16x320xf32, #tpu.memory_space<vmem>>, vector<16x64xf32>
    %920 = vector.broadcast %918 : vector<16x1xf32> to vector<16x64xf32>
    %921 = arith.mulf %920, %919 : vector<16x64xf32>
    %922 = arith.addf %917, %921 : vector<16x64xf32>
    %923 = vector.extract_strided_slice %191 {offsets = [0, 12], sizes = [16, 1], strides = [1, 1]} : vector<16x15xf32> to vector<16x1xf32>
    %c0_318 = arith.constant 0 : index
    %c128_319 = arith.constant 128 : index
    %924 = vector.load %arg29[%c0_318, %c128_319] : memref<16x320xf32, #tpu.memory_space<vmem>>, vector<16x64xf32>
    %925 = vector.broadcast %923 : vector<16x1xf32> to vector<16x64xf32>
    %926 = arith.mulf %925, %924 : vector<16x64xf32>
    %927 = arith.addf %922, %926 : vector<16x64xf32>
    %928 = vector.extract_strided_slice %191 {offsets = [0, 13], sizes = [16, 1], strides = [1, 1]} : vector<16x15xf32> to vector<16x1xf32>
    %c0_320 = arith.constant 0 : index
    %c130_321 = arith.constant 130 : index
    %929 = vector.load %arg29[%c0_320, %c130_321] : memref<16x320xf32, #tpu.memory_space<vmem>>, vector<16x64xf32>
    %930 = vector.broadcast %928 : vector<16x1xf32> to vector<16x64xf32>
    %931 = arith.mulf %930, %929 : vector<16x64xf32>
    %932 = arith.addf %927, %931 : vector<16x64xf32>
    %933 = vector.extract_strided_slice %191 {offsets = [0, 14], sizes = [16, 1], strides = [1, 1]} : vector<16x15xf32> to vector<16x1xf32>
    %c0_322 = arith.constant 0 : index
    %c132_323 = arith.constant 132 : index
    %934 = vector.load %arg29[%c0_322, %c132_323] : memref<16x320xf32, #tpu.memory_space<vmem>>, vector<16x64xf32>
    %935 = vector.broadcast %933 : vector<16x1xf32> to vector<16x64xf32>
    %936 = arith.mulf %935, %934 : vector<16x64xf32>
    %937 = arith.addf %932, %936 : vector<16x64xf32>
    %938 = vector.extract_strided_slice %192 {offsets = [0, 2], sizes = [16, 1], strides = [1, 1]} : vector<16x3xf32> to vector<16x1xf32>
    %939 = vector.broadcast %938 : vector<16x1xf32> to vector<16x64xf32>
    %940 = arith.addf %937, %939 : vector<16x64xf32>
    %c3_i32_324 = arith.constant 3 : i32
    %941 = vector.broadcast %c3_i32_324 : i32 to vector<1x64xi32>
    %942 = arith.andi %195, %941 : vector<1x64xi32>
    %c0_i32_325 = arith.constant 0 : i32
    %943 = vector.broadcast %c0_i32_325 : i32 to vector<1x64xi32>
    %944 = arith.cmpi eq, %942, %943 : vector<1x64xi32>
    %945 = arith.extui %944 : vector<1x64xi1> to vector<1x64xi32>
    %946 = arith.sitofp %945 : vector<1x64xi32> to vector<1x64xf32>
    %947 = vector.broadcast %946 : vector<1x64xf32> to vector<16x64xf32>
    %948 = arith.mulf %940, %947 : vector<16x64xf32>
    %949 = vector.shape_cast %948 : vector<16x64xf32> to vector<1x16x64xf32>
    %cst_326 = arith.constant dense<0.000000e+00> : vector<1xf32>
    %950 = vector.multi_reduction <add>, %949, %cst_326 [1, 2] : vector<1x16x64xf32> to vector<1xf32>
    %951 = vector.shape_cast %950 : vector<1xf32> to vector<1x1x1xf32>
    %952 = vector.extract %951[0, 0, 0] : f32 from vector<1x1x1xf32>
    %cst_327 = arith.constant 2.560000e+02 : f32
    %953 = arith.divf %952, %cst_327 : f32
    %954 = vector.broadcast %953 : f32 to vector<16x64xf32>
    %955 = arith.subf %940, %954 : vector<16x64xf32>
    %956 = arith.mulf %955, %955 : vector<16x64xf32>
    %957 = vector.broadcast %946 : vector<1x64xf32> to vector<16x64xf32>
    %958 = arith.mulf %956, %957 : vector<16x64xf32>
    %959 = vector.shape_cast %958 : vector<16x64xf32> to vector<1x16x64xf32>
    %cst_328 = arith.constant dense<0.000000e+00> : vector<1xf32>
    %960 = vector.multi_reduction <add>, %959, %cst_328 [1, 2] : vector<1x16x64xf32> to vector<1xf32>
    %961 = vector.shape_cast %960 : vector<1xf32> to vector<1x1x1xf32>
    %962 = vector.extract %961[0, 0, 0] : f32 from vector<1x1x1xf32>
    %cst_329 = arith.constant 2.560000e+02 : f32
    %963 = arith.divf %962, %cst_329 : f32
    %cst_330 = arith.constant 9.99999993E-9 : f32
    %964 = arith.addf %963, %cst_330 : f32
    %965 = math.rsqrt %964 : f32
    %966 = vector.broadcast %965 : f32 to vector<16x64xf32>
    %967 = arith.mulf %955, %966 : vector<16x64xf32>
    %968 = vector.extract_strided_slice %193 {offsets = [0, 2], sizes = [16, 1], strides = [1, 1]} : vector<16x3xf32> to vector<16x1xf32>
    %969 = vector.broadcast %968 : vector<16x1xf32> to vector<16x64xf32>
    %970 = arith.mulf %967, %969 : vector<16x64xf32>
    %971 = vector.extract_strided_slice %194 {offsets = [0, 2], sizes = [16, 1], strides = [1, 1]} : vector<16x3xf32> to vector<16x1xf32>
    %972 = vector.broadcast %971 : vector<16x1xf32> to vector<16x64xf32>
    %973 = arith.addf %970, %972 : vector<16x64xf32>
    %c0_331 = arith.constant 0 : index
    %c128_332 = arith.constant 128 : index
    %974 = vector.load %arg29[%c0_331, %c128_332] : memref<16x320xf32, #tpu.memory_space<vmem>>, vector<16x64xf32>
    tpu.vector_store %arg29[%c0_331, %c128_332], %973 {strides = array<i32>} : memref<16x320xf32, #tpu.memory_space<vmem>>, vector<16x64xf32>,
    %c0_333 = arith.constant 0 : index
    %c126_334 = arith.constant 126 : index
    %975 = vector.load %arg29[%c0_333, %c126_334] : memref<16x320xf32, #tpu.memory_space<vmem>>, vector<16x64xf32>
    %c3_i32_335 = arith.constant 3 : i32
    %976 = vector.broadcast %c3_i32_335 : i32 to vector<1x64xi32>
    %977 = arith.andi %195, %976 : vector<1x64xi32>
    %c0_i32_336 = arith.constant 0 : i32
    %978 = vector.broadcast %c0_i32_336 : i32 to vector<1x64xi32>
    %979 = arith.cmpi eq, %977, %978 : vector<1x64xi32>
    %980 = vector.shape_cast %979 : vector<1x64xi1> to vector<1x64xi1>
    %981 = vector.broadcast %980 : vector<1x64xi1> to vector<16x64xi1>
    %982 = arith.select %981, %973, %975 : vector<16x64xi1>, vector<16x64xf32>
    %983 = arith.addf %910, %982 : vector<16x64xf32>
    %c0_337 = arith.constant 0 : index
    %c128_338 = arith.constant 128 : index
    %984 = vector.load %arg29[%c0_337, %c128_338] : memref<16x320xf32, #tpu.memory_space<vmem>>, vector<16x64xf32>
    tpu.vector_store %arg29[%c0_337, %c128_338], %983 {strides = array<i32>} : memref<16x320xf32, #tpu.memory_space<vmem>>, vector<16x64xf32>,
    %c0_339 = arith.constant 0 : index
    %c127_340 = arith.constant 127 : index
    %985 = vector.load %arg29[%c0_339, %c127_340] : memref<16x320xf32, #tpu.memory_space<vmem>>, vector<16x64xf32>
    %c1_i32_341 = arith.constant 1 : i32
    %986 = vector.broadcast %c1_i32_341 : i32 to vector<1x64xi32>
    %987 = arith.andi %195, %986 : vector<1x64xi32>
    %c0_i32_342 = arith.constant 0 : i32
    %988 = vector.broadcast %c0_i32_342 : i32 to vector<1x64xi32>
    %989 = arith.cmpi eq, %987, %988 : vector<1x64xi32>
    %990 = vector.shape_cast %989 : vector<1x64xi1> to vector<1x64xi1>
    %991 = vector.broadcast %990 : vector<1x64xi1> to vector<16x64xi1>
    %992 = arith.select %991, %983, %985 : vector<16x64xi1>, vector<16x64xf32>
    %993 = arith.addf %847, %992 : vector<16x64xf32>
    %994 = vector.shape_cast %993 : vector<16x64xf32> to vector<1x16x64xf32>
    %cst_343 = arith.constant dense<0.000000e+00> : vector<1xf32>
    %995 = vector.multi_reduction <add>, %994, %cst_343 [1, 2] : vector<1x16x64xf32> to vector<1xf32>
    %996 = vector.shape_cast %995 : vector<1xf32> to vector<1x1x1xf32>
    %997 = vector.extract %996[0, 0, 0] : f32 from vector<1x1x1xf32>
    %cst_344 = arith.constant 1.024000e+03 : f32
    %998 = arith.divf %997, %cst_344 : f32
    %999 = vector.broadcast %998 : f32 to vector<16x64xf32>
    %1000 = arith.subf %993, %999 : vector<16x64xf32>
    %1001 = arith.mulf %1000, %1000 : vector<16x64xf32>
    %1002 = vector.shape_cast %1001 : vector<16x64xf32> to vector<1x16x64xf32>
    %cst_345 = arith.constant dense<0.000000e+00> : vector<1xf32>
    %1003 = vector.multi_reduction <add>, %1002, %cst_345 [1, 2] : vector<1x16x64xf32> to vector<1xf32>
    %1004 = vector.shape_cast %1003 : vector<1xf32> to vector<1x1x1xf32>
    %1005 = vector.extract %1004[0, 0, 0] : f32 from vector<1x1x1xf32>
    %cst_346 = arith.constant 1.024000e+03 : f32
    %1006 = arith.divf %1005, %cst_346 : f32
    %cst_347 = arith.constant 9.99999993E-9 : f32
    %1007 = arith.addf %1006, %cst_347 : f32
    %1008 = math.rsqrt %1007 : f32
    %1009 = vector.broadcast %1008 : f32 to vector<16x64xf32>
    %1010 = arith.mulf %1000, %1009 : vector<16x64xf32>
    %1011 = vector.broadcast %186 : vector<16x1xf32> to vector<16x64xf32>
    %1012 = arith.mulf %1010, %1011 : vector<16x64xf32>
    %1013 = vector.broadcast %187 : vector<16x1xf32> to vector<16x64xf32>
    %1014 = arith.addf %1012, %1013 : vector<16x64xf32>
    %cst_348 = arith.constant 0.000000e+00 : f32
    %1015 = vector.broadcast %cst_348 : f32 to vector<16x64xf32>
    %1016 = arith.maximumf %1014, %1015 : vector<16x64xf32>
    %cst_349 = arith.constant 0.000000e+00 : f32
    %1017 = vector.broadcast %cst_349 : f32 to vector<16x64xf32>
    %1018 = arith.minimumf %1014, %1017 : vector<16x64xf32>
    %1019 = vector.broadcast %188 : vector<1x1xf32> to vector<16x64xf32>
    %1020 = arith.mulf %1019, %1018 : vector<16x64xf32>
    %1021 = arith.addf %1016, %1020 : vector<16x64xf32>
    %1022 = arith.truncf %1021 : vector<16x64xf32> to vector<16x64xbf16>
    %cst_350 = arith.constant dense<0.000000e+00> : vector<8x64xf32>
    %1023 = tpu.matmul %189, %1022, %cst_350 {dimension_numbers = #tpu.dot_dimension_numbers<[1], [0], [0], [1], [0, 0, 1, 1], [], []>} : vector<8x16xbf16>, vector<16x64xbf16>, vector<8x64xf32> -> vector<8x64xf32>
    %1024 = vector.broadcast %190 : vector<8x1xf32> to vector<8x64xf32>
    %1025 = arith.addf %1023, %1024 : vector<8x64xf32>
    %1026 = arith.addf %1025, %762 : vector<8x64xf32>
    %c0_351 = arith.constant 0 : index
    %c0_352 = arith.constant 0 : index
    %c128_353 = arith.constant 128 : index
    %1027 = vector.load %arg28[%c0_351, %c0_352, %c128_353] : memref<1x8x256xf32, #tpu.memory_space<vmem>>, vector<1x8x64xf32>
    %1028 = vector.shape_cast %1027 : vector<1x8x64xf32> to vector<8x64xf32>
    %1029 = vector.shape_cast %1026 : vector<8x64xf32> to vector<1x8x64xf32>
    tpu.vector_store %arg28[%c0_351, %c0_352, %c128_353], %1029 {strides = array<i32>} : memref<1x8x256xf32, #tpu.memory_space<vmem>>, vector<1x8x64xf32>,
    %1030 = vector.extract_strided_slice %4 {offsets = [0, 192], sizes = [8, 64], strides = [1, 1]} : vector<8x256xf32> to vector<8x64xf32>
    %1031 = vector.extract_strided_slice %174 {offsets = [0, 192], sizes = [8, 64], strides = [1, 1]} : vector<8x256xf32> to vector<8x64xf32>
    %1032 = arith.addf %1031, %180 : vector<8x64xf32>
    %cst_354 = arith.constant 0.000000e+00 : f32
    %1033 = vector.broadcast %cst_354 : f32 to vector<8x64xf32>
    %1034 = arith.maximumf %1032, %1033 : vector<8x64xf32>
    %cst_355 = arith.constant 0.000000e+00 : f32
    %1035 = vector.broadcast %cst_355 : f32 to vector<8x64xf32>
    %1036 = arith.minimumf %1032, %1035 : vector<8x64xf32>
    %1037 = vector.broadcast %136 : vector<1x1xf32> to vector<8x64xf32>
    %1038 = arith.mulf %1037, %1036 : vector<8x64xf32>
    %1039 = arith.addf %1034, %1038 : vector<8x64xf32>
    %1040 = arith.addf %1030, %1039 : vector<8x64xf32>
    %1041 = arith.truncf %1040 : vector<8x64xf32> to vector<8x64xbf16>
    %cst_356 = arith.constant dense<0.000000e+00> : vector<16x64xf32>
    %1042 = tpu.matmul %181, %1041, %cst_356 {dimension_numbers = #tpu.dot_dimension_numbers<[1], [0], [0], [1], [0, 0, 1, 1], [], []>} : vector<16x8xbf16>, vector<8x64xbf16>, vector<16x64xf32> -> vector<16x64xf32>
    %1043 = vector.broadcast %182 : vector<16x1xf32> to vector<16x64xf32>
    %1044 = arith.addf %1042, %1043 : vector<16x64xf32>
    %1045 = vector.shape_cast %1044 : vector<16x64xf32> to vector<1x16x64xf32>
    %cst_357 = arith.constant dense<0.000000e+00> : vector<1xf32>
    %1046 = vector.multi_reduction <add>, %1045, %cst_357 [1, 2] : vector<1x16x64xf32> to vector<1xf32>
    %1047 = vector.shape_cast %1046 : vector<1xf32> to vector<1x1x1xf32>
    %1048 = vector.extract %1047[0, 0, 0] : f32 from vector<1x1x1xf32>
    %cst_358 = arith.constant 1.024000e+03 : f32
    %1049 = arith.divf %1048, %cst_358 : f32
    %1050 = vector.broadcast %1049 : f32 to vector<16x64xf32>
    %1051 = arith.subf %1044, %1050 : vector<16x64xf32>
    %1052 = arith.mulf %1051, %1051 : vector<16x64xf32>
    %1053 = vector.shape_cast %1052 : vector<16x64xf32> to vector<1x16x64xf32>
    %cst_359 = arith.constant dense<0.000000e+00> : vector<1xf32>
    %1054 = vector.multi_reduction <add>, %1053, %cst_359 [1, 2] : vector<1x16x64xf32> to vector<1xf32>
    %1055 = vector.shape_cast %1054 : vector<1xf32> to vector<1x1x1xf32>
    %1056 = vector.extract %1055[0, 0, 0] : f32 from vector<1x1x1xf32>
    %cst_360 = arith.constant 1.024000e+03 : f32
    %1057 = arith.divf %1056, %cst_360 : f32
    %cst_361 = arith.constant 9.99999993E-9 : f32
    %1058 = arith.addf %1057, %cst_361 : f32
    %1059 = math.rsqrt %1058 : f32
    %1060 = vector.broadcast %1059 : f32 to vector<16x64xf32>
    %1061 = arith.mulf %1051, %1060 : vector<16x64xf32>
    %1062 = vector.broadcast %183 : vector<16x1xf32> to vector<16x64xf32>
    %1063 = arith.mulf %1061, %1062 : vector<16x64xf32>
    %1064 = vector.broadcast %184 : vector<16x1xf32> to vector<16x64xf32>
    %1065 = arith.addf %1063, %1064 : vector<16x64xf32>
    %cst_362 = arith.constant 0.000000e+00 : f32
    %1066 = vector.broadcast %cst_362 : f32 to vector<16x64xf32>
    %1067 = arith.maximumf %1065, %1066 : vector<16x64xf32>
    %cst_363 = arith.constant 0.000000e+00 : f32
    %1068 = vector.broadcast %cst_363 : f32 to vector<16x64xf32>
    %1069 = arith.minimumf %1065, %1068 : vector<16x64xf32>
    %1070 = vector.broadcast %185 : vector<1x1xf32> to vector<16x64xf32>
    %1071 = arith.mulf %1070, %1069 : vector<16x64xf32>
    %1072 = arith.addf %1067, %1071 : vector<16x64xf32>
    %c0_364 = arith.constant 0 : index
    %c128_365 = arith.constant 128 : index
    %1073 = vector.load %arg29[%c0_364, %c128_365] : memref<16x320xf32, #tpu.memory_space<vmem>>, vector<16x64xf32>
    tpu.vector_store %arg29[%c0_364, %c128_365], %1072 {strides = array<i32>} : memref<16x320xf32, #tpu.memory_space<vmem>>, vector<16x64xf32>,
    %cst_366 = arith.constant 0.000000e+00 : f32
    %1074 = vector.broadcast %cst_366 : f32 to vector<16x64xf32>
    %1075 = vector.extract_strided_slice %191 {offsets = [0, 0], sizes = [16, 1], strides = [1, 1]} : vector<16x15xf32> to vector<16x1xf32>
    %c0_367 = arith.constant 0 : index
    %c126_368 = arith.constant 126 : index
    %1076 = vector.load %arg29[%c0_367, %c126_368] : memref<16x320xf32, #tpu.memory_space<vmem>>, vector<16x64xf32>
    %1077 = vector.broadcast %1075 : vector<16x1xf32> to vector<16x64xf32>
    %1078 = arith.mulf %1077, %1076 : vector<16x64xf32>
    %1079 = arith.addf %1074, %1078 : vector<16x64xf32>
    %1080 = vector.extract_strided_slice %191 {offsets = [0, 1], sizes = [16, 1], strides = [1, 1]} : vector<16x15xf32> to vector<16x1xf32>
    %c0_369 = arith.constant 0 : index
    %c127_370 = arith.constant 127 : index
    %1081 = vector.load %arg29[%c0_369, %c127_370] : memref<16x320xf32, #tpu.memory_space<vmem>>, vector<16x64xf32>
    %1082 = vector.broadcast %1080 : vector<16x1xf32> to vector<16x64xf32>
    %1083 = arith.mulf %1082, %1081 : vector<16x64xf32>
    %1084 = arith.addf %1079, %1083 : vector<16x64xf32>
    %1085 = vector.extract_strided_slice %191 {offsets = [0, 2], sizes = [16, 1], strides = [1, 1]} : vector<16x15xf32> to vector<16x1xf32>
    %c0_371 = arith.constant 0 : index
    %c128_372 = arith.constant 128 : index
    %1086 = vector.load %arg29[%c0_371, %c128_372] : memref<16x320xf32, #tpu.memory_space<vmem>>, vector<16x64xf32>
    %1087 = vector.broadcast %1085 : vector<16x1xf32> to vector<16x64xf32>
    %1088 = arith.mulf %1087, %1086 : vector<16x64xf32>
    %1089 = arith.addf %1084, %1088 : vector<16x64xf32>
    %1090 = vector.extract_strided_slice %191 {offsets = [0, 3], sizes = [16, 1], strides = [1, 1]} : vector<16x15xf32> to vector<16x1xf32>
    %c0_373 = arith.constant 0 : index
    %c129_374 = arith.constant 129 : index
    %1091 = vector.load %arg29[%c0_373, %c129_374] : memref<16x320xf32, #tpu.memory_space<vmem>>, vector<16x64xf32>
    %1092 = vector.broadcast %1090 : vector<16x1xf32> to vector<16x64xf32>
    %1093 = arith.mulf %1092, %1091 : vector<16x64xf32>
    %1094 = arith.addf %1089, %1093 : vector<16x64xf32>
    %1095 = vector.extract_strided_slice %191 {offsets = [0, 4], sizes = [16, 1], strides = [1, 1]} : vector<16x15xf32> to vector<16x1xf32>
    %c0_375 = arith.constant 0 : index
    %c130_376 = arith.constant 130 : index
    %1096 = vector.load %arg29[%c0_375, %c130_376] : memref<16x320xf32, #tpu.memory_space<vmem>>, vector<16x64xf32>
    %1097 = vector.broadcast %1095 : vector<16x1xf32> to vector<16x64xf32>
    %1098 = arith.mulf %1097, %1096 : vector<16x64xf32>
    %1099 = arith.addf %1094, %1098 : vector<16x64xf32>
    %1100 = vector.extract_strided_slice %192 {offsets = [0, 0], sizes = [16, 1], strides = [1, 1]} : vector<16x3xf32> to vector<16x1xf32>
    %1101 = vector.broadcast %1100 : vector<16x1xf32> to vector<16x64xf32>
    %1102 = arith.addf %1099, %1101 : vector<16x64xf32>
    %1103 = vector.shape_cast %1102 : vector<16x64xf32> to vector<1x16x64xf32>
    %cst_377 = arith.constant dense<0.000000e+00> : vector<1xf32>
    %1104 = vector.multi_reduction <add>, %1103, %cst_377 [1, 2] : vector<1x16x64xf32> to vector<1xf32>
    %1105 = vector.shape_cast %1104 : vector<1xf32> to vector<1x1x1xf32>
    %1106 = vector.extract %1105[0, 0, 0] : f32 from vector<1x1x1xf32>
    %cst_378 = arith.constant 1.024000e+03 : f32
    %1107 = arith.divf %1106, %cst_378 : f32
    %1108 = vector.broadcast %1107 : f32 to vector<16x64xf32>
    %1109 = arith.subf %1102, %1108 : vector<16x64xf32>
    %1110 = arith.mulf %1109, %1109 : vector<16x64xf32>
    %1111 = vector.shape_cast %1110 : vector<16x64xf32> to vector<1x16x64xf32>
    %cst_379 = arith.constant dense<0.000000e+00> : vector<1xf32>
    %1112 = vector.multi_reduction <add>, %1111, %cst_379 [1, 2] : vector<1x16x64xf32> to vector<1xf32>
    %1113 = vector.shape_cast %1112 : vector<1xf32> to vector<1x1x1xf32>
    %1114 = vector.extract %1113[0, 0, 0] : f32 from vector<1x1x1xf32>
    %cst_380 = arith.constant 1.024000e+03 : f32
    %1115 = arith.divf %1114, %cst_380 : f32
    %cst_381 = arith.constant 9.99999993E-9 : f32
    %1116 = arith.addf %1115, %cst_381 : f32
    %1117 = math.rsqrt %1116 : f32
    %1118 = vector.broadcast %1117 : f32 to vector<16x64xf32>
    %1119 = arith.mulf %1109, %1118 : vector<16x64xf32>
    %1120 = vector.extract_strided_slice %193 {offsets = [0, 0], sizes = [16, 1], strides = [1, 1]} : vector<16x3xf32> to vector<16x1xf32>
    %1121 = vector.broadcast %1120 : vector<16x1xf32> to vector<16x64xf32>
    %1122 = arith.mulf %1119, %1121 : vector<16x64xf32>
    %1123 = vector.extract_strided_slice %194 {offsets = [0, 0], sizes = [16, 1], strides = [1, 1]} : vector<16x3xf32> to vector<16x1xf32>
    %1124 = vector.broadcast %1123 : vector<16x1xf32> to vector<16x64xf32>
    %1125 = arith.addf %1122, %1124 : vector<16x64xf32>
    %c0_382 = arith.constant 0 : index
    %c128_383 = arith.constant 128 : index
    %1126 = vector.load %arg29[%c0_382, %c128_383] : memref<16x320xf32, #tpu.memory_space<vmem>>, vector<16x64xf32>
    tpu.vector_store %arg29[%c0_382, %c128_383], %1125 {strides = array<i32>} : memref<16x320xf32, #tpu.memory_space<vmem>>, vector<16x64xf32>,
    %cst_384 = arith.constant 0.000000e+00 : f32
    %1127 = vector.broadcast %cst_384 : f32 to vector<16x64xf32>
    %1128 = vector.extract_strided_slice %191 {offsets = [0, 5], sizes = [16, 1], strides = [1, 1]} : vector<16x15xf32> to vector<16x1xf32>
    %c0_385 = arith.constant 0 : index
    %c126_386 = arith.constant 126 : index
    %1129 = vector.load %arg29[%c0_385, %c126_386] : memref<16x320xf32, #tpu.memory_space<vmem>>, vector<16x64xf32>
    %1130 = vector.broadcast %1128 : vector<16x1xf32> to vector<16x64xf32>
    %1131 = arith.mulf %1130, %1129 : vector<16x64xf32>
    %1132 = arith.addf %1127, %1131 : vector<16x64xf32>
    %1133 = vector.extract_strided_slice %191 {offsets = [0, 6], sizes = [16, 1], strides = [1, 1]} : vector<16x15xf32> to vector<16x1xf32>
    %c0_387 = arith.constant 0 : index
    %c127_388 = arith.constant 127 : index
    %1134 = vector.load %arg29[%c0_387, %c127_388] : memref<16x320xf32, #tpu.memory_space<vmem>>, vector<16x64xf32>
    %1135 = vector.broadcast %1133 : vector<16x1xf32> to vector<16x64xf32>
    %1136 = arith.mulf %1135, %1134 : vector<16x64xf32>
    %1137 = arith.addf %1132, %1136 : vector<16x64xf32>
    %1138 = vector.extract_strided_slice %191 {offsets = [0, 7], sizes = [16, 1], strides = [1, 1]} : vector<16x15xf32> to vector<16x1xf32>
    %c0_389 = arith.constant 0 : index
    %c128_390 = arith.constant 128 : index
    %1139 = vector.load %arg29[%c0_389, %c128_390] : memref<16x320xf32, #tpu.memory_space<vmem>>, vector<16x64xf32>
    %1140 = vector.broadcast %1138 : vector<16x1xf32> to vector<16x64xf32>
    %1141 = arith.mulf %1140, %1139 : vector<16x64xf32>
    %1142 = arith.addf %1137, %1141 : vector<16x64xf32>
    %1143 = vector.extract_strided_slice %191 {offsets = [0, 8], sizes = [16, 1], strides = [1, 1]} : vector<16x15xf32> to vector<16x1xf32>
    %c0_391 = arith.constant 0 : index
    %c129_392 = arith.constant 129 : index
    %1144 = vector.load %arg29[%c0_391, %c129_392] : memref<16x320xf32, #tpu.memory_space<vmem>>, vector<16x64xf32>
    %1145 = vector.broadcast %1143 : vector<16x1xf32> to vector<16x64xf32>
    %1146 = arith.mulf %1145, %1144 : vector<16x64xf32>
    %1147 = arith.addf %1142, %1146 : vector<16x64xf32>
    %1148 = vector.extract_strided_slice %191 {offsets = [0, 9], sizes = [16, 1], strides = [1, 1]} : vector<16x15xf32> to vector<16x1xf32>
    %c0_393 = arith.constant 0 : index
    %c130_394 = arith.constant 130 : index
    %1149 = vector.load %arg29[%c0_393, %c130_394] : memref<16x320xf32, #tpu.memory_space<vmem>>, vector<16x64xf32>
    %1150 = vector.broadcast %1148 : vector<16x1xf32> to vector<16x64xf32>
    %1151 = arith.mulf %1150, %1149 : vector<16x64xf32>
    %1152 = arith.addf %1147, %1151 : vector<16x64xf32>
    %1153 = vector.extract_strided_slice %192 {offsets = [0, 1], sizes = [16, 1], strides = [1, 1]} : vector<16x3xf32> to vector<16x1xf32>
    %1154 = vector.broadcast %1153 : vector<16x1xf32> to vector<16x64xf32>
    %1155 = arith.addf %1152, %1154 : vector<16x64xf32>
    %c1_i32_395 = arith.constant 1 : i32
    %1156 = vector.broadcast %c1_i32_395 : i32 to vector<1x64xi32>
    %1157 = arith.andi %195, %1156 : vector<1x64xi32>
    %c0_i32_396 = arith.constant 0 : i32
    %1158 = vector.broadcast %c0_i32_396 : i32 to vector<1x64xi32>
    %1159 = arith.cmpi eq, %1157, %1158 : vector<1x64xi32>
    %1160 = arith.extui %1159 : vector<1x64xi1> to vector<1x64xi32>
    %1161 = arith.sitofp %1160 : vector<1x64xi32> to vector<1x64xf32>
    %1162 = vector.broadcast %1161 : vector<1x64xf32> to vector<16x64xf32>
    %1163 = arith.mulf %1155, %1162 : vector<16x64xf32>
    %1164 = vector.shape_cast %1163 : vector<16x64xf32> to vector<1x16x64xf32>
    %cst_397 = arith.constant dense<0.000000e+00> : vector<1xf32>
    %1165 = vector.multi_reduction <add>, %1164, %cst_397 [1, 2] : vector<1x16x64xf32> to vector<1xf32>
    %1166 = vector.shape_cast %1165 : vector<1xf32> to vector<1x1x1xf32>
    %1167 = vector.extract %1166[0, 0, 0] : f32 from vector<1x1x1xf32>
    %cst_398 = arith.constant 5.120000e+02 : f32
    %1168 = arith.divf %1167, %cst_398 : f32
    %1169 = vector.broadcast %1168 : f32 to vector<16x64xf32>
    %1170 = arith.subf %1155, %1169 : vector<16x64xf32>
    %1171 = arith.mulf %1170, %1170 : vector<16x64xf32>
    %1172 = vector.broadcast %1161 : vector<1x64xf32> to vector<16x64xf32>
    %1173 = arith.mulf %1171, %1172 : vector<16x64xf32>
    %1174 = vector.shape_cast %1173 : vector<16x64xf32> to vector<1x16x64xf32>
    %cst_399 = arith.constant dense<0.000000e+00> : vector<1xf32>
    %1175 = vector.multi_reduction <add>, %1174, %cst_399 [1, 2] : vector<1x16x64xf32> to vector<1xf32>
    %1176 = vector.shape_cast %1175 : vector<1xf32> to vector<1x1x1xf32>
    %1177 = vector.extract %1176[0, 0, 0] : f32 from vector<1x1x1xf32>
    %cst_400 = arith.constant 5.120000e+02 : f32
    %1178 = arith.divf %1177, %cst_400 : f32
    %cst_401 = arith.constant 9.99999993E-9 : f32
    %1179 = arith.addf %1178, %cst_401 : f32
    %1180 = math.rsqrt %1179 : f32
    %1181 = vector.broadcast %1180 : f32 to vector<16x64xf32>
    %1182 = arith.mulf %1170, %1181 : vector<16x64xf32>
    %1183 = vector.extract_strided_slice %193 {offsets = [0, 1], sizes = [16, 1], strides = [1, 1]} : vector<16x3xf32> to vector<16x1xf32>
    %1184 = vector.broadcast %1183 : vector<16x1xf32> to vector<16x64xf32>
    %1185 = arith.mulf %1182, %1184 : vector<16x64xf32>
    %1186 = vector.extract_strided_slice %194 {offsets = [0, 1], sizes = [16, 1], strides = [1, 1]} : vector<16x3xf32> to vector<16x1xf32>
    %1187 = vector.broadcast %1186 : vector<16x1xf32> to vector<16x64xf32>
    %1188 = arith.addf %1185, %1187 : vector<16x64xf32>
    %c0_402 = arith.constant 0 : index
    %c128_403 = arith.constant 128 : index
    %1189 = vector.load %arg29[%c0_402, %c128_403] : memref<16x320xf32, #tpu.memory_space<vmem>>, vector<16x64xf32>
    tpu.vector_store %arg29[%c0_402, %c128_403], %1188 {strides = array<i32>} : memref<16x320xf32, #tpu.memory_space<vmem>>, vector<16x64xf32>,
    %cst_404 = arith.constant 0.000000e+00 : f32
    %1190 = vector.broadcast %cst_404 : f32 to vector<16x64xf32>
    %1191 = vector.extract_strided_slice %191 {offsets = [0, 10], sizes = [16, 1], strides = [1, 1]} : vector<16x15xf32> to vector<16x1xf32>
    %c0_405 = arith.constant 0 : index
    %c124_406 = arith.constant 124 : index
    %1192 = vector.load %arg29[%c0_405, %c124_406] : memref<16x320xf32, #tpu.memory_space<vmem>>, vector<16x64xf32>
    %1193 = vector.broadcast %1191 : vector<16x1xf32> to vector<16x64xf32>
    %1194 = arith.mulf %1193, %1192 : vector<16x64xf32>
    %1195 = arith.addf %1190, %1194 : vector<16x64xf32>
    %1196 = vector.extract_strided_slice %191 {offsets = [0, 11], sizes = [16, 1], strides = [1, 1]} : vector<16x15xf32> to vector<16x1xf32>
    %c0_407 = arith.constant 0 : index
    %c126_408 = arith.constant 126 : index
    %1197 = vector.load %arg29[%c0_407, %c126_408] : memref<16x320xf32, #tpu.memory_space<vmem>>, vector<16x64xf32>
    %1198 = vector.broadcast %1196 : vector<16x1xf32> to vector<16x64xf32>
    %1199 = arith.mulf %1198, %1197 : vector<16x64xf32>
    %1200 = arith.addf %1195, %1199 : vector<16x64xf32>
    %1201 = vector.extract_strided_slice %191 {offsets = [0, 12], sizes = [16, 1], strides = [1, 1]} : vector<16x15xf32> to vector<16x1xf32>
    %c0_409 = arith.constant 0 : index
    %c128_410 = arith.constant 128 : index
    %1202 = vector.load %arg29[%c0_409, %c128_410] : memref<16x320xf32, #tpu.memory_space<vmem>>, vector<16x64xf32>
    %1203 = vector.broadcast %1201 : vector<16x1xf32> to vector<16x64xf32>
    %1204 = arith.mulf %1203, %1202 : vector<16x64xf32>
    %1205 = arith.addf %1200, %1204 : vector<16x64xf32>
    %1206 = vector.extract_strided_slice %191 {offsets = [0, 13], sizes = [16, 1], strides = [1, 1]} : vector<16x15xf32> to vector<16x1xf32>
    %c0_411 = arith.constant 0 : index
    %c130_412 = arith.constant 130 : index
    %1207 = vector.load %arg29[%c0_411, %c130_412] : memref<16x320xf32, #tpu.memory_space<vmem>>, vector<16x64xf32>
    %1208 = vector.broadcast %1206 : vector<16x1xf32> to vector<16x64xf32>
    %1209 = arith.mulf %1208, %1207 : vector<16x64xf32>
    %1210 = arith.addf %1205, %1209 : vector<16x64xf32>
    %1211 = vector.extract_strided_slice %191 {offsets = [0, 14], sizes = [16, 1], strides = [1, 1]} : vector<16x15xf32> to vector<16x1xf32>
    %c0_413 = arith.constant 0 : index
    %c132_414 = arith.constant 132 : index
    %1212 = vector.load %arg29[%c0_413, %c132_414] : memref<16x320xf32, #tpu.memory_space<vmem>>, vector<16x64xf32>
    %1213 = vector.broadcast %1211 : vector<16x1xf32> to vector<16x64xf32>
    %1214 = arith.mulf %1213, %1212 : vector<16x64xf32>
    %1215 = arith.addf %1210, %1214 : vector<16x64xf32>
    %1216 = vector.extract_strided_slice %192 {offsets = [0, 2], sizes = [16, 1], strides = [1, 1]} : vector<16x3xf32> to vector<16x1xf32>
    %1217 = vector.broadcast %1216 : vector<16x1xf32> to vector<16x64xf32>
    %1218 = arith.addf %1215, %1217 : vector<16x64xf32>
    %c3_i32_415 = arith.constant 3 : i32
    %1219 = vector.broadcast %c3_i32_415 : i32 to vector<1x64xi32>
    %1220 = arith.andi %195, %1219 : vector<1x64xi32>
    %c0_i32_416 = arith.constant 0 : i32
    %1221 = vector.broadcast %c0_i32_416 : i32 to vector<1x64xi32>
    %1222 = arith.cmpi eq, %1220, %1221 : vector<1x64xi32>
    %1223 = arith.extui %1222 : vector<1x64xi1> to vector<1x64xi32>
    %1224 = arith.sitofp %1223 : vector<1x64xi32> to vector<1x64xf32>
    %1225 = vector.broadcast %1224 : vector<1x64xf32> to vector<16x64xf32>
    %1226 = arith.mulf %1218, %1225 : vector<16x64xf32>
    %1227 = vector.shape_cast %1226 : vector<16x64xf32> to vector<1x16x64xf32>
    %cst_417 = arith.constant dense<0.000000e+00> : vector<1xf32>
    %1228 = vector.multi_reduction <add>, %1227, %cst_417 [1, 2] : vector<1x16x64xf32> to vector<1xf32>
    %1229 = vector.shape_cast %1228 : vector<1xf32> to vector<1x1x1xf32>
    %1230 = vector.extract %1229[0, 0, 0] : f32 from vector<1x1x1xf32>
    %cst_418 = arith.constant 2.560000e+02 : f32
    %1231 = arith.divf %1230, %cst_418 : f32
    %1232 = vector.broadcast %1231 : f32 to vector<16x64xf32>
    %1233 = arith.subf %1218, %1232 : vector<16x64xf32>
    %1234 = arith.mulf %1233, %1233 : vector<16x64xf32>
    %1235 = vector.broadcast %1224 : vector<1x64xf32> to vector<16x64xf32>
    %1236 = arith.mulf %1234, %1235 : vector<16x64xf32>
    %1237 = vector.shape_cast %1236 : vector<16x64xf32> to vector<1x16x64xf32>
    %cst_419 = arith.constant dense<0.000000e+00> : vector<1xf32>
    %1238 = vector.multi_reduction <add>, %1237, %cst_419 [1, 2] : vector<1x16x64xf32> to vector<1xf32>
    %1239 = vector.shape_cast %1238 : vector<1xf32> to vector<1x1x1xf32>
    %1240 = vector.extract %1239[0, 0, 0] : f32 from vector<1x1x1xf32>
    %cst_420 = arith.constant 2.560000e+02 : f32
    %1241 = arith.divf %1240, %cst_420 : f32
    %cst_421 = arith.constant 9.99999993E-9 : f32
    %1242 = arith.addf %1241, %cst_421 : f32
    %1243 = math.rsqrt %1242 : f32
    %1244 = vector.broadcast %1243 : f32 to vector<16x64xf32>
    %1245 = arith.mulf %1233, %1244 : vector<16x64xf32>
    %1246 = vector.extract_strided_slice %193 {offsets = [0, 2], sizes = [16, 1], strides = [1, 1]} : vector<16x3xf32> to vector<16x1xf32>
    %1247 = vector.broadcast %1246 : vector<16x1xf32> to vector<16x64xf32>
    %1248 = arith.mulf %1245, %1247 : vector<16x64xf32>
    %1249 = vector.extract_strided_slice %194 {offsets = [0, 2], sizes = [16, 1], strides = [1, 1]} : vector<16x3xf32> to vector<16x1xf32>
    %1250 = vector.broadcast %1249 : vector<16x1xf32> to vector<16x64xf32>
    %1251 = arith.addf %1248, %1250 : vector<16x64xf32>
    %c0_422 = arith.constant 0 : index
    %c128_423 = arith.constant 128 : index
    %1252 = vector.load %arg29[%c0_422, %c128_423] : memref<16x320xf32, #tpu.memory_space<vmem>>, vector<16x64xf32>
    tpu.vector_store %arg29[%c0_422, %c128_423], %1251 {strides = array<i32>} : memref<16x320xf32, #tpu.memory_space<vmem>>, vector<16x64xf32>,
    %c0_424 = arith.constant 0 : index
    %c126_425 = arith.constant 126 : index
    %1253 = vector.load %arg29[%c0_424, %c126_425] : memref<16x320xf32, #tpu.memory_space<vmem>>, vector<16x64xf32>
    %c3_i32_426 = arith.constant 3 : i32
    %1254 = vector.broadcast %c3_i32_426 : i32 to vector<1x64xi32>
    %1255 = arith.andi %195, %1254 : vector<1x64xi32>
    %c0_i32_427 = arith.constant 0 : i32
    %1256 = vector.broadcast %c0_i32_427 : i32 to vector<1x64xi32>
    %1257 = arith.cmpi eq, %1255, %1256 : vector<1x64xi32>
    %1258 = vector.shape_cast %1257 : vector<1x64xi1> to vector<1x64xi1>
    %1259 = vector.broadcast %1258 : vector<1x64xi1> to vector<16x64xi1>
    %1260 = arith.select %1259, %1251, %1253 : vector<16x64xi1>, vector<16x64xf32>
    %1261 = arith.addf %1188, %1260 : vector<16x64xf32>
    %c0_428 = arith.constant 0 : index
    %c128_429 = arith.constant 128 : index
    %1262 = vector.load %arg29[%c0_428, %c128_429] : memref<16x320xf32, #tpu.memory_space<vmem>>, vector<16x64xf32>
    tpu.vector_store %arg29[%c0_428, %c128_429], %1261 {strides = array<i32>} : memref<16x320xf32, #tpu.memory_space<vmem>>, vector<16x64xf32>,
    %c0_430 = arith.constant 0 : index
    %c127_431 = arith.constant 127 : index
    %1263 = vector.load %arg29[%c0_430, %c127_431] : memref<16x320xf32, #tpu.memory_space<vmem>>, vector<16x64xf32>
    %c1_i32_432 = arith.constant 1 : i32
    %1264 = vector.broadcast %c1_i32_432 : i32 to vector<1x64xi32>
    %1265 = arith.andi %195, %1264 : vector<1x64xi32>
    %c0_i32_433 = arith.constant 0 : i32
    %1266 = vector.broadcast %c0_i32_433 : i32 to vector<1x64xi32>
    %1267 = arith.cmpi eq, %1265, %1266 : vector<1x64xi32>
    %1268 = vector.shape_cast %1267 : vector<1x64xi1> to vector<1x64xi1>
    %1269 = vector.broadcast %1268 : vector<1x64xi1> to vector<16x64xi1>
    %1270 = arith.select %1269, %1261, %1263 : vector<16x64xi1>, vector<16x64xf32>
    %1271 = arith.addf %1125, %1270 : vector<16x64xf32>
    %1272 = vector.shape_cast %1271 : vector<16x64xf32> to vector<1x16x64xf32>
    %cst_434 = arith.constant dense<0.000000e+00> : vector<1xf32>
    %1273 = vector.multi_reduction <add>, %1272, %cst_434 [1, 2] : vector<1x16x64xf32> to vector<1xf32>
    %1274 = vector.shape_cast %1273 : vector<1xf32> to vector<1x1x1xf32>
    %1275 = vector.extract %1274[0, 0, 0] : f32 from vector<1x1x1xf32>
    %cst_435 = arith.constant 1.024000e+03 : f32
    %1276 = arith.divf %1275, %cst_435 : f32
    %1277 = vector.broadcast %1276 : f32 to vector<16x64xf32>
    %1278 = arith.subf %1271, %1277 : vector<16x64xf32>
    %1279 = arith.mulf %1278, %1278 : vector<16x64xf32>
    %1280 = vector.shape_cast %1279 : vector<16x64xf32> to vector<1x16x64xf32>
    %cst_436 = arith.constant dense<0.000000e+00> : vector<1xf32>
    %1281 = vector.multi_reduction <add>, %1280, %cst_436 [1, 2] : vector<1x16x64xf32> to vector<1xf32>
    %1282 = vector.shape_cast %1281 : vector<1xf32> to vector<1x1x1xf32>
    %1283 = vector.extract %1282[0, 0, 0] : f32 from vector<1x1x1xf32>
    %cst_437 = arith.constant 1.024000e+03 : f32
    %1284 = arith.divf %1283, %cst_437 : f32
    %cst_438 = arith.constant 9.99999993E-9 : f32
    %1285 = arith.addf %1284, %cst_438 : f32
    %1286 = math.rsqrt %1285 : f32
    %1287 = vector.broadcast %1286 : f32 to vector<16x64xf32>
    %1288 = arith.mulf %1278, %1287 : vector<16x64xf32>
    %1289 = vector.broadcast %186 : vector<16x1xf32> to vector<16x64xf32>
    %1290 = arith.mulf %1288, %1289 : vector<16x64xf32>
    %1291 = vector.broadcast %187 : vector<16x1xf32> to vector<16x64xf32>
    %1292 = arith.addf %1290, %1291 : vector<16x64xf32>
    %cst_439 = arith.constant 0.000000e+00 : f32
    %1293 = vector.broadcast %cst_439 : f32 to vector<16x64xf32>
    %1294 = arith.maximumf %1292, %1293 : vector<16x64xf32>
    %cst_440 = arith.constant 0.000000e+00 : f32
    %1295 = vector.broadcast %cst_440 : f32 to vector<16x64xf32>
    %1296 = arith.minimumf %1292, %1295 : vector<16x64xf32>
    %1297 = vector.broadcast %188 : vector<1x1xf32> to vector<16x64xf32>
    %1298 = arith.mulf %1297, %1296 : vector<16x64xf32>
    %1299 = arith.addf %1294, %1298 : vector<16x64xf32>
    %1300 = arith.truncf %1299 : vector<16x64xf32> to vector<16x64xbf16>
    %cst_441 = arith.constant dense<0.000000e+00> : vector<8x64xf32>
    %1301 = tpu.matmul %189, %1300, %cst_441 {dimension_numbers = #tpu.dot_dimension_numbers<[1], [0], [0], [1], [0, 0, 1, 1], [], []>} : vector<8x16xbf16>, vector<16x64xbf16>, vector<8x64xf32> -> vector<8x64xf32>
    %1302 = vector.broadcast %190 : vector<8x1xf32> to vector<8x64xf32>
    %1303 = arith.addf %1301, %1302 : vector<8x64xf32>
    %1304 = arith.addf %1303, %1040 : vector<8x64xf32>
    %c0_442 = arith.constant 0 : index
    %c0_443 = arith.constant 0 : index
    %c192_444 = arith.constant 192 : index
    %1305 = vector.load %arg28[%c0_442, %c0_443, %c192_444] : memref<1x8x256xf32, #tpu.memory_space<vmem>>, vector<1x8x64xf32>
    %1306 = vector.shape_cast %1305 : vector<1x8x64xf32> to vector<8x64xf32>
    %1307 = vector.shape_cast %1304 : vector<8x64xf32> to vector<1x8x64xf32>
    tpu.vector_store %arg28[%c0_442, %c0_443, %c192_444], %1307 {strides = array<i32>} : memref<1x8x256xf32, #tpu.memory_space<vmem>>, vector<1x8x64xf32>,
    return
  }
  func.func @transform_0(%arg0: i32) -> (i32, i32, i32) {
    %c0_i32 = arith.constant 0 : i32
    %c0_i32_0 = arith.constant 0 : i32
    %c0_i32_1 = arith.constant 0 : i32
    return %arg0, %c0_i32, %c0_i32_0 : i32, i32, i32
  }
  func.func @transform_1(%arg0: i32) -> (i32, i32) {
    %c0_i32 = arith.constant 0 : i32
    %c0_i32_0 = arith.constant 0 : i32
    %c0_i32_1 = arith.constant 0 : i32
    return %c0_i32, %c0_i32_0 : i32, i32
  }
  func.func @transform_2(%arg0: i32) -> (i32, i32) {
    %c0_i32 = arith.constant 0 : i32
    %c0_i32_0 = arith.constant 0 : i32
    %c0_i32_1 = arith.constant 0 : i32
    return %c0_i32, %c0_i32_0 : i32, i32
  }
  func.func @transform_3(%arg0: i32) -> (i32, i32) {
    %c0_i32 = arith.constant 0 : i32
    %c0_i32_0 = arith.constant 0 : i32
    %c0_i32_1 = arith.constant 0 : i32
    return %c0_i32, %c0_i32_0 : i32, i32
  }
  func.func @transform_4(%arg0: i32) -> (i32, i32) {
    %c0_i32 = arith.constant 0 : i32
    %c0_i32_0 = arith.constant 0 : i32
    %c0_i32_1 = arith.constant 0 : i32
    return %c0_i32, %c0_i32_0 : i32, i32
  }
  func.func @transform_5(%arg0: i32) -> (i32, i32) {
    %c0_i32 = arith.constant 0 : i32
    %c0_i32_0 = arith.constant 0 : i32
    %c0_i32_1 = arith.constant 0 : i32
    return %c0_i32, %c0_i32_0 : i32, i32
  }
  func.func @transform_6(%arg0: i32) -> (i32, i32) {
    %c0_i32 = arith.constant 0 : i32
    %c0_i32_0 = arith.constant 0 : i32
    %c0_i32_1 = arith.constant 0 : i32
    return %c0_i32, %c0_i32_0 : i32, i32
  }
  func.func @transform_7(%arg0: i32) -> (i32, i32) {
    %c0_i32 = arith.constant 0 : i32
    %c0_i32_0 = arith.constant 0 : i32
    %c0_i32_1 = arith.constant 0 : i32
    return %c0_i32, %c0_i32_0 : i32, i32
  }
  func.func @transform_8(%arg0: i32) -> (i32, i32) {
    %c0_i32 = arith.constant 0 : i32
    %c0_i32_0 = arith.constant 0 : i32
    %c0_i32_1 = arith.constant 0 : i32
    return %c0_i32, %c0_i32_0 : i32, i32
  }
  func.func @transform_9(%arg0: i32) -> (i32, i32) {
    %c0_i32 = arith.constant 0 : i32
    %c0_i32_0 = arith.constant 0 : i32
    %c0_i32_1 = arith.constant 0 : i32
    return %c0_i32, %c0_i32_0 : i32, i32
  }
  func.func @transform_10(%arg0: i32) -> (i32, i32) {
    %c0_i32 = arith.constant 0 : i32
    %c0_i32_0 = arith.constant 0 : i32
    %c0_i32_1 = arith.constant 0 : i32
    return %c0_i32, %c0_i32_0 : i32, i32
  }
  func.func @transform_11(%arg0: i32) -> (i32, i32) {
    %c0_i32 = arith.constant 0 : i32
    %c0_i32_0 = arith.constant 0 : i32
    %c0_i32_1 = arith.constant 0 : i32
    return %c0_i32, %c0_i32_0 : i32, i32
  }
  func.func @transform_12(%arg0: i32) -> (i32, i32) {
    %c0_i32 = arith.constant 0 : i32
    %c0_i32_0 = arith.constant 0 : i32
    %c0_i32_1 = arith.constant 0 : i32
    return %c0_i32, %c0_i32_0 : i32, i32
  }
  func.func @transform_13(%arg0: i32) -> (i32, i32) {
    %c0_i32 = arith.constant 0 : i32
    %c0_i32_0 = arith.constant 0 : i32
    %c0_i32_1 = arith.constant 0 : i32
    return %c0_i32, %c0_i32_0 : i32, i32
  }
  func.func @transform_14(%arg0: i32) -> (i32, i32) {
    %c0_i32 = arith.constant 0 : i32
    %c0_i32_0 = arith.constant 0 : i32
    %c0_i32_1 = arith.constant 0 : i32
    return %c0_i32, %c0_i32_0 : i32, i32
  }
  func.func @transform_15(%arg0: i32) -> (i32, i32) {
    %c0_i32 = arith.constant 0 : i32
    %c0_i32_0 = arith.constant 0 : i32
    %c0_i32_1 = arith.constant 0 : i32
    return %c0_i32, %c0_i32_0 : i32, i32
  }
  func.func @transform_16(%arg0: i32) -> (i32, i32) {
    %c0_i32 = arith.constant 0 : i32
    %c0_i32_0 = arith.constant 0 : i32
    %c0_i32_1 = arith.constant 0 : i32
    return %c0_i32, %c0_i32_0 : i32, i32
  }
  func.func @transform_17(%arg0: i32) -> (i32, i32) {
    %c0_i32 = arith.constant 0 : i32
    %c0_i32_0 = arith.constant 0 : i32
    %c0_i32_1 = arith.constant 0 : i32
    return %c0_i32, %c0_i32_0 : i32, i32
  }
  func.func @transform_18(%arg0: i32) -> (i32, i32) {
    %c0_i32 = arith.constant 0 : i32
    %c0_i32_0 = arith.constant 0 : i32
    %c0_i32_1 = arith.constant 0 : i32
    return %c0_i32, %c0_i32_0 : i32, i32
  }
  func.func @transform_19(%arg0: i32) -> (i32, i32) {
    %c0_i32 = arith.constant 0 : i32
    %c0_i32_0 = arith.constant 0 : i32
    %c0_i32_1 = arith.constant 0 : i32
    return %c0_i32, %c0_i32_0 : i32, i32
  }
  func.func @transform_20(%arg0: i32) -> (i32, i32) {
    %c0_i32 = arith.constant 0 : i32
    %c0_i32_0 = arith.constant 0 : i32
    %c0_i32_1 = arith.constant 0 : i32
    return %c0_i32, %c0_i32_0 : i32, i32
  }
  func.func @transform_21(%arg0: i32) -> (i32, i32) {
    %c0_i32 = arith.constant 0 : i32
    %c0_i32_0 = arith.constant 0 : i32
    %c0_i32_1 = arith.constant 0 : i32
    return %c0_i32, %c0_i32_0 : i32, i32
  }
  func.func @transform_22(%arg0: i32) -> (i32, i32) {
    %c0_i32 = arith.constant 0 : i32
    %c0_i32_0 = arith.constant 0 : i32
    %c0_i32_1 = arith.constant 0 : i32
    return %c0_i32, %c0_i32_0 : i32, i32
  }
  func.func @transform_23(%arg0: i32) -> (i32, i32) {
    %c0_i32 = arith.constant 0 : i32
    %c0_i32_0 = arith.constant 0 : i32
    %c0_i32_1 = arith.constant 0 : i32
    return %c0_i32, %c0_i32_0 : i32, i32
  }
  func.func @transform_24(%arg0: i32) -> (i32, i32) {
    %c0_i32 = arith.constant 0 : i32
    %c0_i32_0 = arith.constant 0 : i32
    %c0_i32_1 = arith.constant 0 : i32
    return %c0_i32, %c0_i32_0 : i32, i32
  }
  func.func @transform_25(%arg0: i32) -> (i32, i32) {
    %c0_i32 = arith.constant 0 : i32
    %c0_i32_0 = arith.constant 0 : i32
    %c0_i32_1 = arith.constant 0 : i32
    return %c0_i32, %c0_i32_0 : i32, i32
  }
  func.func @transform_26(%arg0: i32) -> (i32, i32) {
    %c0_i32 = arith.constant 0 : i32
    %c0_i32_0 = arith.constant 0 : i32
    %c0_i32_1 = arith.constant 0 : i32
    return %c0_i32, %c0_i32_0 : i32, i32
  }
  func.func @transform_27(%arg0: i32) -> (i32, i32, i32) {
    %c0_i32 = arith.constant 0 : i32
    %c0_i32_0 = arith.constant 0 : i32
    %c0_i32_1 = arith.constant 0 : i32
    return %arg0, %c0_i32, %c0_i32_0 : i32, i32, i32
  }
}

</mosaic_0001>

<bundles_post_ra>
// kernel: tpu_custom_call.1
= control target key start
LH: loop header
LB: loop body
LE: loop exit
PB: predicated region body
PF: predicated region fallthrough
CT: control target
= control target key end

     0   :  { %s8415_s0 = inlined_call_operand.vmem [shape: f32[2,8,256], index: 0, kind: input, shape index: {}]   ;;  %s8416_s1 = inlined_call_operand.vmem [shape: f32[8,1], index: 1, kind: input, shape index: {}]   ;;  %s8417_s2 = inlined_call_operand.vmem [shape: f32[8,1], index: 2, kind: input, shape index: {}]   ;;  %s8418_s3 = inlined_call_operand.vmem [shape: bf16[24,8], index: 3, kind: input, shape index: {}]   ;;  %s8419_s4 = inlined_call_operand.vmem [shape: f32[24,1], index: 4, kind: input, shape index: {}]   ;;  %s8420_s5 = inlined_call_operand.<no memory space> [shape: f32[1,1], index: 5, kind: input, shape index: {}]   ;;  %s8421_s6 = inlined_call_operand.vmem [shape: bf16[24,24], index: 6, kind: input, shape index: {}]   ;;  %s8422_s7 = inlined_call_operand.vmem [shape: f32[24,1], index: 7, kind: input, shape index: {}]   ;;  %s8423_s9 = inlined_call_operand.vmem [shape: bf16[8,24], index: 9, kind: input, shape index: {}]   ;;  %s8424_s10 = inlined_call_operand.vmem [shape: bf16[8,24], index: 10, kind: input, shape index: {}]   ;;  %s8425_s11 = inlined_call_operand.vmem [shape: f32[8,1], index: 11, kind: input, shape index: {}]   ;;  %s8426_s13 = inlined_call_operand.vmem [shape: bf16[16,8], index: 13, kind: input, shape index: {}]   ;;  %s8427_s14 = inlined_call_operand.vmem [shape: f32[16,1], index: 14, kind: input, shape index: {}]   ;;  %s8428_s15 = inlined_call_operand.vmem [shape: f32[16,1], index: 15, kind: input, shape index: {}]   ;;  %s8429_s16 = inlined_call_operand.vmem [shape: f32[16,1], index: 16, kind: input, shape index: {}]   ;;  %s8430_s18 = inlined_call_operand.vmem [shape: f32[16,15], index: 18, kind: input, shape index: {}]   ;;  %s8431_s19 = inlined_call_operand.vmem [shape: f32[16,3], index: 19, kind: input, shape index: {}]   ;;  %s8432_s20 = inlined_call_operand.vmem [shape: f32[16,3], index: 20, kind: input, shape index: {}]   ;;  %s8433_s21 = inlined_call_operand.vmem [shape: f32[16,3], index: 21, kind: input, shape index: {}]   ;;  %s8434_s22 = inlined_call_operand.vmem [shape: f32[16,1], index: 22, kind: input, shape index: {}]   ;;  %s8435_s23 = inlined_call_operand.vmem [shape: f32[16,1], index: 23, kind: input, shape index: {}]   ;;  %s8436_s25 = inlined_call_operand.vmem [shape: bf16[8,16], index: 25, kind: input, shape index: {}]   ;;  %s8437_s26 = inlined_call_operand.vmem [shape: f32[8,1], index: 26, kind: input, shape index: {}]   ;;  %s8438_s27 = inlined_call_operand.hbm [shape: f32[2,8,256], index: 27, kind: output, shape index: {}]   ;;  %s8439_s8 = inlined_call_operand.<no memory space> [shape: f32[1,1], index: 8, kind: input, shape index: {}]   ;;  %s8440_s12 = inlined_call_operand.<no memory space> [shape: f32[1,1], index: 12, kind: input, shape index: {}]   ;;  %s8441_s17 = inlined_call_operand.<no memory space> [shape: f32[1,1], index: 17, kind: input, shape index: {}]   ;;  %s8442_s24 = inlined_call_operand.<no memory space> [shape: f32[1,1], index: 24, kind: input, shape index: {}]  }
   0x1   :  { %8604 = sst [smem:[#allocation62_spill]] %s8415_s0  ;;  %v34_v1 = vstv %s8439_s8  ;;  %v36_v2 = vstv %s8440_s12  ;;  %v38_v3 = vstv %s8441_s17  ;;  %v40_v4 = vstv %s8442_s24 }
   0x2   :  { %8605 = sst [smem:[#allocation63_spill]] %s8416_s1  ;;  %35 = vst [vmem:[#allocation4] sm:$0x1] %v34_v1  ;;  %37 = vst [vmem:[#allocation5] sm:$0x1] %v36_v2 }
   0x3   :  { %8606 = sst [smem:[#allocation64_spill]] %s8417_s2  ;;  %39 = vst [vmem:[#allocation6] sm:$0x1] %v38_v3  ;;  %41 = vst [vmem:[#allocation7] sm:$0x1] %v40_v4 }
   0x4   :  { %8607 = sst [smem:[#allocation65_spill]] %s8418_s3 }
   0x5   :  { %8608 = sst [smem:[#allocation66_spill]] %s8419_s4 }
   0x6   :  { %8609 = sst [smem:[#allocation67_spill]] %s8420_s5 }
   0x7   :  { %8610 = sst [smem:[#allocation68_spill]] %s8421_s6 }
   0x8   :  { %8611 = sst [smem:[#allocation69_spill]] %s8422_s7 }
   0x9   :  { %8612 = sst [smem:[#allocation70_spill]] %s8423_s9 }
   0xa   :  { %8613 = sst [smem:[#allocation71_spill]] %s8424_s10 }
   0xb   :  { %8614 = sst [smem:[#allocation72_spill]] %s8425_s11 }
   0xc   :  { %8615 = sst [smem:[#allocation73_spill]] %s8426_s13 }
   0xd   :  { %8616 = sst [smem:[#allocation74_spill]] %s8427_s14 }
   0xe   :  { %8617 = sst [smem:[#allocation75_spill]] %s8428_s15 }
   0xf   :  { %8618 = sst [smem:[#allocation76_spill]] %s8429_s16 }
  0x10   :  { %8619 = sst [smem:[#allocation77_spill]] %s8430_s18 }
  0x11   :  { %8620 = sst [smem:[#allocation78_spill]] %s8431_s19 }
  0x12   :  { %8621 = sst [smem:[#allocation79_spill]] %s8432_s20 }
  0x13   :  { %s8622_s9 = sld [smem:[#allocation67_spill]] }
  0x19   :  { %v32_v0 = vstv %s8622_s9 }
  0x1a   :  { %33 = vst [vmem:[#allocation3] sm:$0x1] %v32_v0 }
  0x1b   :  { %42 = vsyncpa [#allocation9], 0 }
  0x1c   :  { %44 = vsyncpa [#allocation9 + $0x1], 0  ;;  %s6367_s8 = smov 0   ;;  %s6369_s6 = smov 0  }
  0x1d   :  { %s6371_s12 = smov 0   ;;  %s6373_s13 = smov 0  }
  0x1e LB: > { %8623 = sst [smem:[#allocation11_spill]] %s6178_s12  ;;  %s6388_s17 = sadd.s32 4294967295, %s6182_s13   ;;  %s6182_s13 = sphi %s6373_s13, %s8828_s13   ;;  %s6178_s12 = sphi %s6371_s12, %s8830_s12   ;;  %s6174_s6 = sphi %s6369_s6, %s8832_s6   ;;  %s6170_s8 = sphi %s6367_s8, %s8831_s8  }
  0x1f   : > { %s5639_s24 = sadd.s32 4294967294, %s6182_s13   ;;  %s6392_s2 = sadd.s32 1, %s6182_s13  }
  0x20   : > { %8624 = sst [smem:[#allocation12_spill]] %s6392_s2  ;;  %s629_s3 = sadd.s32 1, %s6178_s12 }
  0x21   : > { %s626_s7 = ssub.s32 %s6182_s13, %s6392_s2  ;;  %p639_p0 = scmp.ne.s32.totalorder %s6178_s12, %s6174_s6 }
  0x22   : > { %p627_p1 = scmp.eq.s32.totalorder %s626_s7, 0  ;;  %p640_p2 = scmp.eq.s32.totalorder %s6388_s17, 1 }
  0x23   : > { %p645_p3 = scmp.ne.s32.totalorder %s6174_s6, %s6170_s8  ;;  %p646_p4 = scmp.eq.s32.totalorder %s5639_s24, 1 }
  0x24   : > { %s6403_s4 = scalar_select %p627_p1, %s6178_s12, %s629_s3  }
  0x25   : > { %p6405_p5 = por %p640_p2, %p639_p0  ;;  %p6409_p6 = por %p646_p4, %p645_p3 }
  0x26   : > { %8625 = sst [smem:[#allocation13_spill]] %s6403_s4  ;;  %p5642_p7 = scmp.ge.s32.totalorder %s6182_s13, 1 }
  0x27   : > { %s8627_s30 = scalar_select %p6409_p6, 1, 0 }
  0x28   : > { %p750_p8 = scmp.lt.s32.totalorder %s6182_s13, 3 }
  0x29   : > { %8628 = sst [smem:[#allocation14_spill]] %s8627_s30 }
  0x2a   : > { %p751_p9 = pnand %p5642_p7, %p750_p8 }
  0x2c   : > { %754 = sbr.rel (%p751_p9) target bundleno = 21823 (0x553f), region = 128 }
  0x31   : > { %p822_p10 = scmp.lt.s32.totalorder %s6388_s17, 1  ;;  %vm832_vm0 = vcmask 523264   ;;  %s8629_s11 = sld [smem:[#allocation62_spill]]  ;;  %v6185_v7 = vmov 0.0   ;;  %v838_v37 = vlaneseq  ;;  %vm1110_vm5 = vcmask 1043456  }
  0x32   : > { %s8451_s1 = smov 64   ;;  %828 = vst [vmem:[#allocation2] sm:$0xff] %v6185_v7  ;;  %s8632_s12 = sld [smem:[#allocation66_spill]]  ;;  %vm1103_vm6 = vcmask 64512   ;;  %vm1268_vm7 = vcmask 195584   ;;  %vm6187_vm8 = vmmov 0  }
  0x33   : > { %s823_s10 = scalar_select %p822_p10, %s6388_s17, 1  ;;  %v6433_v38 = vand.u32 127, %v838_v37  ;;  %vm830_vm9 = vcmask 1048064   ;;  %vm1690_vm10 = vcmask 1039360   ;;  %vm1793_vm11 = vcmask 15360  }
  0x34   : > { %s8639_s4 = sld [smem:[#allocation72_spill]]  ;;  %831 = vst.msk [vmem:[#allocation2 + $0x8] sm:$0xff] %vm830_vm9, %v6185_v7  ;;  %834 = vst.msk [vmem:[#allocation2 + $0x20] sm:$0xff] %vm830_vm9, %v6185_v7  ;;  %vm2222_vm14 = vcmask 1031168   ;;  %vm2335_vm15 = vcmask 31744  }
  0x35   : > { %s5683_s5 = sshll.u32 %s823_s10, 4  ;;  %vm872_vm1 = vcmp.lt.s32.totalorder %v6433_v38, 64  ;;  %vm926_vm2 = vcmp.ge.s32.totalorder %v6433_v38, 64  ;;  %s8640_s14 = sld [smem:[#allocation74_spill]] }
  0x36   : > { %v5646_v41 = vsel %vm872_vm1, 1.0, %v6185_v7  ;;  %v5647_v42 = vsel %vm926_vm2, 1.0, %v6185_v7  ;;  %s8647_s15 = sld [smem:[#allocation75_spill]]  ;;  %vm2520_vm1 = vcmask 7168   ;;  %vm2688_vm2 = vcmask 130048  }
  0x37   : > { %s6420_s29 = scalar_lea.vmem %s8629_s11, %s5683_s5  ;;  %s8648_s16 = sld [smem:[#allocation76_spill]] }
  0x38   : > { %v6423_v5 = vld [vmem:[%s6420_s29] sm:$0xff]  ;;  %v6436_v39 = vld [vmem:[%s6420_s29 + $0x8] sm:$0xff]  ;;  %s8633_s2 = smov %s8632_s12  ;;  %s8649_s18 = sld [smem:[#allocation77_spill]] }
  0x39   : > { %v841_v6 = vsel %vm832_vm0, %v6423_v5, 0.0  ;;  %890 = vrot.lane.b32.xlu1 %v6423_v5, %s8451_s1  ;;  %v945_v40 = vsel %vm832_vm0, %v6436_v39, 0.0  ;;  %s8650_s19 = sld [smem:[#allocation78_spill]] }
  0x3a   : > { %842 = vadd.xlane.f32.xlu0 %v841_v6  ;;  %s8657_s20 = sld [smem:[#allocation79_spill]] }
  0xab   : > { %v891_v9 = vpop.permute.xlu1 %890 }
  0xac   : > { %v893_v11 = vsel %vm832_vm0, %v891_v9, 0.0 }
  0xad   : > { %894 = vadd.xlane.f32.xlu1 %v893_v11 }
  0xb1   : > { %946 = vadd.xlane.f32.xlu1 %v945_v40 }
  0xc3   : > { %v843_v8 = vpop.xlane.xlu0 %842 }
  0xc4   : > { %v844_v10 = vrot.slane %v843_v8, 4 }
  0xc6   : > { %v845_v12 = vadd.f32 %v844_v10, %v843_v8  ;;  %v840_v8 = vadd.s32 128, %v6433_v38 }
  0xc8   : > { %v846_v13 = vrot.slane %v845_v12, 2  ;;  %vm977_vm3 = vcmp.lt.s32.totalorder %v840_v8, 192  ;;  %vm1031_vm4 = vcmp.ge.s32.totalorder %v840_v8, 192 }
  0xca   : > { %v847_v14 = vadd.f32 %v846_v13, %v845_v12 }
  0xcc   : > { %v848_v15 = vrot.slane %v847_v14, 1 }
  0xce   : > { %v849_v16 = vadd.f32 %v848_v15, %v847_v14  ;;  %v6452_v15 = vsel %vm977_vm3, 1.0, %v6185_v7 }
  0xd0   : > { %5773 = vpush %v849_v16 }
 0x101   : > { %s5774_s24 = spop %5773 }
 0x102   : > { %s851_s3 = smul.f32 0.001953125, %s5774_s24 }
 0x104   : > { %v852_v17 = vstv %s851_s3 }
 0x105   : > { %v853_v18 = vsub.f32 %v6423_v5, %v852_v17  ;;  %v881_v43 = vmul.f32 0.0, %v852_v17  ;;  %v880_v45 = vmul.f32 %v5646_v41, %v852_v17 }
 0x107   : > { %v854_v19 = vmul.f32 %v853_v18, %v853_v18 }
 0x109   : > { %v855_v20 = vsel %vm832_vm0, %v854_v19, 0.0 }
 0x10a   : > { %856 = vadd.xlane.f32.xlu0 %v855_v20 }
 0x136   : > { %v895_v28 = vpop.xlane.xlu1 %894 }
 0x137   : > { %v896_v29 = vrot.slane %v895_v28, 4 }
 0x139   : > { %v897_v30 = vadd.f32 %v896_v29, %v895_v28 }
 0x13a   : > { %v947_v61 = vpop.xlane.xlu1 %946 }
 0x13b   : > { %v898_v32 = vrot.slane %v897_v30, 2  ;;  %v948_v62 = vrot.slane %v947_v61, 4 }
 0x13d   : > { %v899_v33 = vadd.f32 %v898_v32, %v897_v30  ;;  %v949_v63 = vadd.f32 %v948_v62, %v947_v61  ;;  %v5655_v61 = vld [vmem:[#allocation3] ss:$0 sm:$0xff] }
 0x13f   : > { %v900_v34 = vrot.slane %v899_v33, 1  ;;  %v950_v1 = vrot.slane %v949_v63, 2 }
 0x141   : > { %v901_v36 = vadd.f32 %v900_v34, %v899_v33  ;;  %v951_v2 = vadd.f32 %v950_v1, %v949_v63 }
 0x143   : > { %v952_v3 = vrot.slane %v951_v2, 1 }
 0x145   : > { %v953_v6 = vadd.f32 %v952_v3, %v951_v2 }
 0x193   : > { %v857_v21 = vpop.xlane.xlu0 %856 }
 0x194   : > { %v858_v22 = vrot.slane %v857_v21, 4 }
 0x196   : > { %v859_v23 = vadd.f32 %v858_v22, %v857_v21 }
 0x198   : > { %v860_v24 = vrot.slane %v859_v23, 2 }
 0x19a   : > { %v861_v25 = vadd.f32 %v860_v24, %v859_v23 }
 0x19c   : > { %v862_v26 = vrot.slane %v861_v25, 1 }
 0x19e   : > { %v863_v27 = vadd.f32 %v862_v26, %v861_v25 }
 0x1a0   : > { %5775 = vpush %v863_v27 }
 0x1d1   : > { %s5776_s7 = spop %5775 }
 0x1d2   : > { %s865_s10 = smul.f32 0.001953125, %s5776_s7 }
 0x1d4   : > { %s866_s5 = sadd.f32 1.1920929e-07, %s865_s10 }
 0x1d6   : > { %v867_v31 = vstv %s866_s5 }
 0x1d7   : > { %6063 = vrsqrt.f32 %v867_v31 }
 0x1e4   : > { %v6064_v35 = vpop.eup %6063 }
 0x1e5   : > { %5777 = vpush %v6064_v35 }
 0x1e6   : > { %5779 = vpush %v901_v36 }
 0x216   : > { %s6442_s28 = spop %5777 }
 0x217   : > { %s5780_s0 = spop %5779  ;;  %v884_v9 = vstv %s6442_s28 }
 0x218   : > { %s903_s11 = smul.f32 0.001953125, %s5780_s0  ;;  %v885_v10 = vmul.f32 %v5646_v41, %v884_v9  ;;  %v886_v12 = vmul.f32 0.0, %v884_v9 }
 0x21a   : > { %v904_v44 = vstv %s903_s11 }
 0x21b   : > { %v905_v46 = vsub.f32 %v6423_v5, %v904_v44  ;;  %v937_v47 = vmul.f32 0.0, %v904_v44  ;;  %v936_v48 = vmul.f32 %v5647_v42, %v904_v44 }
 0x21d   : > { %v906_v49 = vmul.f32 %v905_v46, %v905_v46  ;;  %v939_v50 = vadd.f32 %v937_v47, %v881_v43  ;;  %v938_v51 = vadd.f32 %v936_v48, %v880_v45  ;;  %v8461_v46 = vmov 0  }
 0x21e   : > { %5983 = vset.pattern.permute.xlu0 %v8461_v46  ;;  %1149 = vmatprep.mubr.bf16.mxu0 %v8461_v46  ;;  %v5649_v47 = vsel %vm1031_vm4, 1.0, %v6185_v7 }
 0x21f   : > { %908 = vrot.lane.b32.xlu0 %v906_v49, %s8451_s1  ;;  %5984 = vset.pattern.permute.xlu1 %v8461_v46 }
 0x291   : > { %v909_v52 = vpop.permute.xlu0 %908 }
 0x292   : > { %v911_v53 = vsel %vm832_vm0, %v909_v52, 0.0 }
 0x293   : > { %912 = vadd.xlane.f32.xlu0 %v911_v53 }
 0x31c   : > { %v913_v54 = vpop.xlane.xlu0 %912 }
 0x31d   : > { %v914_v55 = vrot.slane %v913_v54, 4 }
 0x31f   : > { %v915_v56 = vadd.f32 %v914_v55, %v913_v54 }
 0x321   : > { %v916_v57 = vrot.slane %v915_v56, 2 }
 0x323   : > { %v917_v58 = vadd.f32 %v916_v57, %v915_v56 }
 0x325   : > { %v918_v59 = vrot.slane %v917_v58, 1 }
 0x327   : > { %v919_v60 = vadd.f32 %v918_v59, %v917_v58  ;;  %v1079_v59 = vld [vmem:[%s8632_s12 + $0x10] sm:$0xff] }
 0x329   : > { %5781 = vpush %v919_v60  ;;  %v1078_v60 = vld [vmem:[%s8633_s2 + $0x8] sm:$0xff] }
 0x35a   : > { %s5782_s24 = spop %5781 }
 0x35b   : > { %s921_s3 = smul.f32 0.001953125, %s5782_s24 }
 0x35d   : > { %s922_s7 = sadd.f32 1.1920929e-07, %s921_s3 }
 0x35f   : > { %v923_v0 = vstv %s922_s7 }
 0x360   : > { %6065 = vrsqrt.f32 %v923_v0 }
 0x36d   : > { %v6066_v4 = vpop.eup %6065 }
 0x36e   : > { %5783 = vpush %v6066_v4 }
 0x36f   : > { %5785 = vpush %v953_v6  ;;  %v1077_v6 = vld [vmem:[%s8633_s2] sm:$0xff] }
 0x39f   : > { %s5784_s10 = spop %5783 }
 0x3a0   : > { %v940_v11 = vstv %s5784_s10  ;;  %s5786_s5 = spop %5785 }
 0x3a1   : > { %v941_v13 = vmul.f32 %v5647_v42, %v940_v11  ;;  %v942_v14 = vmul.f32 0.0, %v940_v11  ;;  %s955_s0 = smul.f32 0.001953125, %s5786_s5  ;;  %s8459_s5 = smov 126  }
 0x3a3   : > { %v6454_v16 = vadd.f32 %v941_v13, %v885_v10  ;;  %v6456_v17 = vadd.f32 %v942_v14, %v886_v12  ;;  %v956_v18 = vstv %s955_s0 }
 0x3a4   : > { %v984_v19 = vmul.f32 0.0, %v956_v18  ;;  %v957_v20 = vsub.f32 %v6436_v39, %v956_v18  ;;  %v985_v21 = vmul.f32 %v6452_v15, %v956_v18 }
 0x3a6   : > { %v986_v22 = vadd.f32 %v984_v19, %v938_v51  ;;  %v958_v23 = vmul.f32 %v957_v20, %v957_v20  ;;  %v987_v24 = vadd.f32 %v985_v21, %v939_v50 }
 0x3a8   : > { %v959_v25 = vsel %vm832_vm0, %v958_v23, 0.0 }
 0x3a9   : > { %960 = vadd.xlane.f32.xlu1 %v959_v25 }
 0x3ba   : > { %994 = vrot.lane.b32.xlu1 %v6436_v39, %s8451_s1 }
 0x432   : > { %v961_v26 = vpop.xlane.xlu1 %960 }
 0x433   : > { %v962_v27 = vrot.slane %v961_v26, 4 }
 0x435   : > { %v963_v28 = vadd.f32 %v962_v27, %v961_v26 }
 0x436   : > { %v995_v29 = vpop.permute.xlu1 %994 }
 0x437   : > { %v997_v30 = vsel %vm832_vm0, %v995_v29, 0.0  ;;  %v964_v31 = vrot.slane %v963_v28, 2 }
 0x438   : > { %998 = vadd.xlane.f32.xlu0 %v997_v30 }
 0x439   : > { %v965_v32 = vadd.f32 %v964_v31, %v963_v28 }
 0x43b   : > { %v966_v33 = vrot.slane %v965_v32, 1 }
 0x43d   : > { %v967_v34 = vadd.f32 %v966_v33, %v965_v32 }
 0x43f   : > { %5787 = vpush %v967_v34 }
 0x470   : > { %s5788_s28 = spop %5787 }
 0x471   : > { %s969_s11 = smul.f32 0.001953125, %s5788_s28  ;;  %s8630_s28 = sld [smem:[#allocation63_spill]] }
 0x473   : > { %s970_s24 = sadd.f32 1.1920929e-07, %s969_s11 }
 0x474   : > { %s8634_s11 = sld [smem:[#allocation65_spill]] }
 0x475   : > { %v971_v35 = vstv %s970_s24  ;;  %s8504_s24 = smov 127  }
 0x476   : > { %6067 = vrsqrt.f32 %v971_v35 }
 0x477   : > { %v1053_v55 = vld [vmem:[%s8630_s28] sm:$0xff]  ;;  %s8642_s28 = sld [smem:[#allocation71_spill]] }
 0x47a   : > { %v6058_v33 = vld [vmem:[%s8634_s11] sm:$0xff]  }
 0x483   : > { %v6068_v36 = vpop.eup %6067 }
 0x484   : > { %5789 = vpush %v6068_v36 }
 0x4b5   : > { %s6467_s3 = spop %5789 }
 0x4b6   : > { %v988_v10 = vstv %s6467_s3  ;;  %s8638_s3 = sld [smem:[#allocation68_spill]] }
 0x4b7   : > { %v989_v11 = vmul.f32 0.0, %v988_v10  ;;  %v990_v12 = vmul.f32 %v6452_v15, %v988_v10 }
 0x4b9   : > { %v991_v14 = vadd.f32 %v989_v11, %v6454_v16  ;;  %v992_v18 = vadd.f32 %v990_v12, %v6456_v17 }
 0x4c1   : > { %v999_v37 = vpop.xlane.xlu0 %998 }
 0x4c2   : > { %v1000_v40 = vrot.slane %v999_v37, 4 }
 0x4c4   : > { %v1001_v41 = vadd.f32 %v1000_v40, %v999_v37 }
 0x4c6   : > { %v1002_v42 = vrot.slane %v1001_v41, 2 }
 0x4c8   : > { %v1003_v43 = vadd.f32 %v1002_v42, %v1001_v41 }
 0x4ca   : > { %v1004_v44 = vrot.slane %v1003_v43, 1 }
 0x4cc   : > { %v1005_v45 = vadd.f32 %v1004_v44, %v1003_v43 }
 0x4ce   : > { %5791 = vpush %v1005_v45 }
 0x4ff   : > { %s5792_s7 = spop %5791 }
 0x500   : > { %s1007_s10 = smul.f32 0.001953125, %s5792_s7  ;;  %s8631_s7 = sld [smem:[#allocation64_spill]] }
 0x502   : > { %v1008_v48 = vstv %s1007_s10  ;;  %s8635_s10 = smov 64  }
 0x503   : > { %v1009_v49 = vsub.f32 %v6436_v39, %v1008_v48  ;;  %v1040_v50 = vmul.f32 0.0, %v1008_v48  ;;  %v1041_v51 = vmul.f32 %v5649_v47, %v1008_v48 }
 0x505   : > { %v1010_v52 = vmul.f32 %v1009_v49, %v1009_v49  ;;  %v1042_v53 = vadd.f32 %v1040_v50, %v986_v22  ;;  %v1043_v54 = vadd.f32 %v1041_v51, %v987_v24 }
 0x506   : > { %v1061_v58 = vld [vmem:[%s8631_s7] sm:$0xff]  ;;  %s8646_s7 = sld [smem:[#allocation73_spill]] }
 0x507   : > { %1012 = vrot.lane.b32.xlu0 %v1010_v52, %s8451_s1  ;;  %v1049_v22 = vsub.f32 %v6423_v5, %v1042_v53  ;;  %v1050_v25 = vsub.f32 %v6436_v39, %v1043_v54  ;;  %v6059_v39 = vld [vmem:[%s8634_s11 + $0x8] ss:$0 sps:$4 sm:$0xff]  }
 0x50b   : > { %1056 = vperm.xlu0 %5983, %v1053_v55  }
 0x50f   : > { %1064 = vperm.xlu0 %5983, %v1061_v58  }
 0x513   : > { %1092 = vperm.xlu0 %5983, %v1079_v59  }
 0x517   : > { %1087 = vperm.xlu0 %5983, %v1078_v60  }
 0x51b   : > { %1186 = vperm.xlu0 %5983, %v5655_v61  }
 0x579   : > { %v1013_v56 = vpop.permute.xlu0 %1012 }
 0x57a   : > { %v1015_v57 = vsel %vm832_vm0, %v1013_v56, 0.0 }
 0x57b   : > { %1016 = vadd.xlane.f32.xlu1 %v1015_v57 }
 0x586   : > { %v1057_v21 = vpop.permute.xlu0 %1056 }
 0x58a   : > { %v1065_v15 = vpop.permute.xlu0 %1064 }
 0x58c   : > { %1082 = vperm.xlu1 %5984, %v1077_v6  }
 0x58e   : > { %v1093_v34 = vpop.permute.xlu0 %1092 }
 0x592   : > { %v1088_v35 = vpop.permute.xlu0 %1087 }
 0x596   : > { %v1187_v43 = vpop.permute.xlu0 %1186 }
 0x604   : > { %v1017_v62 = vpop.xlane.xlu1 %1016 }
 0x605   : > { %v1018_v63 = vrot.slane %v1017_v62, 4 }
 0x607   : > { %v1019_v0 = vadd.f32 %v1018_v63, %v1017_v62 }
 0x608   : > { %v1083_v36 = vpop.permute.xlu1 %1082 }
 0x609   : > { %v1020_v1 = vrot.slane %v1019_v0, 2 }
 0x60b   : > { %v1021_v2 = vadd.f32 %v1020_v1, %v1019_v0 }
 0x60d   : > { %v1022_v3 = vrot.slane %v1021_v2, 1 }
 0x60f   : > { %v1023_v4 = vadd.f32 %v1022_v3, %v1021_v2 }
 0x611   : > { %5793 = vpush %v1023_v4 }
 0x642   : > { %s5794_s12 = spop %5793 }
 0x643   : > { %s1025_s30 = smul.f32 0.001953125, %s5794_s12  ;;  %s8636_s12 = sld [smem:[#allocation69_spill]] }
 0x645   : > { %s1026_s1 = sadd.f32 1.1920929e-07, %s1025_s30 }
 0x647   : > { %v1027_v8 = vstv %s1026_s1 }
 0x648   : > { %6069 = vrsqrt.f32 %v1027_v8 }
 0x649   : > { %s8637_s30 = smov %s8636_s12 }
 0x655   : > { %v6070_v9 = vpop.eup %6069 }
 0x656   : > { %5795 = vpush %v6070_v9 }
 0x687   : > { %s5796_s0 = spop %5795 }
 0x688   : > { %v1044_v13 = vstv %s5796_s0 }
 0x689   : > { %v1045_v19 = vmul.f32 0.0, %v1044_v13  ;;  %v1046_v20 = vmul.f32 %v5649_v47, %v1044_v13 }
 0x68b   : > { %v1047_v23 = vadd.f32 %v1045_v19, %v991_v14  ;;  %v1048_v24 = vadd.f32 %v1046_v20, %v992_v18  ;;  %v1244_v14 = vld [vmem:[%s8636_s12 + $0x10] sm:$0xff]  ;;  %v6060_v19 = vld [vmem:[%s8638_s3] sm:$0xff]   ;;  %s8641_s12 = sld [smem:[#allocation70_spill]] }
 0x68c   : > { %5712 = vmatprep.mubr.msk.bf16.mxu1 %vm1268_vm7, %v6060_v19 }
 0x68d   : > { %v1051_v26 = vmul.f32 %v1049_v22, %v1047_v23  ;;  %v1052_v27 = vmul.f32 %v1050_v25, %v1048_v24  ;;  %v5660_v23 = vld [vmem:[#allocation4] ss:$0 sm:$0xff]  ;;  %v1405_v24 = vld [vmem:[%s8639_s4] sm:$0xff]  ;;  %v1243_v25 = vld [vmem:[%s8637_s30 + $0x8] sm:$0xff]  ;;  %s8457_s4 = smov 125  }
 0x68f   : > { %v1060_v28 = vmul.f32 %v1057_v21, %v1052_v27  ;;  %v1059_v29 = vmul.f32 %v1057_v21, %v1051_v26  ;;  %v1242_v21 = vld [vmem:[%s8637_s30] sm:$0xff]  ;;  %v5664_v27 = vld [vmem:[#allocation5] ss:$0 sm:$0xff] }
 0x690   : > { %v1459_v26 = vld [vmem:[%s8640_s14] sm:$0xff] }
 0x691   : > { %v1068_v30 = vadd.f32 %v1065_v15, %v1060_v28  ;;  %v1067_v31 = vadd.f32 %v1065_v15, %v1059_v29  ;;  %v1460_v28 = vld [vmem:[%s8640_s14 + $0x8] sm:$0xff] }
 0x693   : > { %v1076_v16 = vpack.c.bf16 %v1068_v30, %v1068_v30  ;;  %v1075_v32 = vpack.c.bf16 %v1067_v31, %v1067_v31 }
 0x695   : > { %5652 = vmatprep.subr.msk.bf16.mxu0 %vm1110_vm5, %v1076_v16  ;;  %v1112_v17 = vsel %vm1110_vm5, %v1075_v32, 0 }
 0x696   : > { %1132 = vmatpush1.bf16.msra.mxu0 %v1112_v17 }
 0x697   : > { %5716 = vmatprep.subr.bf16.mxu0 %v6185_v7 }
 0x699   : > { %5653 = vmatmul.mubr.msk.bf16.vlgmr.msra.gmra.mxu0 %vm1103_vm6, %v6058_v33 }
 0x69a   : > { %1159 = vmatprep.mubr.bf16.mxu0 %v8461_v46 }
 0x6a1   : > { %5654 = vmatmul.mubr.msk.bf16.gmra.mxu0 %vm1103_vm6, %v6059_v39 }
 0x6a2   : > { %5720 = vmatprep.mubr.msk.bf16.mxu0 %vm6187_vm8, %v6185_v7 }
 0x759   : > { %v1151_v37 = vpop.f32.mrf.mxu0 }
 0x75a   : > { %v1152_v40 = vadd.f32 %v1151_v37, %v1083_v36 }
 0x75b   : > { %v1153_v41 = vpop.f32.mrf.mxu0 }
 0x75c   : > { %v1174_v42 = vmin.f32 %v1152_v40, 0.0  ;;  %v1154_v44 = vadd.f32 %v1153_v41, %v1083_v36  ;;  %v1168_v49 = vmax.f32 %v1152_v40, 0.0 }
 0x75d   : > { %v1155_v45 = vpop.f32.mrf.mxu0 }
 0x75e   : > { %v1189_v47 = vmul.f32 %v1187_v43, %v1174_v42  ;;  %v1156_v48 = vadd.f32 %v1155_v45, %v1088_v35  ;;  %v1175_v52 = vmin.f32 %v1154_v44, 0.0  ;;  %v1169_v4 = vmax.f32 %v1154_v44, 0.0 }
 0x75f   : > { %v1157_v50 = vpop.f32.mrf.mxu0 }
 0x760   : > { %v1176_v51 = vmin.f32 %v1156_v48, 0.0  ;;  %v6506_v54 = vadd.f32 %v1189_v47, %v1168_v49  ;;  %v1170_v57 = vmax.f32 %v1156_v48, 0.0  ;;  %v1158_v59 = vadd.f32 %v1157_v50, %v1088_v35  ;;  %v6061_v50 = vld [vmem:[%s8638_s3 + $0x8] ss:$0 sps:$4 sm:$0xff]  }
 0x761   : > { %v1161_v53 = vpop.f32.mrf.mxu0  ;;  %v1190_v62 = vmul.f32 %v1187_v43, %v1175_v52 }
 0x762   : > { %v1191_v55 = vmul.f32 %v1187_v43, %v1176_v51  ;;  %v1162_v56 = vadd.f32 %v1161_v53, %v1093_v34  ;;  %1204 = vrot.lane.b32.xlu0 %v6506_v54, %s8635_s10  ;;  %v1177_v8 = vmin.f32 %v1158_v59, 0.0  ;;  %v1171_v20 = vmax.f32 %v1158_v59, 0.0 }
 0x763   : > { %v1163_v58 = vpop.f32.mrf.mxu0  ;;  %v6514_v11 = vadd.f32 %v1190_v62, %v1169_v4 }
 0x764   : > { %v1178_v60 = vmin.f32 %v1162_v56, 0.0  ;;  %v1164_v61 = vadd.f32 %v1163_v58, %v1093_v34  ;;  %v6510_v0 = vadd.f32 %v1191_v55, %v1170_v57  ;;  %v1172_v1 = vmax.f32 %v1162_v56, 0.0  ;;  %v1347_v56 = vld [vmem:[%s8641_s12] sm:$0xf]  ;;  %s8455_s12 = smov 124  }
 0x765   : > { %v1165_v63 = vpop.f32.mrf.mxu0  ;;  %v1192_v13 = vmul.f32 %v1187_v43, %v1177_v8 }
 0x766   : > { %v1193_v2 = vmul.f32 %v1187_v43, %v1178_v60  ;;  %v1179_v3 = vmin.f32 %v1164_v61, 0.0  ;;  %1206 = vrot.lane.b32.xlu1 %v6510_v0, %s8635_s10  ;;  %v1173_v12 = vmax.f32 %v1164_v61, 0.0  ;;  %v1348_v55 = vpack.c.bf16 %v6510_v0, %v6506_v54 }
 0x767   : > { %v1166_v6 = vpop.f32.mrf.mxu0  ;;  %v1198_v22 = vadd.f32 %v1192_v13, %v1171_v20 }
 0x768   : > { %v1194_v9 = vmul.f32 %v1187_v43, %v1179_v3  ;;  %v1199_v10 = vadd.f32 %v1193_v2, %v1172_v1 }
 0x769   : > { %v1349_v53 = vpack.c.bf16 %v1198_v22, %v6514_v11 }
 0x76a   : > { %1208 = vrot.lane.b32.xlu0 %v1199_v10, %s8635_s10  ;;  %1222 = vrot.lane.b32.xlu1 %v6514_v11, %s8635_s10  ;;  %v1200_v18 = vadd.f32 %v1194_v9, %v1173_v12  ;;  %v1350_v51 = vpack.c.bf16 %v1199_v10, %v1199_v10 }
 0x76c   : > { %v1351_v49 = vpack.c.bf16 %v1200_v18, %v1200_v18  ;;  %v1356_v52 = vsel %vm1110_vm5, %v1350_v51, 0 }
 0x76e   : > { %1226 = vrot.lane.b32.xlu0 %v1200_v18, %s8635_s10  ;;  %1257 = vperm.xlu1 %5984, %v1244_v14  }
 0x772   : > { %1224 = vrot.lane.b32.xlu0 %v1198_v22, %s8635_s10  ;;  %1247 = vperm.xlu1 %5984, %v1242_v21  }
 0x776   : > { %1338 = vperm.xlu0 %5983, %v5660_v23   ;;  %1408 = vperm.xlu1 %5984, %v1405_v24   ;;  %v1402_v23 = vld [vmem:[%s8642_s28] sm:$0xf] }
 0x77a   : > { %1252 = vperm.xlu0 %5983, %v1243_v25   ;;  %1499 = vperm.xlu1 %5984, %v1459_v26  }
 0x77e   : > { %1490 = vperm.xlu0 %5983, %v5664_v27  }
 0x782   : > { %1504 = vperm.xlu0 %5983, %v1460_v28  }
 0x7d4   : > { %v1205_v29 = vpop.permute.xlu0 %1204 }
 0x7d5   : > { %v1213_v31 = vadd.f32 %v1205_v29, %v6506_v54 }
 0x7d7   : > { %v1216_v34 = vadd.f32 %v1213_v31, %v6514_v11 }
 0x7d8   : > { %v1207_v15 = vpop.permute.xlu1 %1206 }
 0x7d9   : > { %v1214_v32 = vadd.f32 %v1207_v15, %v6510_v0 }
 0x7db   : > { %v1217_v37 = vadd.f32 %v1214_v32, %v1198_v22 }
 0x7dc   : > { %v1209_v30 = vpop.permute.xlu0 %1208  ;;  %v1223_v33 = vpop.permute.xlu1 %1222 }
 0x7dd   : > { %v1215_v16 = vadd.f32 %v1209_v30, %v1199_v10  ;;  %v1231_v36 = vadd.f32 %v1223_v33, %v1216_v34 }
 0x7df   : > { %v1218_v17 = vadd.f32 %v1215_v16, %v1200_v18  ;;  %v1234_v44 = vmul.f32 0.25, %v1231_v36 }
 0x7e0   : > { %v1227_v39 = vpop.permute.xlu0 %1226 }
 0x7e1   : > { %v1233_v35 = vadd.f32 %v1227_v39, %v1218_v17 }
 0x7e3   : > { %v1236_v40 = vmul.f32 0.25, %v1233_v35 }
 0x7e4   : > { %v1225_v41 = vpop.permute.xlu0 %1224 }
 0x7e5   : > { %v1232_v42 = vadd.f32 %v1225_v41, %v1217_v37  ;;  %v1241_v43 = vpack.c.bf16 %v1236_v40, %v1236_v40  ;;  %v6062_v41 = vld [vmem:[%s8646_s7] sm:$0xff]  }
 0x7e7   : > { %v1235_v45 = vmul.f32 0.25, %v1232_v42  ;;  %5772 = vmatprep.subr.msk.bf16.mxu1 %vm1110_vm5, %v1241_v43  ;;  %v1276_v47 = vsel %vm1110_vm5, %v1241_v43, 0 }
 0x7e8   : > { %5709 = vmatpush3.bf16.msra.mxu1 %v1276_v47 }
 0x7e9   : > { %v1240_v48 = vpack.c.bf16 %v1235_v45, %v1234_v44  ;;  %v1258_v57 = vpop.permute.xlu1 %1257 }
 0x7eb   : > { %5710 = vmatprep.subr.bf16.mxu1 %v1240_v48 }
 0x7ec   : > { %5711 = vmatpush3.bf16.msra.mxu1 %v1240_v48 }
 0x7ed   : > { %5661 = vmatprep.subr.msk.bf16.mxu1 %vm1110_vm5, %v1351_v49  ;;  %v1248_v60 = vpop.permute.xlu1 %1247 }
 0x7ef   : > { %5713 = vmatmul.mubr.msk.bf16.vlgmr.msra.gmra.mxu1 %vm1268_vm7, %v6061_v50 }
 0x7f0   : > { %1374 = vmatpush1.bf16.msra.mxu1 %v1356_v52  ;;  %1393 = vmatprep.mubr.bf16.mxu1 %v8461_v46 }
 0x7f1   : > { %1375 = vmatprep.subr.bf16.mxu1 %v1349_v53  ;;  %v1339_v58 = vpop.permute.xlu0 %1338  ;;  %v1409_v28 = vpop.permute.xlu1 %1408  ;;  %v1462_v53 = vld [vmem:[%s8647_s15 + $0x8] sm:$0xff] }
 0x7f4   : > { %1376 = vmatpush1.bf16.msra.mxu1 %v1348_v55  ;;  %v1463_v55 = vld [vmem:[%s8648_s16] sm:$0xff] }
 0x7f5   : > { %5724 = vmatprep.subr.bf16.mxu1 %v6185_v7  ;;  %v1253_v4 = vpop.permute.xlu0 %1252 }
 0x7f7   : > { %5662 = vmatmul.mubr.msk.bf16.vlgmr.msra.gmra.mxu1 %vm1268_vm7, %v1347_v56  ;;  %v5667_v56 = vld [vmem:[#allocation6] ss:$0 sm:$0xff] }
 0x7f8   : > { %5726 = vmatprep.mubr.msk.bf16.mxu1 %vm6187_vm8, %v6185_v7 }
 0x7f9   : > { %v6584_v17 = vpop.permute.xlu0 %1490 }
 0x7fa   : > { %8644 = vst [vmem:[#allocation16_spill] sm:$0xff] %v6584_v17 }
 0x7fd   : > { %v6603_v45 = vpop.permute.xlu0 %1504 }
 0x8af   : > { %v5714_v59 = vpop.f32.mrf.mxu1 }
 0x8b0   : > { %v1321_v54 = vadd.f32 %v5714_v59, %v1258_v57 }
 0x8b1   : > { %v1312_v61 = vpop.f32.mrf.mxu1 }
 0x8b2   : > { %v1331_v62 = vmin.f32 %v1321_v54, 0.0  ;;  %v1313_v63 = vadd.f32 %v1312_v61, %v1248_v60  ;;  %v1328_v1 = vmax.f32 %v1321_v54, 0.0 }
 0x8b3   : > { %v5715_v0 = vpop.f32.mrf.mxu1 }
 0x8b4   : > { %v1343_v2 = vmul.f32 %v1339_v58, %v1331_v62  ;;  %v1329_v3 = vmin.f32 %v1313_v63, 0.0  ;;  %v1326_v13 = vmax.f32 %v1313_v63, 0.0 }
 0x8b5   : > { %v1315_v6 = vpop.f32.mrf.mxu1 }
 0x8b6   : > { %v1346_v8 = vadd.f32 %v1343_v2, %v1328_v1  ;;  %v1316_v9 = vadd.f32 %v1315_v6, %v1253_v4  ;;  %v1341_v11 = vmul.f32 %v1339_v58, %v1329_v3 }
 0x8b7   : > { %v6576_v24 = vpop.f32.mrf.mxu1 }
 0x8b8   : > { %v1404_v10 = vpack.c.bf16 %v1346_v8, %v1346_v8  ;;  %v1330_v12 = vmin.f32 %v1316_v9, 0.0  ;;  %v1327_v14 = vmax.f32 %v1316_v9, 0.0  ;;  %v1344_v20 = vadd.f32 %v1341_v11, %v1326_v13  ;;  %v6627_v9 = vld [vmem:[%s8649_s18 + $0x8] sm:$0xff]  ;;  %v6634_v11 = vld [vmem:[%s8649_s18] sm:$0xff] }
 0x8b9   : > { %v6578_v25 = vpop.f32.mrf.mxu1  ;;  %v1461_v13 = vld [vmem:[%s8647_s15] sm:$0xff] }
 0x8ba   : > { %v1342_v18 = vmul.f32 %v1339_v58, %v1330_v12  ;;  %v1415_v19 = vsel %vm1110_vm5, %v1404_v10, 0  ;;  %8643 = vst [vmem:[#allocation15_spill] sm:$0xff] %v6578_v25  ;;  %v6188_v10 = vmov 1   ;;  %v8463_v12 = vmov 2  }
 0x8bb   : > { %5717 = vmatpush3.bf16.msra.mxu0 %v1415_v19  ;;  %v1399_v26 = vpop.f32.mrf.mxu1  ;;  %v6191_v19 = vmov 4  }
 0x8bc   : > { %v1345_v21 = vadd.f32 %v1342_v18, %v1327_v14  ;;  %5718 = vmatprep.subr.bf16.mxu0 %v6185_v7  ;;  %v1464_v14 = vld [vmem:[%s8648_s16 + $0x8] sm:$0xff]  ;;  %v6190_v18 = vmov 3  }
 0x8bd   : > { %v1400_v27 = vpop.f32.mrf.mxu1 }
 0x8be   : > { %v1403_v22 = vpack.c.bf16 %v1345_v21, %v1344_v20 }
 0x8c0   : > { %5719 = vmatpush3.bf16.msra.mxu0 %v1403_v22 }
 0x8c1   : > { %5730 = vmatprep.subr.bf16.mxu0 %v6185_v7 }
 0x8c3   : > { %5721 = vmatmul.mubr.msk.bf16.vlgmr.msra.gmra.mxu0 %vm1268_vm7, %v1402_v23 }
 0x8c4   : > { %5732 = vmatprep.mubr.msk.bf16.mxu0 %vm6187_vm8, %v6185_v7 }
 0x983   : > { %v1451_v29 = vpop.f32.mrf.mxu0 }
 0x984   : > { %v6580_v15 = vadd.f32 %v1451_v29, %v1409_v28 }
 0x985   : > { %v5722_v30 = vpop.f32.mrf.mxu0 }
 0x986   : > { %v1481_v31 = vadd.f32 %v6580_v15, %v6576_v24 }
 0x987   : > { %v1454_v16 = vpop.f32.mrf.mxu0 }
 0x988   : > { %v1483_v32 = vmin.f32 %v1481_v31, 0.0  ;;  %v1482_v39 = vmax.f32 %v1481_v31, 0.0 }
 0x989   : > { %v5723_v33 = vpop.f32.mrf.mxu0 }
 0x98a   : > { %v1493_v34 = vmul.f32 %v6584_v17, %v1483_v32  ;;  %v6675_v32 = vld [vmem:[%s8650_s19] sm:$0xff] }
 0x98c   : > { %v1494_v35 = vadd.f32 %v1493_v34, %v1482_v39 }
 0x98e   : > { %v6588_v36 = vadd.f32 %v1494_v35, %v6423_v5  ;;  %v6600_v5 = vpop.permute.xlu1 %1499 }
 0x990   : > { %8645 = vst [vmem:[#allocation17_spill] sm:$0xff] %v6588_v36  ;;  %v1496_v37 = vpack.c.bf16 %v6588_v36, %v6588_v36 }
 0x992   : > { %v1516_v40 = vsel %vm1110_vm5, %v1496_v37, 0  ;;  %v6687_v37 = vld [vmem:[%s8650_s19 + $0x8] sm:$0xff] }
 0x993   : > { %5725 = vmatpush3.bf16.msra.mxu1 %v1516_v40 }
 0x994   : > { %5736 = vmatprep.subr.bf16.mxu1 %v6185_v7 }
 0x996   : > { %5727 = vmatmul.mubr.msk.bf16.vlgmr.msra.gmra.mxu1 %vm1103_vm6, %v6062_v41 }
 0x997   : > { %5738 = vmatprep.mubr.msk.bf16.mxu1 %vm6187_vm8, %v6185_v7 }
 0xa56   : > { %v1552_v42 = vpop.f32.mrf.mxu1 }
 0xa57   : > { %v1553_v44 = vadd.f32 %v1552_v42, %v6600_v5 }
 0xa58   : > { %v5728_v43 = vpop.f32.mrf.mxu1 }
 0xa59   : > { %v1559_v50 = vsel %vm832_vm0, %v1553_v44, 0.0 }
 0xa5a   : > { %v1555_v47 = vpop.f32.mrf.mxu1 }
 0xa5b   : > { %v1556_v48 = vadd.f32 %v1555_v47, %v6603_v45 }
 0xa5c   : > { %v5729_v49 = vpop.f32.mrf.mxu1 }
 0xa5d   : > { %v1560_v51 = vsel %vm832_vm0, %v1556_v48, 0.0 }
 0xa5e   : > { %v1561_v52 = vadd.f32 %v1560_v51, %v1559_v50 }
 0xa60   : > { %1562 = vadd.xlane.f32.xlu1 %v1561_v52 }
 0xa71   : > { %1608 = vperm.xlu1 %5984, %v1462_v53  }
 0xa75   : > { %1615 = vperm.xlu1 %5984, %v1463_v55  }
 0xa79   : > { %1635 = vperm.xlu1 %5984, %v5667_v56  }
 0xa7d   : > { %5986 = vset.pattern.permute.xlu1 %v6188_v10 }
 0xa7e   : > { %1671 = vperm.xlu1 %5986, %v6627_v9  }
 0xa82   : > { %5987 = vset.pattern.permute.xlu1 %v8463_v12 }
 0xa83   : > { %1702 = vperm.xlu1 %5987, %v6634_v11  }
 0xa87   : > { %5989 = vset.pattern.permute.xlu1 %v6190_v18 }
 0xa88   : > { %1724 = vperm.xlu1 %5989, %v6634_v11  }
 0xa8c   : > { %1728 = vperm.xlu1 %5989, %v6627_v9  }
 0xa90   : > { %5991 = vset.pattern.permute.xlu1 %v6191_v19 }
 0xa91   : > { %1750 = vperm.xlu1 %5991, %v6627_v9  }
 0xa95   : > { %5992 = vset.pattern.permute.xlu1 %v8461_v46 }
 0xa96   : > { %1650 = vperm.xlu1 %5992, %v6634_v11  }
 0xae9   : > { %v1563_v57 = vpop.xlane.xlu1 %1562 }
 0xaea   : > { %v1564_v58 = vrot.slane %v1563_v57, 4 }
 0xaec   : > { %v1565_v59 = vadd.f32 %v1564_v58, %v1563_v57 }
 0xaed   : > { %v6660_v20 = vpop.permute.xlu1 %1608 }
 0xaee   : > { %v1566_v54 = vrot.slane %v1565_v59, 2 }
 0xaf0   : > { %v1567_v60 = vadd.f32 %v1566_v54, %v1565_v59 }
 0xaf1   : > { %v6662_v21 = vpop.permute.xlu1 %1615 }
 0xaf2   : > { %v1568_v61 = vrot.slane %v1567_v60, 1 }
 0xaf4   : > { %v1569_v62 = vadd.f32 %v1568_v61, %v1567_v60 }
 0xaf5   : > { %v6664_v22 = vpop.permute.xlu1 %1635 }
 0xaf6   : > { %5797 = vpush %v1569_v62 }
 0xaf9   : > { %v6666_v28 = vpop.permute.xlu1 %1671 }
 0xafa   : > { %v1676_v30 = vmul.f32 0.0, %v6666_v28 }
 0xafe   : > { %v6700_v54 = vpop.permute.xlu1 %1702 }
 0xb27   : > { %s5798_s0 = spop %5797 }
 0xb28   : > { %s1573_s28 = smul.f32 0.0009765625, %s5798_s0 }
 0xb2a   : > { %v1574_v63 = vstv %s1573_s28 }
 0xb2b   : > { %v6614_v0 = vsub.f32 %v1553_v44, %v1574_v63  ;;  %v6616_v1 = vsub.f32 %v1556_v48, %v1574_v63 }
 0xb2d   : > { %v1577_v2 = vmul.f32 %v6614_v0, %v6614_v0  ;;  %v1578_v3 = vmul.f32 %v6616_v1, %v6616_v1 }
 0xb2f   : > { %v1579_v4 = vsel %vm832_vm0, %v1577_v2, 0.0  ;;  %v1580_v6 = vsel %vm832_vm0, %v1578_v3, 0.0 }
 0xb30   : > { %v1581_v8 = vadd.f32 %v1580_v6, %v1579_v4 }
 0xb32   : > { %1582 = vadd.xlane.f32.xlu0 %v1581_v8 }
 0xb48   : > { %1603 = vperm.xlu0 %5983, %v1461_v13  }
 0xb4c   : > { %1620 = vperm.xlu0 %5983, %v1464_v14  }
 0xb50   : > { %5985 = vset.pattern.permute.xlu0 %v6188_v10 }
 0xb51   : > { %1667 = vperm.xlu0 %5985, %v6634_v11  }
 0xb55   : > { %5988 = vset.pattern.permute.xlu0 %v8463_v12 }
 0xb56   : > { %1706 = vperm.xlu0 %5988, %v6627_v9  }
 0xb5a   : > { %5990 = vset.pattern.permute.xlu0 %v6191_v19 }
 0xb5b   : > { %1746 = vperm.xlu0 %5990, %v6634_v11  }
 0xb5f   : > { %5993 = vset.pattern.permute.xlu0 %v8461_v46 }
 0xb60   : > { %1655 = vperm.xlu0 %5993, %v6627_v9  }
 0xb64   : > { %1686 = vrot.lane.b32.xlu0 %v1676_v30, %s8504_s24 }
 0xb68   : > { %1769 = vperm.xlu0 %5993, %v6675_v32  }
 0xbbb   : > { %v1583_v23 = vpop.xlane.xlu0 %1582 }
 0xbbc   : > { %v1584_v26 = vrot.slane %v1583_v23, 4 }
 0xbbe   : > { %v1585_v27 = vadd.f32 %v1584_v26, %v1583_v23 }
 0xbc0   : > { %v1586_v29 = vrot.slane %v1585_v27, 2 }
 0xbc2   : > { %v1587_v31 = vadd.f32 %v1586_v29, %v1585_v27 }
 0xbc3   : > { %v6670_v16 = vpop.permute.xlu0 %1603 }
 0xbc4   : > { %v1588_v7 = vrot.slane %v1587_v31, 1 }
 0xbc6   : > { %v1589_v33 = vadd.f32 %v1588_v7, %v1587_v31 }
 0xbc7   : > { %v6678_v39 = vpop.permute.xlu0 %1620 }
 0xbc8   : > { %5799 = vpush %v1589_v33 }
 0xbcc   : > { %v6680_v34 = vpop.permute.xlu0 %1667 }
 0xbcd   : > { %v1674_v35 = vmul.f32 0.0, %v6680_v34 }
 0xbcf   : > { %1682 = vrot.lane.b32.xlu1 %v1674_v35, %s8504_s24  ;;  %v6737_v35 = vld [vmem:[#allocation2] sm:$0xff] }
 0xbd1   : > { %v6704_v63 = vpop.permute.xlu0 %1706 }
 0xbd3   : > { %1774 = vperm.xlu1 %5992, %v6687_v37  }
 0xbd6   : > { %v6714_v4 = vpop.permute.xlu0 %1746 }
 0xbdb   : > { %v6728_v23 = vpop.permute.xlu0 %1655 }
 0xbdc   : > { %8653 = vst [vmem:[#allocation20_spill] sm:$0xff] %v6728_v23 }
 0xbdf   : > { %v1687_v29 = vpop.permute.xlu0 %1686 }
 0xbe3   : > { %v6734_v31 = vpop.permute.xlu0 %1769 }
 0xbe4   : > { %8656 = vst [vmem:[#allocation23_spill] sm:$0xff] %v6734_v31 }
 0xbf9   : > { %s5800_s1 = spop %5799 }
 0xbfa   : > { %s1593_s0 = smul.f32 0.0009765625, %s5800_s1  ;;  %s8542_s1 = smov 2  }
 0xbfc   : > { %s1594_s28 = sadd.f32 1e-08, %s1593_s0 }
 0xbfe   : > { %v1595_v40 = vstv %s1594_s28 }
 0xbff   : > { %6071 = vrsqrt.f32 %v1595_v40 }
 0xc0c   : > { %v6072_v41 = vpop.eup %6071 }
 0xc0d   : > { %5801 = vpush %v6072_v41 }
 0xc3e   : > { %s5802_s2 = spop %5801 }
 0xc3f   : > { %v1598_v42 = vstv %s5802_s2 }
 0xc40   : > { %v1599_v43 = vmul.f32 %v1598_v42, %v6614_v0  ;;  %v1600_v44 = vmul.f32 %v1598_v42, %v6616_v1  ;;  %v6708_v1 = vpop.permute.xlu1 %1724 }
 0xc42   : > { %v1611_v47 = vmul.f32 %v6670_v16, %v1599_v43  ;;  %v1612_v48 = vmul.f32 %v6660_v20, %v1600_v44 }
 0xc44   : > { %v1623_v49 = vadd.f32 %v6662_v21, %v1611_v47  ;;  %v1624_v50 = vadd.f32 %v6678_v39, %v1612_v48  ;;  %v6718_v13 = vpop.permute.xlu1 %1728 }
 0xc45   : > { %8651 = vst [vmem:[#allocation18_spill] sm:$0xff] %v6718_v13 }
 0xc46   : > { %v1627_v51 = vmin.f32 %v1623_v49, 0.0  ;;  %v1628_v52 = vmin.f32 %v1624_v50, 0.0  ;;  %v1625_v53 = vmax.f32 %v1623_v49, 0.0  ;;  %v1626_v55 = vmax.f32 %v1624_v50, 0.0 }
 0xc48   : > { %v1638_v56 = vmul.f32 %v6664_v22, %v1627_v51  ;;  %v1639_v57 = vmul.f32 %v6664_v22, %v1628_v52  ;;  %v6724_v18 = vpop.permute.xlu1 %1750 }
 0xc49   : > { %8652 = vst [vmem:[#allocation19_spill] sm:$0xff] %v6724_v18 }
 0xc4a   : > { %v1640_v58 = vadd.f32 %v1638_v56, %v1625_v53  ;;  %v1641_v59 = vadd.f32 %v1639_v57, %v1626_v55  ;;  %v1660_v55 = vmul.f32 %v6737_v35, %v6728_v23 }
 0xc4c   : > { %1642 = vst.msk [vmem:[#allocation2 + $0x8] sm:$0xff] %vm832_vm0, %v1640_v58  ;;  %1643 = vst.msk [vmem:[#allocation2 + $0x20] sm:$0xff] %vm832_vm0, %v1641_v59  ;;  %v6730_v26 = vpop.permute.xlu1 %1650 }
 0xc4d   : > { %8654 = vst [vmem:[#allocation21_spill] sm:$0xff] %v6730_v26  ;;  %v1658_v40 = vmul.f32 %v6737_v35, %v6730_v26 }
 0xc50   : > { %v1683_v27 = vpop.permute.xlu1 %1682 }
 0xc53   : > { %v1645_v60 = vld [vmem:[#allocation2 + $0x8] sm:$0xff]  ;;  %v1647_v0 = vld [vmem:[#allocation2 + $0x20] sm:$0xff] }
 0xc54   : > { %v1675_v61 = vmul.f32 %v6680_v34, %v1645_v60  ;;  %v1709_v62 = vmul.f32 %v6700_v54, %v1645_v60  ;;  %v1677_v2 = vmul.f32 %v6666_v28, %v1647_v0  ;;  %v1731_v3 = vmul.f32 %v6708_v1, %v1645_v60  ;;  %v6732_v30 = vpop.permute.xlu1 %1774 }
 0xc55   : > { %v1710_v6 = vmul.f32 %v6704_v63, %v1647_v0  ;;  %v1753_v8 = vmul.f32 %v6714_v4, %v1645_v60  ;;  %v1732_v14 = vmul.f32 %v6718_v13, %v1647_v0  ;;  %v1754_v19 = vmul.f32 %v6724_v18, %v1647_v0  ;;  %8655 = vst [vmem:[#allocation22_spill] sm:$0xff] %v6732_v30 }
 0xc56   : > { %1684 = vrot.lane.b32.xlu1 %v1675_v61, %s8504_s24  ;;  %1713 = vrot.lane.b32.xlu0 %v1709_v62, %s8459_s5  ;;  %v1659_v7 = vmul.f32 %v6730_v26, %v1645_v60  ;;  %v1661_v58 = vmul.f32 %v6728_v23, %v1647_v0 }
 0xc5a   : > { %1688 = vrot.lane.b32.xlu1 %v1677_v2, %s8504_s24  ;;  %1735 = vrot.lane.b32.xlu0 %v1731_v3, %s8457_s4 }
 0xc5e   : > { %1715 = vrot.lane.b32.xlu1 %v1710_v6, %s8459_s5  ;;  %1757 = vrot.lane.b32.xlu0 %v1753_v8, %s8455_s12  ;;  %s8666_s5 = smov 126  }
 0xc62   : > { %1737 = vrot.lane.b32.xlu1 %v1732_v14, %s8457_s4  ;;  %s8668_s4 = smov 125  }
 0xc66   : > { %1759 = vrot.lane.b32.xlu1 %v1754_v19, %s8455_s12 }
 0xcc8   : > { %v1714_v33 = vpop.permute.xlu0 %1713  ;;  %v1685_v41 = vpop.permute.xlu1 %1684 }
 0xcc9   : > { %v1691_v42 = vsel %vm1690_vm10, %v1683_v27, %v1685_v41  ;;  %v1698_v43 = vadd.f32 %v1685_v41, %v1659_v7 }
 0xcca   : > { %v1697_v44 = vadd.f32 %v1691_v42, %v1658_v40 }
 0xccb   : > { %v1720_v47 = vadd.f32 %v1714_v33, %v1698_v43 }
 0xccc   : > { %v1736_v48 = vpop.permute.xlu0 %1735  ;;  %v1719_v49 = vadd.f32 %v1714_v33, %v1697_v44  ;;  %v1689_v50 = vpop.permute.xlu1 %1688 }
 0xccd   : > { %v1692_v52 = vsel %vm1690_vm10, %v1687_v29, %v1689_v50  ;;  %v1742_v53 = vadd.f32 %v1736_v48, %v1720_v47  ;;  %v1700_v62 = vadd.f32 %v1689_v50, %v1661_v58 }
 0xcce   : > { %v1741_v51 = vadd.f32 %v1736_v48, %v1719_v49  ;;  %v1699_v59 = vadd.f32 %v1692_v52, %v1660_v55  ;;  %v6761_v52 = vld [vmem:[%s8657_s20] sm:$0xff]  ;;  %v6773_v55 = vld [vmem:[%s8433_s21 + $0x8] sm:$0xff] }
 0xcd0   : > { %v1758_v56 = vpop.permute.xlu0 %1757  ;;  %v1716_v57 = vpop.permute.xlu1 %1715 }
 0xcd1   : > { %v1763_v60 = vadd.f32 %v1758_v56, %v1741_v51  ;;  %v1764_v61 = vadd.f32 %v1758_v56, %v1742_v53  ;;  %v1721_v8 = vadd.f32 %v1716_v57, %v1699_v59  ;;  %v1722_v14 = vadd.f32 %v1716_v57, %v1700_v62  ;;  %v6767_v53 = vld [vmem:[%s8657_s20 + $0x8] sm:$0xff] }
 0xcd3   : > { %v1778_v2 = vadd.f32 %v6734_v31, %v1764_v61  ;;  %v1777_v3 = vadd.f32 %v6734_v31, %v1763_v60 }
 0xcd4   : > { %v1738_v6 = vpop.permute.xlu1 %1737 }
 0xcd5   : > { %1787 = vrot.lane.b32.xlu1 %v1778_v2, %s8542_s1  ;;  %1785 = vrot.lane.b32.xlu0 %v1777_v3, %s8542_s1  ;;  %v1743_v19 = vadd.f32 %v1738_v6, %v1721_v8  ;;  %v1744_v27 = vadd.f32 %v1738_v6, %v1722_v14 }
 0xcd8   : > { %v1760_v29 = vpop.permute.xlu1 %1759 }
 0xcd9   : > { %v1765_v0 = vadd.f32 %v1760_v29, %v1743_v19  ;;  %v1766_v7 = vadd.f32 %v1760_v29, %v1744_v27 }
 0xcdb   : > { %v1780_v33 = vadd.f32 %v6732_v30, %v1766_v7  ;;  %v1779_v40 = vadd.f32 %v6732_v30, %v1765_v0 }
 0xcdd   : > { %1791 = vrot.lane.b32.xlu1 %v1780_v33, %s8542_s1  ;;  %1789 = vrot.lane.b32.xlu0 %v1779_v40, %s8542_s1 }
 0xd47   : > { %v1786_v41 = vpop.permute.xlu0 %1785  ;;  %v1788_v42 = vpop.permute.xlu1 %1787 }
 0xd48   : > { %v1794_v43 = vsel %vm1793_vm11, %v1786_v41, %v1788_v42 }
 0xd49   : > { %v1798_v49 = vsel %vm832_vm0, %v1794_v43, 0.0 }
 0xd4f   : > { %v1790_v44 = vpop.permute.xlu0 %1789  ;;  %v1792_v47 = vpop.permute.xlu1 %1791 }
 0xd50   : > { %v1795_v48 = vsel %vm1793_vm11, %v1790_v44, %v1792_v47 }
 0xd51   : > { %v1799_v50 = vsel %vm832_vm0, %v1795_v48, 0.0 }
 0xd52   : > { %v1800_v51 = vadd.f32 %v1799_v50, %v1798_v49  ;;  %v6197_v50 = vmov 6  }
 0xd54   : > { %1801 = vadd.xlane.f32.xlu0 %v1800_v51  ;;  %v6198_v51 = vmov 7  }
 0xd6a   : > { %1864 = vperm.xlu0 %5993, %v6761_v52  }
 0xd6e   : > { %1869 = vperm.xlu0 %5993, %v6767_v53  }
 0xd72   : > { %1883 = vperm.xlu0 %5993, %v6773_v55  }
 0xd76   : > { %5994 = vset.pattern.permute.xlu0 %v6197_v50 }
 0xd77   : > { %1929 = vperm.xlu0 %5994, %v6634_v11  }
 0xd7b   : > { %5997 = vset.pattern.permute.xlu0 %v6198_v51 }
 0xddd   : > { %v1802_v56 = vpop.xlane.xlu0 %1801 }
 0xdde   : > { %v1803_v57 = vrot.slane %v1802_v56, 4 }
 0xde0   : > { %v1804_v58 = vadd.f32 %v1803_v57, %v1802_v56 }
 0xde2   : > { %v1805_v59 = vrot.slane %v1804_v58, 2 }
 0xde4   : > { %v1806_v60 = vadd.f32 %v1805_v59, %v1804_v58 }
 0xde6   : > { %v1807_v61 = vrot.slane %v1806_v60, 1 }
 0xde8   : > { %v1808_v62 = vadd.f32 %v1807_v61, %v1806_v60 }
 0xdea   : > { %5803 = vpush %v1808_v62 }
 0xe1b   : > { %s5804_s12 = spop %5803 }
 0xe1c   : > { %s1812_s0 = smul.f32 0.0009765625, %s5804_s12 }
 0xe1e   : > { %v1813_v6 = vstv %s1812_s0 }
 0xe1f   : > { %v1814_v8 = vsub.f32 %v1777_v3, %v1813_v6  ;;  %v1815_v14 = vsub.f32 %v1778_v2, %v1813_v6  ;;  %v1816_v27 = vsub.f32 %v1779_v40, %v1813_v6  ;;  %v1817_v0 = vsub.f32 %v1780_v33, %v1813_v6  ;;  %v6787_v33 = vld [vmem:[%s8433_s21] sm:$0xff] }
 0xe20   : > { %v6199_v6 = vmov 8  }
 0xe21   : > { %v1818_v19 = vmul.f32 %v1814_v8, %v1814_v8  ;;  %v1819_v29 = vmul.f32 %v1815_v14, %v1815_v14  ;;  %v1820_v7 = vmul.f32 %v1816_v27, %v1816_v27  ;;  %v1821_v41 = vmul.f32 %v1817_v0, %v1817_v0 }
 0xe23   : > { %1826 = vrot.lane.b32.xlu1 %v1818_v19, %s8542_s1 }
 0xe27   : > { %1828 = vrot.lane.b32.xlu1 %v1819_v29, %s8542_s1 }
 0xe2b   : > { %1830 = vrot.lane.b32.xlu1 %v1820_v7, %s8542_s1  ;;  %v6793_v7 = vpop.permute.xlu0 %1864 }
 0xe2c   : > { %8658 = vst [vmem:[#allocation24_spill] sm:$0xff] %v6793_v7 }
 0xe2f   : > { %1832 = vrot.lane.b32.xlu1 %v1821_v41, %s8542_s1  ;;  %v6795_v41 = vpop.permute.xlu0 %1869 }
 0xe30   : > { %8659 = vst [vmem:[#allocation25_spill] sm:$0xff] %v6795_v41 }
 0xe95   : > { %v1827_v42 = vpop.permute.xlu1 %1826 }
 0xe99   : > { %v1829_v43 = vpop.permute.xlu1 %1828 }
 0xe9a   : > { %v1834_v3 = vsel %vm1793_vm11, %v1827_v42, %v1829_v43 }
 0xe9b   : > { %v1838_v40 = vsel %vm832_vm0, %v1834_v3, 0.0 }
 0xe9d   : > { %v1831_v44 = vpop.permute.xlu1 %1830 }
 0xea1   : > { %v1833_v2 = vpop.permute.xlu1 %1832 }
 0xea2   : > { %v1835_v47 = vsel %vm1793_vm11, %v1831_v44, %v1833_v2 }
 0xea3   : > { %v1839_v48 = vsel %vm832_vm0, %v1835_v47, 0.0 }
 0xea4   : > { %v1840_v49 = vadd.f32 %v1839_v48, %v1838_v40  ;;  %v6799_v40 = vpop.permute.xlu0 %1883 }
 0xea5   : > { %8660 = vst [vmem:[#allocation26_spill] sm:$0xff] %v6799_v40 }
 0xea6   : > { %1841 = vadd.xlane.f32.xlu1 %v1840_v49 }
 0xeb7   : > { %1878 = vperm.xlu1 %5992, %v6787_v33  }
 0xebb   : > { %5995 = vset.pattern.permute.xlu1 %v6197_v50 }
 0xebc   : > { %1933 = vperm.xlu1 %5995, %v6627_v9  }
 0xec0   : > { %5996 = vset.pattern.permute.xlu1 %v6198_v51 }
 0xec1   : > { %1963 = vperm.xlu1 %5996, %v6634_v11  }
 0xec5   : > { %5998 = vset.pattern.permute.xlu1 %v6199_v6 }
 0xf2f   : > { %v1842_v56 = vpop.xlane.xlu1 %1841 }
 0xf30   : > { %v1843_v57 = vrot.slane %v1842_v56, 4 }
 0xf32   : > { %v1844_v58 = vadd.f32 %v1843_v57, %v1842_v56  ;;  %v6829_v57 = vpop.permute.xlu0 %1929 }
 0xf33   : > { %v6801_v48 = vpop.permute.xlu1 %1878  ;;  %8662 = vst [vmem:[#allocation28_spill] sm:$0xff] %v6829_v57 }
 0xf34   : > { %v1845_v59 = vrot.slane %v1844_v58, 2  ;;  %8661 = vst [vmem:[#allocation27_spill] sm:$0xff] %v6801_v48 }
 0xf36   : > { %v1846_v60 = vadd.f32 %v1845_v59, %v1844_v58  ;;  %v6201_v58 = vmov 5   ;;  %v1936_v59 = vmul.f32 %v6737_v35, %v6829_v57 }
 0xf38   : > { %v1847_v61 = vrot.slane %v1846_v60, 1 }
 0xf3a   : > { %v1848_v62 = vadd.f32 %v1847_v61, %v1846_v60  ;;  %v6835_v60 = vpop.permute.xlu1 %1933 }
 0xf3b   : > { %8663 = vst [vmem:[#allocation29_spill] sm:$0xff] %v6835_v60  ;;  %v1938_v61 = vmul.f32 %v6737_v35, %v6835_v60 }
 0xf3c   : > { %5805 = vpush %v1848_v62 }
 0xf3e   : > { %v6846_v6 = vpop.permute.xlu1 %1963 }
 0xf3f   : > { %8664 = vst [vmem:[#allocation30_spill] sm:$0xff] %v6846_v6 }
 0xf6d   : > { %s5806_s28 = spop %5805 }
 0xf6e   : > { %s1852_s2 = smul.f32 0.0009765625, %s5806_s28  ;;  %s8671_s28 = smov 124  }
 0xf70   : > { %s1853_s12 = sadd.f32 1e-08, %s1852_s2 }
 0xf72   : > { %v1854_v19 = vstv %s1853_s12 }
 0xf73   : > { %6073 = vrsqrt.f32 %v1854_v19 }
 0xf80   : > { %v6074_v29 = vpop.eup %6073 }
 0xf81   : > { %5807 = vpush %v6074_v29 }
 0xfb2   : > { %s5808_s0 = spop %5807 }
 0xfb3   : > { %v1857_v42 = vstv %s5808_s0 }
 0xfb4   : > { %v1858_v43 = vmul.f32 %v1857_v42, %v1814_v8  ;;  %v1859_v44 = vmul.f32 %v1857_v42, %v1815_v14  ;;  %v1861_v3 = vmul.f32 %v1857_v42, %v1817_v0  ;;  %v1860_v49 = vmul.f32 %v1857_v42, %v1816_v27 }
 0xfb5   : > { %v6200_v0 = vmov 9  }
 0xfb6   : > { %v1872_v2 = vmul.f32 %v6793_v7, %v1858_v43  ;;  %v1875_v47 = vmul.f32 %v6795_v41, %v1861_v3  ;;  %v1873_v56 = vmul.f32 %v6793_v7, %v1859_v44  ;;  %v1874_v14 = vmul.f32 %v6795_v41, %v1860_v49 }
 0xfb8   : > { %v6804_v50 = vadd.f32 %v6801_v48, %v1872_v2  ;;  %v6807_v51 = vadd.f32 %v6799_v40, %v1875_v47  ;;  %v6815_v8 = vadd.f32 %v6801_v48, %v1873_v56  ;;  %v6822_v27 = vadd.f32 %v6799_v40, %v1874_v14 }
 0xfba   : > { %1894 = vrot.lane.b32.xlu0 %v6804_v50, %s8542_s1  ;;  %1900 = vrot.lane.b32.xlu1 %v6807_v51, %s8542_s1 }
 0xfbe   : > { %1896 = vrot.lane.b32.xlu0 %v6815_v8, %s8542_s1  ;;  %1985 = vperm.xlu1 %5998, %v6634_v11  }
 0xfc2   : > { %1989 = vperm.xlu1 %5998, %v6627_v9   ;;  %1898 = vrot.lane.b32.xlu0 %v6822_v27, %s8542_s1 }
 0xfc6   : > { %6000 = vset.pattern.permute.xlu1 %v6200_v0  ;;  %1967 = vperm.xlu0 %5997, %v6627_v9  }
 0xfc7   : > { %2011 = vperm.xlu1 %6000, %v6627_v9  }
 0xfca   : > { %5999 = vset.pattern.permute.xlu0 %v6200_v0 }
 0xfcb   : > { %6001 = vset.pattern.permute.xlu1 %v6201_v58  ;;  %2007 = vperm.xlu0 %5999, %v6634_v11  }
 0xfcc   : > { %1913 = vperm.xlu1 %6001, %v6634_v11  }
 0xfcf   : > { %6002 = vset.pattern.permute.xlu0 %v6201_v58 }
 0xfd0   : > { %1917 = vperm.xlu0 %6002, %v6627_v9   ;;  %1944 = vrot.lane.b32.xlu1 %v1936_v59, %s8504_s24 }
 0xfd1   : > { %6004 = vset.pattern.permute.xlu1 %v6188_v10 }
 0xfd4   : > { %1948 = vrot.lane.b32.xlu0 %v1938_v61, %s8504_s24  ;;  %2033 = vperm.xlu1 %6004, %v6687_v37  }
 0xfd5   : > { %6003 = vset.pattern.permute.xlu0 %v6188_v10 }
 0xfd8   : > { %2029 = vperm.xlu0 %6003, %v6675_v32  }
0x102c   : > { %v1895_v62 = vpop.permute.xlu0 %1894  ;;  %v1901_v42 = vpop.permute.xlu1 %1900 }
0x1030   : > { %v1897_v19 = vpop.permute.xlu0 %1896 }
0x1031   : > { %v1902_v29 = vsel %vm1793_vm11, %v1895_v62, %v1897_v19 }
0x1032   : > { %1906 = vst.msk [vmem:[#allocation2 + $0x8] sm:$0xff] %vm832_vm0, %v1902_v29  ;;  %v2040_v29 = vand.u32 1, %v6433_v38 }
0x1034   : > { %v1899_v43 = vpop.permute.xlu0 %1898  ;;  %vm6878_vm12 = vcmp.eq.s32.totalorder %v2040_v29, 0 }
0x1035   : > { %v1903_v44 = vsel %vm1793_vm11, %v1899_v43, %v1901_v42 }
0x1036   : > { %1907 = vst.msk [vmem:[#allocation2 + $0x20] sm:$0xff] %vm832_vm0, %v1903_v44 }
0x1039   : > { %v6852_v3 = vpop.permute.xlu1 %1985  ;;  %v1909_v2 = vld [vmem:[#allocation2 + $0x8] sm:$0xff] }
0x103a   : > { %8665 = vst [vmem:[#allocation31_spill] sm:$0xff] %v6852_v3  ;;  %v1970_v10 = vmul.f32 %v6846_v6, %v1909_v2  ;;  %v1937_v47 = vmul.f32 %v6829_v57, %v1909_v2  ;;  %v1992_v19 = vmul.f32 %v6852_v3, %v1909_v2 }
0x103c   : > { %1974 = vrot.lane.b32.xlu0 %v1970_v10, %s8666_s5  ;;  %1946 = vrot.lane.b32.xlu1 %v1937_v47, %s8504_s24  ;;  %v5668_v10 = vsel %vm6878_vm12, 1.0, %v6737_v35 }
0x103d   : > { %v6858_v49 = vpop.permute.xlu1 %1989  ;;  %v1911_v56 = vld [vmem:[#allocation2 + $0x20] sm:$0xff] }
0x103e   : > { %8667 = vst [vmem:[#allocation32_spill] sm:$0xff] %v6858_v49  ;;  %v1993_v14 = vmul.f32 %v6858_v49, %v1911_v56  ;;  %v1939_v0 = vmul.f32 %v6835_v60, %v1911_v56 }
0x1040   : > { %1998 = vrot.lane.b32.xlu0 %v1993_v14, %s8668_s4  ;;  %1950 = vrot.lane.b32.xlu1 %v1939_v0, %s8504_s24 }
0x1041   : > { %v6864_v58 = vpop.permute.xlu0 %1967 }
0x1042   : > { %8669 = vst [vmem:[#allocation33_spill] sm:$0xff] %v6864_v58  ;;  %v6866_v59 = vpop.permute.xlu1 %2011  ;;  %v1971_v61 = vmul.f32 %v6864_v58, %v1911_v56 }
0x1043   : > { %8670 = vst [vmem:[#allocation34_spill] sm:$0xff] %v6866_v59  ;;  %v2015_v62 = vmul.f32 %v6866_v59, %v1911_v56 }
0x1044   : > { %1976 = vrot.lane.b32.xlu1 %v1971_v61, %s8666_s5 }
0x1045   : > { %2020 = vrot.lane.b32.xlu0 %v2015_v62, %s8671_s28 }
0x1046   : > { %v6874_v42 = vpop.permute.xlu0 %2007 }
0x1047   : > { %8672 = vst [vmem:[#allocation35_spill] sm:$0xff] %v6874_v42  ;;  %v2014_v43 = vmul.f32 %v6874_v42, %v1909_v2  ;;  %v6887_v47 = vpop.permute.xlu1 %1913 }
0x1048   : > { %1996 = vrot.lane.b32.xlu1 %v1992_v19, %s8668_s4  ;;  %8675 = vst [vmem:[#allocation36_spill] sm:$0xff] %v6887_v47  ;;  %v1920_v59 = vmul.f32 %v6737_v35, %v6887_v47  ;;  %v1921_v49 = vmul.f32 %v6887_v47, %v1909_v2 }
0x104b   : > { %v1945_v14 = vpop.permute.xlu1 %1944  ;;  %v6889_v0 = vpop.permute.xlu0 %1917 }
0x104c   : > { %2018 = vrot.lane.b32.xlu1 %v2014_v43, %s8671_s28  ;;  %8676 = vst [vmem:[#allocation37_spill] sm:$0xff] %v6889_v0  ;;  %v1922_v43 = vmul.f32 %v6737_v35, %v6889_v0  ;;  %v1923_v42 = vmul.f32 %v6889_v0, %v1911_v56 }
0x104f   : > { %v6891_v61 = vpop.permute.xlu1 %2033  ;;  %v1949_v62 = vpop.permute.xlu0 %1948 }
0x1050   : > { %2045 = vrot.lane.b32.xlu1 %v5668_v10, %s8666_s5  ;;  %8677 = vst [vmem:[#allocation38_spill] sm:$0xff] %v6891_v61 }
0x1053   : > { %v6893_v19 = vpop.permute.xlu0 %2029 }
0x1054   : > { %8678 = vst [vmem:[#allocation39_spill] sm:$0xff] %v6893_v19 }
0x10ae   : > { %v1947_v29 = vpop.permute.xlu1 %1946  ;;  %v1975_v10 = vpop.permute.xlu0 %1974 }
0x10af   : > { %v1952_v36 = vsel %vm1690_vm10, %v1945_v14, %v1947_v29  ;;  %v1959_v60 = vadd.f32 %v1947_v29, %v1921_v49 }
0x10b0   : > { %v1958_v6 = vadd.f32 %v1952_v36, %v1920_v59 }
0x10b1   : > { %v1981_v30 = vadd.f32 %v1975_v10, %v1959_v60 }
0x10b2   : > { %v1951_v46 = vpop.permute.xlu1 %1950  ;;  %v1999_v41 = vpop.permute.xlu0 %1998 }
0x10b3   : > { %v1953_v12 = vsel %vm1690_vm10, %v1949_v62, %v1951_v46  ;;  %v1961_v57 = vadd.f32 %v1951_v46, %v1923_v42  ;;  %v1980_v62 = vadd.f32 %v1975_v10, %v1958_v6 }
0x10b4   : > { %v1960_v58 = vadd.f32 %v1953_v12, %v1922_v43 }
0x10b6   : > { %v1977_v3 = vpop.permute.xlu1 %1976 }
0x10b7   : > { %v1982_v48 = vadd.f32 %v1977_v3, %v1960_v58  ;;  %v1983_v40 = vadd.f32 %v1977_v3, %v1961_v57  ;;  %v2021_v47 = vpop.permute.xlu0 %2020 }
0x10b9   : > { %v2004_v14 = vadd.f32 %v1999_v41, %v1982_v48  ;;  %v2005_v31 = vadd.f32 %v1999_v41, %v1983_v40 }
0x10ba   : > { %v1997_v7 = vpop.permute.xlu1 %1996 }
0x10bb   : > { %v2002_v23 = vadd.f32 %v1997_v7, %v1980_v62  ;;  %v2003_v26 = vadd.f32 %v1997_v7, %v1981_v30  ;;  %v2026_v56 = vadd.f32 %v2021_v47, %v2004_v14  ;;  %v2027_v12 = vadd.f32 %v2021_v47, %v2005_v31 }
0x10bd   : > { %v2038_v41 = vadd.f32 %v6891_v61, %v2026_v56  ;;  %v2039_v30 = vadd.f32 %v6891_v61, %v2027_v12 }
0x10be   : > { %v2019_v18 = vpop.permute.xlu1 %2018 }
0x10bf   : > { %v2024_v13 = vadd.f32 %v2019_v18, %v2002_v23  ;;  %v2025_v2 = vadd.f32 %v2019_v18, %v2003_v26 }
0x10c1   : > { %v2036_v36 = vadd.f32 %v6893_v19, %v2024_v13  ;;  %v2037_v46 = vadd.f32 %v6893_v19, %v2025_v2 }
0x10c2   : > { %v6905_v49 = vpop.permute.xlu1 %2045 }
0x10c3   : > { %8679 = vst [vmem:[#allocation40_spill] sm:$0xff] %v6905_v49  ;;  %v2049_v57 = vmul.f32 %v6905_v49, %v2037_v46  ;;  %v2048_v60 = vmul.f32 %v6905_v49, %v2036_v36  ;;  %v2051_v18 = vmul.f32 %v6905_v49, %v2039_v30  ;;  %v2050_v13 = vmul.f32 %v6905_v49, %v2038_v41 }
0x10c5   : > { %2058 = vrot.lane.b32.xlu1 %v2049_v57, %s8542_s1  ;;  %2056 = vrot.lane.b32.xlu0 %v2048_v60, %s8542_s1 }
0x10c9   : > { %2062 = vrot.lane.b32.xlu1 %v2051_v18, %s8542_s1  ;;  %2060 = vrot.lane.b32.xlu0 %v2050_v13, %s8542_s1 }
0x1137   : > { %v2059_v23 = vpop.permute.xlu1 %2058  ;;  %v2057_v26 = vpop.permute.xlu0 %2056 }
0x1138   : > { %v2064_v31 = vsel %vm1793_vm11, %v2057_v26, %v2059_v23 }
0x1139   : > { %v2068_v6 = vsel %vm832_vm0, %v2064_v31, 0.0 }
0x113b   : > { %v2063_v7 = vpop.permute.xlu1 %2062  ;;  %v2061_v40 = vpop.permute.xlu0 %2060 }
0x113c   : > { %v2065_v48 = vsel %vm1793_vm11, %v2061_v40, %v2063_v7 }
0x113d   : > { %v2069_v3 = vsel %vm832_vm0, %v2065_v48, 0.0 }
0x113e   : > { %v2070_v58 = vadd.f32 %v2069_v3, %v2068_v6 }
0x1140   : > { %2071 = vadd.xlane.f32.xlu0 %v2070_v58 }
0x1156   : > { %2137 = vperm.xlu0 %6003, %v6761_v52  }
0x115a   : > { %2141 = vperm.xlu0 %6003, %v6767_v53  }
0x115e   : > { %2153 = vperm.xlu0 %6003, %v6773_v55  }
0x11c9   : > { %v2072_v59 = vpop.xlane.xlu0 %2071 }
0x11ca   : > { %v2073_v42 = vrot.slane %v2072_v59, 4 }
0x11cc   : > { %v2074_v47 = vadd.f32 %v2073_v42, %v2072_v59  ;;  %v6202_v42 = vmov 11  }
0x11cd   : > { %6005 = vset.pattern.permute.xlu0 %v6202_v42 }
0x11ce   : > { %v2075_v29 = vrot.slane %v2074_v47, 2  ;;  %2199 = vperm.xlu0 %6005, %v6634_v11  }
0x11d0   : > { %v2076_v43 = vadd.f32 %v2075_v29, %v2074_v47  ;;  %v6203_v47 = vmov 12  }
0x11d2   : > { %v2077_v10 = vrot.slane %v2076_v43, 1  ;;  %6008 = vset.pattern.permute.xlu0 %v6203_v47 }
0x11d4   : > { %v2078_v62 = vadd.f32 %v2077_v10, %v2076_v43 }
0x11d6   : > { %5809 = vpush %v2078_v62 }
0x1207   : > { %s5810_s2 = spop %5809 }
0x1208   : > { %s2082_s12 = smul.f32 0.001953125, %s5810_s2 }
0x120a   : > { %v2083_v14 = vstv %s2082_s12 }
0x120b   : > { %v2084_v2 = vsub.f32 %v2036_v36, %v2083_v14  ;;  %v2085_v56 = vsub.f32 %v2037_v46, %v2083_v14  ;;  %v2086_v57 = vsub.f32 %v2038_v41, %v2083_v14  ;;  %v2087_v13 = vsub.f32 %v2039_v30, %v2083_v14 }
0x120d   : > { %v2088_v12 = vmul.f32 %v2084_v2, %v2084_v2  ;;  %v2089_v60 = vmul.f32 %v2085_v56, %v2085_v56  ;;  %v2090_v23 = vmul.f32 %v2086_v57, %v2086_v57  ;;  %v2091_v31 = vmul.f32 %v2087_v13, %v2087_v13 }
0x120f   : > { %v2092_v18 = vmul.f32 %v2088_v12, %v6905_v49  ;;  %v2093_v26 = vmul.f32 %v2089_v60, %v6905_v49  ;;  %v2094_v7 = vmul.f32 %v2090_v23, %v6905_v49  ;;  %v2095_v36 = vmul.f32 %v2091_v31, %v6905_v49  ;;  %v6940_v31 = vpop.permute.xlu0 %2137 }
0x1210   : > { %8680 = vst [vmem:[#allocation41_spill] sm:$0xff] %v6940_v31 }
0x1211   : > { %2100 = vrot.lane.b32.xlu1 %v2092_v18, %s8542_s1  ;;  %v6204_v18 = vmov 13  }
0x1215   : > { %2102 = vrot.lane.b32.xlu1 %v2093_v26, %s8542_s1 }
0x1219   : > { %2104 = vrot.lane.b32.xlu1 %v2094_v7, %s8542_s1  ;;  %v6942_v7 = vpop.permute.xlu0 %2141 }
0x121a   : > { %8681 = vst [vmem:[#allocation42_spill] sm:$0xff] %v6942_v7 }
0x121d   : > { %2106 = vrot.lane.b32.xlu1 %v2095_v36, %s8542_s1 }
0x1283   : > { %v2101_v46 = vpop.permute.xlu1 %2100 }
0x1287   : > { %v2103_v41 = vpop.permute.xlu1 %2102 }
0x1288   : > { %v2108_v48 = vsel %vm1793_vm11, %v2101_v46, %v2103_v41 }
0x1289   : > { %v2112_v3 = vsel %vm832_vm0, %v2108_v48, 0.0 }
0x128b   : > { %v2105_v40 = vpop.permute.xlu1 %2104 }
0x128f   : > { %v2107_v30 = vpop.permute.xlu1 %2106 }
0x1290   : > { %v2109_v6 = vsel %vm1793_vm11, %v2105_v40, %v2107_v30 }
0x1291   : > { %v2113_v58 = vsel %vm832_vm0, %v2109_v6, 0.0  ;;  %v6946_v6 = vpop.permute.xlu0 %2153 }
0x1292   : > { %v2114_v59 = vadd.f32 %v2113_v58, %v2112_v3  ;;  %8682 = vst [vmem:[#allocation43_spill] sm:$0xff] %v6946_v6 }
0x1294   : > { %2115 = vadd.xlane.f32.xlu1 %v2114_v59 }
0x12a5   : > { %2149 = vperm.xlu1 %6004, %v6787_v33  }
0x12a9   : > { %6006 = vset.pattern.permute.xlu1 %v6202_v42 }
0x12aa   : > { %2203 = vperm.xlu1 %6006, %v6627_v9  }
0x12ae   : > { %6007 = vset.pattern.permute.xlu1 %v6203_v47 }
0x12af   : > { %2234 = vperm.xlu1 %6007, %v6634_v11  }
0x12b3   : > { %6009 = vset.pattern.permute.xlu1 %v6204_v18 }
0x131d   : > { %v2116_v29 = vpop.xlane.xlu1 %2115 }
0x131e   : > { %v2117_v43 = vrot.slane %v2116_v29, 4 }
0x1320   : > { %v2118_v10 = vadd.f32 %v2117_v43, %v2116_v29  ;;  %v6976_v29 = vpop.permute.xlu0 %2199  ;;  %v6206_v43 = vmov 10  }
0x1321   : > { %v6948_v3 = vpop.permute.xlu1 %2149  ;;  %8684 = vst [vmem:[#allocation45_spill] sm:$0xff] %v6976_v29 }
0x1322   : > { %v2119_v62 = vrot.slane %v2118_v10, 2  ;;  %8683 = vst [vmem:[#allocation44_spill] sm:$0xff] %v6948_v3 }
0x1324   : > { %v2120_v14 = vadd.f32 %v2119_v62, %v2118_v10  ;;  %v2206_v10 = vmul.f32 %v6737_v35, %v6976_v29 }
0x1325   : > { %v6982_v62 = vpop.permute.xlu1 %2203 }
0x1326   : > { %v2121_v12 = vrot.slane %v2120_v14, 1  ;;  %8685 = vst [vmem:[#allocation46_spill] sm:$0xff] %v6982_v62 }
0x1328   : > { %v2122_v60 = vadd.f32 %v2121_v12, %v2120_v14  ;;  %v2208_v14 = vmul.f32 %v6737_v35, %v6982_v62  ;;  %v8686_v12 = vmov 2  }
0x132a   : > { %5811 = vpush %v2122_v60  ;;  %v6993_v60 = vpop.permute.xlu1 %2234 }
0x132b   : > { %8687 = vst [vmem:[#allocation47_spill] sm:$0xff] %v6993_v60 }
0x135b   : > { %s5812_s0 = spop %5811 }
0x135c   : > { %s2126_s2 = smul.f32 0.001953125, %s5812_s0  ;;  %s8538_s0 = smov 120  }
0x135e   : > { %s2127_s12 = sadd.f32 1e-08, %s2126_s2  ;;  %s8546_s2 = smov 4  }
0x1360   : > { %v2128_v23 = vstv %s2127_s12 }
0x1361   : > { %6075 = vrsqrt.f32 %v2128_v23 }
0x136e   : > { %v6076_v26 = vpop.eup %6075 }
0x136f   : > { %5813 = vpush %v6076_v26 }
0x13a0   : > { %s5814_s24 = spop %5813 }
0x13a1   : > { %v2131_v36 = vstv %s5814_s24  ;;  %s8540_s24 = smov 122  }
0x13a2   : > { %v2132_v46 = vmul.f32 %v2131_v36, %v2084_v2  ;;  %v2133_v41 = vmul.f32 %v2131_v36, %v2085_v56  ;;  %v2135_v40 = vmul.f32 %v2131_v36, %v2087_v13  ;;  %v2134_v58 = vmul.f32 %v2131_v36, %v2086_v57 }
0x13a3   : > { %v6205_v13 = vmov 14  }
0x13a4   : > { %v2144_v48 = vmul.f32 %v6940_v31, %v2132_v46  ;;  %v2147_v30 = vmul.f32 %v6942_v7, %v2135_v40  ;;  %v2145_v59 = vmul.f32 %v6940_v31, %v2133_v41  ;;  %v2146_v2 = vmul.f32 %v6942_v7, %v2134_v58 }
0x13a6   : > { %v6952_v42 = vadd.f32 %v6948_v3, %v2144_v48  ;;  %v6955_v47 = vadd.f32 %v6946_v6, %v2147_v30  ;;  %v6963_v56 = vadd.f32 %v6948_v3, %v2145_v59  ;;  %v6969_v57 = vadd.f32 %v6946_v6, %v2146_v2 }
0x13a8   : > { %2164 = vrot.lane.b32.xlu0 %v6952_v42, %s8542_s1  ;;  %2170 = vrot.lane.b32.xlu1 %v6955_v47, %s8542_s1 }
0x13ac   : > { %2166 = vrot.lane.b32.xlu0 %v6963_v56, %s8542_s1  ;;  %2256 = vperm.xlu1 %6009, %v6634_v11  }
0x13b0   : > { %2260 = vperm.xlu1 %6009, %v6627_v9   ;;  %2168 = vrot.lane.b32.xlu0 %v6969_v57, %s8542_s1 }
0x13b4   : > { %6011 = vset.pattern.permute.xlu1 %v6205_v13  ;;  %2238 = vperm.xlu0 %6008, %v6627_v9  }
0x13b5   : > { %2282 = vperm.xlu1 %6011, %v6627_v9  }
0x13b8   : > { %6010 = vset.pattern.permute.xlu0 %v6205_v13 }
0x13b9   : > { %6012 = vset.pattern.permute.xlu1 %v6206_v43  ;;  %2278 = vperm.xlu0 %6010, %v6634_v11  }
0x13ba   : > { %2183 = vperm.xlu1 %6012, %v6634_v11  }
0x13bd   : > { %6013 = vset.pattern.permute.xlu0 %v6206_v43 }
0x13be   : > { %2187 = vperm.xlu0 %6013, %v6627_v9   ;;  %2214 = vrot.lane.b32.xlu1 %v2206_v10, %s8666_s5 }
0x13bf   : > { %6015 = vset.pattern.permute.xlu1 %v8686_v12 }
0x13c2   : > { %2218 = vrot.lane.b32.xlu0 %v2208_v14, %s8666_s5  ;;  %2304 = vperm.xlu1 %6015, %v6687_v37   ;;  %v2311_v14 = vand.u32 3, %v6433_v38 }
0x13c3   : > { %6014 = vset.pattern.permute.xlu0 %v8686_v12 }
0x13c4   : > { %vm7025_vm13 = vcmp.eq.s32.totalorder %v2311_v14, 0 }
0x13c6   : > { %2300 = vperm.xlu0 %6014, %v6675_v32  }
0x141a   : > { %v2165_v11 = vpop.permute.xlu0 %2164  ;;  %v2171_v23 = vpop.permute.xlu1 %2170 }
0x141e   : > { %v2167_v18 = vpop.permute.xlu0 %2166 }
0x141f   : > { %v2172_v9 = vsel %vm1793_vm11, %v2165_v11, %v2167_v18 }
0x1420   : > { %2176 = vst.msk [vmem:[#allocation2 + $0x8] sm:$0xff] %vm832_vm0, %v2172_v9  ;;  %v5669_v9 = vsel %vm7025_vm13, 1.0, %v6737_v35 }
0x1422   : > { %v2169_v26 = vpop.permute.xlu0 %2168 }
0x1423   : > { %v2173_v36 = vsel %vm1793_vm11, %v2169_v26, %v2171_v23 }
0x1424   : > { %2177 = vst.msk [vmem:[#allocation2 + $0x20] sm:$0xff] %vm832_vm0, %v2173_v36 }
0x1427   : > { %v6999_v46 = vpop.permute.xlu1 %2256  ;;  %v2179_v37 = vld [vmem:[#allocation2 + $0x8] sm:$0xff] }
0x1428   : > { %8688 = vst [vmem:[#allocation48_spill] sm:$0xff] %v6999_v46  ;;  %v2241_v41 = vmul.f32 %v6993_v60, %v2179_v37  ;;  %v2207_v32 = vmul.f32 %v6976_v29, %v2179_v37  ;;  %v2263_v10 = vmul.f32 %v6999_v46, %v2179_v37 }
0x142a   : > { %2245 = vrot.lane.b32.xlu0 %v2241_v41, %s8671_s28  ;;  %2216 = vrot.lane.b32.xlu1 %v2207_v32, %s8666_s5 }
0x142b   : > { %v7005_v40 = vpop.permute.xlu1 %2260  ;;  %v2181_v48 = vld [vmem:[#allocation2 + $0x20] sm:$0xff] }
0x142c   : > { %8689 = vst [vmem:[#allocation49_spill] sm:$0xff] %v7005_v40  ;;  %v2264_v30 = vmul.f32 %v7005_v40, %v2181_v48  ;;  %v2209_v58 = vmul.f32 %v6982_v62, %v2181_v48 }
0x142e   : > { %2269 = vrot.lane.b32.xlu0 %v2264_v30, %s8540_s24  ;;  %2220 = vrot.lane.b32.xlu1 %v2209_v58, %s8666_s5 }
0x142f   : > { %v7011_v59 = vpop.permute.xlu0 %2238 }
0x1430   : > { %8690 = vst [vmem:[#allocation50_spill] sm:$0xff] %v7011_v59  ;;  %v7013_v2 = vpop.permute.xlu1 %2282  ;;  %v2242_v13 = vmul.f32 %v7011_v59, %v2181_v48 }
0x1431   : > { %8691 = vst [vmem:[#allocation51_spill] sm:$0xff] %v7013_v2  ;;  %v2286_v43 = vmul.f32 %v7013_v2, %v2181_v48 }
0x1432   : > { %2247 = vrot.lane.b32.xlu1 %v2242_v13, %s8671_s28 }
0x1433   : > { %2291 = vrot.lane.b32.xlu0 %v2286_v43, %s8538_s0 }
0x1434   : > { %v7021_v12 = vpop.permute.xlu0 %2278 }
0x1435   : > { %8692 = vst [vmem:[#allocation52_spill] sm:$0xff] %v7021_v12  ;;  %v2285_v11 = vmul.f32 %v7021_v12, %v2179_v37  ;;  %v7034_v23 = vpop.permute.xlu1 %2183 }
0x1436   : > { %2267 = vrot.lane.b32.xlu1 %v2263_v10, %s8540_s24  ;;  %8695 = vst [vmem:[#allocation53_spill] sm:$0xff] %v7034_v23 }
0x1439   : > { %v2215_v38 = vpop.permute.xlu1 %2214  ;;  %v7036_v26 = vpop.permute.xlu0 %2187 }
0x143a   : > { %2289 = vrot.lane.b32.xlu1 %v2285_v11, %s8538_s0  ;;  %v2192_v13 = vmul.f32 %v6737_v35, %v7036_v26  ;;  %v2190_v11 = vmul.f32 %v6737_v35, %v7034_v23  ;;  %v2193_v2 = vmul.f32 %v7036_v26, %v2181_v48 }
0x143d   : > { %v7038_v36 = vpop.permute.xlu1 %2304  ;;  %v2219_v41 = vpop.permute.xlu0 %2218 }
0x143e   : > { %2316 = vrot.lane.b32.xlu1 %v5669_v9, %s8671_s28  ;;  %v2191_v9 = vmul.f32 %v7034_v23, %v2179_v37 }
0x1441   : > { %v7040_v32 = vpop.permute.xlu0 %2300 }
0x149c   : > { %v2217_v30 = vpop.permute.xlu1 %2216  ;;  %v2246_v14 = vpop.permute.xlu0 %2245 }
0x149d   : > { %v2223_v10 = vsel %vm2222_vm14, %v2215_v38, %v2217_v30  ;;  %v2230_v46 = vadd.f32 %v2217_v30, %v2191_v9 }
0x149e   : > { %v2229_v59 = vadd.f32 %v2223_v10, %v2190_v11 }
0x149f   : > { %v2252_v7 = vadd.f32 %v2246_v14, %v2230_v46 }
0x14a0   : > { %v2221_v58 = vpop.permute.xlu1 %2220  ;;  %v2270_v3 = vpop.permute.xlu0 %2269 }
0x14a1   : > { %v2224_v43 = vsel %vm2222_vm14, %v2219_v41, %v2221_v58  ;;  %v2232_v60 = vadd.f32 %v2221_v58, %v2193_v2  ;;  %v2251_v41 = vadd.f32 %v2246_v14, %v2229_v59  ;;  %v8696_v58 = vmov 0  }
0x14a2   : > { %v2231_v40 = vadd.f32 %v2224_v43, %v2192_v13 }
0x14a4   : > { %v2248_v12 = vpop.permute.xlu1 %2247 }
0x14a5   : > { %v2253_v62 = vadd.f32 %v2248_v12, %v2231_v40  ;;  %v2254_v29 = vadd.f32 %v2248_v12, %v2232_v60  ;;  %v2292_v23 = vpop.permute.xlu0 %2291 }
0x14a7   : > { %v2275_v38 = vadd.f32 %v2270_v3, %v2253_v62  ;;  %v2276_v31 = vadd.f32 %v2270_v3, %v2254_v29 }
0x14a8   : > { %v2268_v6 = vpop.permute.xlu1 %2267 }
0x14a9   : > { %v2273_v61 = vadd.f32 %v2268_v6, %v2251_v41  ;;  %v2274_v49 = vadd.f32 %v2268_v6, %v2252_v7  ;;  %v2297_v48 = vadd.f32 %v2292_v23, %v2275_v38  ;;  %v2298_v13 = vadd.f32 %v2292_v23, %v2276_v31 }
0x14ab   : > { %v2309_v3 = vadd.f32 %v7038_v36, %v2297_v48  ;;  %v2310_v7 = vadd.f32 %v7038_v36, %v2298_v13 }
0x14ac   : > { %v2290_v35 = vpop.permute.xlu1 %2289 }
0x14ad   : > { %v2295_v19 = vadd.f32 %v2290_v35, %v2273_v61  ;;  %v2296_v37 = vadd.f32 %v2290_v35, %v2274_v49 }
0x14af   : > { %v2307_v43 = vadd.f32 %v7040_v32, %v2295_v19  ;;  %v2308_v2 = vadd.f32 %v7040_v32, %v2296_v37 }
0x14b0   : > { %v7052_v40 = vpop.permute.xlu1 %2316 }
0x14b1   : > { %v2320_v60 = vmul.f32 %v7052_v40, %v2308_v2  ;;  %v2319_v46 = vmul.f32 %v7052_v40, %v2307_v43  ;;  %v2322_v61 = vmul.f32 %v7052_v40, %v2310_v7  ;;  %v2321_v19 = vmul.f32 %v7052_v40, %v2309_v3 }
0x14b3   : > { %2329 = vrot.lane.b32.xlu1 %v2320_v60, %s8546_s2  ;;  %2327 = vrot.lane.b32.xlu0 %v2319_v46, %s8546_s2 }
0x14b7   : > { %2333 = vrot.lane.b32.xlu1 %v2322_v61, %s8546_s2  ;;  %2331 = vrot.lane.b32.xlu0 %v2321_v19, %s8546_s2 }
0x1525   : > { %v2330_v49 = vpop.permute.xlu1 %2329  ;;  %v2328_v31 = vpop.permute.xlu0 %2327 }
0x1526   : > { %v2336_v6 = vsel %vm2335_vm15, %v2328_v31, %v2330_v49 }
0x1527   : > { %v2340_v12 = vsel %vm832_vm0, %v2336_v6, 0.0 }
0x1529   : > { %v2334_v29 = vpop.permute.xlu1 %2333  ;;  %v2332_v62 = vpop.permute.xlu0 %2331 }
0x152a   : > { %v2337_v59 = vsel %vm2335_vm15, %v2332_v62, %v2334_v29 }
0x152b   : > { %v2341_v23 = vsel %vm832_vm0, %v2337_v59, 0.0 }
0x152c   : > { %v2342_v30 = vadd.f32 %v2341_v23, %v2340_v12 }
0x152e   : > { %2343 = vadd.xlane.f32.xlu0 %v2342_v30 }
0x1544   : > { %2409 = vperm.xlu0 %6014, %v6761_v52  }
0x1548   : > { %2413 = vperm.xlu0 %6014, %v6767_v53  }
0x154c   : > { %2425 = vperm.xlu0 %6014, %v6773_v55  }
0x1550   : > { %6057 = vset.pattern.permute.xlu0 %v8696_v58 }
0x15b7   : > { %v2344_v10 = vpop.xlane.xlu0 %2343 }
0x15b8   : > { %v2345_v14 = vrot.slane %v2344_v10, 4 }
0x15ba   : > { %v2346_v11 = vadd.f32 %v2345_v14, %v2344_v10 }
0x15bc   : > { %v2347_v9 = vrot.slane %v2346_v11, 2 }
0x15be   : > { %v2348_v41 = vadd.f32 %v2347_v9, %v2346_v11 }
0x15c0   : > { %v2349_v38 = vrot.slane %v2348_v41, 1 }
0x15c2   : > { %v2350_v35 = vadd.f32 %v2349_v38, %v2348_v41 }
0x15c4   : > { %5815 = vpush %v2350_v35 }
0x15f5   : > { %s5816_s12 = spop %5815 }
0x15f6   : > { %s2354_s0 = smul.f32 0.00390625, %s5816_s12 }
0x15f8   : > { %v2355_v37 = vstv %s2354_s0 }
0x15f9   : > { %v2356_v48 = vsub.f32 %v2307_v43, %v2355_v37  ;;  %v2357_v13 = vsub.f32 %v2308_v2, %v2355_v37  ;;  %v2358_v60 = vsub.f32 %v2309_v3, %v2355_v37  ;;  %v2359_v46 = vsub.f32 %v2310_v7, %v2355_v37 }
0x15fb   : > { %v2360_v52 = vmul.f32 %v2356_v48, %v2356_v48  ;;  %v2361_v53 = vmul.f32 %v2357_v13, %v2357_v13  ;;  %v2362_v61 = vmul.f32 %v2358_v60, %v2358_v60  ;;  %v2363_v49 = vmul.f32 %v2359_v46, %v2359_v46 }
0x15fd   : > { %v2364_v55 = vmul.f32 %v2360_v52, %v7052_v40  ;;  %v2365_v19 = vmul.f32 %v2361_v53, %v7052_v40  ;;  %v2366_v31 = vmul.f32 %v2362_v61, %v7052_v40  ;;  %v2367_v43 = vmul.f32 %v2363_v49, %v7052_v40  ;;  %v7086_v52 = vpop.permute.xlu0 %2409 }
0x15ff   : > { %2372 = vrot.lane.b32.xlu1 %v2364_v55, %s8546_s2 }
0x1603   : > { %2374 = vrot.lane.b32.xlu1 %v2365_v19, %s8546_s2 }
0x1607   : > { %2376 = vrot.lane.b32.xlu1 %v2366_v31, %s8546_s2 }
0x160b   : > { %2378 = vrot.lane.b32.xlu1 %v2367_v43, %s8546_s2 }
0x1671   : > { %v2373_v2 = vpop.permute.xlu1 %2372 }
0x1675   : > { %v2375_v3 = vpop.permute.xlu1 %2374 }
0x1676   : > { %v2380_v29 = vsel %vm2335_vm15, %v2373_v2, %v2375_v3 }
0x1677   : > { %v2384_v59 = vsel %vm832_vm0, %v2380_v29, 0.0 }
0x1679   : > { %v2377_v6 = vpop.permute.xlu1 %2376 }
0x167d   : > { %v2379_v7 = vpop.permute.xlu1 %2378 }
0x167e   : > { %v2381_v62 = vsel %vm2335_vm15, %v2377_v6, %v2379_v7 }
0x167f   : > { %v2385_v12 = vsel %vm832_vm0, %v2381_v62, 0.0 }
0x1680   : > { %v2386_v23 = vadd.f32 %v2385_v12, %v2384_v59 }
0x1682   : > { %2387 = vadd.xlane.f32.xlu1 %v2386_v23 }
0x1693   : > { %2421 = vperm.xlu1 %6015, %v6787_v33   ;;  %v7088_v33 = vpop.permute.xlu0 %2413 }
0x1697   : > { %6056 = vset.pattern.permute.xlu1 %v8696_v58  ;;  %v7092_v31 = vpop.permute.xlu0 %2425 }
0x170b   : > { %v2388_v30 = vpop.xlane.xlu1 %2387 }
0x170c   : > { %v2389_v10 = vrot.slane %v2388_v30, 4 }
0x170e   : > { %v2390_v14 = vadd.f32 %v2389_v10, %v2388_v30 }
0x170f   : > { %v7094_v43 = vpop.permute.xlu1 %2421 }
0x1710   : > { %v2391_v11 = vrot.slane %v2390_v14, 2 }
0x1712   : > { %v2392_v9 = vadd.f32 %v2391_v11, %v2390_v14 }
0x1714   : > { %v2393_v41 = vrot.slane %v2392_v9, 1 }
0x1716   : > { %v2394_v38 = vadd.f32 %v2393_v41, %v2392_v9 }
0x1718   : > { %5817 = vpush %v2394_v38 }
0x1749   : > { %s5818_s0 = spop %5817 }
0x174a   : > { %s2398_s12 = smul.f32 0.00390625, %s5818_s0 }
0x174c   : > { %s2399_s24 = sadd.f32 1e-08, %s2398_s12 }
0x174e   : > { %v2400_v35 = vstv %s2399_s24  ;;  %s8544_s24 = smov 1  }
0x174f   : > { %6077 = vrsqrt.f32 %v2400_v35 }
0x175c   : > { %v6078_v37 = vpop.eup %6077 }
0x175d   : > { %5819 = vpush %v6078_v37 }
0x178e   : > { %s5820_s1 = spop %5819 }
0x178f   : > { %v2403_v58 = vstv %s5820_s1  ;;  %s8697_s1 = smov 2  }
0x1790   : > { %v2404_v53 = vmul.f32 %v2403_v58, %v2356_v48  ;;  %v2405_v55 = vmul.f32 %v2403_v58, %v2357_v13  ;;  %v2407_v61 = vmul.f32 %v2403_v58, %v2359_v46  ;;  %v2406_v2 = vmul.f32 %v2403_v58, %v2358_v60  ;;  %v7106_v60 = vld [vmem:[#allocation2] sm:$0xff] }
0x1791   : > { %v6016_v7 = vpack.i.bf16 %v7106_v60, %v7106_v60 }
0x1792   : > { %v2416_v19 = vmul.f32 %v7086_v52, %v2404_v53  ;;  %v2419_v49 = vmul.f32 %v7088_v33, %v2407_v61  ;;  %v2417_v3 = vmul.f32 %v7086_v52, %v2405_v55  ;;  %v2418_v48 = vmul.f32 %v7088_v33, %v2406_v2 }
0x1794   : > { %v2428_v6 = vadd.f32 %v7094_v43, %v2416_v19  ;;  %v2431_v29 = vadd.f32 %v7092_v31, %v2419_v49  ;;  %v2429_v13 = vadd.f32 %v7094_v43, %v2417_v3  ;;  %v2430_v46 = vadd.f32 %v7092_v31, %v2418_v48 }
0x1796   : > { %2436 = vrot.lane.b32.xlu0 %v2428_v6, %s8546_s2  ;;  %2442 = vrot.lane.b32.xlu1 %v2431_v29, %s8546_s2 }
0x179a   : > { %2438 = vrot.lane.b32.xlu0 %v2429_v13, %s8546_s2 }
0x179e   : > { %2440 = vrot.lane.b32.xlu0 %v2430_v46, %s8546_s2 }
0x17a2   : > { %6017 = vrot.lane.b32.xlu0 %v6016_v7, %s8697_s1 }
0x1808   : > { %v2437_v62 = vpop.permute.xlu0 %2436  ;;  %v2443_v23 = vpop.permute.xlu1 %2442 }
0x180c   : > { %v2439_v59 = vpop.permute.xlu0 %2438 }
0x180d   : > { %v2444_v12 = vsel %vm2335_vm15, %v2437_v62, %v2439_v59 }
0x180e   : > { %2448 = vst.msk [vmem:[#allocation2 + $0x8] sm:$0xff] %vm832_vm0, %v2444_v12 }
0x1810   : > { %v2441_v30 = vpop.permute.xlu0 %2440 }
0x1811   : > { %v2445_v10 = vsel %vm2335_vm15, %v2441_v30, %v2443_v23 }
0x1812   : > { %2449 = vst.msk [vmem:[#allocation2 + $0x20] sm:$0xff] %vm832_vm0, %v2445_v10 }
0x1814   : > { %v6018_v9 = vpop.permute.xlu0 %6017 }
0x1815   : > { %v2451_v14 = vld [vmem:[#allocation2 + $0x8] sm:$0xff]  ;;  %v6019_v41 = vunpack.i.l.bf16 %v6018_v9  ;;  %v6020_v58 = vunpack.i.h.bf16 %v6018_v9 }
0x1816   : > { %2461 = vrot.lane.b32.xlu1 %v2451_v14, %s8697_s1 }
0x1819   : > { %v2453_v11 = vld [vmem:[#allocation2 + $0x20] sm:$0xff] }
0x181a   : > { %2465 = vrot.lane.b32.xlu0 %v2453_v11, %s8697_s1 }
0x1888   : > { %v2462_v38 = vpop.permute.xlu1 %2461 }
0x1889   : > { %v2467_v35 = vsel %vm1793_vm11, %v6019_v41, %v2462_v38 }
0x188a   : > { %v2471_v37 = vsel %vm7025_vm13, %v2444_v12, %v2467_v35 }
0x188b   : > { %2475 = vrot.lane.b32.xlu1 %v2471_v37, %s8666_s5 }
0x188c   : > { %v2466_v53 = vpop.permute.xlu0 %2465 }
0x188d   : > { %v2468_v55 = vsel %vm1793_vm11, %v6020_v58, %v2466_v53 }
0x188e   : > { %v2472_v61 = vsel %vm7025_vm13, %v2445_v10, %v2468_v55 }
0x188f   : > { %2477 = vrot.lane.b32.xlu0 %v2472_v61, %s8666_s5 }
0x18fd   : > { %v2476_v19 = vpop.permute.xlu1 %2475 }
0x18fe   : > { %v2481_v49 = vadd.f32 %v2476_v19, %v6952_v42  ;;  %v2482_v2 = vadd.f32 %v2476_v19, %v6963_v56 }
0x1900   : > { %2491 = vrot.lane.b32.xlu0 %v2482_v2, %s8697_s1  ;;  %2489 = vrot.lane.b32.xlu1 %v2481_v49, %s8697_s1  ;;  %v6113_v2 = vld [vmem:[%s6420_s29] sm:$0xff] }
0x1901   : > { %v2478_v3 = vpop.permute.xlu0 %2477 }
0x1902   : > { %v2483_v6 = vadd.f32 %v2478_v3, %v6969_v57  ;;  %v2484_v29 = vadd.f32 %v2478_v3, %v6955_v47 }
0x1904   : > { %2495 = vrot.lane.b32.xlu0 %v2484_v29, %s8697_s1  ;;  %2493 = vrot.lane.b32.xlu1 %v2483_v6, %s8697_s1 }
0x1908   : > { %6022 = vrot.lane.b32.xlu1 %v6016_v7, %s8544_s24 }
0x1972   : > { %v2492_v48 = vpop.permute.xlu0 %2491  ;;  %v2490_v42 = vpop.permute.xlu1 %2489 }
0x1973   : > { %v2497_v56 = vsel %vm1793_vm11, %v2490_v42, %v2492_v48 }
0x1974   : > { %2501 = vst.msk [vmem:[#allocation2 + $0x8] sm:$0xff] %vm832_vm0, %v2497_v56 }
0x1976   : > { %v2496_v13 = vpop.permute.xlu0 %2495  ;;  %v2494_v46 = vpop.permute.xlu1 %2493 }
0x1977   : > { %v2498_v62 = vsel %vm1793_vm11, %v2494_v46, %v2496_v13 }
0x1978   : > { %2502 = vst.msk [vmem:[#allocation2 + $0x20] sm:$0xff] %vm832_vm0, %v2498_v62 }
0x197a   : > { %v6023_v59 = vpop.permute.xlu1 %6022 }
0x197b   : > { %v2504_v47 = vld [vmem:[#allocation2 + $0x8] sm:$0xff]  ;;  %v6024_v7 = vunpack.i.l.bf16 %v6023_v59  ;;  %v6025_v10 = vunpack.i.h.bf16 %v6023_v59 }
0x197c   : > { %2514 = vrot.lane.b32.xlu0 %v2504_v47, %s8544_s24 }
0x197f   : > { %v2506_v57 = vld [vmem:[#allocation2 + $0x20] sm:$0xff] }
0x1980   : > { %2518 = vrot.lane.b32.xlu1 %v2506_v57, %s8544_s24 }
0x19ee   : > { %v2515_v12 = vpop.permute.xlu0 %2514 }
0x19ef   : > { %v2521_v23 = vsel %vm2520_vm1, %v6024_v7, %v2515_v12 }
0x19f0   : > { %v2525_v30 = vsel %vm6878_vm12, %v2497_v56, %v2521_v23 }
0x19f1   : > { %2529 = vrot.lane.b32.xlu0 %v2525_v30, %s8666_s5 }
0x19f2   : > { %v2519_v14 = vpop.permute.xlu1 %2518 }
0x19f3   : > { %v2522_v11 = vsel %vm2520_vm1, %v6025_v10, %v2519_v14  ;;  %v6115_v14 = vld [vmem:[%s8646_s7] sm:$0xff]  }
0x19f4   : > { %v2526_v9 = vsel %vm6878_vm12, %v2498_v62, %v2522_v11 }
0x19f5   : > { %2531 = vrot.lane.b32.xlu1 %v2526_v9, %s8666_s5  ;;  %2735 = vrot.lane.b32.xlu0 %v6580_v15, %s8635_s10 }
0x1a63   : > { %v2530_v41 = vpop.permute.xlu0 %2529 }
0x1a64   : > { %v2535_v38 = vadd.f32 %v2530_v41, %v6804_v50  ;;  %v2536_v35 = vadd.f32 %v2530_v41, %v6815_v8 }
0x1a66   : > { %2545 = vrot.lane.b32.xlu0 %v2536_v35, %s8697_s1  ;;  %2543 = vrot.lane.b32.xlu1 %v2535_v38, %s8697_s1 }
0x1a67   : > { %v2532_v37 = vpop.permute.xlu1 %2531  ;;  %v7154_v58 = vpop.permute.xlu0 %2735 }
0x1a68   : > { %8698 = vst [vmem:[#allocation54_spill] sm:$0xff] %v7154_v58  ;;  %v7157_v53 = vadd.f32 %v2532_v37, %v6822_v27  ;;  %v7160_v55 = vadd.f32 %v2532_v37, %v6807_v51  ;;  %v2738_v61 = vadd.f32 %v7154_v58, %v6576_v24  ;;  %v3684_v24 = vadd.f32 %v6580_v15, %v6578_v25  ;;  %v6114_v15 = vld [vmem:[%s6420_s29 + $0x8] sm:$0xff] }
0x1a6a   : > { %v2740_v19 = vmin.f32 %v2738_v61, 0.0  ;;  %2549 = vrot.lane.b32.xlu0 %v7160_v55, %s8697_s1  ;;  %2547 = vrot.lane.b32.xlu1 %v7157_v53, %s8697_s1  ;;  %v2739_v50 = vmax.f32 %v2738_v61, 0.0  ;;  %v3686_v3 = vmin.f32 %v3684_v24, 0.0  ;;  %v3685_v46 = vmax.f32 %v3684_v24, 0.0 }
0x1a6c   : > { %v2741_v8 = vmul.f32 %v2740_v19, %v6584_v17  ;;  %v3687_v48 = vmul.f32 %v3686_v3, %v6584_v17 }
0x1a6e   : > { %v2742_v49 = vadd.f32 %v2741_v8, %v2739_v50  ;;  %v3688_v59 = vadd.f32 %v3687_v48, %v3685_v46 }
0x1a70   : > { %v7170_v27 = vadd.f32 %v6113_v2, %v2742_v49  ;;  %v7183_v12 = vadd.f32 %v6114_v15, %v3688_v59 }
0x1a72   : > { %8699 = vst [vmem:[#allocation55_spill] sm:$0xff] %v7170_v27  ;;  %v2744_v51 = vpack.c.bf16 %v7170_v27, %v7170_v27  ;;  %8700 = vst [vmem:[#allocation56_spill] sm:$0xff] %v7183_v12  ;;  %v3690_v10 = vpack.c.bf16 %v7183_v12, %v7183_v12  ;;  %v8723_v27 = vld [vmem:[#allocation34_spill] sm:$0xff] }
0x1a74   : > { %2746 = vrot.lane.b32.xlu0 %v2744_v51, %s8635_s10  ;;  %v3692_v11 = vsel %vm1110_vm5, %v3690_v10, 0 }
0x1ad8   : > { %v2544_v6 = vpop.permute.xlu1 %2543  ;;  %v2546_v29 = vpop.permute.xlu0 %2545 }
0x1ad9   : > { %v2551_v42 = vsel %vm1793_vm11, %v2544_v6, %v2546_v29 }
0x1ada   : > { %v2555_v47 = vsel %vm832_vm0, %v2551_v42, 0.0 }
0x1adc   : > { %v2548_v56 = vpop.permute.xlu1 %2547  ;;  %v2550_v13 = vpop.permute.xlu0 %2549 }
0x1add   : > { %v2552_v62 = vsel %vm1793_vm11, %v2548_v56, %v2550_v13 }
0x1ade   : > { %v2556_v57 = vsel %vm832_vm0, %v2552_v62, 0.0 }
0x1adf   : > { %v2557_v7 = vadd.f32 %v2556_v57, %v2555_v47 }
0x1ae1   : > { %2558 = vadd.xlane.f32.xlu1 %v2557_v7 }
0x1ae6   : > { %v2747_v23 = vpop.permute.xlu0 %2746 }
0x1ae7   : > { %v2749_v30 = vsel %vm1110_vm5, %v2747_v23, 0 }
0x1ae8   : > { %5737 = vmatpush3.bf16.msra.mxu1 %v2749_v30 }
0x1ae9   : > { %5748 = vmatprep.subr.bf16.mxu1 %v7106_v60 }
0x1aeb   : > { %5739 = vmatmul.mubr.msk.bf16.vlgmr.msra.gmra.mxu1 %vm1103_vm6, %v6115_v14 }
0x1aec   : > { %5749 = vmatpush3.bf16.msra.mxu1 %v3692_v11  ;;  %5750 = vmatprep.mubr.msk.bf16.mxu1 %vm6187_vm8, %v7106_v60 }
0x1aed   : > { %5760 = vmatprep.subr.bf16.mxu1 %v7106_v60 }
0x1af3   : > { %5751 = vmatmul.mubr.msk.bf16.vlgmr.msra.gmra.mxu1 %vm1103_vm6, %v6115_v14 }
0x1af4   : > { %5762 = vmatprep.mubr.msk.bf16.mxu1 %vm6187_vm8, %v7106_v60 }
0x1b6a   : > { %v2559_v9 = vpop.xlane.xlu1 %2558 }
0x1b6b   : > { %v2560_v41 = vrot.slane %v2559_v9, 4 }
0x1b6d   : > { %v2561_v37 = vadd.f32 %v2560_v41, %v2559_v9 }
0x1b6f   : > { %v2562_v61 = vrot.slane %v2561_v37, 2 }
0x1b71   : > { %v2563_v19 = vadd.f32 %v2562_v61, %v2561_v37 }
0x1b73   : > { %v2564_v50 = vrot.slane %v2563_v19, 1 }
0x1b75   : > { %v2565_v8 = vadd.f32 %v2564_v50, %v2563_v19 }
0x1b77   : > { %5821 = vpush %v2565_v8 }
0x1ba8   : > { %s5822_s0 = spop %5821 }
0x1ba9   : > { %s2569_s12 = smul.f32 0.0009765625, %s5822_s0 }
0x1bab   : > { %v2570_v49 = vstv %s2569_s12  ;;  %v2785_v2 = vpop.f32.mrf.mxu1 }
0x1bac   : > { %v7200_v51 = vsub.f32 %v2535_v38, %v2570_v49  ;;  %v7202_v3 = vsub.f32 %v2536_v35, %v2570_v49  ;;  %v2786_v29 = vadd.f32 %v2785_v2, %v6600_v5  ;;  %v7210_v13 = vsub.f32 %v7157_v53, %v2570_v49 }
0x1bad   : > { %v5740_v24 = vpop.f32.mrf.mxu1  ;;  %v7220_v59 = vsub.f32 %v7160_v55, %v2570_v49 }
0x1bae   : > { %8701 = vst [vmem:[#allocation57_spill] sm:$0xff] %v7200_v51  ;;  %8702 = vst [vmem:[#allocation58_spill] sm:$0xff] %v7202_v3  ;;  %v2575_v6 = vmul.f32 %v7200_v51, %v7200_v51  ;;  %v2576_v38 = vmul.f32 %v7202_v3, %v7202_v3  ;;  %v2792_v35 = vsel %vm832_vm0, %v2786_v29, 0.0  ;;  %v2577_v53 = vmul.f32 %v7210_v13, %v7210_v13 }
0x1baf   : > { %v2788_v48 = vpop.f32.mrf.mxu1  ;;  %8703 = vst [vmem:[#allocation59_spill] sm:$0xff] %v7210_v13  ;;  %8704 = vst [vmem:[#allocation60_spill] sm:$0xff] %v7220_v59  ;;  %v2578_v23 = vmul.f32 %v7220_v59, %v7220_v59 }
0x1bb0   : > { %v2789_v42 = vadd.f32 %v2788_v48, %v6603_v45  ;;  %2583 = vrot.lane.b32.xlu0 %v2575_v6, %s8697_s1 }
0x1bb1   : > { %v5741_v56 = vpop.f32.mrf.mxu1 }
0x1bb2   : > { %v2793_v46 = vsel %vm832_vm0, %v2789_v42, 0.0 }
0x1bb3   : > { %v2794_v62 = vadd.f32 %v2793_v46, %v2792_v35  ;;  %v7216_v47 = vpop.f32.mrf.mxu1 }
0x1bb4   : > { %2585 = vrot.lane.b32.xlu0 %v2576_v38, %s8697_s1 }
0x1bb5   : > { %2795 = vadd.xlane.f32.xlu1 %v2794_v62  ;;  %v5752_v57 = vpop.f32.mrf.mxu1 }
0x1bb7   : > { %v7224_v7 = vpop.f32.mrf.mxu1 }
0x1bb8   : > { %2587 = vrot.lane.b32.xlu0 %v2577_v53, %s8697_s1 }
0x1bb9   : > { %v5753_v15 = vpop.f32.mrf.mxu1 }
0x1bbc   : > { %2589 = vrot.lane.b32.xlu0 %v2578_v23, %s8697_s1 }
0x1c22   : > { %v2584_v30 = vpop.permute.xlu0 %2583 }
0x1c26   : > { %v2586_v10 = vpop.permute.xlu0 %2585 }
0x1c27   : > { %v2591_v11 = vsel %vm1793_vm11, %v2584_v30, %v2586_v10 }
0x1c28   : > { %v2595_v41 = vsel %vm832_vm0, %v2591_v11, 0.0 }
0x1c2a   : > { %v2588_v14 = vpop.permute.xlu0 %2587 }
0x1c2e   : > { %v2590_v55 = vpop.permute.xlu0 %2589 }
0x1c2f   : > { %v2592_v9 = vsel %vm1793_vm11, %v2588_v14, %v2590_v55 }
0x1c30   : > { %v2596_v37 = vsel %vm832_vm0, %v2592_v9, 0.0 }
0x1c31   : > { %v2597_v61 = vadd.f32 %v2596_v37, %v2595_v41  ;;  %v2860_v37 = vmul.f32 %v7106_v60, %v6680_v34 }
0x1c33   : > { %2598 = vadd.xlane.f32.xlu0 %v2597_v61  ;;  %v2862_v61 = vmul.f32 %v7106_v60, %v6666_v28 }
0x1c3e   : > { %v2796_v48 = vpop.xlane.xlu1 %2795 }
0x1c3f   : > { %v2797_v56 = vrot.slane %v2796_v48, 4 }
0x1c41   : > { %v2798_v38 = vadd.f32 %v2797_v56, %v2796_v48 }
0x1c43   : > { %v2799_v46 = vrot.slane %v2798_v38, 2 }
0x1c45   : > { %v2800_v62 = vadd.f32 %v2799_v46, %v2798_v38 }
0x1c47   : > { %v2801_v57 = vrot.slane %v2800_v62, 1 }
0x1c49   : > { %v2802_v15 = vadd.f32 %v2801_v57, %v2800_v62 }
0x1cbc   : > { %v2599_v19 = vpop.xlane.xlu0 %2598 }
0x1cbd   : > { %v2600_v50 = vrot.slane %v2599_v19, 4 }
0x1cbf   : > { %v2601_v8 = vadd.f32 %v2600_v50, %v2599_v19 }
0x1cc1   : > { %v2602_v49 = vrot.slane %v2601_v8, 2 }
0x1cc3   : > { %v2603_v2 = vadd.f32 %v2602_v49, %v2601_v8 }
0x1cc5   : > { %v2604_v24 = vrot.slane %v2603_v2, 1 }
0x1cc7   : > { %v2605_v6 = vadd.f32 %v2604_v24, %v2603_v2 }
0x1cc9   : > { %5823 = vpush %v2605_v6 }
0x1cfa   : > { %s5824_s0 = spop %5823 }
0x1cfb   : > { %s2609_s12 = smul.f32 0.0009765625, %s5824_s0 }
0x1cfd   : > { %s2610_s24 = sadd.f32 1e-08, %s2609_s12 }
0x1cff   : > { %v2611_v35 = vstv %s2610_s24  ;;  %s8705_s24 = smov 127  }
0x1d00   : > { %6079 = vrsqrt.f32 %v2611_v35 }
0x1d0d   : > { %v6080_v53 = vpop.eup %6079 }
0x1d0e   : > { %5825 = vpush %v6080_v53 }
0x1d0f   : > { %5827 = vpush %v2802_v15 }
0x1d3f   : > { %s7234_s2 = spop %5825 }
0x1d40   : > { %s5828_s3 = spop %5827 }
0x1d41   : > { %s2806_s11 = smul.f32 0.0009765625, %s5828_s3 }
0x1d43   : > { %v2807_v23 = vstv %s2806_s11 }
0x1d44   : > { %v2808_v30 = vsub.f32 %v2786_v29, %v2807_v23  ;;  %v2809_v10 = vsub.f32 %v2789_v42, %v2807_v23 }
0x1d46   : > { %v2810_v14 = vmul.f32 %v2808_v30, %v2808_v30  ;;  %v2811_v11 = vmul.f32 %v2809_v10, %v2809_v10 }
0x1d48   : > { %v2812_v55 = vsel %vm832_vm0, %v2810_v14, 0.0  ;;  %v2813_v9 = vsel %vm832_vm0, %v2811_v11, 0.0 }
0x1d49   : > { %v2814_v41 = vadd.f32 %v2813_v9, %v2812_v55 }
0x1d4b   : > { %2815 = vadd.xlane.f32.xlu1 %v2814_v41 }
0x1d5c   : > { %2868 = vrot.lane.b32.xlu1 %v2860_v37, %s8705_s24 }
0x1d60   : > { %2872 = vrot.lane.b32.xlu1 %v2862_v61, %s8705_s24 }
0x1dd4   : > { %v2816_v29 = vpop.xlane.xlu1 %2815 }
0x1dd5   : > { %v2817_v42 = vrot.slane %v2816_v29, 4 }
0x1dd7   : > { %v2818_v19 = vadd.f32 %v2817_v42, %v2816_v29 }
0x1dd9   : > { %v2819_v50 = vrot.slane %v2818_v19, 2 }
0x1ddb   : > { %v2820_v8 = vadd.f32 %v2819_v50, %v2818_v19 }
0x1ddd   : > { %v2821_v49 = vrot.slane %v2820_v8, 1 }
0x1ddf   : > { %v2822_v2 = vadd.f32 %v2821_v49, %v2820_v8  ;;  %v8706_v8 = vld [vmem:[#allocation18_spill] sm:$0xff] }
0x1de1   : > { %5829 = vpush %v2822_v2  ;;  %v8707_v2 = vld [vmem:[#allocation19_spill] sm:$0xff] }
0x1e12   : > { %s5830_s11 = spop %5829 }
0x1e13   : > { %s2826_s3 = smul.f32 0.0009765625, %s5830_s11 }
0x1e15   : > { %s2827_s0 = sadd.f32 1e-08, %s2826_s3 }
0x1e17   : > { %v2828_v24 = vstv %s2827_s0 }
0x1e18   : > { %6081 = vrsqrt.f32 %v2828_v24 }
0x1e25   : > { %v6082_v6 = vpop.eup %6081 }
0x1e26   : > { %5831 = vpush %v6082_v6  ;;  %v2869_v6 = vpop.permute.xlu1 %2868 }
0x1e57   : > { %s5832_s12 = spop %5831 }
0x1e58   : > { %v2831_v48 = vstv %s5832_s12 }
0x1e59   : > { %v2832_v56 = vmul.f32 %v2831_v48, %v2808_v30  ;;  %v2833_v38 = vmul.f32 %v2831_v48, %v2809_v10  ;;  %v2873_v48 = vpop.permute.xlu1 %2872 }
0x1e5b   : > { %v2834_v35 = vmul.f32 %v2832_v56, %v6670_v16  ;;  %v2835_v46 = vmul.f32 %v2833_v38, %v6660_v20  ;;  %v8708_v56 = vld [vmem:[#allocation21_spill] sm:$0xff] }
0x1e5c   : > { %v2852_v38 = vmul.f32 %v7106_v60, %v8708_v56 }
0x1e5d   : > { %v2836_v62 = vadd.f32 %v2834_v35, %v6662_v21  ;;  %v2837_v57 = vadd.f32 %v2835_v46, %v6678_v39 }
0x1e5f   : > { %v2840_v53 = vmin.f32 %v2836_v62, 0.0  ;;  %v2841_v15 = vmin.f32 %v2837_v57, 0.0  ;;  %v2838_v23 = vmax.f32 %v2836_v62, 0.0  ;;  %v2839_v14 = vmax.f32 %v2837_v57, 0.0 }
0x1e61   : > { %v2842_v11 = vmul.f32 %v2840_v53, %v6664_v22  ;;  %v2843_v55 = vmul.f32 %v2841_v15, %v6664_v22 }
0x1e63   : > { %v2844_v9 = vadd.f32 %v2842_v11, %v2838_v23  ;;  %v2845_v41 = vadd.f32 %v2843_v55, %v2839_v14 }
0x1e65   : > { %2846 = vst.msk [vmem:[#allocation2 + $0x8] sm:$0xff] %vm832_vm0, %v2844_v9  ;;  %2847 = vst.msk [vmem:[#allocation2 + $0x20] sm:$0xff] %vm832_vm0, %v2845_v41 }
0x1e6c   : > { %v2851_v30 = vld [vmem:[#allocation2 + $0x20] sm:$0xff]  ;;  %v2849_v10 = vld [vmem:[#allocation2 + $0x8] sm:$0xff] }
0x1e6d   : > { %v2863_v37 = vmul.f32 %v2851_v30, %v6666_v28  ;;  %v2861_v61 = vmul.f32 %v2849_v10, %v6680_v34  ;;  %v2886_v29 = vmul.f32 %v2849_v10, %v6700_v54  ;;  %v2900_v42 = vmul.f32 %v2849_v10, %v6708_v1 }
0x1e6e   : > { %v2887_v19 = vmul.f32 %v2851_v30, %v6704_v63  ;;  %v2914_v50 = vmul.f32 %v2849_v10, %v6714_v4  ;;  %v2901_v49 = vmul.f32 %v2851_v30, %v8706_v8  ;;  %v2915_v24 = vmul.f32 %v2851_v30, %v8707_v2 }
0x1e6f   : > { %2874 = vrot.lane.b32.xlu1 %v2863_v37, %s8705_s24  ;;  %2870 = vrot.lane.b32.xlu0 %v2861_v61, %s8705_s24  ;;  %v2853_v62 = vmul.f32 %v2849_v10, %v8708_v56 }
0x1e73   : > { %2890 = vrot.lane.b32.xlu1 %v2886_v29, %s8666_s5  ;;  %2904 = vrot.lane.b32.xlu0 %v2900_v42, %s8668_s4  ;;  %v8709_v42 = vld [vmem:[#allocation20_spill] sm:$0xff] }
0x1e77   : > { %2892 = vrot.lane.b32.xlu1 %v2887_v19, %s8666_s5  ;;  %2918 = vrot.lane.b32.xlu0 %v2914_v50, %s8671_s28  ;;  %v2854_v19 = vmul.f32 %v7106_v60, %v8709_v42  ;;  %v2855_v50 = vmul.f32 %v2851_v30, %v8709_v42 }
0x1e7b   : > { %2906 = vrot.lane.b32.xlu1 %v2901_v49, %s8668_s4 }
0x1e7f   : > { %2920 = vrot.lane.b32.xlu1 %v2915_v24, %s8671_s28 }
0x1ee1   : > { %v2871_v35 = vpop.permute.xlu0 %2870  ;;  %v2875_v46 = vpop.permute.xlu1 %2874 }
0x1ee2   : > { %v2876_v57 = vsel %vm1690_vm10, %v2869_v6, %v2871_v35  ;;  %v2883_v15 = vadd.f32 %v2871_v35, %v2853_v62  ;;  %v2877_v37 = vsel %vm1690_vm10, %v2873_v48, %v2875_v46  ;;  %v2885_v6 = vadd.f32 %v2875_v46, %v2855_v50 }
0x1ee3   : > { %v2882_v53 = vadd.f32 %v2876_v57, %v2852_v38  ;;  %v2884_v24 = vadd.f32 %v2877_v37, %v2854_v19  ;;  %v8710_v38 = vld [vmem:[#allocation23_spill] sm:$0xff] }
0x1ee5   : > { %v2905_v23 = vpop.permute.xlu0 %2904  ;;  %v2891_v14 = vpop.permute.xlu1 %2890 }
0x1ee6   : > { %v2896_v11 = vadd.f32 %v2891_v14, %v2882_v53  ;;  %v2897_v55 = vadd.f32 %v2891_v14, %v2883_v15 }
0x1ee8   : > { %v2910_v9 = vadd.f32 %v2905_v23, %v2896_v11  ;;  %v2911_v41 = vadd.f32 %v2905_v23, %v2897_v55  ;;  %v8711_v55 = vld [vmem:[#allocation22_spill] sm:$0xff] }
0x1ee9   : > { %v2919_v61 = vpop.permute.xlu0 %2918  ;;  %v2893_v29 = vpop.permute.xlu1 %2892 }
0x1eea   : > { %v2924_v10 = vadd.f32 %v2919_v61, %v2910_v9  ;;  %v2925_v49 = vadd.f32 %v2919_v61, %v2911_v41  ;;  %v2898_v53 = vadd.f32 %v2893_v29, %v2884_v24  ;;  %v2899_v15 = vadd.f32 %v2893_v29, %v2885_v6 }
0x1eec   : > { %v2928_v35 = vadd.f32 %v2924_v10, %v8710_v38  ;;  %v2929_v62 = vadd.f32 %v2925_v49, %v8710_v38 }
0x1eed   : > { %v2907_v57 = vpop.permute.xlu1 %2906 }
0x1eee   : > { %2938 = vrot.lane.b32.xlu1 %v2929_v62, %s8697_s1  ;;  %2936 = vrot.lane.b32.xlu0 %v2928_v35, %s8697_s1  ;;  %v2912_v48 = vadd.f32 %v2907_v57, %v2898_v53  ;;  %v2913_v23 = vadd.f32 %v2907_v57, %v2899_v15 }
0x1ef1   : > { %v2921_v14 = vpop.permute.xlu1 %2920 }
0x1ef2   : > { %v2926_v11 = vadd.f32 %v2921_v14, %v2912_v48  ;;  %v2927_v30 = vadd.f32 %v2921_v14, %v2913_v23 }
0x1ef4   : > { %v2930_v9 = vadd.f32 %v2926_v11, %v8711_v55  ;;  %v2931_v46 = vadd.f32 %v2927_v30, %v8711_v55 }
0x1ef6   : > { %2942 = vrot.lane.b32.xlu1 %v2931_v46, %s8697_s1  ;;  %2940 = vrot.lane.b32.xlu0 %v2930_v9, %s8697_s1 }
0x1f60   : > { %v2937_v41 = vpop.permute.xlu0 %2936  ;;  %v2939_v37 = vpop.permute.xlu1 %2938 }
0x1f61   : > { %v2944_v61 = vsel %vm1793_vm11, %v2937_v41, %v2939_v37 }
0x1f62   : > { %v2948_v10 = vsel %vm832_vm0, %v2944_v61, 0.0 }
0x1f68   : > { %v2941_v29 = vpop.permute.xlu0 %2940  ;;  %v2943_v19 = vpop.permute.xlu1 %2942 }
0x1f69   : > { %v2945_v50 = vsel %vm1793_vm11, %v2941_v29, %v2943_v19 }
0x1f6a   : > { %v2949_v49 = vsel %vm832_vm0, %v2945_v50, 0.0 }
0x1f6b   : > { %v2950_v24 = vadd.f32 %v2949_v49, %v2948_v10 }
0x1f6d   : > { %2951 = vadd.xlane.f32.xlu0 %v2950_v24 }
0x1ff6   : > { %v2952_v6 = vpop.xlane.xlu0 %2951 }
0x1ff7   : > { %v2953_v57 = vrot.slane %v2952_v6, 4 }
0x1ff9   : > { %v2954_v53 = vadd.f32 %v2953_v57, %v2952_v6 }
0x1ffb   : > { %v2955_v15 = vrot.slane %v2954_v53, 2 }
0x1ffd   : > { %v2956_v48 = vadd.f32 %v2955_v15, %v2954_v53 }
0x1fff   : > { %v2957_v23 = vrot.slane %v2956_v48, 1 }
0x2001   : > { %v2958_v14 = vadd.f32 %v2957_v23, %v2956_v48 }
0x2003   : > { %5833 = vpush %v2958_v14 }
0x2034   : > { %s5834_s11 = spop %5833 }
0x2035   : > { %s2962_s3 = smul.f32 0.0009765625, %s5834_s11 }
0x2037   : > { %v2963_v11 = vstv %s2962_s3 }
0x2038   : > { %v2964_v30 = vsub.f32 %v2928_v35, %v2963_v11  ;;  %v2965_v41 = vsub.f32 %v2929_v62, %v2963_v11  ;;  %v2966_v61 = vsub.f32 %v2930_v9, %v2963_v11  ;;  %v2967_v19 = vsub.f32 %v2931_v46, %v2963_v11 }
0x203a   : > { %v2968_v37 = vmul.f32 %v2964_v30, %v2964_v30  ;;  %v2969_v29 = vmul.f32 %v2965_v41, %v2965_v41  ;;  %v2970_v50 = vmul.f32 %v2966_v61, %v2966_v61  ;;  %v2971_v10 = vmul.f32 %v2967_v19, %v2967_v19 }
0x203c   : > { %2976 = vrot.lane.b32.xlu1 %v2968_v37, %s8697_s1 }
0x2040   : > { %2978 = vrot.lane.b32.xlu1 %v2969_v29, %s8697_s1 }
0x2044   : > { %2980 = vrot.lane.b32.xlu1 %v2970_v50, %s8697_s1 }
0x2048   : > { %2982 = vrot.lane.b32.xlu1 %v2971_v10, %s8697_s1 }
0x20ae   : > { %v2977_v49 = vpop.permute.xlu1 %2976 }
0x20b2   : > { %v2979_v24 = vpop.permute.xlu1 %2978 }
0x20b3   : > { %v2984_v35 = vsel %vm1793_vm11, %v2977_v49, %v2979_v24 }
0x20b4   : > { %v2988_v9 = vsel %vm832_vm0, %v2984_v35, 0.0 }
0x20b6   : > { %v2981_v6 = vpop.permute.xlu1 %2980 }
0x20ba   : > { %v2983_v62 = vpop.permute.xlu1 %2982 }
0x20bb   : > { %v2985_v57 = vsel %vm1793_vm11, %v2981_v6, %v2983_v62  ;;  %v8712_v62 = vld [vmem:[#allocation24_spill] sm:$0xff] }
0x20bc   : > { %v2989_v53 = vsel %vm832_vm0, %v2985_v57, 0.0 }
0x20bd   : > { %v2990_v15 = vadd.f32 %v2989_v53, %v2988_v9  ;;  %v8713_v9 = vld [vmem:[#allocation25_spill] sm:$0xff] }
0x20bf   : > { %2991 = vadd.xlane.f32.xlu1 %v2990_v15 }
0x2148   : > { %v2992_v46 = vpop.xlane.xlu1 %2991 }
0x2149   : > { %v2993_v48 = vrot.slane %v2992_v46, 4 }
0x214b   : > { %v2994_v23 = vadd.f32 %v2993_v48, %v2992_v46  ;;  %v8714_v48 = vld [vmem:[#allocation26_spill] sm:$0xff] }
0x214d   : > { %v2995_v14 = vrot.slane %v2994_v23, 2 }
0x214f   : > { %v2996_v11 = vadd.f32 %v2995_v14, %v2994_v23  ;;  %v8715_v14 = vld [vmem:[#allocation27_spill] sm:$0xff] }
0x2151   : > { %v2997_v37 = vrot.slane %v2996_v11, 1 }
0x2153   : > { %v2998_v29 = vadd.f32 %v2997_v37, %v2996_v11 }
0x2155   : > { %5835 = vpush %v2998_v29  ;;  %v8717_v29 = vld [vmem:[#allocation29_spill] sm:$0xff] }
0x2186   : > { %s5836_s0 = spop %5835 }
0x2187   : > { %s3002_s12 = smul.f32 0.0009765625, %s5836_s0 }
0x2189   : > { %s3003_s11 = sadd.f32 1e-08, %s3002_s12 }
0x218b   : > { %v3004_v50 = vstv %s3003_s11 }
0x218c   : > { %6083 = vrsqrt.f32 %v3004_v50  ;;  %v3052_v50 = vmul.f32 %v7106_v60, %v8717_v29 }
0x2199   : > { %v6084_v10 = vpop.eup %6083 }
0x219a   : > { %5837 = vpush %v6084_v10 }
0x21cb   : > { %s5838_s3 = spop %5837 }
0x21cc   : > { %v3007_v49 = vstv %s5838_s3 }
0x21cd   : > { %v3008_v24 = vmul.f32 %v3007_v49, %v2964_v30  ;;  %v3009_v6 = vmul.f32 %v3007_v49, %v2965_v41  ;;  %v3010_v35 = vmul.f32 %v3007_v49, %v2966_v61  ;;  %v3011_v15 = vmul.f32 %v3007_v49, %v2967_v19  ;;  %v8716_v19 = vld [vmem:[#allocation28_spill] sm:$0xff] }
0x21ce   : > { %v3050_v37 = vmul.f32 %v7106_v60, %v8716_v19 }
0x21cf   : > { %v3012_v57 = vmul.f32 %v3008_v24, %v8712_v62  ;;  %v3014_v53 = vmul.f32 %v3010_v35, %v8713_v9  ;;  %v3013_v46 = vmul.f32 %v3009_v6, %v8712_v62  ;;  %v3015_v30 = vmul.f32 %v3011_v15, %v8713_v9 }
0x21d1   : > { %v7300_v23 = vadd.f32 %v3014_v53, %v8714_v48  ;;  %v7303_v11 = vadd.f32 %v3012_v57, %v8715_v14  ;;  %v7311_v41 = vadd.f32 %v3013_v46, %v8715_v14  ;;  %v7316_v61 = vadd.f32 %v3015_v30, %v8714_v48  ;;  %v8718_v30 = vld [vmem:[#allocation30_spill] sm:$0xff] }
0x21d3   : > { %3028 = vrot.lane.b32.xlu1 %v7300_v23, %s8697_s1  ;;  %3024 = vrot.lane.b32.xlu0 %v7303_v11, %s8697_s1 }
0x21d7   : > { %3026 = vrot.lane.b32.xlu0 %v7311_v41, %s8697_s1 }
0x21db   : > { %3030 = vrot.lane.b32.xlu0 %v7316_v61, %s8697_s1 }
0x21df   : > { %3058 = vrot.lane.b32.xlu0 %v3050_v37, %s8705_s24 }
0x21e3   : > { %3062 = vrot.lane.b32.xlu0 %v3052_v50, %s8705_s24 }
0x2245   : > { %v3025_v10 = vpop.permute.xlu0 %3024  ;;  %v3029_v6 = vpop.permute.xlu1 %3028 }
0x2249   : > { %v3027_v49 = vpop.permute.xlu0 %3026 }
0x224a   : > { %v3032_v24 = vsel %vm1793_vm11, %v3025_v10, %v3027_v49  ;;  %v8719_v10 = vld [vmem:[#allocation31_spill] sm:$0xff] }
0x224b   : > { %3036 = vst.msk [vmem:[#allocation2 + $0x8] sm:$0xff] %vm832_vm0, %v3032_v24  ;;  %v8720_v24 = vld [vmem:[#allocation33_spill] sm:$0xff] }
0x224d   : > { %v3031_v35 = vpop.permute.xlu0 %3030 }
0x224e   : > { %v3033_v57 = vsel %vm1793_vm11, %v3029_v6, %v3031_v35  ;;  %v8721_v35 = vld [vmem:[#allocation35_spill] sm:$0xff] }
0x224f   : > { %3037 = vst.msk [vmem:[#allocation2 + $0x20] sm:$0xff] %vm832_vm0, %v3033_v57 }
0x2252   : > { %v3039_v53 = vld [vmem:[#allocation2 + $0x8] sm:$0xff] }
0x2253   : > { %v3051_v15 = vmul.f32 %v3039_v53, %v8716_v19  ;;  %v3076_v37 = vmul.f32 %v3039_v53, %v8718_v30  ;;  %v3090_v49 = vmul.f32 %v3039_v53, %v8719_v10  ;;  %v3104_v57 = vmul.f32 %v3039_v53, %v8721_v35 }
0x2255   : > { %3060 = vrot.lane.b32.xlu0 %v3051_v15, %s8705_s24  ;;  %v8722_v15 = vld [vmem:[#allocation32_spill] sm:$0xff] }
0x2256   : > { %v3041_v46 = vld [vmem:[#allocation2 + $0x20] sm:$0xff] }
0x2257   : > { %v3053_v50 = vmul.f32 %v3041_v46, %v8717_v29  ;;  %v3077_v6 = vmul.f32 %v3041_v46, %v8720_v24  ;;  %v3091_v12 = vmul.f32 %v3041_v46, %v8722_v15  ;;  %v3045_v35 = vmul.f32 %v3041_v46, %v6889_v0 }
0x2259   : > { %3080 = vrot.lane.b32.xlu0 %v3076_v37, %s8666_s5  ;;  %3064 = vrot.lane.b32.xlu1 %v3053_v50, %s8705_s24  ;;  %v3105_v37 = vmul.f32 %v3041_v46, %v8723_v27  ;;  %v3059_v50 = vpop.permute.xlu0 %3058  ;;  %v3044_v27 = vmul.f32 %v7106_v60, %v6889_v0 }
0x225d   : > { %3094 = vrot.lane.b32.xlu0 %v3090_v49, %s8668_s4  ;;  %3082 = vrot.lane.b32.xlu1 %v3077_v6, %s8666_s5  ;;  %v3063_v59 = vpop.permute.xlu0 %3062  ;;  %v8724_v49 = vld [vmem:[#allocation36_spill] sm:$0xff] }
0x225e   : > { %v3042_v6 = vmul.f32 %v7106_v60, %v8724_v49  ;;  %v3043_v58 = vmul.f32 %v3039_v53, %v8724_v49  ;;  %v8725_v49 = vld [vmem:[#allocation39_spill] sm:$0xff] }
0x2261   : > { %3108 = vrot.lane.b32.xlu0 %v3104_v57, %s8671_s28  ;;  %3096 = vrot.lane.b32.xlu1 %v3091_v12, %s8668_s4 }
0x2265   : > { %3110 = vrot.lane.b32.xlu1 %v3105_v37, %s8671_s28 }
0x22c7   : > { %v3061_v13 = vpop.permute.xlu0 %3060 }
0x22c8   : > { %v3066_v3 = vsel %vm1690_vm10, %v3059_v50, %v3061_v13  ;;  %v3073_v12 = vadd.f32 %v3061_v13, %v3043_v58 }
0x22c9   : > { %v3072_v25 = vadd.f32 %v3066_v3, %v3042_v6 }
0x22cb   : > { %v3065_v51 = vpop.permute.xlu1 %3064  ;;  %v3081_v17 = vpop.permute.xlu0 %3080 }
0x22cc   : > { %v3067_v57 = vsel %vm1690_vm10, %v3063_v59, %v3065_v51  ;;  %v3086_v50 = vadd.f32 %v3081_v17, %v3072_v25  ;;  %v3087_v10 = vadd.f32 %v3081_v17, %v3073_v12  ;;  %v3075_v30 = vadd.f32 %v3065_v51, %v3045_v35  ;;  %v8726_v25 = vld [vmem:[#allocation40_spill] sm:$0xff] }
0x22cd   : > { %v3074_v24 = vadd.f32 %v3067_v57, %v3044_v27 }
0x22cf   : > { %v3083_v37 = vpop.permute.xlu1 %3082  ;;  %v3095_v15 = vpop.permute.xlu0 %3094 }
0x22d0   : > { %v3100_v29 = vadd.f32 %v3095_v15, %v3086_v50  ;;  %v3101_v19 = vadd.f32 %v3095_v15, %v3087_v10  ;;  %v3088_v53 = vadd.f32 %v3083_v37, %v3074_v24  ;;  %v3089_v3 = vadd.f32 %v3083_v37, %v3075_v30  ;;  %v8727_v10 = vld [vmem:[#allocation38_spill] sm:$0xff] }
0x22d3   : > { %v3097_v14 = vpop.permute.xlu1 %3096  ;;  %v3109_v48 = vpop.permute.xlu0 %3108 }
0x22d4   : > { %v3114_v6 = vadd.f32 %v3109_v48, %v3100_v29  ;;  %v3115_v59 = vadd.f32 %v3109_v48, %v3101_v19  ;;  %v3102_v58 = vadd.f32 %v3097_v14, %v3088_v53  ;;  %v3103_v13 = vadd.f32 %v3097_v14, %v3089_v3 }
0x22d6   : > { %v3118_v60 = vadd.f32 %v3114_v6, %v8725_v49  ;;  %v3119_v9 = vadd.f32 %v3115_v59, %v8725_v49 }
0x22d7   : > { %v3111_v62 = vpop.permute.xlu1 %3110 }
0x22d8   : > { %v3116_v46 = vadd.f32 %v3111_v62, %v3102_v58  ;;  %v3117_v27 = vadd.f32 %v3111_v62, %v3103_v13  ;;  %v3123_v17 = vmul.f32 %v3119_v9, %v8726_v25  ;;  %v3122_v51 = vmul.f32 %v3118_v60, %v8726_v25 }
0x22da   : > { %v3120_v35 = vadd.f32 %v3116_v46, %v8727_v10  ;;  %v3121_v24 = vadd.f32 %v3117_v27, %v8727_v10  ;;  %3132 = vrot.lane.b32.xlu1 %v3123_v17, %s8697_s1  ;;  %3130 = vrot.lane.b32.xlu0 %v3122_v51, %s8697_s1 }
0x22dc   : > { %v3125_v48 = vmul.f32 %v3121_v24, %v8726_v25  ;;  %v3124_v14 = vmul.f32 %v3120_v35, %v8726_v25 }
0x22de   : > { %3136 = vrot.lane.b32.xlu1 %v3125_v48, %s8697_s1  ;;  %3134 = vrot.lane.b32.xlu0 %v3124_v14, %s8697_s1 }
0x234c   : > { %v3133_v62 = vpop.permute.xlu1 %3132  ;;  %v3131_v19 = vpop.permute.xlu0 %3130 }
0x234d   : > { %v3138_v29 = vsel %vm1793_vm11, %v3131_v19, %v3133_v62 }
0x234e   : > { %v3142_v12 = vsel %vm832_vm0, %v3138_v29, 0.0 }
0x2350   : > { %v3137_v30 = vpop.permute.xlu1 %3136  ;;  %v3135_v15 = vpop.permute.xlu0 %3134 }
0x2351   : > { %v3139_v57 = vsel %vm1793_vm11, %v3135_v15, %v3137_v30 }
0x2352   : > { %v3143_v37 = vsel %vm832_vm0, %v3139_v57, 0.0 }
0x2353   : > { %v3144_v50 = vadd.f32 %v3143_v37, %v3142_v12 }
0x2355   : > { %3145 = vadd.xlane.f32.xlu0 %v3144_v50 }
0x23de   : > { %v3146_v53 = vpop.xlane.xlu0 %3145 }
0x23df   : > { %v3147_v3 = vrot.slane %v3146_v53, 4 }
0x23e1   : > { %v3148_v6 = vadd.f32 %v3147_v3, %v3146_v53 }
0x23e3   : > { %v3149_v59 = vrot.slane %v3148_v6, 2 }
0x23e5   : > { %v3150_v58 = vadd.f32 %v3149_v59, %v3148_v6 }
0x23e7   : > { %v3151_v13 = vrot.slane %v3150_v58, 1 }
0x23e9   : > { %v3152_v46 = vadd.f32 %v3151_v13, %v3150_v58 }
0x23eb   : > { %5839 = vpush %v3152_v46 }
0x241c   : > { %s5840_s0 = spop %5839 }
0x241d   : > { %s3156_s12 = smul.f32 0.001953125, %s5840_s0 }
0x241f   : > { %v3157_v27 = vstv %s3156_s12 }
0x2420   : > { %v3158_v17 = vsub.f32 %v3118_v60, %v3157_v27  ;;  %v3159_v51 = vsub.f32 %v3119_v9, %v3157_v27  ;;  %v3160_v14 = vsub.f32 %v3120_v35, %v3157_v27  ;;  %v3161_v29 = vsub.f32 %v3121_v24, %v3157_v27 }
0x2422   : > { %v3162_v48 = vmul.f32 %v3158_v17, %v3158_v17  ;;  %v3163_v62 = vmul.f32 %v3159_v51, %v3159_v51  ;;  %v3164_v30 = vmul.f32 %v3160_v14, %v3160_v14  ;;  %v3165_v57 = vmul.f32 %v3161_v29, %v3161_v29 }
0x2424   : > { %v3166_v19 = vmul.f32 %v3162_v48, %v8726_v25  ;;  %v3167_v15 = vmul.f32 %v3163_v62, %v8726_v25  ;;  %v3168_v12 = vmul.f32 %v3164_v30, %v8726_v25  ;;  %v3169_v9 = vmul.f32 %v3165_v57, %v8726_v25 }
0x2426   : > { %3174 = vrot.lane.b32.xlu1 %v3166_v19, %s8697_s1 }
0x242a   : > { %3176 = vrot.lane.b32.xlu1 %v3167_v15, %s8697_s1 }
0x242e   : > { %3178 = vrot.lane.b32.xlu1 %v3168_v12, %s8697_s1 }
0x2432   : > { %3180 = vrot.lane.b32.xlu1 %v3169_v9, %s8697_s1 }
0x2498   : > { %v3175_v60 = vpop.permute.xlu1 %3174 }
0x249c   : > { %v3177_v35 = vpop.permute.xlu1 %3176 }
0x249d   : > { %v3182_v50 = vsel %vm1793_vm11, %v3175_v60, %v3177_v35  ;;  %v8728_v35 = vld [vmem:[#allocation41_spill] sm:$0xff] }
0x249e   : > { %v3186_v3 = vsel %vm832_vm0, %v3182_v50, 0.0  ;;  %v8729_v50 = vld [vmem:[#allocation42_spill] sm:$0xff] }
0x24a0   : > { %v3179_v37 = vpop.permute.xlu1 %3178 }
0x24a4   : > { %v3181_v24 = vpop.permute.xlu1 %3180 }
0x24a5   : > { %v3183_v53 = vsel %vm1793_vm11, %v3179_v37, %v3181_v24 }
0x24a6   : > { %v3187_v6 = vsel %vm832_vm0, %v3183_v53, 0.0 }
0x24a7   : > { %v3188_v59 = vadd.f32 %v3187_v6, %v3186_v3  ;;  %v8730_v6 = vld [vmem:[#allocation43_spill] sm:$0xff] }
0x24a9   : > { %3189 = vadd.xlane.f32.xlu1 %v3188_v59 }
0x2532   : > { %v3190_v58 = vpop.xlane.xlu1 %3189 }
0x2533   : > { %v3191_v13 = vrot.slane %v3190_v58, 4 }
0x2535   : > { %v3192_v46 = vadd.f32 %v3191_v13, %v3190_v58  ;;  %v8731_v58 = vld [vmem:[#allocation44_spill] sm:$0xff] }
0x2537   : > { %v3193_v27 = vrot.slane %v3192_v46, 2 }
0x2539   : > { %v3194_v48 = vadd.f32 %v3193_v27, %v3192_v46  ;;  %v8732_v46 = vld [vmem:[#allocation45_spill] sm:$0xff] }
0x253b   : > { %v3195_v62 = vrot.slane %v3194_v48, 1 }
0x253d   : > { %v3196_v19 = vadd.f32 %v3195_v62, %v3194_v48  ;;  %v8733_v48 = vld [vmem:[#allocation46_spill] sm:$0xff] }
0x253f   : > { %5841 = vpush %v3196_v19 }
0x2570   : > { %s5842_s11 = spop %5841 }
0x2571   : > { %s3200_s3 = smul.f32 0.001953125, %s5842_s11  ;;  %s8737_s11 = smov 122  }
0x2573   : > { %s3201_s0 = sadd.f32 1e-08, %s3200_s3  ;;  %s8740_s3 = smov 120  }
0x2575   : > { %v3202_v30 = vstv %s3201_s0  ;;  %s8743_s0 = smov 4  }
0x2576   : > { %6085 = vrsqrt.f32 %v3202_v30 }
0x2583   : > { %v6086_v15 = vpop.eup %6085 }
0x2584   : > { %5843 = vpush %v6086_v15 }
0x25b5   : > { %s5844_s12 = spop %5843 }
0x25b6   : > { %v3205_v57 = vstv %s5844_s12 }
0x25b7   : > { %v3206_v12 = vmul.f32 %v3205_v57, %v3158_v17  ;;  %v3207_v9 = vmul.f32 %v3205_v57, %v3159_v51  ;;  %v3208_v60 = vmul.f32 %v3205_v57, %v3160_v14  ;;  %v3209_v53 = vmul.f32 %v3205_v57, %v3161_v29  ;;  %v7406_v29 = vld [vmem:[#allocation2] sm:$0xff] }
0x25b8   : > { %v3248_v27 = vmul.f32 %v7406_v29, %v8732_v46  ;;  %v3250_v62 = vmul.f32 %v7406_v29, %v8733_v48 }
0x25b9   : > { %v3210_v37 = vmul.f32 %v3206_v12, %v8728_v35  ;;  %v3212_v24 = vmul.f32 %v3208_v60, %v8729_v50  ;;  %v3211_v3 = vmul.f32 %v3207_v9, %v8728_v35  ;;  %v3213_v17 = vmul.f32 %v3209_v53, %v8729_v50  ;;  %v8734_v53 = vld [vmem:[#allocation47_spill] sm:$0xff] }
0x25bb   : > { %v7386_v59 = vadd.f32 %v3212_v24, %v8730_v6  ;;  %v7389_v13 = vadd.f32 %v3210_v37, %v8731_v58  ;;  %v7397_v51 = vadd.f32 %v3211_v3, %v8731_v58  ;;  %v7402_v14 = vadd.f32 %v3213_v17, %v8730_v6 }
0x25bd   : > { %3226 = vrot.lane.b32.xlu1 %v7386_v59, %s8697_s1  ;;  %3222 = vrot.lane.b32.xlu0 %v7389_v13, %s8697_s1 }
0x25c1   : > { %3224 = vrot.lane.b32.xlu0 %v7397_v51, %s8697_s1 }
0x25c5   : > { %3228 = vrot.lane.b32.xlu0 %v7402_v14, %s8697_s1 }
0x25c9   : > { %3256 = vrot.lane.b32.xlu0 %v3248_v27, %s8666_s5  ;;  %v8735_v27 = vld [vmem:[#allocation48_spill] sm:$0xff] }
0x25cd   : > { %3260 = vrot.lane.b32.xlu0 %v3250_v62, %s8666_s5 }
0x262f   : > { %v3223_v19 = vpop.permute.xlu0 %3222  ;;  %v3227_v57 = vpop.permute.xlu1 %3226 }
0x2633   : > { %v3225_v30 = vpop.permute.xlu0 %3224 }
0x2634   : > { %v3230_v15 = vsel %vm1793_vm11, %v3223_v19, %v3225_v30  ;;  %v8736_v19 = vld [vmem:[#allocation50_spill] sm:$0xff] }
0x2635   : > { %3234 = vst.msk [vmem:[#allocation2 + $0x8] sm:$0xff] %vm832_vm0, %v3230_v15  ;;  %v8738_v15 = vld [vmem:[#allocation52_spill] sm:$0xff] }
0x2637   : > { %v3229_v12 = vpop.permute.xlu0 %3228 }
0x2638   : > { %v3231_v9 = vsel %vm1793_vm11, %v3227_v57, %v3229_v12  ;;  %v8739_v12 = vld [vmem:[#allocation49_spill] sm:$0xff] }
0x2639   : > { %3235 = vst.msk [vmem:[#allocation2 + $0x20] sm:$0xff] %vm832_vm0, %v3231_v9 }
0x263c   : > { %v3237_v60 = vld [vmem:[#allocation2 + $0x8] sm:$0xff] }
0x263d   : > { %v3249_v37 = vmul.f32 %v3237_v60, %v8732_v46  ;;  %v3274_v3 = vmul.f32 %v3237_v60, %v8734_v53  ;;  %v3288_v62 = vmul.f32 %v3237_v60, %v8735_v27  ;;  %v3302_v57 = vmul.f32 %v3237_v60, %v8738_v15 }
0x263f   : > { %3258 = vrot.lane.b32.xlu0 %v3249_v37, %s8666_s5  ;;  %v8741_v37 = vld [vmem:[#allocation51_spill] sm:$0xff] }
0x2640   : > { %v3239_v24 = vld [vmem:[#allocation2 + $0x20] sm:$0xff] }
0x2641   : > { %v3251_v17 = vmul.f32 %v3239_v24, %v8733_v48  ;;  %v3275_v30 = vmul.f32 %v3239_v24, %v8736_v19  ;;  %v3289_v9 = vmul.f32 %v3239_v24, %v8739_v12  ;;  %v3243_v6 = vmul.f32 %v3239_v24, %v7036_v26 }
0x2643   : > { %3278 = vrot.lane.b32.xlu0 %v3274_v3, %s8671_s28  ;;  %3262 = vrot.lane.b32.xlu1 %v3251_v17, %s8666_s5  ;;  %v3303_v3 = vmul.f32 %v3239_v24, %v8741_v37  ;;  %v3257_v17 = vpop.permute.xlu0 %3256  ;;  %v3242_v37 = vmul.f32 %v7406_v29, %v7036_v26 }
0x2647   : > { %3292 = vrot.lane.b32.xlu0 %v3288_v62, %s8737_s11  ;;  %3280 = vrot.lane.b32.xlu1 %v3275_v30, %s8671_s28  ;;  %v3261_v27 = vpop.permute.xlu0 %3260  ;;  %v8742_v62 = vld [vmem:[#allocation53_spill] sm:$0xff] }
0x2648   : > { %v3240_v30 = vmul.f32 %v7406_v29, %v8742_v62  ;;  %v3241_v12 = vmul.f32 %v3237_v60, %v8742_v62 }
0x264b   : > { %3306 = vrot.lane.b32.xlu0 %v3302_v57, %s8740_s3  ;;  %3294 = vrot.lane.b32.xlu1 %v3289_v9, %s8737_s11 }
0x264f   : > { %3308 = vrot.lane.b32.xlu1 %v3303_v3, %s8740_s3 }
0x26b1   : > { %v3259_v53 = vpop.permute.xlu0 %3258 }
0x26b2   : > { %v3264_v19 = vsel %vm2222_vm14, %v3257_v17, %v3259_v53  ;;  %v3271_v9 = vadd.f32 %v3259_v53, %v3241_v12 }
0x26b3   : > { %v3270_v46 = vadd.f32 %v3264_v19, %v3240_v30 }
0x26b5   : > { %v3263_v48 = vpop.permute.xlu1 %3262  ;;  %v3279_v15 = vpop.permute.xlu0 %3278 }
0x26b6   : > { %v3265_v57 = vsel %vm2222_vm14, %v3261_v27, %v3263_v48  ;;  %v3284_v17 = vadd.f32 %v3279_v15, %v3270_v46  ;;  %v3285_v35 = vadd.f32 %v3279_v15, %v3271_v9  ;;  %v3273_v10 = vadd.f32 %v3263_v48, %v3243_v6 }
0x26b7   : > { %v3272_v50 = vadd.f32 %v3265_v57, %v3242_v37 }
0x26b9   : > { %v3281_v3 = vpop.permute.xlu1 %3280  ;;  %v3293_v58 = vpop.permute.xlu0 %3292 }
0x26ba   : > { %v3298_v25 = vadd.f32 %v3293_v58, %v3284_v17  ;;  %v3299_v49 = vadd.f32 %v3293_v58, %v3285_v35  ;;  %v3286_v60 = vadd.f32 %v3281_v3, %v3272_v50  ;;  %v3287_v19 = vadd.f32 %v3281_v3, %v3273_v10 }
0x26bd   : > { %v3295_v0 = vpop.permute.xlu1 %3294  ;;  %v3307_v55 = vpop.permute.xlu0 %3306 }
0x26be   : > { %v3312_v30 = vadd.f32 %v3307_v55, %v3298_v25  ;;  %v3313_v27 = vadd.f32 %v3307_v55, %v3299_v49  ;;  %v3300_v53 = vadd.f32 %v3295_v0, %v3286_v60  ;;  %v3301_v12 = vadd.f32 %v3295_v0, %v3287_v19 }
0x26c0   : > { %v3316_v62 = vadd.f32 %v3312_v30, %v7040_v32  ;;  %v3317_v38 = vadd.f32 %v3313_v27, %v7040_v32 }
0x26c1   : > { %v3309_v42 = vpop.permute.xlu1 %3308 }
0x26c2   : > { %v3314_v24 = vadd.f32 %v3309_v42, %v3300_v53  ;;  %v3315_v37 = vadd.f32 %v3309_v42, %v3301_v12  ;;  %v3321_v46 = vmul.f32 %v3317_v38, %v7052_v40  ;;  %v3320_v6 = vmul.f32 %v3316_v62, %v7052_v40 }
0x26c4   : > { %v3318_v35 = vadd.f32 %v3314_v24, %v7038_v36  ;;  %v3319_v50 = vadd.f32 %v3315_v37, %v7038_v36  ;;  %3330 = vrot.lane.b32.xlu1 %v3321_v46, %s8743_s0  ;;  %3328 = vrot.lane.b32.xlu0 %v3320_v6, %s8743_s0 }
0x26c6   : > { %v3323_v0 = vmul.f32 %v3319_v50, %v7052_v40  ;;  %v3322_v55 = vmul.f32 %v3318_v35, %v7052_v40 }
0x26c8   : > { %3334 = vrot.lane.b32.xlu1 %v3323_v0, %s8743_s0  ;;  %3332 = vrot.lane.b32.xlu0 %v3322_v55, %s8743_s0 }
0x2736   : > { %v3331_v42 = vpop.permute.xlu1 %3330  ;;  %v3329_v49 = vpop.permute.xlu0 %3328 }
0x2737   : > { %v3336_v25 = vsel %vm2335_vm15, %v3329_v49, %v3331_v42 }
0x2738   : > { %v3340_v15 = vsel %vm832_vm0, %v3336_v25, 0.0 }
0x273a   : > { %v3335_v10 = vpop.permute.xlu1 %3334  ;;  %v3333_v58 = vpop.permute.xlu0 %3332 }
0x273b   : > { %v3337_v48 = vsel %vm2335_vm15, %v3333_v58, %v3335_v10 }
0x273c   : > { %v3341_v57 = vsel %vm832_vm0, %v3337_v48, 0.0 }
0x273d   : > { %v3342_v9 = vadd.f32 %v3341_v57, %v3340_v15 }
0x273f   : > { %3343 = vadd.xlane.f32.xlu0 %v3342_v9 }
0x27c8   : > { %v3344_v3 = vpop.xlane.xlu0 %3343 }
0x27c9   : > { %v3345_v17 = vrot.slane %v3344_v3, 4 }
0x27cb   : > { %v3346_v60 = vadd.f32 %v3345_v17, %v3344_v3 }
0x27cd   : > { %v3347_v19 = vrot.slane %v3346_v60, 2 }
0x27cf   : > { %v3348_v30 = vadd.f32 %v3347_v19, %v3346_v60 }
0x27d1   : > { %v3349_v27 = vrot.slane %v3348_v30, 1 }
0x27d3   : > { %v3350_v53 = vadd.f32 %v3349_v27, %v3348_v30 }
0x27d5   : > { %5845 = vpush %v3350_v53 }
0x2806   : > { %s5846_s12 = spop %5845 }
0x2807   : > { %s3354_s14 = smul.f32 0.00390625, %s5846_s12 }
0x2809   : > { %v3355_v12 = vstv %s3354_s14 }
0x280a   : > { %v3356_v24 = vsub.f32 %v3316_v62, %v3355_v12  ;;  %v3357_v37 = vsub.f32 %v3317_v38, %v3355_v12  ;;  %v3358_v6 = vsub.f32 %v3318_v35, %v3355_v12  ;;  %v3359_v42 = vsub.f32 %v3319_v50, %v3355_v12 }
0x280c   : > { %v3360_v46 = vmul.f32 %v3356_v24, %v3356_v24  ;;  %v3361_v0 = vmul.f32 %v3357_v37, %v3357_v37  ;;  %v3362_v49 = vmul.f32 %v3358_v6, %v3358_v6  ;;  %v3363_v10 = vmul.f32 %v3359_v42, %v3359_v42 }
0x280e   : > { %v3364_v55 = vmul.f32 %v3360_v46, %v7052_v40  ;;  %v3365_v25 = vmul.f32 %v3361_v0, %v7052_v40  ;;  %v3366_v58 = vmul.f32 %v3362_v49, %v7052_v40  ;;  %v3367_v38 = vmul.f32 %v3363_v10, %v7052_v40 }
0x2810   : > { %3372 = vrot.lane.b32.xlu1 %v3364_v55, %s8743_s0 }
0x2814   : > { %3374 = vrot.lane.b32.xlu1 %v3365_v25, %s8743_s0 }
0x2818   : > { %3376 = vrot.lane.b32.xlu1 %v3366_v58, %s8743_s0 }
0x281c   : > { %3378 = vrot.lane.b32.xlu1 %v3367_v38, %s8743_s0 }
0x2882   : > { %v3373_v62 = vpop.permute.xlu1 %3372 }
0x2886   : > { %v3375_v35 = vpop.permute.xlu1 %3374 }
0x2887   : > { %v3380_v15 = vsel %vm2335_vm15, %v3373_v62, %v3375_v35 }
0x2888   : > { %v3384_v9 = vsel %vm832_vm0, %v3380_v15, 0.0 }
0x288a   : > { %v3377_v48 = vpop.permute.xlu1 %3376 }
0x288e   : > { %v3379_v50 = vpop.permute.xlu1 %3378 }
0x288f   : > { %v3381_v57 = vsel %vm2335_vm15, %v3377_v48, %v3379_v50 }
0x2890   : > { %v3385_v3 = vsel %vm832_vm0, %v3381_v57, 0.0 }
0x2891   : > { %v3386_v17 = vadd.f32 %v3385_v3, %v3384_v9 }
0x2893   : > { %3387 = vadd.xlane.f32.xlu1 %v3386_v17 }
0x291c   : > { %v3388_v60 = vpop.xlane.xlu1 %3387 }
0x291d   : > { %v3389_v19 = vrot.slane %v3388_v60, 4 }
0x291f   : > { %v3390_v30 = vadd.f32 %v3389_v19, %v3388_v60 }
0x2921   : > { %v3391_v27 = vrot.slane %v3390_v30, 2 }
0x2923   : > { %v3392_v53 = vadd.f32 %v3391_v27, %v3390_v30 }
0x2925   : > { %v3393_v12 = vrot.slane %v3392_v53, 1 }
0x2927   : > { %v3394_v46 = vadd.f32 %v3393_v12, %v3392_v53 }
0x2929   : > { %5847 = vpush %v3394_v46 }
0x295a   : > { %s5848_s14 = spop %5847 }
0x295b   : > { %s3398_s12 = smul.f32 0.00390625, %s5848_s14 }
0x295d   : > { %s3399_s15 = sadd.f32 1e-08, %s3398_s12 }
0x295f   : > { %v3400_v0 = vstv %s3399_s15  ;;  %s8744_s15 = smov 1  }
0x2960   : > { %6087 = vrsqrt.f32 %v3400_v0 }
0x296d   : > { %v6088_v55 = vpop.eup %6087 }
0x296e   : > { %5849 = vpush %v6088_v55 }
0x299f   : > { %s5850_s16 = spop %5849 }
0x29a0   : > { %v3403_v49 = vstv %s5850_s16 }
0x29a1   : > { %v3404_v25 = vmul.f32 %v3403_v49, %v3356_v24  ;;  %v3405_v10 = vmul.f32 %v3403_v49, %v3357_v37  ;;  %v3406_v58 = vmul.f32 %v3403_v49, %v3358_v6  ;;  %v3407_v35 = vmul.f32 %v3403_v49, %v3359_v42 }
0x29a2   : > { %v6026_v6 = vpack.i.bf16 %v7406_v29, %v7406_v29 }
0x29a3   : > { %v3408_v38 = vmul.f32 %v3404_v25, %v7086_v52  ;;  %v3410_v62 = vmul.f32 %v3406_v58, %v7088_v33  ;;  %v3409_v48 = vmul.f32 %v3405_v10, %v7086_v52  ;;  %v3411_v57 = vmul.f32 %v3407_v35, %v7088_v33 }
0x29a5   : > { %v3414_v15 = vadd.f32 %v3410_v62, %v7092_v31  ;;  %v3412_v50 = vadd.f32 %v3408_v38, %v7094_v43  ;;  %v3413_v24 = vadd.f32 %v3409_v48, %v7094_v43  ;;  %v3415_v37 = vadd.f32 %v3411_v57, %v7092_v31 }
0x29a7   : > { %3424 = vrot.lane.b32.xlu1 %v3414_v15, %s8743_s0  ;;  %3420 = vrot.lane.b32.xlu0 %v3412_v50, %s8743_s0 }
0x29ab   : > { %3422 = vrot.lane.b32.xlu0 %v3413_v24, %s8743_s0 }
0x29af   : > { %3426 = vrot.lane.b32.xlu0 %v3415_v37, %s8743_s0 }
0x29b3   : > { %6027 = vrot.lane.b32.xlu0 %v6026_v6, %s8697_s1 }
0x2a19   : > { %v3421_v42 = vpop.permute.xlu0 %3420  ;;  %v3425_v17 = vpop.permute.xlu1 %3424 }
0x2a1d   : > { %v3423_v9 = vpop.permute.xlu0 %3422 }
0x2a1e   : > { %v3428_v3 = vsel %vm2335_vm15, %v3421_v42, %v3423_v9 }
0x2a1f   : > { %3432 = vst.msk [vmem:[#allocation2 + $0x8] sm:$0xff] %vm832_vm0, %v3428_v3 }
0x2a21   : > { %v3427_v60 = vpop.permute.xlu0 %3426 }
0x2a22   : > { %v3429_v19 = vsel %vm2335_vm15, %v3425_v17, %v3427_v60 }
0x2a23   : > { %3433 = vst.msk [vmem:[#allocation2 + $0x20] sm:$0xff] %vm832_vm0, %v3429_v19 }
0x2a25   : > { %v6028_v53 = vpop.permute.xlu0 %6027 }
0x2a26   : > { %v3435_v30 = vld [vmem:[#allocation2 + $0x8] sm:$0xff]  ;;  %v6029_v12 = vunpack.i.l.bf16 %v6028_v53  ;;  %v6030_v49 = vunpack.i.h.bf16 %v6028_v53 }
0x2a27   : > { %3444 = vrot.lane.b32.xlu0 %v3435_v30, %s8697_s1 }
0x2a2a   : > { %v3437_v27 = vld [vmem:[#allocation2 + $0x20] sm:$0xff] }
0x2a2b   : > { %3448 = vrot.lane.b32.xlu0 %v3437_v27, %s8697_s1 }
0x2a99   : > { %v3445_v46 = vpop.permute.xlu0 %3444 }
0x2a9a   : > { %v3450_v0 = vsel %vm1793_vm11, %v6029_v12, %v3445_v46 }
0x2a9b   : > { %v3454_v55 = vsel %vm7025_vm13, %v3428_v3, %v3450_v0 }
0x2a9c   : > { %3458 = vrot.lane.b32.xlu1 %v3454_v55, %s8666_s5 }
0x2a9d   : > { %v3449_v25 = vpop.permute.xlu0 %3448 }
0x2a9e   : > { %v3451_v10 = vsel %vm1793_vm11, %v6030_v49, %v3449_v25 }
0x2a9f   : > { %v3455_v58 = vsel %vm7025_vm13, %v3429_v19, %v3451_v10 }
0x2aa0   : > { %3460 = vrot.lane.b32.xlu0 %v3455_v58, %s8666_s5 }
0x2b0e   : > { %v3459_v38 = vpop.permute.xlu1 %3458 }
0x2b0f   : > { %v3464_v62 = vadd.f32 %v3459_v38, %v7389_v13  ;;  %v3465_v35 = vadd.f32 %v3459_v38, %v7397_v51 }
0x2b11   : > { %3474 = vrot.lane.b32.xlu0 %v3465_v35, %s8697_s1  ;;  %3472 = vrot.lane.b32.xlu1 %v3464_v62, %s8697_s1 }
0x2b12   : > { %v3461_v48 = vpop.permute.xlu0 %3460 }
0x2b13   : > { %v3466_v15 = vadd.f32 %v3461_v48, %v7386_v59  ;;  %v3467_v50 = vadd.f32 %v3461_v48, %v7402_v14 }
0x2b15   : > { %3478 = vrot.lane.b32.xlu0 %v3467_v50, %s8697_s1  ;;  %3476 = vrot.lane.b32.xlu1 %v3466_v15, %s8697_s1 }
0x2b19   : > { %6032 = vrot.lane.b32.xlu1 %v6026_v6, %s8744_s15 }
0x2b83   : > { %v3475_v57 = vpop.permute.xlu0 %3474  ;;  %v3473_v24 = vpop.permute.xlu1 %3472 }
0x2b84   : > { %v3480_v13 = vsel %vm1793_vm11, %v3473_v24, %v3475_v57 }
0x2b85   : > { %3484 = vst.msk [vmem:[#allocation2 + $0x8] sm:$0xff] %vm832_vm0, %v3480_v13 }
0x2b87   : > { %v3479_v51 = vpop.permute.xlu0 %3478  ;;  %v3477_v37 = vpop.permute.xlu1 %3476 }
0x2b88   : > { %v3481_v42 = vsel %vm1793_vm11, %v3477_v37, %v3479_v51 }
0x2b89   : > { %3485 = vst.msk [vmem:[#allocation2 + $0x20] sm:$0xff] %vm832_vm0, %v3481_v42 }
0x2b8b   : > { %v6033_v9 = vpop.permute.xlu1 %6032 }
0x2b8c   : > { %v3487_v59 = vld [vmem:[#allocation2 + $0x8] sm:$0xff]  ;;  %v6034_v6 = vunpack.i.l.bf16 %v6033_v9  ;;  %v6035_v19 = vunpack.i.h.bf16 %v6033_v9 }
0x2b8d   : > { %3496 = vrot.lane.b32.xlu0 %v3487_v59, %s8744_s15 }
0x2b90   : > { %v3489_v14 = vld [vmem:[#allocation2 + $0x20] sm:$0xff] }
0x2b91   : > { %3500 = vrot.lane.b32.xlu1 %v3489_v14, %s8744_s15 }
0x2bff   : > { %v3497_v3 = vpop.permute.xlu0 %3496 }
0x2c00   : > { %v3502_v17 = vsel %vm2520_vm1, %v6034_v6, %v3497_v3 }
0x2c01   : > { %v3506_v60 = vsel %vm6878_vm12, %v3480_v13, %v3502_v17 }
0x2c02   : > { %3510 = vrot.lane.b32.xlu0 %v3506_v60, %s8666_s5 }
0x2c03   : > { %v3501_v30 = vpop.permute.xlu1 %3500 }
0x2c04   : > { %v3503_v27 = vsel %vm2520_vm1, %v6035_v19, %v3501_v30 }
0x2c05   : > { %v3507_v53 = vsel %vm6878_vm12, %v3481_v42, %v3503_v27 }
0x2c06   : > { %3512 = vrot.lane.b32.xlu1 %v3507_v53, %s8666_s5 }
0x2c74   : > { %v3511_v12 = vpop.permute.xlu0 %3510 }
0x2c75   : > { %v3516_v46 = vadd.f32 %v3511_v12, %v7303_v11  ;;  %v3517_v0 = vadd.f32 %v3511_v12, %v7311_v41  ;;  %v7533_v11 = vadd.f32 %v7224_v7, %v6603_v45 }
0x2c77   : > { %3526 = vrot.lane.b32.xlu1 %v3517_v0, %s8697_s1  ;;  %3524 = vrot.lane.b32.xlu0 %v3516_v46, %s8697_s1  ;;  %v3736_v50 = vsel %vm832_vm0, %v7533_v11, 0.0 }
0x2c78   : > { %v3513_v55 = vpop.permute.xlu1 %3512 }
0x2c79   : > { %v3518_v49 = vadd.f32 %v3513_v55, %v7300_v23  ;;  %v3519_v25 = vadd.f32 %v3513_v55, %v7316_v61  ;;  %v7538_v23 = vadd.f32 %v7216_v47, %v6600_v5 }
0x2c7b   : > { %3530 = vrot.lane.b32.xlu1 %v3519_v25, %s8697_s1  ;;  %3528 = vrot.lane.b32.xlu0 %v3518_v49, %s8697_s1  ;;  %v3735_v7 = vsel %vm832_vm0, %v7538_v23, 0.0 }
0x2c7c   : > { %v3737_v57 = vadd.f32 %v3736_v50, %v3735_v7 }
0x2ce9   : > { %v3527_v10 = vpop.permute.xlu1 %3526  ;;  %v3525_v58 = vpop.permute.xlu0 %3524 }
0x2cea   : > { %v3532_v38 = vsel %vm1793_vm11, %v3525_v58, %v3527_v10 }
0x2ceb   : > { %v3536_v61 = vsel %vm832_vm0, %v3532_v38, 0.0 }
0x2ced   : > { %v3531_v41 = vpop.permute.xlu1 %3530  ;;  %v3529_v62 = vpop.permute.xlu0 %3528 }
0x2cee   : > { %v3533_v35 = vsel %vm1793_vm11, %v3529_v62, %v3531_v41 }
0x2cef   : > { %v3537_v48 = vsel %vm832_vm0, %v3533_v35, 0.0 }
0x2cf0   : > { %v3538_v15 = vadd.f32 %v3537_v48, %v3536_v61 }
0x2cf2   : > { %3539 = vadd.xlane.f32.xlu0 %v3538_v15 }
0x2cf6   : > { %3738 = vadd.xlane.f32.xlu0 %v3737_v57 }
0x2d7b   : > { %v3540_v24 = vpop.xlane.xlu0 %3539 }
0x2d7c   : > { %v3541_v13 = vrot.slane %v3540_v24, 4 }
0x2d7e   : > { %v3542_v51 = vadd.f32 %v3541_v13, %v3540_v24 }
0x2d7f   : > { %v3739_v50 = vpop.xlane.xlu0 %3738 }
0x2d80   : > { %v3543_v37 = vrot.slane %v3542_v51, 2  ;;  %v3740_v7 = vrot.slane %v3739_v50, 4 }
0x2d82   : > { %v3544_v47 = vadd.f32 %v3543_v37, %v3542_v51  ;;  %v3741_v57 = vadd.f32 %v3740_v7, %v3739_v50 }
0x2d84   : > { %v3545_v42 = vrot.slane %v3544_v47, 1  ;;  %v3742_v13 = vrot.slane %v3741_v57, 2 }
0x2d86   : > { %v3546_v59 = vadd.f32 %v3545_v42, %v3544_v47  ;;  %v3743_v51 = vadd.f32 %v3742_v13, %v3741_v57 }
0x2d88   : > { %5851 = vpush %v3546_v59  ;;  %v3744_v37 = vrot.slane %v3743_v51, 1 }
0x2d8a   : > { %v3745_v42 = vadd.f32 %v3744_v37, %v3743_v51 }
0x2db9   : > { %s5852_s16 = spop %5851 }
0x2dba   : > { %s3550_s14 = smul.f32 0.0009765625, %s5852_s16 }
0x2dbc   : > { %v3551_v14 = vstv %s3550_s14 }
0x2dbd   : > { %v7546_v9 = vsub.f32 %v3516_v46, %v3551_v14  ;;  %v7548_v6 = vsub.f32 %v3517_v0, %v3551_v14  ;;  %v7553_v17 = vsub.f32 %v3518_v49, %v3551_v14  ;;  %v7558_v19 = vsub.f32 %v3519_v25, %v3551_v14 }
0x2dbf   : > { %8745 = vst [vmem:[#allocation18_spill] sm:$0xff] %v7546_v9  ;;  %8746 = vst [vmem:[#allocation19_spill] sm:$0xff] %v7548_v6  ;;  %v3556_v3 = vmul.f32 %v7546_v9, %v7546_v9  ;;  %v3557_v60 = vmul.f32 %v7548_v6, %v7548_v6  ;;  %v3558_v30 = vmul.f32 %v7553_v17, %v7553_v17  ;;  %v8765_v6 = vld [vmem:[#allocation37_spill] sm:$0xff] }
0x2dc0   : > { %8747 = vst [vmem:[#allocation21_spill] sm:$0xff] %v7553_v17  ;;  %8748 = vst [vmem:[#allocation61_spill] sm:$0xff] %v7558_v19  ;;  %v3559_v27 = vmul.f32 %v7558_v19, %v7558_v19 }
0x2dc1   : > { %3564 = vrot.lane.b32.xlu1 %v3556_v3, %s8697_s1 }
0x2dc5   : > { %3566 = vrot.lane.b32.xlu1 %v3557_v60, %s8697_s1 }
0x2dc9   : > { %3568 = vrot.lane.b32.xlu1 %v3558_v30, %s8697_s1 }
0x2dcd   : > { %3570 = vrot.lane.b32.xlu1 %v3559_v27, %s8697_s1 }
0x2e33   : > { %v3565_v53 = vpop.permute.xlu1 %3564 }
0x2e37   : > { %v3567_v12 = vpop.permute.xlu1 %3566 }
0x2e38   : > { %v3572_v0 = vsel %vm1793_vm11, %v3565_v53, %v3567_v12 }
0x2e39   : > { %v3576_v25 = vsel %vm832_vm0, %v3572_v0, 0.0  ;;  %v3805_v0 = vmul.f32 %v7406_v29, %v6666_v28 }
0x2e3b   : > { %v3569_v46 = vpop.permute.xlu1 %3568 }
0x2e3f   : > { %v3571_v55 = vpop.permute.xlu1 %3570 }
0x2e40   : > { %v3573_v49 = vsel %vm1793_vm11, %v3569_v46, %v3571_v55  ;;  %v3803_v46 = vmul.f32 %v7406_v29, %v6680_v34 }
0x2e41   : > { %v3577_v10 = vsel %vm832_vm0, %v3573_v49, 0.0 }
0x2e42   : > { %v3578_v58 = vadd.f32 %v3577_v10, %v3576_v25 }
0x2e44   : > { %3579 = vadd.xlane.f32.xlu1 %v3578_v58 }
0x2ecd   : > { %v3580_v38 = vpop.xlane.xlu1 %3579 }
0x2ece   : > { %v3581_v41 = vrot.slane %v3580_v38, 4 }
0x2ed0   : > { %v3582_v62 = vadd.f32 %v3581_v41, %v3580_v38 }
0x2ed2   : > { %v3583_v35 = vrot.slane %v3582_v62, 2 }
0x2ed4   : > { %v3584_v61 = vadd.f32 %v3583_v35, %v3582_v62 }
0x2ed6   : > { %v3585_v48 = vrot.slane %v3584_v61, 1 }
0x2ed8   : > { %v3586_v15 = vadd.f32 %v3585_v48, %v3584_v61 }
0x2eda   : > { %5853 = vpush %v3586_v15 }
0x2f0b   : > { %s5854_s12 = spop %5853 }
0x2f0c   : > { %s3590_s16 = smul.f32 0.0009765625, %s5854_s12 }
0x2f0e   : > { %s3591_s14 = sadd.f32 1e-08, %s3590_s16 }
0x2f10   : > { %v3592_v24 = vstv %s3591_s14 }
0x2f11   : > { %6089 = vrsqrt.f32 %v3592_v24 }
0x2f1e   : > { %v6090_v47 = vpop.eup %6089 }
0x2f1f   : > { %5855 = vpush %v6090_v47 }
0x2f20   : > { %5857 = vpush %v3745_v42 }
0x2f50   : > { %s7570_s18 = spop %5855 }
0x2f51   : > { %s5858_s19 = spop %5857 }
0x2f52   : > { %s3749_s20 = smul.f32 0.0009765625, %s5858_s19 }
0x2f54   : > { %v3750_v59 = vstv %s3749_s20 }
0x2f55   : > { %v3751_v14 = vsub.f32 %v7538_v23, %v3750_v59  ;;  %v3752_v3 = vsub.f32 %v7533_v11, %v3750_v59 }
0x2f57   : > { %v3753_v60 = vmul.f32 %v3751_v14, %v3751_v14  ;;  %v3754_v30 = vmul.f32 %v3752_v3, %v3752_v3 }
0x2f59   : > { %v3755_v27 = vsel %vm832_vm0, %v3753_v60, 0.0  ;;  %v3756_v53 = vsel %vm832_vm0, %v3754_v30, 0.0 }
0x2f5a   : > { %v3757_v12 = vadd.f32 %v3756_v53, %v3755_v27 }
0x2f5c   : > { %3758 = vadd.xlane.f32.xlu0 %v3757_v12 }
0x2f72   : > { %3811 = vrot.lane.b32.xlu0 %v3803_v46, %s8705_s24 }
0x2f76   : > { %3815 = vrot.lane.b32.xlu0 %v3805_v0, %s8705_s24 }
0x2fe5   : > { %v3759_v23 = vpop.xlane.xlu0 %3758 }
0x2fe6   : > { %v3760_v11 = vrot.slane %v3759_v23, 4 }
0x2fe8   : > { %v3761_v55 = vadd.f32 %v3760_v11, %v3759_v23 }
0x2fe9   : > { %v3812_v11 = vpop.permute.xlu0 %3811 }
0x2fea   : > { %v3762_v49 = vrot.slane %v3761_v55, 2 }
0x2fec   : > { %v3763_v25 = vadd.f32 %v3762_v49, %v3761_v55 }
0x2fed   : > { %v3816_v55 = vpop.permute.xlu0 %3815 }
0x2fee   : > { %v3764_v10 = vrot.slane %v3763_v25, 1 }
0x2ff0   : > { %v3765_v58 = vadd.f32 %v3764_v10, %v3763_v25 }
0x2ff2   : > { %5859 = vpush %v3765_v58  ;;  %v3795_v58 = vmul.f32 %v7406_v29, %v8708_v56 }
0x3023   : > { %s5860_s19 = spop %5859 }
0x3024   : > { %s3769_s20 = smul.f32 0.0009765625, %s5860_s19 }
0x3026   : > { %s3770_s12 = sadd.f32 1e-08, %s3769_s20 }
0x3028   : > { %v3771_v38 = vstv %s3770_s12 }
0x3029   : > { %6091 = vrsqrt.f32 %v3771_v38 }
0x3036   : > { %v6092_v41 = vpop.eup %6091 }
0x3037   : > { %5861 = vpush %v6092_v41 }
0x3068   : > { %s5862_s16 = spop %5861 }
0x3069   : > { %v3774_v62 = vstv %s5862_s16 }
0x306a   : > { %v3775_v35 = vmul.f32 %v3774_v62, %v3751_v14  ;;  %v3776_v61 = vmul.f32 %v3774_v62, %v3752_v3 }
0x306c   : > { %v3777_v48 = vmul.f32 %v3775_v35, %v6670_v16  ;;  %v3778_v15 = vmul.f32 %v3776_v61, %v6660_v20 }
0x306e   : > { %v3779_v50 = vadd.f32 %v3777_v48, %v6662_v21  ;;  %v3780_v7 = vadd.f32 %v3778_v15, %v6678_v39  ;;  %v8749_v48 = vld [vmem:[#allocation20_spill] sm:$0xff] }
0x306f   : > { %v3797_v15 = vmul.f32 %v7406_v29, %v8749_v48 }
0x3070   : > { %v3783_v57 = vmin.f32 %v3779_v50, 0.0  ;;  %v3784_v24 = vmin.f32 %v3780_v7, 0.0  ;;  %v3781_v13 = vmax.f32 %v3779_v50, 0.0  ;;  %v3782_v51 = vmax.f32 %v3780_v7, 0.0 }
0x3072   : > { %v3785_v37 = vmul.f32 %v3783_v57, %v6664_v22  ;;  %v3786_v47 = vmul.f32 %v3784_v24, %v6664_v22 }
0x3074   : > { %v3787_v42 = vadd.f32 %v3785_v37, %v3781_v13  ;;  %v3788_v59 = vadd.f32 %v3786_v47, %v3782_v51 }
0x3076   : > { %3789 = vst.msk [vmem:[#allocation2 + $0x8] sm:$0xff] %vm832_vm0, %v3787_v42  ;;  %3790 = vst.msk [vmem:[#allocation2 + $0x20] sm:$0xff] %vm832_vm0, %v3788_v59 }
0x307d   : > { %v3794_v14 = vld [vmem:[#allocation2 + $0x20] sm:$0xff]  ;;  %v3792_v3 = vld [vmem:[#allocation2 + $0x8] sm:$0xff] }
0x307e   : > { %v3806_v60 = vmul.f32 %v3794_v14, %v6666_v28  ;;  %v3804_v30 = vmul.f32 %v3792_v3, %v6680_v34  ;;  %v3829_v27 = vmul.f32 %v3792_v3, %v6700_v54  ;;  %v3830_v53 = vmul.f32 %v3794_v14, %v6704_v63 }
0x307f   : > { %v3843_v12 = vmul.f32 %v3792_v3, %v6708_v1  ;;  %v3844_v46 = vmul.f32 %v3794_v14, %v8706_v8  ;;  %v3857_v0 = vmul.f32 %v3792_v3, %v6714_v4  ;;  %v3858_v23 = vmul.f32 %v3794_v14, %v8707_v2 }
0x3080   : > { %3817 = vrot.lane.b32.xlu0 %v3806_v60, %s8705_s24  ;;  %3813 = vrot.lane.b32.xlu1 %v3804_v30, %s8705_s24  ;;  %v3796_v35 = vmul.f32 %v3792_v3, %v8708_v56  ;;  %v3798_v7 = vmul.f32 %v3794_v14, %v8749_v48 }
0x3084   : > { %3833 = vrot.lane.b32.xlu0 %v3829_v27, %s8666_s5  ;;  %3835 = vrot.lane.b32.xlu1 %v3830_v53, %s8666_s5 }
0x3088   : > { %3847 = vrot.lane.b32.xlu0 %v3843_v12, %s8668_s4  ;;  %3849 = vrot.lane.b32.xlu1 %v3844_v46, %s8668_s4 }
0x308c   : > { %3861 = vrot.lane.b32.xlu0 %v3857_v0, %s8671_s28  ;;  %3863 = vrot.lane.b32.xlu1 %v3858_v23, %s8671_s28 }
0x30f2   : > { %v3814_v49 = vpop.permute.xlu1 %3813  ;;  %v3818_v25 = vpop.permute.xlu0 %3817 }
0x30f3   : > { %v3819_v10 = vsel %vm1690_vm10, %v3812_v11, %v3814_v49  ;;  %v3820_v38 = vsel %vm1690_vm10, %v3816_v55, %v3818_v25  ;;  %v3826_v50 = vadd.f32 %v3814_v49, %v3796_v35  ;;  %v3828_v51 = vadd.f32 %v3818_v25, %v3798_v7  ;;  %v8750_v55 = vld [vmem:[#allocation23_spill] sm:$0xff]  ;;  %v8751_v25 = vld [vmem:[#allocation22_spill] sm:$0xff] }
0x30f4   : > { %v3825_v61 = vadd.f32 %v3819_v10, %v3795_v58  ;;  %v3827_v57 = vadd.f32 %v3820_v38, %v3797_v15 }
0x30f6   : > { %v3836_v41 = vpop.permute.xlu1 %3835  ;;  %v3834_v62 = vpop.permute.xlu0 %3833 }
0x30f7   : > { %v3839_v37 = vadd.f32 %v3834_v62, %v3825_v61  ;;  %v3840_v47 = vadd.f32 %v3834_v62, %v3826_v50  ;;  %v3841_v42 = vadd.f32 %v3836_v41, %v3827_v57  ;;  %v3842_v59 = vadd.f32 %v3836_v41, %v3828_v51 }
0x30fa   : > { %v3850_v24 = vpop.permute.xlu1 %3849  ;;  %v3848_v13 = vpop.permute.xlu0 %3847 }
0x30fb   : > { %v3853_v60 = vadd.f32 %v3848_v13, %v3839_v37  ;;  %v3854_v30 = vadd.f32 %v3848_v13, %v3840_v47  ;;  %v3855_v3 = vadd.f32 %v3850_v24, %v3841_v42  ;;  %v3856_v12 = vadd.f32 %v3850_v24, %v3842_v59 }
0x30fe   : > { %v3864_v27 = vpop.permute.xlu1 %3863  ;;  %v3862_v53 = vpop.permute.xlu0 %3861 }
0x30ff   : > { %v3867_v46 = vadd.f32 %v3862_v53, %v3853_v60  ;;  %v3868_v0 = vadd.f32 %v3862_v53, %v3854_v30  ;;  %v3869_v23 = vadd.f32 %v3864_v27, %v3855_v3  ;;  %v3870_v11 = vadd.f32 %v3864_v27, %v3856_v12 }
0x3101   : > { %v3871_v14 = vadd.f32 %v3867_v46, %v8750_v55  ;;  %v3872_v49 = vadd.f32 %v3868_v0, %v8750_v55  ;;  %v3873_v10 = vadd.f32 %v3869_v23, %v8751_v25  ;;  %v3874_v58 = vadd.f32 %v3870_v11, %v8751_v25 }
0x3103   : > { %3881 = vrot.lane.b32.xlu1 %v3872_v49, %s8697_s1  ;;  %3879 = vrot.lane.b32.xlu0 %v3871_v14, %s8697_s1 }
0x3107   : > { %3885 = vrot.lane.b32.xlu1 %v3874_v58, %s8697_s1  ;;  %3883 = vrot.lane.b32.xlu0 %v3873_v10, %s8697_s1 }
0x3175   : > { %v3882_v38 = vpop.permute.xlu1 %3881  ;;  %v3880_v41 = vpop.permute.xlu0 %3879 }
0x3176   : > { %v3887_v62 = vsel %vm1793_vm11, %v3880_v41, %v3882_v38 }
0x3177   : > { %v3891_v50 = vsel %vm832_vm0, %v3887_v62, 0.0 }
0x3179   : > { %v3886_v35 = vpop.permute.xlu1 %3885  ;;  %v3884_v61 = vpop.permute.xlu0 %3883 }
0x317a   : > { %v3888_v15 = vsel %vm1793_vm11, %v3884_v61, %v3886_v35 }
0x317b   : > { %v3892_v7 = vsel %vm832_vm0, %v3888_v15, 0.0 }
0x317c   : > { %v3893_v57 = vadd.f32 %v3892_v7, %v3891_v50 }
0x317e   : > { %3894 = vadd.xlane.f32.xlu0 %v3893_v57 }
0x3207   : > { %v3895_v24 = vpop.xlane.xlu0 %3894 }
0x3208   : > { %v3896_v13 = vrot.slane %v3895_v24, 4 }
0x320a   : > { %v3897_v51 = vadd.f32 %v3896_v13, %v3895_v24 }
0x320c   : > { %v3898_v37 = vrot.slane %v3897_v51, 2 }
0x320e   : > { %v3899_v47 = vadd.f32 %v3898_v37, %v3897_v51 }
0x3210   : > { %v3900_v42 = vrot.slane %v3899_v47, 1 }
0x3212   : > { %v3901_v59 = vadd.f32 %v3900_v42, %v3899_v47 }
0x3214   : > { %5863 = vpush %v3901_v59 }
0x3245   : > { %s5864_s14 = spop %5863 }
0x3246   : > { %s3905_s19 = smul.f32 0.0009765625, %s5864_s14 }
0x3248   : > { %v3906_v60 = vstv %s3905_s19 }
0x3249   : > { %v3907_v30 = vsub.f32 %v3871_v14, %v3906_v60  ;;  %v3908_v27 = vsub.f32 %v3872_v49, %v3906_v60  ;;  %v3909_v3 = vsub.f32 %v3873_v10, %v3906_v60  ;;  %v3910_v46 = vsub.f32 %v3874_v58, %v3906_v60 }
0x324b   : > { %v3911_v53 = vmul.f32 %v3907_v30, %v3907_v30  ;;  %v3912_v12 = vmul.f32 %v3908_v27, %v3908_v27  ;;  %v3913_v0 = vmul.f32 %v3909_v3, %v3909_v3  ;;  %v3914_v23 = vmul.f32 %v3910_v46, %v3910_v46 }
0x324d   : > { %3919 = vrot.lane.b32.xlu1 %v3911_v53, %s8697_s1  ;;  %v8752_v53 = vld [vmem:[#allocation24_spill] sm:$0xff] }
0x3251   : > { %3921 = vrot.lane.b32.xlu1 %v3912_v12, %s8697_s1 }
0x3255   : > { %3923 = vrot.lane.b32.xlu1 %v3913_v0, %s8697_s1  ;;  %v8753_v0 = vld [vmem:[#allocation25_spill] sm:$0xff] }
0x3259   : > { %3925 = vrot.lane.b32.xlu1 %v3914_v23, %s8697_s1 }
0x32bf   : > { %v3920_v11 = vpop.permute.xlu1 %3919 }
0x32c3   : > { %v3922_v38 = vpop.permute.xlu1 %3921 }
0x32c4   : > { %v3927_v14 = vsel %vm1793_vm11, %v3920_v11, %v3922_v38 }
0x32c5   : > { %v3931_v10 = vsel %vm832_vm0, %v3927_v14, 0.0 }
0x32c7   : > { %v3924_v41 = vpop.permute.xlu1 %3923 }
0x32cb   : > { %v3926_v49 = vpop.permute.xlu1 %3925 }
0x32cc   : > { %v3928_v62 = vsel %vm1793_vm11, %v3924_v41, %v3926_v49  ;;  %v8754_v41 = vld [vmem:[#allocation26_spill] sm:$0xff]  ;;  %v8755_v49 = vld [vmem:[#allocation27_spill] sm:$0xff] }
0x32cd   : > { %v3932_v35 = vsel %vm832_vm0, %v3928_v62, 0.0 }
0x32ce   : > { %v3933_v61 = vadd.f32 %v3932_v35, %v3931_v10  ;;  %v8757_v35 = vld [vmem:[#allocation29_spill] sm:$0xff] }
0x32d0   : > { %3934 = vadd.xlane.f32.xlu1 %v3933_v61  ;;  %v3995_v61 = vmul.f32 %v7406_v29, %v8757_v35 }
0x3359   : > { %v3935_v58 = vpop.xlane.xlu1 %3934 }
0x335a   : > { %v3936_v15 = vrot.slane %v3935_v58, 4 }
0x335c   : > { %v3937_v50 = vadd.f32 %v3936_v15, %v3935_v58 }
0x335e   : > { %v3938_v7 = vrot.slane %v3937_v50, 2 }
0x3360   : > { %v3939_v57 = vadd.f32 %v3938_v7, %v3937_v50 }
0x3362   : > { %v3940_v24 = vrot.slane %v3939_v57, 1 }
0x3364   : > { %v3941_v13 = vadd.f32 %v3940_v24, %v3939_v57 }
0x3366   : > { %5865 = vpush %v3941_v13 }
0x3397   : > { %s5866_s20 = spop %5865 }
0x3398   : > { %s3945_s12 = smul.f32 0.0009765625, %s5866_s20 }
0x339a   : > { %s3946_s16 = sadd.f32 1e-08, %s3945_s12 }
0x339c   : > { %v3947_v51 = vstv %s3946_s16 }
0x339d   : > { %6093 = vrsqrt.f32 %v3947_v51 }
0x33aa   : > { %v6094_v37 = vpop.eup %6093 }
0x33ab   : > { %5867 = vpush %v6094_v37  ;;  %v8758_v37 = vld [vmem:[#allocation30_spill] sm:$0xff] }
0x33dc   : > { %s5868_s14 = spop %5867 }
0x33dd   : > { %v3950_v47 = vstv %s5868_s14 }
0x33de   : > { %v3951_v42 = vmul.f32 %v3950_v47, %v3907_v30  ;;  %v3952_v59 = vmul.f32 %v3950_v47, %v3908_v27  ;;  %v3953_v60 = vmul.f32 %v3950_v47, %v3909_v3  ;;  %v3954_v11 = vmul.f32 %v3950_v47, %v3910_v46  ;;  %v8756_v46 = vld [vmem:[#allocation28_spill] sm:$0xff] }
0x33df   : > { %v3993_v10 = vmul.f32 %v7406_v29, %v8756_v46 }
0x33e0   : > { %v3955_v12 = vmul.f32 %v3951_v42, %v8752_v53  ;;  %v3957_v23 = vmul.f32 %v3953_v60, %v8753_v0  ;;  %v3956_v38 = vmul.f32 %v3952_v59, %v8752_v53  ;;  %v3958_v30 = vmul.f32 %v3954_v11, %v8753_v0  ;;  %v8759_v59 = vld [vmem:[#allocation31_spill] sm:$0xff] }
0x33e1   : > { %v8761_v11 = vld [vmem:[#allocation35_spill] sm:$0xff] }
0x33e2   : > { %v7638_v14 = vadd.f32 %v3957_v23, %v8754_v41  ;;  %v7641_v62 = vadd.f32 %v3955_v12, %v8755_v49  ;;  %v7649_v27 = vadd.f32 %v3956_v38, %v8755_v49  ;;  %v7654_v3 = vadd.f32 %v3958_v30, %v8754_v41  ;;  %v8760_v12 = vld [vmem:[#allocation33_spill] sm:$0xff]  ;;  %v8762_v30 = vld [vmem:[#allocation32_spill] sm:$0xff] }
0x33e4   : > { %3971 = vrot.lane.b32.xlu1 %v7638_v14, %s8697_s1  ;;  %3967 = vrot.lane.b32.xlu0 %v7641_v62, %s8697_s1 }
0x33e8   : > { %3969 = vrot.lane.b32.xlu0 %v7649_v27, %s8697_s1 }
0x33ec   : > { %3973 = vrot.lane.b32.xlu0 %v7654_v3, %s8697_s1 }
0x33f0   : > { %4001 = vrot.lane.b32.xlu0 %v3993_v10, %s8705_s24 }
0x33f4   : > { %4005 = vrot.lane.b32.xlu0 %v3995_v61, %s8705_s24  ;;  %v8763_v61 = vld [vmem:[#allocation34_spill] sm:$0xff] }
0x3456   : > { %v3968_v58 = vpop.permute.xlu0 %3967  ;;  %v3972_v7 = vpop.permute.xlu1 %3971 }
0x345a   : > { %v3970_v15 = vpop.permute.xlu0 %3969 }
0x345b   : > { %v3975_v50 = vsel %vm1793_vm11, %v3968_v58, %v3970_v15 }
0x345c   : > { %3979 = vst.msk [vmem:[#allocation2 + $0x8] sm:$0xff] %vm832_vm0, %v3975_v50 }
0x345e   : > { %v3974_v57 = vpop.permute.xlu0 %3973 }
0x345f   : > { %v3976_v24 = vsel %vm1793_vm11, %v3972_v7, %v3974_v57 }
0x3460   : > { %3980 = vst.msk [vmem:[#allocation2 + $0x20] sm:$0xff] %vm832_vm0, %v3976_v24  ;;  %v7685_v24 = vld [vmem:[#allocation2] sm:$0xff] }
0x3462   : > { %v4002_v15 = vpop.permute.xlu0 %4001 }
0x3463   : > { %v3982_v13 = vld [vmem:[#allocation2 + $0x8] sm:$0xff] }
0x3464   : > { %v3994_v51 = vmul.f32 %v3982_v13, %v8756_v46  ;;  %v4019_v47 = vmul.f32 %v3982_v13, %v8758_v37  ;;  %v4033_v60 = vmul.f32 %v3982_v13, %v8759_v59  ;;  %v4047_v38 = vmul.f32 %v3982_v13, %v8761_v11 }
0x3466   : > { %4003 = vrot.lane.b32.xlu0 %v3994_v51, %s8705_s24  ;;  %v4006_v50 = vpop.permute.xlu0 %4005  ;;  %v8764_v51 = vld [vmem:[#allocation36_spill] sm:$0xff] }
0x3467   : > { %v3984_v29 = vld [vmem:[#allocation2 + $0x20] sm:$0xff] }
0x3468   : > { %v3996_v42 = vmul.f32 %v3984_v29, %v8757_v35  ;;  %v4020_v23 = vmul.f32 %v3984_v29, %v8760_v12  ;;  %v4034_v10 = vmul.f32 %v3984_v29, %v8762_v30  ;;  %v4048_v58 = vmul.f32 %v3984_v29, %v8763_v61 }
0x346a   : > { %4023 = vrot.lane.b32.xlu0 %v4019_v47, %s8666_s5  ;;  %4007 = vrot.lane.b32.xlu1 %v3996_v42, %s8705_s24  ;;  %v3985_v47 = vmul.f32 %v7685_v24, %v8764_v51 }
0x346e   : > { %4037 = vrot.lane.b32.xlu0 %v4033_v60, %s8668_s4  ;;  %4025 = vrot.lane.b32.xlu1 %v4020_v23, %s8666_s5  ;;  %v3986_v23 = vmul.f32 %v3982_v13, %v8764_v51  ;;  %v8766_v51 = vld [vmem:[#allocation39_spill] sm:$0xff] }
0x3472   : > { %4051 = vrot.lane.b32.xlu0 %v4047_v38, %s8671_s28  ;;  %4039 = vrot.lane.b32.xlu1 %v4034_v10, %s8668_s4 }
0x3476   : > { %4053 = vrot.lane.b32.xlu1 %v4048_v58, %s8671_s28  ;;  %v3987_v58 = vmul.f32 %v7685_v24, %v8765_v6 }
0x34d8   : > { %v4004_v7 = vpop.permute.xlu0 %4003 }
0x34d9   : > { %v4009_v57 = vsel %vm1690_vm10, %v4002_v15, %v4004_v7  ;;  %v4016_v19 = vadd.f32 %v4004_v7, %v3986_v23  ;;  %v3988_v15 = vmul.f32 %v3984_v29, %v8765_v6 }
0x34da   : > { %v4015_v38 = vadd.f32 %v4009_v57, %v3985_v47 }
0x34dc   : > { %v4008_v42 = vpop.permute.xlu1 %4007  ;;  %v4024_v60 = vpop.permute.xlu0 %4023 }
0x34dd   : > { %v4010_v10 = vsel %vm1690_vm10, %v4006_v50, %v4008_v42  ;;  %v4029_v30 = vadd.f32 %v4024_v60, %v4015_v38  ;;  %v4030_v12 = vadd.f32 %v4024_v60, %v4016_v19  ;;  %v4018_v11 = vadd.f32 %v4008_v42, %v3988_v15  ;;  %v8767_v38 = vld [vmem:[#allocation40_spill] sm:$0xff] }
0x34de   : > { %v4017_v61 = vadd.f32 %v4010_v10, %v3987_v58 }
0x34e0   : > { %v4026_v17 = vpop.permute.xlu1 %4025  ;;  %v4038_v9 = vpop.permute.xlu0 %4037 }
0x34e1   : > { %v4043_v59 = vadd.f32 %v4038_v9, %v4029_v30  ;;  %v4044_v37 = vadd.f32 %v4038_v9, %v4030_v12  ;;  %v4031_v13 = vadd.f32 %v4026_v17, %v4017_v61  ;;  %v4032_v57 = vadd.f32 %v4026_v17, %v4018_v11  ;;  %v8768_v9 = vld [vmem:[#allocation38_spill] sm:$0xff] }
0x34e4   : > { %v4040_v35 = vpop.permute.xlu1 %4039  ;;  %v4052_v46 = vpop.permute.xlu0 %4051 }
0x34e5   : > { %v4057_v47 = vadd.f32 %v4052_v46, %v4043_v59  ;;  %v4058_v50 = vadd.f32 %v4052_v46, %v4044_v37  ;;  %v4045_v7 = vadd.f32 %v4040_v35, %v4031_v13  ;;  %v4046_v23 = vadd.f32 %v4040_v35, %v4032_v57 }
0x34e7   : > { %v4061_v41 = vadd.f32 %v4057_v47, %v8766_v51  ;;  %v4062_v49 = vadd.f32 %v4058_v50, %v8766_v51 }
0x34e8   : > { %v4054_v0 = vpop.permute.xlu1 %4053 }
0x34e9   : > { %v4059_v29 = vadd.f32 %v4054_v0, %v4045_v7  ;;  %v4060_v10 = vadd.f32 %v4054_v0, %v4046_v23  ;;  %v4066_v19 = vmul.f32 %v4062_v49, %v8767_v38  ;;  %v4065_v30 = vmul.f32 %v4061_v41, %v8767_v38 }
0x34eb   : > { %v4063_v12 = vadd.f32 %v4059_v29, %v8768_v9  ;;  %v4064_v61 = vadd.f32 %v4060_v10, %v8768_v9  ;;  %4075 = vrot.lane.b32.xlu1 %v4066_v19, %s8697_s1  ;;  %4073 = vrot.lane.b32.xlu0 %v4065_v30, %s8697_s1 }
0x34ed   : > { %v4068_v17 = vmul.f32 %v4064_v61, %v8767_v38  ;;  %v4067_v46 = vmul.f32 %v4063_v12, %v8767_v38 }
0x34ef   : > { %4079 = vrot.lane.b32.xlu1 %v4068_v17, %s8697_s1  ;;  %4077 = vrot.lane.b32.xlu0 %v4067_v46, %s8697_s1 }
0x355d   : > { %v4076_v0 = vpop.permute.xlu1 %4075  ;;  %v4074_v35 = vpop.permute.xlu0 %4073 }
0x355e   : > { %v4081_v37 = vsel %vm1793_vm11, %v4074_v35, %v4076_v0 }
0x355f   : > { %v4085_v60 = vsel %vm832_vm0, %v4081_v37, 0.0 }
0x3561   : > { %v4080_v59 = vpop.permute.xlu1 %4079  ;;  %v4078_v11 = vpop.permute.xlu0 %4077 }
0x3562   : > { %v4082_v42 = vsel %vm1793_vm11, %v4078_v11, %v4080_v59 }
0x3563   : > { %v4086_v58 = vsel %vm832_vm0, %v4082_v42, 0.0 }
0x3564   : > { %v4087_v15 = vadd.f32 %v4086_v58, %v4085_v60 }
0x3566   : > { %4088 = vadd.xlane.f32.xlu0 %v4087_v15 }
0x35ef   : > { %v4089_v13 = vpop.xlane.xlu0 %4088 }
0x35f0   : > { %v4090_v57 = vrot.slane %v4089_v13, 4 }
0x35f2   : > { %v4091_v47 = vadd.f32 %v4090_v57, %v4089_v13 }
0x35f4   : > { %v4092_v50 = vrot.slane %v4091_v47, 2 }
0x35f6   : > { %v4093_v7 = vadd.f32 %v4092_v50, %v4091_v47 }
0x35f8   : > { %v4094_v23 = vrot.slane %v4093_v7, 1 }
0x35fa   : > { %v4095_v29 = vadd.f32 %v4094_v23, %v4093_v7 }
0x35fc   : > { %5869 = vpush %v4095_v29 }
0x362d   : > { %s5870_s19 = spop %5869 }
0x362e   : > { %s4099_s20 = smul.f32 0.001953125, %s5870_s19 }
0x3630   : > { %v4100_v10 = vstv %s4099_s20 }
0x3631   : > { %v4101_v19 = vsub.f32 %v4061_v41, %v4100_v10  ;;  %v4102_v30 = vsub.f32 %v4062_v49, %v4100_v10  ;;  %v4103_v46 = vsub.f32 %v4063_v12, %v4100_v10  ;;  %v4104_v37 = vsub.f32 %v4064_v61, %v4100_v10 }
0x3633   : > { %v4105_v17 = vmul.f32 %v4101_v19, %v4101_v19  ;;  %v4106_v0 = vmul.f32 %v4102_v30, %v4102_v30  ;;  %v4107_v59 = vmul.f32 %v4103_v46, %v4103_v46  ;;  %v4108_v42 = vmul.f32 %v4104_v37, %v4104_v37 }
0x3635   : > { %v4109_v35 = vmul.f32 %v4105_v17, %v8767_v38  ;;  %v4110_v11 = vmul.f32 %v4106_v0, %v8767_v38  ;;  %v4111_v60 = vmul.f32 %v4107_v59, %v8767_v38  ;;  %v4112_v41 = vmul.f32 %v4108_v42, %v8767_v38 }
0x3637   : > { %4117 = vrot.lane.b32.xlu1 %v4109_v35, %s8697_s1 }
0x363b   : > { %4119 = vrot.lane.b32.xlu1 %v4110_v11, %s8697_s1 }
0x363f   : > { %4121 = vrot.lane.b32.xlu1 %v4111_v60, %s8697_s1 }
0x3643   : > { %4123 = vrot.lane.b32.xlu1 %v4112_v41, %s8697_s1 }
0x36a9   : > { %v4118_v49 = vpop.permute.xlu1 %4117 }
0x36ad   : > { %v4120_v12 = vpop.permute.xlu1 %4119 }
0x36ae   : > { %v4125_v15 = vsel %vm1793_vm11, %v4118_v49, %v4120_v12  ;;  %v8769_v12 = vld [vmem:[#allocation41_spill] sm:$0xff] }
0x36af   : > { %v4129_v57 = vsel %vm832_vm0, %v4125_v15, 0.0  ;;  %v8770_v15 = vld [vmem:[#allocation42_spill] sm:$0xff] }
0x36b1   : > { %v4122_v58 = vpop.permute.xlu1 %4121 }
0x36b5   : > { %v4124_v61 = vpop.permute.xlu1 %4123 }
0x36b6   : > { %v4126_v13 = vsel %vm1793_vm11, %v4122_v58, %v4124_v61 }
0x36b7   : > { %v4130_v47 = vsel %vm832_vm0, %v4126_v13, 0.0 }
0x36b8   : > { %v4131_v50 = vadd.f32 %v4130_v47, %v4129_v57  ;;  %v8771_v47 = vld [vmem:[#allocation43_spill] sm:$0xff] }
0x36ba   : > { %4132 = vadd.xlane.f32.xlu1 %v4131_v50 }
0x3743   : > { %v4133_v7 = vpop.xlane.xlu1 %4132 }
0x3744   : > { %v4134_v23 = vrot.slane %v4133_v7, 4 }
0x3746   : > { %v4135_v29 = vadd.f32 %v4134_v23, %v4133_v7  ;;  %v8772_v7 = vld [vmem:[#allocation44_spill] sm:$0xff] }
0x3748   : > { %v4136_v10 = vrot.slane %v4135_v29, 2 }
0x374a   : > { %v4137_v17 = vadd.f32 %v4136_v10, %v4135_v29  ;;  %v8774_v10 = vld [vmem:[#allocation46_spill] sm:$0xff] }
0x374c   : > { %v4138_v0 = vrot.slane %v4137_v17, 1 }
0x374e   : > { %v4139_v35 = vadd.f32 %v4138_v0, %v4137_v17  ;;  %v4193_v17 = vmul.f32 %v7685_v24, %v8774_v10 }
0x3750   : > { %5871 = vpush %v4139_v35 }
0x3781   : > { %s5872_s12 = spop %5871 }
0x3782   : > { %s4143_s16 = smul.f32 0.001953125, %s5872_s12 }
0x3784   : > { %s4144_s14 = sadd.f32 1e-08, %s4143_s16 }
0x3786   : > { %v4145_v59 = vstv %s4144_s14 }
0x3787   : > { %6095 = vrsqrt.f32 %v4145_v59 }
0x3794   : > { %v6096_v11 = vpop.eup %6095 }
0x3795   : > { %5873 = vpush %v6096_v11 }
0x37c6   : > { %s5874_s19 = spop %5873 }
0x37c7   : > { %v4148_v42 = vstv %s5874_s19 }
0x37c8   : > { %v4149_v60 = vmul.f32 %v4148_v42, %v4101_v19  ;;  %v4150_v41 = vmul.f32 %v4148_v42, %v4102_v30  ;;  %v4151_v49 = vmul.f32 %v4148_v42, %v4103_v46  ;;  %v4152_v13 = vmul.f32 %v4148_v42, %v4104_v37  ;;  %v8773_v37 = vld [vmem:[#allocation45_spill] sm:$0xff] }
0x37c9   : > { %v4191_v29 = vmul.f32 %v7685_v24, %v8773_v37 }
0x37ca   : > { %v4153_v58 = vmul.f32 %v4149_v60, %v8769_v12  ;;  %v4155_v61 = vmul.f32 %v4151_v49, %v8770_v15  ;;  %v4154_v57 = vmul.f32 %v4150_v41, %v8769_v12  ;;  %v4156_v19 = vmul.f32 %v4152_v13, %v8770_v15 }
0x37cc   : > { %v7726_v50 = vadd.f32 %v4155_v61, %v8771_v47  ;;  %v7729_v23 = vadd.f32 %v4153_v58, %v8772_v7  ;;  %v7737_v30 = vadd.f32 %v4154_v57, %v8772_v7  ;;  %v7742_v46 = vadd.f32 %v4156_v19, %v8771_v47  ;;  %v8775_v61 = vld [vmem:[#allocation47_spill] sm:$0xff]  ;;  %v8776_v19 = vld [vmem:[#allocation48_spill] sm:$0xff] }
0x37ce   : > { %4169 = vrot.lane.b32.xlu1 %v7726_v50, %s8697_s1  ;;  %4165 = vrot.lane.b32.xlu0 %v7729_v23, %s8697_s1 }
0x37d2   : > { %4167 = vrot.lane.b32.xlu0 %v7737_v30, %s8697_s1 }
0x37d6   : > { %4171 = vrot.lane.b32.xlu0 %v7742_v46, %s8697_s1 }
0x37da   : > { %4199 = vrot.lane.b32.xlu0 %v4191_v29, %s8666_s5 }
0x37de   : > { %4203 = vrot.lane.b32.xlu0 %v4193_v17, %s8666_s5  ;;  %v8777_v17 = vld [vmem:[#allocation50_spill] sm:$0xff] }
0x3840   : > { %v4166_v0 = vpop.permute.xlu0 %4165  ;;  %v4170_v11 = vpop.permute.xlu1 %4169 }
0x3844   : > { %v4168_v35 = vpop.permute.xlu0 %4167 }
0x3845   : > { %v4173_v59 = vsel %vm1793_vm11, %v4166_v0, %v4168_v35  ;;  %v8778_v35 = vld [vmem:[#allocation52_spill] sm:$0xff] }
0x3846   : > { %4177 = vst.msk [vmem:[#allocation2 + $0x8] sm:$0xff] %vm832_vm0, %v4173_v59 }
0x3848   : > { %v4172_v42 = vpop.permute.xlu0 %4171 }
0x3849   : > { %v4174_v60 = vsel %vm1793_vm11, %v4170_v11, %v4172_v42  ;;  %v8779_v11 = vld [vmem:[#allocation49_spill] sm:$0xff] }
0x384a   : > { %4178 = vst.msk [vmem:[#allocation2 + $0x20] sm:$0xff] %vm832_vm0, %v4174_v60  ;;  %v8780_v60 = vld [vmem:[#allocation51_spill] sm:$0xff] }
0x384d   : > { %v4180_v41 = vld [vmem:[#allocation2 + $0x8] sm:$0xff] }
0x384e   : > { %v4192_v49 = vmul.f32 %v4180_v41, %v8773_v37  ;;  %v4217_v13 = vmul.f32 %v4180_v41, %v8775_v61  ;;  %v4231_v29 = vmul.f32 %v4180_v41, %v8776_v19  ;;  %v4245_v59 = vmul.f32 %v4180_v41, %v8778_v35 }
0x3850   : > { %4201 = vrot.lane.b32.xlu0 %v4192_v49, %s8666_s5 }
0x3851   : > { %v4182_v58 = vld [vmem:[#allocation2 + $0x20] sm:$0xff] }
0x3852   : > { %v4194_v57 = vmul.f32 %v4182_v58, %v8774_v10  ;;  %v4218_v0 = vmul.f32 %v4182_v58, %v8777_v17  ;;  %v4232_v42 = vmul.f32 %v4182_v58, %v8779_v11  ;;  %v4246_v49 = vmul.f32 %v4182_v58, %v8780_v60 }
0x3853   : > { %v4185_v60 = vmul.f32 %v7685_v24, %v7036_v26  ;;  %v4186_v47 = vmul.f32 %v4182_v58, %v7036_v26 }
0x3854   : > { %4221 = vrot.lane.b32.xlu0 %v4217_v13, %s8671_s28  ;;  %4205 = vrot.lane.b32.xlu1 %v4194_v57, %s8666_s5  ;;  %v4200_v13 = vpop.permute.xlu0 %4199 }
0x3858   : > { %4235 = vrot.lane.b32.xlu0 %v4231_v29, %s8737_s11  ;;  %4223 = vrot.lane.b32.xlu1 %v4218_v0, %s8671_s28  ;;  %v4204_v57 = vpop.permute.xlu0 %4203  ;;  %v8781_v29 = vld [vmem:[#allocation53_spill] sm:$0xff] }
0x3859   : > { %v4183_v0 = vmul.f32 %v7685_v24, %v8781_v29  ;;  %v4184_v11 = vmul.f32 %v4180_v41, %v8781_v29 }
0x385c   : > { %4249 = vrot.lane.b32.xlu0 %v4245_v59, %s8740_s3  ;;  %4237 = vrot.lane.b32.xlu1 %v4232_v42, %s8737_s11 }
0x3860   : > { %4251 = vrot.lane.b32.xlu1 %v4246_v49, %s8740_s3 }
0x38c2   : > { %v4202_v19 = vpop.permute.xlu0 %4201 }
0x38c3   : > { %v4207_v17 = vsel %vm2222_vm14, %v4200_v13, %v4202_v19  ;;  %v4214_v42 = vadd.f32 %v4202_v19, %v4184_v11 }
0x38c4   : > { %v4213_v10 = vadd.f32 %v4207_v17, %v4183_v0 }
0x38c6   : > { %v4206_v61 = vpop.permute.xlu1 %4205  ;;  %v4222_v35 = vpop.permute.xlu0 %4221 }
0x38c7   : > { %v4208_v59 = vsel %vm2222_vm14, %v4204_v57, %v4206_v61  ;;  %v4227_v13 = vadd.f32 %v4222_v35, %v4213_v10  ;;  %v4228_v15 = vadd.f32 %v4222_v35, %v4214_v42  ;;  %v4216_v12 = vadd.f32 %v4206_v61, %v4186_v47 }
0x38c8   : > { %v4215_v7 = vadd.f32 %v4208_v59, %v4185_v60 }
0x38ca   : > { %v4224_v49 = vpop.permute.xlu1 %4223  ;;  %v4236_v37 = vpop.permute.xlu0 %4235 }
0x38cb   : > { %v4241_v9 = vadd.f32 %v4236_v37, %v4227_v13  ;;  %v4242_v38 = vadd.f32 %v4236_v37, %v4228_v15  ;;  %v4229_v41 = vadd.f32 %v4224_v49, %v4215_v7  ;;  %v4230_v17 = vadd.f32 %v4224_v49, %v4216_v12 }
0x38ce   : > { %v4238_v51 = vpop.permute.xlu1 %4237  ;;  %v4250_v6 = vpop.permute.xlu0 %4249 }
0x38cf   : > { %v4255_v0 = vadd.f32 %v4250_v6, %v4241_v9  ;;  %v4256_v57 = vadd.f32 %v4250_v6, %v4242_v38  ;;  %v4243_v19 = vadd.f32 %v4238_v51, %v4229_v41  ;;  %v4244_v11 = vadd.f32 %v4238_v51, %v4230_v17 }
0x38d1   : > { %v4259_v29 = vadd.f32 %v4255_v0, %v7040_v32  ;;  %v4260_v53 = vadd.f32 %v4256_v57, %v7040_v32 }
0x38d2   : > { %v4252_v25 = vpop.permute.xlu1 %4251 }
0x38d3   : > { %v4257_v58 = vadd.f32 %v4252_v25, %v4243_v19  ;;  %v4258_v60 = vadd.f32 %v4252_v25, %v4244_v11  ;;  %v4264_v10 = vmul.f32 %v4260_v53, %v7052_v40  ;;  %v4263_v47 = vmul.f32 %v4259_v29, %v7052_v40 }
0x38d5   : > { %v4261_v15 = vadd.f32 %v4257_v58, %v7038_v36  ;;  %v4262_v7 = vadd.f32 %v4258_v60, %v7038_v36  ;;  %4273 = vrot.lane.b32.xlu1 %v4264_v10, %s8743_s0  ;;  %4271 = vrot.lane.b32.xlu0 %v4263_v47, %s8743_s0 }
0x38d7   : > { %v4266_v6 = vmul.f32 %v4262_v7, %v7052_v40  ;;  %v4265_v51 = vmul.f32 %v4261_v15, %v7052_v40 }
0x38d9   : > { %4277 = vrot.lane.b32.xlu1 %v4266_v6, %s8743_s0  ;;  %4275 = vrot.lane.b32.xlu0 %v4265_v51, %s8743_s0 }
0x3947   : > { %v4274_v25 = vpop.permute.xlu1 %4273  ;;  %v4272_v38 = vpop.permute.xlu0 %4271 }
0x3948   : > { %v4279_v9 = vsel %vm2335_vm15, %v4272_v38, %v4274_v25 }
0x3949   : > { %v4283_v35 = vsel %vm832_vm0, %v4279_v9, 0.0 }
0x394b   : > { %v4278_v12 = vpop.permute.xlu1 %4277  ;;  %v4276_v37 = vpop.permute.xlu0 %4275 }
0x394c   : > { %v4280_v61 = vsel %vm2335_vm15, %v4276_v37, %v4278_v12 }
0x394d   : > { %v4284_v59 = vsel %vm832_vm0, %v4280_v61, 0.0 }
0x394e   : > { %v4285_v42 = vadd.f32 %v4284_v59, %v4283_v35 }
0x3950   : > { %4286 = vadd.xlane.f32.xlu0 %v4285_v42 }
0x39d9   : > { %v4287_v49 = vpop.xlane.xlu0 %4286 }
0x39da   : > { %v4288_v13 = vrot.slane %v4287_v49, 4 }
0x39dc   : > { %v4289_v41 = vadd.f32 %v4288_v13, %v4287_v49 }
0x39de   : > { %v4290_v17 = vrot.slane %v4289_v41, 2 }
0x39e0   : > { %v4291_v0 = vadd.f32 %v4290_v17, %v4289_v41 }
0x39e2   : > { %v4292_v57 = vrot.slane %v4291_v0, 1 }
0x39e4   : > { %v4293_v19 = vadd.f32 %v4292_v57, %v4291_v0 }
0x39e6   : > { %5875 = vpush %v4293_v19 }
0x3a17   : > { %s5876_s20 = spop %5875 }
0x3a18   : > { %s4297_s12 = smul.f32 0.00390625, %s5876_s20 }
0x3a1a   : > { %v4298_v11 = vstv %s4297_s12 }
0x3a1b   : > { %v4299_v58 = vsub.f32 %v4259_v29, %v4298_v11  ;;  %v4300_v60 = vsub.f32 %v4260_v53, %v4298_v11  ;;  %v4301_v47 = vsub.f32 %v4261_v15, %v4298_v11  ;;  %v4302_v25 = vsub.f32 %v4262_v7, %v4298_v11 }
0x3a1d   : > { %v4303_v10 = vmul.f32 %v4299_v58, %v4299_v58  ;;  %v4304_v6 = vmul.f32 %v4300_v60, %v4300_v60  ;;  %v4305_v38 = vmul.f32 %v4301_v47, %v4301_v47  ;;  %v4306_v12 = vmul.f32 %v4302_v25, %v4302_v25 }
0x3a1f   : > { %v4307_v51 = vmul.f32 %v4303_v10, %v7052_v40  ;;  %v4308_v9 = vmul.f32 %v4304_v6, %v7052_v40  ;;  %v4309_v37 = vmul.f32 %v4305_v38, %v7052_v40  ;;  %v4310_v53 = vmul.f32 %v4306_v12, %v7052_v40 }
0x3a21   : > { %4315 = vrot.lane.b32.xlu1 %v4307_v51, %s8743_s0 }
0x3a25   : > { %4317 = vrot.lane.b32.xlu1 %v4308_v9, %s8743_s0 }
0x3a29   : > { %4319 = vrot.lane.b32.xlu1 %v4309_v37, %s8743_s0 }
0x3a2d   : > { %4321 = vrot.lane.b32.xlu1 %v4310_v53, %s8743_s0 }
0x3a93   : > { %v4316_v29 = vpop.permute.xlu1 %4315 }
0x3a97   : > { %v4318_v15 = vpop.permute.xlu1 %4317 }
0x3a98   : > { %v4323_v35 = vsel %vm2335_vm15, %v4316_v29, %v4318_v15 }
0x3a99   : > { %v4327_v42 = vsel %vm832_vm0, %v4323_v35, 0.0 }
0x3a9b   : > { %v4320_v61 = vpop.permute.xlu1 %4319 }
0x3a9f   : > { %v4322_v7 = vpop.permute.xlu1 %4321 }
0x3aa0   : > { %v4324_v59 = vsel %vm2335_vm15, %v4320_v61, %v4322_v7 }
0x3aa1   : > { %v4328_v49 = vsel %vm832_vm0, %v4324_v59, 0.0 }
0x3aa2   : > { %v4329_v13 = vadd.f32 %v4328_v49, %v4327_v42 }
0x3aa4   : > { %4330 = vadd.xlane.f32.xlu1 %v4329_v13 }
0x3b2d   : > { %v4331_v41 = vpop.xlane.xlu1 %4330 }
0x3b2e   : > { %v4332_v17 = vrot.slane %v4331_v41, 4 }
0x3b30   : > { %v4333_v0 = vadd.f32 %v4332_v17, %v4331_v41 }
0x3b32   : > { %v4334_v57 = vrot.slane %v4333_v0, 2 }
0x3b34   : > { %v4335_v19 = vadd.f32 %v4334_v57, %v4333_v0 }
0x3b36   : > { %v4336_v11 = vrot.slane %v4335_v19, 1 }
0x3b38   : > { %v4337_v10 = vadd.f32 %v4336_v11, %v4335_v19 }
0x3b3a   : > { %5877 = vpush %v4337_v10 }
0x3b6b   : > { %s5878_s16 = spop %5877 }
0x3b6c   : > { %s4341_s14 = smul.f32 0.00390625, %s5878_s16 }
0x3b6e   : > { %s4342_s19 = sadd.f32 1e-08, %s4341_s14 }
0x3b70   : > { %v4343_v6 = vstv %s4342_s19 }
0x3b71   : > { %6097 = vrsqrt.f32 %v4343_v6 }
0x3b7e   : > { %v6098_v51 = vpop.eup %6097 }
0x3b7f   : > { %5879 = vpush %v6098_v51 }
0x3bb0   : > { %s5880_s20 = spop %5879 }
0x3bb1   : > { %v4346_v38 = vstv %s5880_s20 }
0x3bb2   : > { %v4347_v9 = vmul.f32 %v4346_v38, %v4299_v58  ;;  %v4348_v12 = vmul.f32 %v4346_v38, %v4300_v60  ;;  %v4349_v37 = vmul.f32 %v4346_v38, %v4301_v47  ;;  %v4350_v15 = vmul.f32 %v4346_v38, %v4302_v25 }
0x3bb3   : > { %v6036_v47 = vpack.i.bf16 %v7685_v24, %v7685_v24 }
0x3bb4   : > { %v4351_v53 = vmul.f32 %v4347_v9, %v7086_v52  ;;  %v4353_v29 = vmul.f32 %v4349_v37, %v7088_v33  ;;  %v4352_v61 = vmul.f32 %v4348_v12, %v7086_v52  ;;  %v4354_v59 = vmul.f32 %v4350_v15, %v7088_v33 }
0x3bb6   : > { %v4357_v35 = vadd.f32 %v4353_v29, %v7092_v31  ;;  %v4355_v7 = vadd.f32 %v4351_v53, %v7094_v43  ;;  %v4356_v58 = vadd.f32 %v4352_v61, %v7094_v43  ;;  %v4358_v60 = vadd.f32 %v4354_v59, %v7092_v31 }
0x3bb8   : > { %4367 = vrot.lane.b32.xlu1 %v4357_v35, %s8743_s0  ;;  %4363 = vrot.lane.b32.xlu0 %v4355_v7, %s8743_s0 }
0x3bbc   : > { %4365 = vrot.lane.b32.xlu0 %v4356_v58, %s8743_s0 }
0x3bc0   : > { %4369 = vrot.lane.b32.xlu0 %v4358_v60, %s8743_s0 }
0x3bc4   : > { %6037 = vrot.lane.b32.xlu0 %v6036_v47, %s8697_s1 }
0x3c2a   : > { %v4364_v25 = vpop.permute.xlu0 %4363  ;;  %v4368_v13 = vpop.permute.xlu1 %4367 }
0x3c2e   : > { %v4366_v42 = vpop.permute.xlu0 %4365 }
0x3c2f   : > { %v4371_v49 = vsel %vm2335_vm15, %v4364_v25, %v4366_v42 }
0x3c30   : > { %4375 = vst.msk [vmem:[#allocation2 + $0x8] sm:$0xff] %vm832_vm0, %v4371_v49 }
0x3c32   : > { %v4370_v41 = vpop.permute.xlu0 %4369 }
0x3c33   : > { %v4372_v17 = vsel %vm2335_vm15, %v4368_v13, %v4370_v41 }
0x3c34   : > { %4376 = vst.msk [vmem:[#allocation2 + $0x20] sm:$0xff] %vm832_vm0, %v4372_v17 }
0x3c36   : > { %v6038_v19 = vpop.permute.xlu0 %6037 }
0x3c37   : > { %v4378_v0 = vld [vmem:[#allocation2 + $0x8] sm:$0xff]  ;;  %v6039_v11 = vunpack.i.l.bf16 %v6038_v19  ;;  %v6040_v38 = vunpack.i.h.bf16 %v6038_v19 }
0x3c38   : > { %4387 = vrot.lane.b32.xlu0 %v4378_v0, %s8697_s1 }
0x3c3b   : > { %v4380_v57 = vld [vmem:[#allocation2 + $0x20] sm:$0xff] }
0x3c3c   : > { %4391 = vrot.lane.b32.xlu0 %v4380_v57, %s8697_s1 }
0x3caa   : > { %v4388_v10 = vpop.permute.xlu0 %4387 }
0x3cab   : > { %v4393_v6 = vsel %vm1793_vm11, %v6039_v11, %v4388_v10  ;;  %v8782_v11 = vld [vmem:[#allocation15_spill] sm:$0xff]  ;;  %v8783_v10 = vld [vmem:[#allocation54_spill] sm:$0xff] }
0x3cac   : > { %v4397_v51 = vsel %vm7025_vm13, %v4371_v49, %v4393_v6  ;;  %v4619_v6 = vadd.f32 %v8783_v10, %v8782_v11 }
0x3cad   : > { %4401 = vrot.lane.b32.xlu1 %v4397_v51, %s8666_s5 }
0x3cae   : > { %v4392_v9 = vpop.permute.xlu0 %4391  ;;  %v4621_v51 = vmin.f32 %v4619_v6, 0.0 }
0x3caf   : > { %v4394_v12 = vsel %vm1793_vm11, %v6040_v38, %v4392_v9  ;;  %v8784_v38 = vld [vmem:[#allocation16_spill] sm:$0xff] }
0x3cb0   : > { %v4398_v37 = vsel %vm7025_vm13, %v4372_v17, %v4394_v12  ;;  %v4622_v9 = vmul.f32 %v4621_v51, %v8784_v38  ;;  %v4620_v12 = vmax.f32 %v4619_v6, 0.0 }
0x3cb1   : > { %4403 = vrot.lane.b32.xlu0 %v4398_v37, %s8666_s5 }
0x3d1f   : > { %v4402_v53 = vpop.permute.xlu1 %4401 }
0x3d20   : > { %v4407_v29 = vadd.f32 %v4402_v53, %v7729_v23  ;;  %v4408_v15 = vadd.f32 %v4402_v53, %v7737_v30  ;;  %v4623_v53 = vadd.f32 %v4622_v9, %v4620_v12 }
0x3d22   : > { %4417 = vrot.lane.b32.xlu0 %v4408_v15, %s8697_s1  ;;  %4415 = vrot.lane.b32.xlu1 %v4407_v29, %s8697_s1 }
0x3d23   : > { %v4404_v61 = vpop.permute.xlu0 %4403 }
0x3d24   : > { %v4409_v35 = vadd.f32 %v4404_v61, %v7726_v50  ;;  %v4410_v7 = vadd.f32 %v4404_v61, %v7742_v46 }
0x3d26   : > { %4421 = vrot.lane.b32.xlu0 %v4410_v7, %s8697_s1  ;;  %4419 = vrot.lane.b32.xlu1 %v4409_v35, %s8697_s1 }
0x3d2a   : > { %6042 = vrot.lane.b32.xlu1 %v6036_v47, %s8744_s15 }
0x3d94   : > { %v4418_v59 = vpop.permute.xlu0 %4417  ;;  %v4416_v58 = vpop.permute.xlu1 %4415 }
0x3d95   : > { %v4423_v23 = vsel %vm1793_vm11, %v4416_v58, %v4418_v59  ;;  %v6118_v59 = vld [vmem:[%s6420_s29 + $0x8] sm:$0xff] }
0x3d96   : > { %4427 = vst.msk [vmem:[#allocation2 + $0x8] sm:$0xff] %vm832_vm0, %v4423_v23  ;;  %v7870_v58 = vadd.f32 %v6118_v59, %v4623_v53 }
0x3d98   : > { %v4422_v30 = vpop.permute.xlu0 %4421  ;;  %v4420_v60 = vpop.permute.xlu1 %4419 }
0x3d99   : > { %v4424_v25 = vsel %vm1793_vm11, %v4420_v60, %v4422_v30 }
0x3d9a   : > { %4428 = vst.msk [vmem:[#allocation2 + $0x20] sm:$0xff] %vm832_vm0, %v4424_v25 }
0x3d9c   : > { %v6043_v42 = vpop.permute.xlu1 %6042 }
0x3d9d   : > { %v4430_v50 = vld [vmem:[#allocation2 + $0x8] sm:$0xff]  ;;  %v6044_v47 = vunpack.i.l.bf16 %v6043_v42  ;;  %v6045_v17 = vunpack.i.h.bf16 %v6043_v42 }
0x3d9e   : > { %4439 = vrot.lane.b32.xlu0 %v4430_v50, %s8744_s15 }
0x3da1   : > { %v4432_v46 = vld [vmem:[#allocation2 + $0x20] sm:$0xff] }
0x3da2   : > { %4443 = vrot.lane.b32.xlu1 %v4432_v46, %s8744_s15 }
0x3e10   : > { %v4440_v49 = vpop.permute.xlu0 %4439 }
0x3e11   : > { %v4445_v13 = vsel %vm2520_vm1, %v6044_v47, %v4440_v49  ;;  %v6119_v49 = vld [vmem:[%s8646_s7] sm:$0xff]  }
0x3e12   : > { %v4449_v41 = vsel %vm6878_vm12, %v4423_v23, %v4445_v13 }
0x3e13   : > { %4453 = vrot.lane.b32.xlu0 %v4449_v41, %s8666_s5 }
0x3e14   : > { %v4444_v0 = vpop.permute.xlu1 %4443 }
0x3e15   : > { %v4446_v57 = vsel %vm2520_vm1, %v6045_v17, %v4444_v0 }
0x3e16   : > { %v4450_v19 = vsel %vm6878_vm12, %v4424_v25, %v4446_v57 }
0x3e17   : > { %4455 = vrot.lane.b32.xlu1 %v4450_v19, %s8666_s5 }
0x3e85   : > { %v4454_v37 = vpop.permute.xlu0 %4453 }
0x3e86   : > { %v4459_v29 = vadd.f32 %v4454_v37, %v7641_v62  ;;  %v4460_v15 = vadd.f32 %v4454_v37, %v7649_v27  ;;  %v4625_v62 = vpack.c.bf16 %v7870_v58, %v7870_v58 }
0x3e88   : > { %4469 = vrot.lane.b32.xlu1 %v4460_v15, %s8697_s1  ;;  %4467 = vrot.lane.b32.xlu0 %v4459_v29, %s8697_s1 }
0x3e89   : > { %v4456_v61 = vpop.permute.xlu1 %4455 }
0x3e8a   : > { %v4461_v35 = vadd.f32 %v4456_v61, %v7638_v14  ;;  %v4462_v7 = vadd.f32 %v4456_v61, %v7654_v3 }
0x3e8c   : > { %4473 = vrot.lane.b32.xlu1 %v4462_v7, %s8697_s1  ;;  %4471 = vrot.lane.b32.xlu0 %v4461_v35, %s8697_s1 }
0x3e90   : > { %4627 = vrot.lane.b32.xlu1 %v4625_v62, %s8635_s10 }
0x3efa   : > { %v4470_v27 = vpop.permute.xlu1 %4469  ;;  %v4468_v23 = vpop.permute.xlu0 %4467 }
0x3efb   : > { %v4475_v30 = vsel %vm1793_vm11, %v4468_v23, %v4470_v27 }
0x3efc   : > { %v4479_v25 = vsel %vm832_vm0, %v4475_v30, 0.0 }
0x3efe   : > { %v4474_v60 = vpop.permute.xlu1 %4473  ;;  %v4472_v14 = vpop.permute.xlu0 %4471 }
0x3eff   : > { %v4476_v3 = vsel %vm1793_vm11, %v4472_v14, %v4474_v60 }
0x3f00   : > { %v4480_v50 = vsel %vm832_vm0, %v4476_v3, 0.0 }
0x3f01   : > { %v4481_v46 = vadd.f32 %v4480_v50, %v4479_v25 }
0x3f02   : > { %v4628_v42 = vpop.permute.xlu1 %4627 }
0x3f03   : > { %v4630_v47 = vsel %vm1110_vm5, %v4628_v42, 0  ;;  %4482 = vadd.xlane.f32.xlu0 %v4481_v46 }
0x3f04   : > { %5761 = vmatpush3.bf16.msra.mxu1 %v4630_v47 }
0x3f07   : > { %5763 = vmatmul.mubr.msk.bf16.vlgmr.msra.gmra.mxu1 %vm1103_vm6, %v6119_v49 }
0x3f8c   : > { %v4483_v13 = vpop.xlane.xlu0 %4482 }
0x3f8d   : > { %v4484_v41 = vrot.slane %v4483_v13, 4 }
0x3f8f   : > { %v4485_v17 = vadd.f32 %v4484_v41, %v4483_v13 }
0x3f91   : > { %v4486_v0 = vrot.slane %v4485_v17, 2 }
0x3f93   : > { %v4487_v57 = vadd.f32 %v4486_v0, %v4485_v17 }
0x3f95   : > { %v4488_v19 = vrot.slane %v4487_v57, 1 }
0x3f97   : > { %v4489_v11 = vadd.f32 %v4488_v19, %v4487_v57 }
0x3f99   : > { %5881 = vpush %v4489_v11 }
0x3fc7   : > { %v4666_v10 = vpop.f32.mrf.mxu1 }
0x3fc8   : > { %v4667_v38 = vadd.f32 %v4666_v10, %v6600_v5 }
0x3fc9   : > { %v5764_v6 = vpop.f32.mrf.mxu1 }
0x3fca   : > { %s5882_s16 = spop %5881  ;;  %v4673_v59 = vsel %vm832_vm0, %v4667_v38, 0.0 }
0x3fcb   : > { %s4493_s14 = smul.f32 0.0009765625, %s5882_s16  ;;  %v4669_v51 = vpop.f32.mrf.mxu1 }
0x3fcc   : > { %v4670_v9 = vadd.f32 %v4669_v51, %v6603_v45 }
0x3fcd   : > { %v4494_v12 = vstv %s4493_s14  ;;  %v5765_v37 = vpop.f32.mrf.mxu1 }
0x3fce   : > { %v7888_v53 = vsub.f32 %v4459_v29, %v4494_v12  ;;  %v4674_v61 = vsel %vm832_vm0, %v4670_v9, 0.0  ;;  %v7892_v62 = vsub.f32 %v4460_v15, %v4494_v12  ;;  %v7897_v5 = vsub.f32 %v4461_v35, %v4494_v12 }
0x3fcf   : > { %v4675_v23 = vadd.f32 %v4674_v61, %v4673_v59  ;;  %v7902_v29 = vsub.f32 %v4462_v7, %v4494_v12 }
0x3fd0   : > { %v4499_v27 = vmul.f32 %v7888_v53, %v7888_v53  ;;  %v4500_v45 = vmul.f32 %v7892_v62, %v7892_v62  ;;  %v4501_v15 = vmul.f32 %v7897_v5, %v7897_v5 }
0x3fd1   : > { %4676 = vadd.xlane.f32.xlu0 %v4675_v23  ;;  %v4502_v30 = vmul.f32 %v7902_v29, %v7902_v29 }
0x3fd2   : > { %4507 = vrot.lane.b32.xlu1 %v4499_v27, %s8697_s1 }
0x3fd6   : > { %4509 = vrot.lane.b32.xlu1 %v4500_v45, %s8697_s1 }
0x3fda   : > { %4511 = vrot.lane.b32.xlu1 %v4501_v15, %s8697_s1 }
0x3fde   : > { %4513 = vrot.lane.b32.xlu1 %v4502_v30, %s8697_s1 }
0x4044   : > { %v4508_v60 = vpop.permute.xlu1 %4507 }
0x4048   : > { %v4510_v35 = vpop.permute.xlu1 %4509 }
0x4049   : > { %v4515_v3 = vsel %vm1793_vm11, %v4508_v60, %v4510_v35 }
0x404a   : > { %v4519_v7 = vsel %vm832_vm0, %v4515_v3, 0.0  ;;  %v4741_v3 = vmul.f32 %v7685_v24, %v6680_v34 }
0x404c   : > { %v4512_v14 = vpop.permute.xlu1 %4511 }
0x4050   : > { %v4514_v25 = vpop.permute.xlu1 %4513 }
0x4051   : > { %v4516_v50 = vsel %vm1793_vm11, %v4512_v14, %v4514_v25  ;;  %v4743_v25 = vmul.f32 %v7685_v24, %v6666_v28 }
0x4052   : > { %v4520_v46 = vsel %vm832_vm0, %v4516_v50, 0.0 }
0x4053   : > { %v4521_v42 = vadd.f32 %v4520_v46, %v4519_v7 }
0x4055   : > { %4522 = vadd.xlane.f32.xlu1 %v4521_v42 }
0x405a   : > { %v4677_v19 = vpop.xlane.xlu0 %4676 }
0x405b   : > { %v4678_v11 = vrot.slane %v4677_v19, 4 }
0x405d   : > { %v4679_v10 = vadd.f32 %v4678_v11, %v4677_v19 }
0x405f   : > { %v4680_v51 = vrot.slane %v4679_v10, 2 }
0x4061   : > { %v4681_v12 = vadd.f32 %v4680_v51, %v4679_v10 }
0x4063   : > { %v4682_v37 = vrot.slane %v4681_v12, 1 }
0x4065   : > { %v4683_v59 = vadd.f32 %v4682_v37, %v4681_v12 }
0x40de   : > { %v4523_v47 = vpop.xlane.xlu1 %4522 }
0x40df   : > { %v4524_v49 = vrot.slane %v4523_v47, 4 }
0x40e1   : > { %v4525_v13 = vadd.f32 %v4524_v49, %v4523_v47 }
0x40e3   : > { %v4526_v41 = vrot.slane %v4525_v13, 2 }
0x40e5   : > { %v4527_v17 = vadd.f32 %v4526_v41, %v4525_v13 }
0x40e7   : > { %v4528_v0 = vrot.slane %v4527_v17, 1 }
0x40e9   : > { %v4529_v57 = vadd.f32 %v4528_v0, %v4527_v17 }
0x40eb   : > { %5883 = vpush %v4529_v57 }
0x411c   : > { %s5884_s19 = spop %5883 }
0x411d   : > { %s4533_s20 = smul.f32 0.0009765625, %s5884_s19 }
0x411f   : > { %s4534_s29 = sadd.f32 1e-08, %s4533_s20 }
0x4121   : > { %v4535_v6 = vstv %s4534_s29 }
0x4122   : > { %6099 = vrsqrt.f32 %v4535_v6 }
0x412f   : > { %v6100_v61 = vpop.eup %6099 }
0x4130   : > { %5885 = vpush %v6100_v61 }
0x4131   : > { %5887 = vpush %v4683_v59 }
0x4161   : > { %s7914_s12 = spop %5885 }
0x4162   : > { %s5888_s16 = spop %5887 }
0x4163   : > { %s4687_s14 = smul.f32 0.0009765625, %s5888_s16 }
0x4165   : > { %v4688_v27 = vstv %s4687_s14 }
0x4166   : > { %v4689_v23 = vsub.f32 %v4667_v38, %v4688_v27  ;;  %v4690_v45 = vsub.f32 %v4670_v9, %v4688_v27 }
0x4168   : > { %v4691_v15 = vmul.f32 %v4689_v23, %v4689_v23  ;;  %v4692_v30 = vmul.f32 %v4690_v45, %v4690_v45 }
0x416a   : > { %v4693_v60 = vsel %vm832_vm0, %v4691_v15, 0.0  ;;  %v4694_v35 = vsel %vm832_vm0, %v4692_v30, 0.0 }
0x416b   : > { %v4695_v14 = vadd.f32 %v4694_v35, %v4693_v60  ;;  %v4733_v60 = vmul.f32 %v7685_v24, %v8708_v56 }
0x416d   : > { %4696 = vadd.xlane.f32.xlu0 %v4695_v14 }
0x4183   : > { %4749 = vrot.lane.b32.xlu0 %v4741_v3, %s8705_s24 }
0x4187   : > { %4753 = vrot.lane.b32.xlu0 %v4743_v25, %s8705_s24 }
0x41f6   : > { %v4697_v38 = vpop.xlane.xlu0 %4696 }
0x41f7   : > { %v4698_v9 = vrot.slane %v4697_v38, 4 }
0x41f9   : > { %v4699_v50 = vadd.f32 %v4698_v9, %v4697_v38 }
0x41fb   : > { %v4700_v7 = vrot.slane %v4699_v50, 2 }
0x41fd   : > { %v4701_v46 = vadd.f32 %v4700_v7, %v4699_v50 }
0x41ff   : > { %v4702_v42 = vrot.slane %v4701_v46, 1 }
0x4201   : > { %v4703_v47 = vadd.f32 %v4702_v42, %v4701_v46 }
0x4203   : > { %5889 = vpush %v4703_v47 }
0x4234   : > { %s5890_s19 = spop %5889 }
0x4235   : > { %s4707_s20 = smul.f32 0.0009765625, %s5890_s19 }
0x4237   : > { %s4708_s29 = sadd.f32 1e-08, %s4707_s20 }
0x4239   : > { %v4709_v49 = vstv %s4708_s29 }
0x423a   : > { %6101 = vrsqrt.f32 %v4709_v49  ;;  %v7953_v49 = vld [vmem:[#allocation2] sm:$0xff] }
0x423b   : > { %v4735_v24 = vmul.f32 %v7953_v49, %v8749_v48 }
0x4247   : > { %v6102_v13 = vpop.eup %6101 }
0x4248   : > { %5891 = vpush %v6102_v13 }
0x4279   : > { %s5892_s16 = spop %5891 }
0x427a   : > { %v4712_v41 = vstv %s5892_s16 }
0x427b   : > { %v4713_v17 = vmul.f32 %v4712_v41, %v4689_v23  ;;  %v4714_v0 = vmul.f32 %v4712_v41, %v4690_v45 }
0x427d   : > { %v4715_v57 = vmul.f32 %v4713_v17, %v6670_v16  ;;  %v4716_v19 = vmul.f32 %v4714_v0, %v6660_v20 }
0x427f   : > { %v4717_v11 = vadd.f32 %v4715_v57, %v6662_v21  ;;  %v4718_v10 = vadd.f32 %v4716_v19, %v6678_v39 }
0x4281   : > { %v4721_v6 = vmin.f32 %v4717_v11, 0.0  ;;  %v4722_v51 = vmin.f32 %v4718_v10, 0.0  ;;  %v4719_v12 = vmax.f32 %v4717_v11, 0.0  ;;  %v4720_v37 = vmax.f32 %v4718_v10, 0.0 }
0x4283   : > { %v4723_v61 = vmul.f32 %v4721_v6, %v6664_v22  ;;  %v4724_v59 = vmul.f32 %v4722_v51, %v6664_v22 }
0x4285   : > { %v4725_v27 = vadd.f32 %v4723_v61, %v4719_v12  ;;  %v4726_v15 = vadd.f32 %v4724_v59, %v4720_v37  ;;  %v8785_v59 = vld [vmem:[#allocation22_spill] sm:$0xff] }
0x4287   : > { %4727 = vst.msk [vmem:[#allocation2 + $0x8] sm:$0xff] %vm832_vm0, %v4725_v27  ;;  %4728 = vst.msk [vmem:[#allocation2 + $0x20] sm:$0xff] %vm832_vm0, %v4726_v15 }
0x428e   : > { %v4732_v16 = vld [vmem:[#allocation2 + $0x20] sm:$0xff]  ;;  %v4730_v20 = vld [vmem:[#allocation2 + $0x8] sm:$0xff] }
0x428f   : > { %v4744_v21 = vmul.f32 %v4732_v16, %v6666_v28  ;;  %v4742_v39 = vmul.f32 %v4730_v20, %v6680_v34  ;;  %v4767_v23 = vmul.f32 %v4730_v20, %v6700_v54  ;;  %v4781_v22 = vmul.f32 %v4730_v20, %v6708_v1  ;;  %v4750_v54 = vpop.permute.xlu0 %4749 }
0x4290   : > { %v4768_v45 = vmul.f32 %v4732_v16, %v6704_v63  ;;  %v4795_v30 = vmul.f32 %v4730_v20, %v6714_v4  ;;  %v4782_v28 = vmul.f32 %v4732_v16, %v8706_v8  ;;  %v4796_v34 = vmul.f32 %v4732_v16, %v8707_v2 }
0x4291   : > { %4755 = vrot.lane.b32.xlu0 %v4744_v21, %s8705_s24  ;;  %4751 = vrot.lane.b32.xlu1 %v4742_v39, %s8705_s24  ;;  %v4734_v4 = vmul.f32 %v4730_v20, %v8708_v56  ;;  %v4736_v56 = vmul.f32 %v4732_v16, %v8749_v48 }
0x4293   : > { %v4754_v1 = vpop.permute.xlu0 %4753 }
0x4295   : > { %4771 = vrot.lane.b32.xlu0 %v4767_v23, %s8666_s5  ;;  %4785 = vrot.lane.b32.xlu1 %v4781_v22, %s8668_s4 }
0x4299   : > { %4773 = vrot.lane.b32.xlu0 %v4768_v45, %s8666_s5  ;;  %4799 = vrot.lane.b32.xlu1 %v4795_v30, %s8671_s28 }
0x429d   : > { %4787 = vrot.lane.b32.xlu0 %v4782_v28, %s8668_s4 }
0x42a1   : > { %4801 = vrot.lane.b32.xlu0 %v4796_v34, %s8671_s28 }
0x4303   : > { %v4752_v63 = vpop.permute.xlu1 %4751  ;;  %v4756_v35 = vpop.permute.xlu0 %4755 }
0x4304   : > { %v4757_v14 = vsel %vm1690_vm10, %v4750_v54, %v4752_v63  ;;  %v4764_v25 = vadd.f32 %v4752_v63, %v4734_v4  ;;  %v4758_v46 = vsel %vm1690_vm10, %v4754_v1, %v4756_v35  ;;  %v4766_v0 = vadd.f32 %v4756_v35, %v4736_v56 }
0x4305   : > { %v4763_v3 = vadd.f32 %v4757_v14, %v4733_v60  ;;  %v4765_v17 = vadd.f32 %v4758_v46, %v4735_v24 }
0x4307   : > { %v4786_v8 = vpop.permute.xlu1 %4785  ;;  %v4772_v38 = vpop.permute.xlu0 %4771 }
0x4308   : > { %v4777_v9 = vadd.f32 %v4772_v38, %v4763_v3  ;;  %v4778_v50 = vadd.f32 %v4772_v38, %v4764_v25 }
0x430a   : > { %v4791_v2 = vadd.f32 %v4786_v8, %v4777_v9  ;;  %v4792_v7 = vadd.f32 %v4786_v8, %v4778_v50 }
0x430b   : > { %v4800_v42 = vpop.permute.xlu1 %4799  ;;  %v4774_v47 = vpop.permute.xlu0 %4773 }
0x430c   : > { %v4805_v13 = vadd.f32 %v4800_v42, %v4791_v2  ;;  %v4806_v41 = vadd.f32 %v4800_v42, %v4792_v7  ;;  %v4779_v10 = vadd.f32 %v4774_v47, %v4765_v17  ;;  %v4780_v6 = vadd.f32 %v4774_v47, %v4766_v0 }
0x430e   : > { %v4809_v57 = vadd.f32 %v4805_v13, %v8750_v55  ;;  %v4810_v19 = vadd.f32 %v4806_v41, %v8750_v55 }
0x430f   : > { %v4788_v11 = vpop.permute.xlu0 %4787 }
0x4310   : > { %4819 = vrot.lane.b32.xlu0 %v4810_v19, %s8697_s1  ;;  %4817 = vrot.lane.b32.xlu1 %v4809_v57, %s8697_s1  ;;  %v4793_v51 = vadd.f32 %v4788_v11, %v4779_v10  ;;  %v4794_v12 = vadd.f32 %v4788_v11, %v4780_v6 }
0x4313   : > { %v4802_v37 = vpop.permute.xlu0 %4801 }
0x4314   : > { %v4807_v61 = vadd.f32 %v4802_v37, %v4793_v51  ;;  %v4808_v48 = vadd.f32 %v4802_v37, %v4794_v12 }
0x4316   : > { %v4811_v27 = vadd.f32 %v4807_v61, %v8785_v59  ;;  %v4812_v15 = vadd.f32 %v4808_v48, %v8785_v59 }
0x4318   : > { %4823 = vrot.lane.b32.xlu0 %v4812_v15, %s8697_s1  ;;  %4821 = vrot.lane.b32.xlu1 %v4811_v27, %s8697_s1 }
0x4382   : > { %v4818_v55 = vpop.permute.xlu1 %4817  ;;  %v4820_v16 = vpop.permute.xlu0 %4819 }
0x4383   : > { %v4825_v20 = vsel %vm1793_vm11, %v4818_v55, %v4820_v16 }
0x4384   : > { %v4829_v22 = vsel %vm832_vm0, %v4825_v20, 0.0 }
0x438a   : > { %v4822_v21 = vpop.permute.xlu1 %4821  ;;  %v4824_v39 = vpop.permute.xlu0 %4823 }
0x438b   : > { %v4826_v23 = vsel %vm1793_vm11, %v4822_v21, %v4824_v39  ;;  %v8787_v21 = vld [vmem:[#allocation25_spill] sm:$0xff] }
0x438c   : > { %v4830_v45 = vsel %vm832_vm0, %v4826_v23, 0.0  ;;  %v8788_v23 = vld [vmem:[#allocation27_spill] sm:$0xff] }
0x438d   : > { %v4831_v30 = vadd.f32 %v4830_v45, %v4829_v22 }
0x438f   : > { %4832 = vadd.xlane.f32.xlu1 %v4831_v30 }
0x4418   : > { %v4833_v28 = vpop.xlane.xlu1 %4832 }
0x4419   : > { %v4834_v34 = vrot.slane %v4833_v28, 4 }
0x441b   : > { %v4835_v54 = vadd.f32 %v4834_v34, %v4833_v28  ;;  %v8789_v28 = vld [vmem:[#allocation26_spill] sm:$0xff] }
0x441d   : > { %v4836_v1 = vrot.slane %v4835_v54, 2 }
0x441f   : > { %v4837_v60 = vadd.f32 %v4836_v1, %v4835_v54  ;;  %v8790_v1 = vld [vmem:[#allocation28_spill] sm:$0xff] }
0x4421   : > { %v4838_v63 = vrot.slane %v4837_v60, 1 }
0x4423   : > { %v4839_v35 = vadd.f32 %v4838_v63, %v4837_v60  ;;  %v4931_v60 = vmul.f32 %v7953_v49, %v8790_v1  ;;  %v8791_v63 = vld [vmem:[#allocation29_spill] sm:$0xff] }
0x4425   : > { %5893 = vpush %v4839_v35  ;;  %v4933_v35 = vmul.f32 %v7953_v49, %v8791_v63 }
0x4456   : > { %s5894_s14 = spop %5893 }
0x4457   : > { %s4843_s19 = smul.f32 0.0009765625, %s5894_s14 }
0x4459   : > { %v4844_v4 = vstv %s4843_s19 }
0x445a   : > { %v4845_v14 = vsub.f32 %v4809_v57, %v4844_v4  ;;  %v4846_v3 = vsub.f32 %v4810_v19, %v4844_v4  ;;  %v4847_v8 = vsub.f32 %v4811_v27, %v4844_v4  ;;  %v4848_v9 = vsub.f32 %v4812_v15, %v4844_v4  ;;  %v8786_v15 = vld [vmem:[#allocation24_spill] sm:$0xff] }
0x445c   : > { %v4849_v25 = vmul.f32 %v4845_v14, %v4845_v14  ;;  %v4850_v38 = vmul.f32 %v4846_v3, %v4846_v3  ;;  %v4851_v50 = vmul.f32 %v4847_v8, %v4847_v8  ;;  %v4852_v2 = vmul.f32 %v4848_v9, %v4848_v9 }
0x445e   : > { %4857 = vrot.lane.b32.xlu0 %v4849_v25, %s8697_s1 }
0x4462   : > { %4859 = vrot.lane.b32.xlu0 %v4850_v38, %s8697_s1 }
0x4466   : > { %4861 = vrot.lane.b32.xlu0 %v4851_v50, %s8697_s1 }
0x446a   : > { %4863 = vrot.lane.b32.xlu0 %v4852_v2, %s8697_s1  ;;  %v8792_v2 = vld [vmem:[#allocation30_spill] sm:$0xff] }
0x44d0   : > { %v4858_v7 = vpop.permute.xlu0 %4857 }
0x44d4   : > { %v4860_v46 = vpop.permute.xlu0 %4859 }
0x44d5   : > { %v4865_v47 = vsel %vm1793_vm11, %v4858_v7, %v4860_v46 }
0x44d6   : > { %v4869_v13 = vsel %vm832_vm0, %v4865_v47, 0.0 }
0x44d8   : > { %v4862_v42 = vpop.permute.xlu0 %4861 }
0x44dc   : > { %v4864_v24 = vpop.permute.xlu0 %4863 }
0x44dd   : > { %v4866_v56 = vsel %vm1793_vm11, %v4862_v42, %v4864_v24  ;;  %v8793_v42 = vld [vmem:[#allocation31_spill] sm:$0xff] }
0x44de   : > { %v4870_v41 = vsel %vm832_vm0, %v4866_v56, 0.0  ;;  %v8794_v56 = vld [vmem:[#allocation35_spill] sm:$0xff] }
0x44df   : > { %v4871_v17 = vadd.f32 %v4870_v41, %v4869_v13  ;;  %v8795_v41 = vld [vmem:[#allocation33_spill] sm:$0xff] }
0x44e1   : > { %4872 = vadd.xlane.f32.xlu0 %v4871_v17 }
0x456a   : > { %v4873_v0 = vpop.xlane.xlu0 %4872 }
0x456b   : > { %v4874_v57 = vrot.slane %v4873_v0, 4 }
0x456d   : > { %v4875_v19 = vadd.f32 %v4874_v57, %v4873_v0  ;;  %v8796_v0 = vld [vmem:[#allocation32_spill] sm:$0xff] }
0x456f   : > { %v4876_v11 = vrot.slane %v4875_v19, 2 }
0x4571   : > { %v4877_v10 = vadd.f32 %v4876_v11, %v4875_v19  ;;  %v8797_v19 = vld [vmem:[#allocation34_spill] sm:$0xff] }
0x4573   : > { %v4878_v6 = vrot.slane %v4877_v10, 1 }
0x4575   : > { %v4879_v51 = vadd.f32 %v4878_v6, %v4877_v10 }
0x4577   : > { %5895 = vpush %v4879_v51 }
0x45a8   : > { %s5896_s20 = spop %5895 }
0x45a9   : > { %s4883_s29 = smul.f32 0.0009765625, %s5896_s20 }
0x45ab   : > { %s4884_s16 = sadd.f32 1e-08, %s4883_s29 }
0x45ad   : > { %v4885_v12 = vstv %s4884_s16 }
0x45ae   : > { %6103 = vrsqrt.f32 %v4885_v12 }
0x45bb   : > { %v6104_v37 = vpop.eup %6103 }
0x45bc   : > { %5897 = vpush %v6104_v37  ;;  %v8798_v37 = vld [vmem:[#allocation36_spill] sm:$0xff] }
0x45ed   : > { %s5898_s14 = spop %5897 }
0x45ee   : > { %v4888_v61 = vstv %s5898_s14 }
0x45ef   : > { %v4889_v48 = vmul.f32 %v4888_v61, %v4845_v14  ;;  %v4890_v59 = vmul.f32 %v4888_v61, %v4846_v3  ;;  %v4891_v27 = vmul.f32 %v4888_v61, %v4847_v8  ;;  %v4892_v20 = vmul.f32 %v4888_v61, %v4848_v9 }
0x45f0   : > { %v4923_v61 = vmul.f32 %v7953_v49, %v8798_v37 }
0x45f1   : > { %v4893_v55 = vmul.f32 %v4889_v48, %v8786_v15  ;;  %v4894_v16 = vmul.f32 %v4890_v59, %v8786_v15  ;;  %v4895_v39 = vmul.f32 %v4891_v27, %v8787_v21  ;;  %v4896_v30 = vmul.f32 %v4892_v20, %v8787_v21 }
0x45f3   : > { %v7982_v22 = vadd.f32 %v4894_v16, %v8788_v23  ;;  %v7985_v45 = vadd.f32 %v4893_v55, %v8788_v23  ;;  %v7993_v34 = vadd.f32 %v4895_v39, %v8789_v28  ;;  %v7998_v54 = vadd.f32 %v4896_v30, %v8789_v28  ;;  %v8799_v23 = vld [vmem:[#allocation37_spill] sm:$0xff] }
0x45f4   : > { %v4925_v30 = vmul.f32 %v7953_v49, %v8799_v23 }
0x45f5   : > { %4907 = vrot.lane.b32.xlu0 %v7982_v22, %s8697_s1  ;;  %4905 = vrot.lane.b32.xlu1 %v7985_v45, %s8697_s1 }
0x45f9   : > { %4909 = vrot.lane.b32.xlu1 %v7993_v34, %s8697_s1 }
0x45fd   : > { %4911 = vrot.lane.b32.xlu1 %v7998_v54, %s8697_s1 }
0x4601   : > { %4939 = vrot.lane.b32.xlu1 %v4931_v60, %s8705_s24 }
0x4605   : > { %4943 = vrot.lane.b32.xlu1 %v4933_v35, %s8705_s24 }
0x4667   : > { %v4908_v4 = vpop.permute.xlu0 %4907  ;;  %v4906_v14 = vpop.permute.xlu1 %4905 }
0x4668   : > { %v4913_v3 = vsel %vm1793_vm11, %v4906_v14, %v4908_v4 }
0x4669   : > { %4917 = vst.msk [vmem:[#allocation2 + $0x8] sm:$0xff] %vm832_vm0, %v4913_v3 }
0x466b   : > { %v4910_v25 = vpop.permute.xlu1 %4909 }
0x466f   : > { %v4912_v8 = vpop.permute.xlu1 %4911 }
0x4670   : > { %v4914_v38 = vsel %vm1793_vm11, %v4910_v25, %v4912_v8  ;;  %v4920_v9 = vld [vmem:[#allocation2 + $0x8] sm:$0xff]  ;;  %v8800_v8 = vld [vmem:[#allocation39_spill] sm:$0xff] }
0x4671   : > { %4918 = vst.msk [vmem:[#allocation2 + $0x20] sm:$0xff] %vm832_vm0, %v4914_v38  ;;  %v4932_v50 = vmul.f32 %v4920_v9, %v8790_v1  ;;  %v4957_v7 = vmul.f32 %v4920_v9, %v8792_v2  ;;  %v4971_v47 = vmul.f32 %v4920_v9, %v8793_v42  ;;  %v4985_v13 = vmul.f32 %v4920_v9, %v8794_v56  ;;  %v8801_v42 = vld [vmem:[#allocation40_spill] sm:$0xff] }
0x4672   : > { %v4924_v59 = vmul.f32 %v4920_v9, %v8798_v37 }
0x4673   : > { %4941 = vrot.lane.b32.xlu1 %v4932_v50, %s8705_s24  ;;  %v4940_v10 = vpop.permute.xlu1 %4939 }
0x4677   : > { %4961 = vrot.lane.b32.xlu1 %v4957_v7, %s8666_s5  ;;  %v4944_v6 = vpop.permute.xlu1 %4943 }
0x4678   : > { %v4922_v46 = vld [vmem:[#allocation2 + $0x20] sm:$0xff] }
0x4679   : > { %v4934_v24 = vmul.f32 %v4922_v46, %v8791_v63  ;;  %v4958_v17 = vmul.f32 %v4922_v46, %v8795_v41  ;;  %v4972_v57 = vmul.f32 %v4922_v46, %v8796_v0  ;;  %v4986_v11 = vmul.f32 %v4922_v46, %v8797_v19  ;;  %v8802_v0 = vld [vmem:[#allocation38_spill] sm:$0xff] }
0x467a   : > { %v4926_v35 = vmul.f32 %v4922_v46, %v8799_v23 }
0x467b   : > { %4975 = vrot.lane.b32.xlu1 %v4971_v47, %s8668_s4  ;;  %4945 = vrot.lane.b32.xlu0 %v4934_v24, %s8705_s24 }
0x467f   : > { %4989 = vrot.lane.b32.xlu1 %v4985_v13, %s8671_s28  ;;  %4963 = vrot.lane.b32.xlu0 %v4958_v17, %s8666_s5 }
0x4683   : > { %4977 = vrot.lane.b32.xlu0 %v4972_v57, %s8668_s4 }
0x4687   : > { %4991 = vrot.lane.b32.xlu0 %v4986_v11, %s8671_s28 }
0x46e5   : > { %v4942_v51 = vpop.permute.xlu1 %4941 }
0x46e6   : > { %v4947_v12 = vsel %vm1690_vm10, %v4940_v10, %v4942_v51  ;;  %v4954_v15 = vadd.f32 %v4942_v51, %v4924_v59 }
0x46e7   : > { %v4953_v27 = vadd.f32 %v4947_v12, %v4923_v61 }
0x46e9   : > { %v4962_v48 = vpop.permute.xlu1 %4961 }
0x46ea   : > { %v4967_v20 = vadd.f32 %v4962_v48, %v4953_v27  ;;  %v4968_v21 = vadd.f32 %v4962_v48, %v4954_v15 }
0x46ed   : > { %v4946_v55 = vpop.permute.xlu0 %4945  ;;  %v4976_v16 = vpop.permute.xlu1 %4975 }
0x46ee   : > { %v4948_v39 = vsel %vm1690_vm10, %v4944_v6, %v4946_v55  ;;  %v4981_v28 = vadd.f32 %v4976_v16, %v4967_v20  ;;  %v4982_v1 = vadd.f32 %v4976_v16, %v4968_v21  ;;  %v4956_v25 = vadd.f32 %v4946_v55, %v4926_v35 }
0x46ef   : > { %v4955_v4 = vadd.f32 %v4948_v39, %v4925_v30 }
0x46f1   : > { %v4964_v60 = vpop.permute.xlu0 %4963  ;;  %v4990_v63 = vpop.permute.xlu1 %4989 }
0x46f2   : > { %v4995_v14 = vadd.f32 %v4990_v63, %v4981_v28  ;;  %v4996_v3 = vadd.f32 %v4990_v63, %v4982_v1  ;;  %v4969_v2 = vadd.f32 %v4964_v60, %v4955_v4  ;;  %v4970_v7 = vadd.f32 %v4964_v60, %v4956_v25 }
0x46f4   : > { %v4999_v38 = vadd.f32 %v4995_v14, %v8800_v8  ;;  %v5000_v9 = vadd.f32 %v4996_v3, %v8800_v8 }
0x46f5   : > { %v4978_v50 = vpop.permute.xlu0 %4977 }
0x46f6   : > { %v5003_v47 = vmul.f32 %v4999_v38, %v8801_v42  ;;  %v5004_v24 = vmul.f32 %v5000_v9, %v8801_v42  ;;  %v4983_v56 = vadd.f32 %v4978_v50, %v4969_v2  ;;  %v4984_v13 = vadd.f32 %v4978_v50, %v4970_v7 }
0x46f8   : > { %5013 = vrot.lane.b32.xlu0 %v5004_v24, %s8697_s1  ;;  %5011 = vrot.lane.b32.xlu1 %v5003_v47, %s8697_s1 }
0x46f9   : > { %v4992_v46 = vpop.permute.xlu0 %4991 }
0x46fa   : > { %v4997_v41 = vadd.f32 %v4992_v46, %v4983_v56  ;;  %v4998_v17 = vadd.f32 %v4992_v46, %v4984_v13 }
0x46fc   : > { %v5001_v57 = vadd.f32 %v4997_v41, %v8802_v0  ;;  %v5002_v19 = vadd.f32 %v4998_v17, %v8802_v0 }
0x46fe   : > { %v5005_v11 = vmul.f32 %v5001_v57, %v8801_v42  ;;  %v5006_v10 = vmul.f32 %v5002_v19, %v8801_v42 }
0x4700   : > { %5017 = vrot.lane.b32.xlu0 %v5006_v10, %s8697_s1  ;;  %5015 = vrot.lane.b32.xlu1 %v5005_v11, %s8697_s1 }
0x476a   : > { %v5014_v6 = vpop.permute.xlu0 %5013  ;;  %v5012_v51 = vpop.permute.xlu1 %5011 }
0x476b   : > { %v5019_v12 = vsel %vm1793_vm11, %v5012_v51, %v5014_v6 }
0x476c   : > { %v5023_v59 = vsel %vm832_vm0, %v5019_v12, 0.0 }
0x4772   : > { %v5018_v37 = vpop.permute.xlu0 %5017  ;;  %v5016_v61 = vpop.permute.xlu1 %5015 }
0x4773   : > { %v5020_v48 = vsel %vm1793_vm11, %v5016_v61, %v5018_v37 }
0x4774   : > { %v5024_v27 = vsel %vm832_vm0, %v5020_v48, 0.0 }
0x4775   : > { %v5025_v15 = vadd.f32 %v5024_v27, %v5023_v59  ;;  %v8803_v27 = vld [vmem:[#allocation41_spill] sm:$0xff] }
0x4777   : > { %5026 = vadd.xlane.f32.xlu1 %v5025_v15 }
0x4800   : > { %v5027_v55 = vpop.xlane.xlu1 %5026 }
0x4801   : > { %v5028_v16 = vrot.slane %v5027_v55, 4 }
0x4803   : > { %v5029_v20 = vadd.f32 %v5028_v16, %v5027_v55 }
0x4805   : > { %v5030_v21 = vrot.slane %v5029_v20, 2 }
0x4807   : > { %v5031_v39 = vadd.f32 %v5030_v21, %v5029_v20  ;;  %v8804_v20 = vld [vmem:[#allocation42_spill] sm:$0xff] }
0x4809   : > { %v5032_v23 = vrot.slane %v5031_v39, 1 }
0x480b   : > { %v5033_v30 = vadd.f32 %v5032_v23, %v5031_v39  ;;  %v8805_v39 = vld [vmem:[#allocation44_spill] sm:$0xff] }
0x480d   : > { %5899 = vpush %v5033_v30 }
0x483e   : > { %s5900_s4 = spop %5899 }
0x483f   : > { %s5037_s24 = smul.f32 0.001953125, %s5900_s4 }
0x4841   : > { %v5038_v28 = vstv %s5037_s24 }
0x4842   : > { %v5039_v1 = vsub.f32 %v4999_v38, %v5038_v28  ;;  %v5040_v60 = vsub.f32 %v5000_v9, %v5038_v28  ;;  %v5041_v35 = vsub.f32 %v5001_v57, %v5038_v28  ;;  %v5042_v3 = vsub.f32 %v5002_v19, %v5038_v28 }
0x4844   : > { %v5043_v63 = vmul.f32 %v5039_v1, %v5039_v1  ;;  %v5044_v4 = vmul.f32 %v5040_v60, %v5040_v60  ;;  %v5045_v25 = vmul.f32 %v5041_v35, %v5041_v35  ;;  %v5046_v50 = vmul.f32 %v5042_v3, %v5042_v3 }
0x4846   : > { %v5047_v14 = vmul.f32 %v5043_v63, %v8801_v42  ;;  %v5048_v8 = vmul.f32 %v5044_v4, %v8801_v42  ;;  %v5049_v2 = vmul.f32 %v5045_v25, %v8801_v42  ;;  %v5050_v38 = vmul.f32 %v5046_v50, %v8801_v42 }
0x4848   : > { %5055 = vrot.lane.b32.xlu0 %v5047_v14, %s8697_s1  ;;  %v8808_v14 = vld [vmem:[#allocation46_spill] sm:$0xff] }
0x484c   : > { %5057 = vrot.lane.b32.xlu0 %v5048_v8, %s8697_s1 }
0x4850   : > { %5059 = vrot.lane.b32.xlu0 %v5049_v2, %s8697_s1 }
0x4854   : > { %5061 = vrot.lane.b32.xlu0 %v5050_v38, %s8697_s1 }
0x48ba   : > { %v5056_v9 = vpop.permute.xlu0 %5055 }
0x48be   : > { %v5058_v7 = vpop.permute.xlu0 %5057 }
0x48bf   : > { %v5063_v24 = vsel %vm1793_vm11, %v5056_v9, %v5058_v7 }
0x48c0   : > { %v5067_v46 = vsel %vm832_vm0, %v5063_v24, 0.0  ;;  %v8809_v24 = vld [vmem:[#allocation47_spill] sm:$0xff] }
0x48c2   : > { %v5060_v47 = vpop.permute.xlu0 %5059 }
0x48c6   : > { %v5062_v56 = vpop.permute.xlu0 %5061 }
0x48c7   : > { %v5064_v13 = vsel %vm1793_vm11, %v5060_v47, %v5062_v56 }
0x48c8   : > { %v5068_v41 = vsel %vm832_vm0, %v5064_v13, 0.0 }
0x48c9   : > { %v5069_v17 = vadd.f32 %v5068_v41, %v5067_v46  ;;  %v8810_v46 = vld [vmem:[#allocation48_spill] sm:$0xff] }
0x48cb   : > { %5070 = vadd.xlane.f32.xlu0 %v5069_v17 }
0x4954   : > { %v5071_v0 = vpop.xlane.xlu0 %5070 }
0x4955   : > { %v5072_v57 = vrot.slane %v5071_v0, 4 }
0x4957   : > { %v5073_v19 = vadd.f32 %v5072_v57, %v5071_v0  ;;  %v8811_v0 = vld [vmem:[#allocation52_spill] sm:$0xff] }
0x4959   : > { %v5074_v42 = vrot.slane %v5073_v19, 2 }
0x495b   : > { %v5075_v11 = vadd.f32 %v5074_v42, %v5073_v19  ;;  %v8812_v19 = vld [vmem:[#allocation50_spill] sm:$0xff] }
0x495d   : > { %v5076_v10 = vrot.slane %v5075_v11, 1 }
0x495f   : > { %v5077_v6 = vadd.f32 %v5076_v10, %v5075_v11  ;;  %v8813_v11 = vld [vmem:[#allocation49_spill] sm:$0xff] }
0x4961   : > { %5901 = vpush %v5077_v6  ;;  %v8814_v6 = vld [vmem:[#allocation51_spill] sm:$0xff] }
0x4992   : > { %s5902_s19 = spop %5901 }
0x4993   : > { %s5081_s20 = smul.f32 0.001953125, %s5902_s19 }
0x4995   : > { %s5082_s29 = sadd.f32 1e-08, %s5081_s20  ;;  %s5684_s20 = sshll.u32 %s6388_s17, 8 }
0x4997   : > { %v5083_v51 = vstv %s5082_s29 }
0x4998   : > { %6105 = vrsqrt.f32 %v5083_v51 }
0x49a5   : > { %v6106_v12 = vpop.eup %6105 }
0x49a6   : > { %5903 = vpush %v6106_v12 }
0x49d7   : > { %s5904_s16 = spop %5903 }
0x49d8   : > { %v5086_v37 = vstv %s5904_s16 }
0x49d9   : > { %v5087_v61 = vmul.f32 %v5086_v37, %v5039_v1  ;;  %v5088_v48 = vmul.f32 %v5086_v37, %v5040_v60  ;;  %v5089_v59 = vmul.f32 %v5086_v37, %v5041_v35  ;;  %v5090_v16 = vmul.f32 %v5086_v37, %v5042_v3  ;;  %v8806_v1 = vld [vmem:[#allocation43_spill] sm:$0xff]  ;;  %v8807_v35 = vld [vmem:[#allocation45_spill] sm:$0xff] }
0x49da   : > { %v5129_v4 = vmul.f32 %v7953_v49, %v8807_v35  ;;  %v5131_v3 = vmul.f32 %v7953_v49, %v8808_v14 }
0x49db   : > { %v5091_v15 = vmul.f32 %v5087_v61, %v8803_v27  ;;  %v5092_v55 = vmul.f32 %v5088_v48, %v8803_v27  ;;  %v5093_v21 = vmul.f32 %v5089_v59, %v8804_v20  ;;  %v5094_v28 = vmul.f32 %v5090_v16, %v8804_v20  ;;  %v8815_v59 = vld [vmem:[#allocation53_spill] sm:$0xff] }
0x49dc   : > { %v5121_v27 = vmul.f32 %v7953_v49, %v8815_v59 }
0x49dd   : > { %v8068_v23 = vadd.f32 %v5092_v55, %v8805_v39  ;;  %v8071_v30 = vadd.f32 %v5091_v15, %v8805_v39  ;;  %v8079_v60 = vadd.f32 %v5093_v21, %v8806_v1  ;;  %v8084_v63 = vadd.f32 %v5094_v28, %v8806_v1 }
0x49df   : > { %5105 = vrot.lane.b32.xlu0 %v8068_v23, %s8697_s1  ;;  %5103 = vrot.lane.b32.xlu1 %v8071_v30, %s8697_s1 }
0x49e3   : > { %5107 = vrot.lane.b32.xlu1 %v8079_v60, %s8697_s1 }
0x49e7   : > { %5109 = vrot.lane.b32.xlu1 %v8084_v63, %s8697_s1 }
0x49eb   : > { %5137 = vrot.lane.b32.xlu1 %v5129_v4, %s8666_s5  ;;  %v5123_v4 = vmul.f32 %v7953_v49, %v7036_v26 }
0x49ef   : > { %5141 = vrot.lane.b32.xlu1 %v5131_v3, %s8666_s5 }
0x4a51   : > { %v5106_v25 = vpop.permute.xlu0 %5105  ;;  %v5104_v8 = vpop.permute.xlu1 %5103 }
0x4a52   : > { %v5111_v50 = vsel %vm1793_vm11, %v5104_v8, %v5106_v25 }
0x4a53   : > { %5115 = vst.msk [vmem:[#allocation2 + $0x8] sm:$0xff] %vm832_vm0, %v5111_v50 }
0x4a55   : > { %v5108_v2 = vpop.permute.xlu1 %5107 }
0x4a59   : > { %v5110_v38 = vpop.permute.xlu1 %5109 }
0x4a5a   : > { %v5112_v9 = vsel %vm1793_vm11, %v5108_v2, %v5110_v38  ;;  %v5118_v7 = vld [vmem:[#allocation2 + $0x8] sm:$0xff] }
0x4a5b   : > { %5116 = vst.msk [vmem:[#allocation2 + $0x20] sm:$0xff] %vm832_vm0, %v5112_v9  ;;  %v5130_v47 = vmul.f32 %v5118_v7, %v8807_v35  ;;  %v5155_v56 = vmul.f32 %v5118_v7, %v8809_v24  ;;  %v5169_v41 = vmul.f32 %v5118_v7, %v8810_v46  ;;  %v5183_v57 = vmul.f32 %v5118_v7, %v8811_v0 }
0x4a5c   : > { %v5122_v55 = vmul.f32 %v5118_v7, %v8815_v59 }
0x4a5d   : > { %5139 = vrot.lane.b32.xlu1 %v5130_v47, %s8666_s5  ;;  %v5138_v12 = vpop.permute.xlu1 %5137 }
0x4a61   : > { %5159 = vrot.lane.b32.xlu1 %v5155_v56, %s8671_s28  ;;  %v5142_v37 = vpop.permute.xlu1 %5141 }
0x4a62   : > { %v5120_v13 = vld [vmem:[#allocation2 + $0x20] sm:$0xff] }
0x4a63   : > { %v5132_v17 = vmul.f32 %v5120_v13, %v8808_v14  ;;  %v5156_v42 = vmul.f32 %v5120_v13, %v8812_v19  ;;  %v5170_v10 = vmul.f32 %v5120_v13, %v8813_v11  ;;  %v5184_v51 = vmul.f32 %v5120_v13, %v8814_v6 }
0x4a64   : > { %v5124_v50 = vmul.f32 %v5120_v13, %v7036_v26 }
0x4a65   : > { %5173 = vrot.lane.b32.xlu1 %v5169_v41, %s8737_s11  ;;  %5143 = vrot.lane.b32.xlu0 %v5132_v17, %s8666_s5 }
0x4a69   : > { %5187 = vrot.lane.b32.xlu1 %v5183_v57, %s8740_s3  ;;  %5161 = vrot.lane.b32.xlu0 %v5156_v42, %s8671_s28 }
0x4a6d   : > { %5175 = vrot.lane.b32.xlu0 %v5170_v10, %s8737_s11 }
0x4a71   : > { %5189 = vrot.lane.b32.xlu0 %v5184_v51, %s8740_s3 }
0x4acf   : > { %v5140_v61 = vpop.permute.xlu1 %5139 }
0x4ad0   : > { %v5145_v48 = vsel %vm2222_vm14, %v5138_v12, %v5140_v61  ;;  %v5152_v20 = vadd.f32 %v5140_v61, %v5122_v55 }
0x4ad1   : > { %v5151_v16 = vadd.f32 %v5145_v48, %v5121_v27 }
0x4ad3   : > { %v5160_v15 = vpop.permute.xlu1 %5159 }
0x4ad4   : > { %v5165_v28 = vadd.f32 %v5160_v15, %v5151_v16  ;;  %v5166_v1 = vadd.f32 %v5160_v15, %v5152_v20 }
0x4ad7   : > { %v5144_v21 = vpop.permute.xlu0 %5143  ;;  %v5174_v39 = vpop.permute.xlu1 %5173 }
0x4ad8   : > { %v5146_v35 = vsel %vm2222_vm14, %v5142_v37, %v5144_v21  ;;  %v5179_v14 = vadd.f32 %v5174_v39, %v5165_v28  ;;  %v5180_v3 = vadd.f32 %v5174_v39, %v5166_v1  ;;  %v5154_v7 = vadd.f32 %v5144_v21, %v5124_v50 }
0x4ad9   : > { %v5153_v2 = vadd.f32 %v5146_v35, %v5123_v4 }
0x4adb   : > { %v5162_v25 = vpop.permute.xlu0 %5161  ;;  %v5188_v8 = vpop.permute.xlu1 %5187 }
0x4adc   : > { %v5193_v38 = vadd.f32 %v5188_v8, %v5179_v14  ;;  %v5194_v9 = vadd.f32 %v5188_v8, %v5180_v3  ;;  %v5167_v46 = vadd.f32 %v5162_v25, %v5153_v2  ;;  %v5168_v41 = vadd.f32 %v5162_v25, %v5154_v7 }
0x4ade   : > { %v5197_v47 = vadd.f32 %v5193_v38, %v7040_v32  ;;  %v5198_v24 = vadd.f32 %v5194_v9, %v7040_v32 }
0x4adf   : > { %v5176_v56 = vpop.permute.xlu0 %5175 }
0x4ae0   : > { %v5201_v17 = vmul.f32 %v5197_v47, %v7052_v40  ;;  %v5202_v0 = vmul.f32 %v5198_v24, %v7052_v40  ;;  %v5181_v57 = vadd.f32 %v5176_v56, %v5167_v46  ;;  %v5182_v19 = vadd.f32 %v5176_v56, %v5168_v41 }
0x4ae2   : > { %5211 = vrot.lane.b32.xlu0 %v5202_v0, %s8743_s0  ;;  %5209 = vrot.lane.b32.xlu1 %v5201_v17, %s8743_s0 }
0x4ae3   : > { %v5190_v26 = vpop.permute.xlu0 %5189 }
0x4ae4   : > { %v5195_v13 = vadd.f32 %v5190_v26, %v5181_v57  ;;  %v5196_v42 = vadd.f32 %v5190_v26, %v5182_v19 }
0x4ae6   : > { %v5199_v11 = vadd.f32 %v5195_v13, %v7038_v36  ;;  %v5200_v32 = vadd.f32 %v5196_v42, %v7038_v36 }
0x4ae8   : > { %v5203_v10 = vmul.f32 %v5199_v11, %v7052_v40  ;;  %v5204_v6 = vmul.f32 %v5200_v32, %v7052_v40 }
0x4aea   : > { %5215 = vrot.lane.b32.xlu0 %v5204_v6, %s8743_s0  ;;  %5213 = vrot.lane.b32.xlu1 %v5203_v10, %s8743_s0 }
0x4b54   : > { %v5212_v51 = vpop.permute.xlu0 %5211  ;;  %v5210_v12 = vpop.permute.xlu1 %5209 }
0x4b55   : > { %v5217_v37 = vsel %vm2335_vm15, %v5210_v12, %v5212_v51 }
0x4b56   : > { %v5221_v27 = vsel %vm832_vm0, %v5217_v37, 0.0 }
0x4b5c   : > { %v5216_v61 = vpop.permute.xlu0 %5215  ;;  %v5214_v48 = vpop.permute.xlu1 %5213 }
0x4b5d   : > { %v5218_v59 = vsel %vm2335_vm15, %v5214_v48, %v5216_v61 }
0x4b5e   : > { %v5222_v36 = vsel %vm832_vm0, %v5218_v59, 0.0 }
0x4b5f   : > { %v5223_v15 = vadd.f32 %v5222_v36, %v5221_v27 }
0x4b61   : > { %5224 = vadd.xlane.f32.xlu1 %v5223_v15 }
0x4bea   : > { %v5225_v55 = vpop.xlane.xlu1 %5224 }
0x4beb   : > { %v5226_v16 = vrot.slane %v5225_v55, 4 }
0x4bed   : > { %v5227_v20 = vadd.f32 %v5226_v16, %v5225_v55 }
0x4bef   : > { %v5228_v21 = vrot.slane %v5227_v20, 2 }
0x4bf1   : > { %v5229_v39 = vadd.f32 %v5228_v21, %v5227_v20 }
0x4bf3   : > { %v5230_v28 = vrot.slane %v5229_v39, 1 }
0x4bf5   : > { %v5231_v1 = vadd.f32 %v5230_v28, %v5229_v39 }
0x4bf7   : > { %5905 = vpush %v5231_v1 }
0x4c28   : > { %s5906_s28 = spop %5905 }
0x4c29   : > { %s5235_s11 = smul.f32 0.00390625, %s5906_s28 }
0x4c2b   : > { %v5236_v35 = vstv %s5235_s11  ;;  %s8376_s11 = scalar_lea.hbm %s8438_s27, %s5684_s20 }
0x4c2c   : > { %v5237_v4 = vsub.f32 %v5197_v47, %v5236_v35  ;;  %v5238_v14 = vsub.f32 %v5198_v24, %v5236_v35  ;;  %v5239_v25 = vsub.f32 %v5199_v11, %v5236_v35  ;;  %v5240_v2 = vsub.f32 %v5200_v32, %v5236_v35 }
0x4c2e   : > { %v5241_v3 = vmul.f32 %v5237_v4, %v5237_v4  ;;  %v5242_v8 = vmul.f32 %v5238_v14, %v5238_v14  ;;  %v5243_v38 = vmul.f32 %v5239_v25, %v5239_v25  ;;  %v5244_v7 = vmul.f32 %v5240_v2, %v5240_v2 }
0x4c30   : > { %v5245_v50 = vmul.f32 %v5241_v3, %v7052_v40  ;;  %v5246_v9 = vmul.f32 %v5242_v8, %v7052_v40  ;;  %v5247_v56 = vmul.f32 %v5243_v38, %v7052_v40  ;;  %v5248_v47 = vmul.f32 %v5244_v7, %v7052_v40 }
0x4c32   : > { %5253 = vrot.lane.b32.xlu0 %v5245_v50, %s8743_s0 }
0x4c36   : > { %5255 = vrot.lane.b32.xlu0 %v5246_v9, %s8743_s0 }
0x4c3a   : > { %5257 = vrot.lane.b32.xlu0 %v5247_v56, %s8743_s0 }
0x4c3e   : > { %5259 = vrot.lane.b32.xlu0 %v5248_v47, %s8743_s0 }
0x4ca4   : > { %v5254_v24 = vpop.permute.xlu0 %5253 }
0x4ca8   : > { %v5256_v46 = vpop.permute.xlu0 %5255 }
0x4ca9   : > { %v5261_v17 = vsel %vm2335_vm15, %v5254_v24, %v5256_v46 }
0x4caa   : > { %v5265_v19 = vsel %vm832_vm0, %v5261_v17, 0.0 }
0x4cac   : > { %v5258_v41 = vpop.permute.xlu0 %5257 }
0x4cb0   : > { %v5260_v0 = vpop.permute.xlu0 %5259 }
0x4cb1   : > { %v5262_v57 = vsel %vm2335_vm15, %v5258_v41, %v5260_v0 }
0x4cb2   : > { %v5266_v26 = vsel %vm832_vm0, %v5262_v57, 0.0 }
0x4cb3   : > { %v5267_v13 = vadd.f32 %v5266_v26, %v5265_v19 }
0x4cb5   : > { %5268 = vadd.xlane.f32.xlu0 %v5267_v13 }
0x4d3e   : > { %v5269_v42 = vpop.xlane.xlu0 %5268 }
0x4d3f   : > { %v5270_v11 = vrot.slane %v5269_v42, 4 }
0x4d41   : > { %v5271_v32 = vadd.f32 %v5270_v11, %v5269_v42 }
0x4d43   : > { %v5272_v40 = vrot.slane %v5271_v32, 2 }
0x4d45   : > { %v5273_v10 = vadd.f32 %v5272_v40, %v5271_v32 }
0x4d47   : > { %v5274_v6 = vrot.slane %v5273_v10, 1 }
0x4d49   : > { %v5275_v51 = vadd.f32 %v5274_v6, %v5273_v10 }
0x4d4b   : > { %5907 = vpush %v5275_v51 }
0x4d7c   : > { %s5908_s3 = spop %5907 }
0x4d7d   : > { %s5279_s14 = smul.f32 0.00390625, %s5908_s3 }
0x4d7f   : > { %s5280_s4 = sadd.f32 1e-08, %s5279_s14 }
0x4d81   : > { %v5281_v12 = vstv %s5280_s4 }
0x4d82   : > { %6107 = vrsqrt.f32 %v5281_v12 }
0x4d8f   : > { %v6108_v37 = vpop.eup %6107 }
0x4d90   : > { %5909 = vpush %v6108_v37 }
0x4dc1   : > { %s5910_s24 = spop %5909 }
0x4dc2   : > { %v5284_v61 = vstv %s5910_s24 }
0x4dc3   : > { %v5285_v48 = vmul.f32 %v5284_v61, %v5237_v4  ;;  %v5286_v59 = vmul.f32 %v5284_v61, %v5238_v14  ;;  %v5287_v27 = vmul.f32 %v5284_v61, %v5239_v25  ;;  %v5288_v55 = vmul.f32 %v5284_v61, %v5240_v2 }
0x4dc5   : > { %v5289_v36 = vmul.f32 %v5285_v48, %v7086_v52  ;;  %v5290_v15 = vmul.f32 %v5286_v59, %v7086_v52  ;;  %v5291_v16 = vmul.f32 %v5287_v27, %v7088_v33  ;;  %v5292_v39 = vmul.f32 %v5288_v55, %v7088_v33 }
0x4dc6   : > { %v6046_v52 = vpack.i.bf16 %v7953_v49, %v7953_v49 }
0x4dc7   : > { %v5294_v20 = vadd.f32 %v5290_v15, %v7094_v43  ;;  %v5293_v21 = vadd.f32 %v5289_v36, %v7094_v43  ;;  %v5295_v28 = vadd.f32 %v5291_v16, %v7092_v31  ;;  %v5296_v1 = vadd.f32 %v5292_v39, %v7092_v31 }
0x4dc9   : > { %5303 = vrot.lane.b32.xlu0 %v5294_v20, %s8743_s0  ;;  %5301 = vrot.lane.b32.xlu1 %v5293_v21, %s8743_s0 }
0x4dcd   : > { %5305 = vrot.lane.b32.xlu1 %v5295_v28, %s8743_s0 }
0x4dd1   : > { %5307 = vrot.lane.b32.xlu1 %v5296_v1, %s8743_s0  ;;  %v1469_v1 = vld [vmem:[%s8435_s23 + $0x8] sm:$0xff] }
0x4dd5   : > { %6047 = vrot.lane.b32.xlu1 %v6046_v52, %s8697_s1 }
0x4e3b   : > { %v5304_v43 = vpop.permute.xlu0 %5303  ;;  %v5302_v35 = vpop.permute.xlu1 %5301 }
0x4e3c   : > { %v5309_v4 = vsel %vm2335_vm15, %v5302_v35, %v5304_v43 }
0x4e3d   : > { %5313 = vst.msk [vmem:[#allocation2 + $0x8] sm:$0xff] %vm832_vm0, %v5309_v4 }
0x4e3f   : > { %v5306_v33 = vpop.permute.xlu1 %5305 }
0x4e43   : > { %v5308_v14 = vpop.permute.xlu1 %5307 }
0x4e44   : > { %v5310_v3 = vsel %vm2335_vm15, %v5306_v33, %v5308_v14  ;;  %v5316_v25 = vld [vmem:[#allocation2 + $0x8] sm:$0xff] }
0x4e45   : > { %5314 = vst.msk [vmem:[#allocation2 + $0x20] sm:$0xff] %vm832_vm0, %v5310_v3  ;;  %5325 = vrot.lane.b32.xlu1 %v5316_v25, %s8697_s1 }
0x4e47   : > { %v6048_v49 = vpop.permute.xlu1 %6047 }
0x4e48   : > { %v6049_v8 = vunpack.i.l.bf16 %v6048_v49  ;;  %v6050_v9 = vunpack.i.h.bf16 %v6048_v49 }
0x4e4c   : > { %v5318_v31 = vld [vmem:[#allocation2 + $0x20] sm:$0xff] }
0x4e4d   : > { %5329 = vrot.lane.b32.xlu1 %v5318_v31, %s8697_s1 }
0x4eb7   : > { %v5326_v50 = vpop.permute.xlu1 %5325 }
0x4eb8   : > { %v5331_v2 = vsel %vm1793_vm11, %v6049_v8, %v5326_v50 }
0x4eb9   : > { %v5335_v38 = vsel %vm7025_vm13, %v5309_v4, %v5331_v2 }
0x4eba   : > { %5339 = vrot.lane.b32.xlu0 %v5335_v38, %s8666_s5 }
0x4ebf   : > { %v5330_v7 = vpop.permute.xlu1 %5329 }
0x4ec0   : > { %v5332_v56 = vsel %vm1793_vm11, %v6050_v9, %v5330_v7 }
0x4ec1   : > { %v5336_v47 = vsel %vm7025_vm13, %v5310_v3, %v5332_v56 }
0x4ec2   : > { %5341 = vrot.lane.b32.xlu1 %v5336_v47, %s8666_s5 }
0x4f2c   : > { %v5340_v24 = vpop.permute.xlu0 %5339 }
0x4f2d   : > { %v5345_v46 = vadd.f32 %v5340_v24, %v8071_v30  ;;  %v5346_v41 = vadd.f32 %v5340_v24, %v8068_v23 }
0x4f2f   : > { %5355 = vrot.lane.b32.xlu1 %v5346_v41, %s8697_s1  ;;  %5353 = vrot.lane.b32.xlu0 %v5345_v46, %s8697_s1 }
0x4f34   : > { %v5342_v17 = vpop.permute.xlu1 %5341 }
0x4f35   : > { %v5347_v0 = vadd.f32 %v5342_v17, %v8079_v60  ;;  %v5348_v57 = vadd.f32 %v5342_v17, %v8084_v63 }
0x4f37   : > { %5359 = vrot.lane.b32.xlu1 %v5348_v57, %s8697_s1  ;;  %5357 = vrot.lane.b32.xlu0 %v5347_v0, %s8697_s1 }
0x4f3b   : > { %6052 = vrot.lane.b32.xlu0 %v6046_v52, %s8744_s15  ;;  %v5670_v52 = vld [vmem:[#allocation7] ss:$0 sm:$0xff] }
0x4fa1   : > { %v5356_v18 = vpop.permute.xlu1 %5355  ;;  %v5354_v19 = vpop.permute.xlu0 %5353 }
0x4fa2   : > { %v5361_v30 = vsel %vm1793_vm11, %v5354_v19, %v5356_v18 }
0x4fa3   : > { %5365 = vst.msk [vmem:[#allocation2 + $0x8] sm:$0xff] %vm832_vm0, %v5361_v30 }
0x4fa9   : > { %v5360_v23 = vpop.permute.xlu1 %5359  ;;  %v5358_v26 = vpop.permute.xlu0 %5357 }
0x4faa   : > { %v5362_v13 = vsel %vm1793_vm11, %v5358_v26, %v5360_v23  ;;  %v5368_v42 = vld [vmem:[#allocation2 + $0x8] sm:$0xff] }
0x4fab   : > { %5366 = vst.msk [vmem:[#allocation2 + $0x20] sm:$0xff] %vm832_vm0, %v5362_v13  ;;  %5377 = vrot.lane.b32.xlu1 %v5368_v42, %s8744_s15 }
0x4fad   : > { %v6053_v63 = vpop.permute.xlu0 %6052 }
0x4fae   : > { %v6054_v11 = vunpack.i.l.bf16 %v6053_v63  ;;  %v6055_v6 = vunpack.i.h.bf16 %v6053_v63  ;;  %v8816_v63 = vld [vmem:[#allocation57_spill] sm:$0xff] }
0x4fb2   : > { %v5370_v60 = vld [vmem:[#allocation2 + $0x20] sm:$0xff] }
0x4fb3   : > { %5381 = vrot.lane.b32.xlu0 %v5370_v60, %s8744_s15 }
0x501d   : > { %v5378_v32 = vpop.permute.xlu1 %5377 }
0x501e   : > { %v5383_v40 = vsel %vm2520_vm1, %v6054_v11, %v5378_v32 }
0x501f   : > { %v5387_v10 = vsel %vm6878_vm12, %v5361_v30, %v5383_v40  ;;  %v1467_v30 = vld [vmem:[%s8434_s22 + $0x8] sm:$0xff]  ;;  %v3595_v40 = vstv %s7570_s18 }
0x5020   : > { %5391 = vrot.lane.b32.xlu1 %v5387_v10, %s8666_s5 }
0x5025   : > { %v5382_v51 = vpop.permute.xlu0 %5381 }
0x5026   : > { %v5384_v12 = vsel %vm2520_vm1, %v6055_v6, %v5382_v51 }
0x5027   : > { %v5388_v37 = vsel %vm6878_vm12, %v5362_v13, %v5384_v12  ;;  %v2614_v13 = vstv %s7234_s2  ;;  %v8817_v12 = vld [vmem:[#allocation58_spill] sm:$0xff] }
0x5028   : > { %5393 = vrot.lane.b32.xlu0 %v5388_v37, %s8666_s5  ;;  %v2615_v11 = vmul.f32 %v2614_v13, %v8816_v63  ;;  %v2616_v37 = vmul.f32 %v2614_v13, %v8817_v12 }
0x5092   : > { %v5392_v61 = vpop.permute.xlu1 %5391 }
0x5093   : > { %v5397_v48 = vadd.f32 %v5392_v61, %v7985_v45  ;;  %v5398_v59 = vadd.f32 %v5392_v61, %v7982_v22  ;;  %v8818_v61 = vld [vmem:[#allocation59_spill] sm:$0xff] }
0x5095   : > { %5407 = vrot.lane.b32.xlu0 %v5398_v59, %s8697_s1  ;;  %5405 = vrot.lane.b32.xlu1 %v5397_v48, %s8697_s1 }
0x509a   : > { %v5394_v27 = vpop.permute.xlu0 %5393 }
0x509b   : > { %v5399_v36 = vadd.f32 %v5394_v27, %v7993_v34  ;;  %v5400_v15 = vadd.f32 %v5394_v27, %v7998_v54  ;;  %v1466_v34 = vld [vmem:[%s8434_s22] sm:$0xff] }
0x509c   : > { %v1468_v54 = vld [vmem:[%s8435_s23] sm:$0xff] }
0x509d   : > { %5411 = vrot.lane.b32.xlu0 %v5400_v15, %s8697_s1  ;;  %5409 = vrot.lane.b32.xlu1 %v5399_v36, %s8697_s1  ;;  %v8819_v27 = vld [vmem:[#allocation60_spill] sm:$0xff] }
0x5107   : > { %v5408_v44 = vpop.permute.xlu0 %5407  ;;  %v5406_v55 = vpop.permute.xlu1 %5405 }
0x5108   : > { %v5413_v16 = vsel %vm1793_vm11, %v5406_v55, %v5408_v44  ;;  %v8821_v55 = vld [vmem:[#allocation21_spill] sm:$0xff] }
0x5109   : > { %v5417_v21 = vsel %vm832_vm0, %v5413_v16, 0.0  ;;  %v3598_v16 = vmul.f32 %v3595_v40, %v8821_v55 }
0x510f   : > { %v5412_v45 = vpop.permute.xlu0 %5411  ;;  %v5410_v20 = vpop.permute.xlu1 %5409 }
0x5110   : > { %v5414_v22 = vsel %vm1793_vm11, %v5410_v20, %v5412_v45  ;;  %v8822_v20 = vld [vmem:[#allocation19_spill] sm:$0xff] }
0x5111   : > { %v5418_v39 = vsel %vm832_vm0, %v5414_v22, 0.0  ;;  %v3597_v22 = vmul.f32 %v3595_v40, %v8822_v20 }
0x5112   : > { %v5419_v28 = vadd.f32 %v5418_v39, %v5417_v21  ;;  %v8823_v21 = vld [vmem:[#allocation61_spill] sm:$0xff] }
0x5113   : > { %v3599_v39 = vmul.f32 %v3595_v40, %v8823_v21 }
0x5114   : > { %5420 = vadd.xlane.f32.xlu1 %v5419_v28  ;;  %v4538_v28 = vstv %s7914_s12 }
0x5115   : > { %v4542_v63 = vmul.f32 %v4538_v28, %v7902_v29 }
0x5125   : > { %2621 = vperm.xlu1 %6056, %v1466_v34  }
0x5129   : > { %2635 = vperm.xlu1 %6056, %v1468_v54  }
0x512d   : > { %2640 = vperm.xlu1 %6056, %v1469_v1  }
0x5131   : > { %2661 = vperm.xlu1 %6056, %v5670_v52  }
0x519d   : > { %v5421_v43 = vpop.xlane.xlu1 %5420 }
0x519e   : > { %v5422_v35 = vrot.slane %v5421_v43, 4 }
0x51a0   : > { %v5423_v4 = vadd.f32 %v5422_v35, %v5421_v43 }
0x51a1   : > { %v8250_v23 = vpop.permute.xlu1 %2621 }
0x51a2   : > { %v5424_v33 = vrot.slane %v5423_v4, 2  ;;  %v2629_v6 = vmul.f32 %v8250_v23, %v2615_v11  ;;  %v2630_v54 = vmul.f32 %v8250_v23, %v2616_v37 }
0x51a4   : > { %v5425_v14 = vadd.f32 %v5424_v33, %v5423_v4 }
0x51a5   : > { %v8252_v26 = vpop.permute.xlu1 %2635 }
0x51a6   : > { %v5426_v3 = vrot.slane %v5425_v14, 1 }
0x51a8   : > { %v5427_v25 = vadd.f32 %v5426_v3, %v5425_v14  ;;  %v2644_v14 = vadd.f32 %v8252_v26, %v2630_v54 }
0x51a9   : > { %v8257_v10 = vpop.permute.xlu1 %2640 }
0x51aa   : > { %5911 = vpush %v5427_v25  ;;  %v2648_v12 = vmax.f32 %v2644_v14, 0.0 }
0x51ad   : > { %v8275_v4 = vpop.permute.xlu1 %2661 }
0x51db   : > { %s5912_s16 = spop %5911 }
0x51dc   : > { %s5431_s28 = smul.f32 0.0009765625, %s5912_s16 }
0x51de   : > { %v5432_v31 = vstv %s5431_s28 }
0x51df   : > { %v8223_v49 = vsub.f32 %v5397_v48, %v5432_v31  ;;  %v8225_v8 = vsub.f32 %v5398_v59, %v5432_v31  ;;  %v8230_v2 = vsub.f32 %v5399_v36, %v5432_v31  ;;  %v8235_v9 = vsub.f32 %v5400_v15, %v5432_v31  ;;  %v8820_v15 = vld [vmem:[#allocation18_spill] sm:$0xff] }
0x51e0   : > { %v2617_v48 = vmul.f32 %v2614_v13, %v8818_v61  ;;  %v2643_v59 = vadd.f32 %v8252_v26, %v2629_v6  ;;  %v2618_v36 = vmul.f32 %v2614_v13, %v8819_v27  ;;  %v3596_v44 = vmul.f32 %v3595_v40, %v8820_v15 }
0x51e1   : > { %v5437_v50 = vmul.f32 %v8223_v49, %v8223_v49  ;;  %v5438_v38 = vmul.f32 %v8225_v8, %v8225_v8  ;;  %v5439_v7 = vmul.f32 %v8230_v2, %v8230_v2  ;;  %v5440_v56 = vmul.f32 %v8235_v9, %v8235_v9 }
0x51e2   : > { %v2651_v33 = vmin.f32 %v2643_v59, 0.0  ;;  %v3600_v3 = vmul.f32 %v3596_v44, %v8250_v23  ;;  %v4540_v15 = vmul.f32 %v4538_v28, %v7892_v62 }
0x51e3   : > { %5445 = vrot.lane.b32.xlu0 %v5437_v50, %s8697_s1 }
0x51e7   : > { %5447 = vrot.lane.b32.xlu0 %v5438_v38, %s8697_s1 }
0x51eb   : > { %5449 = vrot.lane.b32.xlu0 %v5439_v7, %s8697_s1 }
0x51ef   : > { %5451 = vrot.lane.b32.xlu0 %v5440_v56, %s8697_s1  ;;  %v4541_v56 = vmul.f32 %v4538_v28, %v7897_v5 }
0x5255   : > { %v5446_v47 = vpop.permute.xlu0 %5445 }
0x5259   : > { %v5448_v24 = vpop.permute.xlu0 %5447 }
0x525a   : > { %v5453_v41 = vsel %vm1793_vm11, %v5446_v47, %v5448_v24  ;;  %v3601_v47 = vmul.f32 %v3597_v22, %v8250_v23 }
0x525b   : > { %v5457_v57 = vsel %vm832_vm0, %v5453_v41, 0.0 }
0x525c   : > { %v3605_v11 = vadd.f32 %v3601_v47, %v8252_v26 }
0x525d   : > { %v5450_v46 = vpop.permute.xlu0 %5449 }
0x525e   : > { %v3613_v20 = vmin.f32 %v3605_v11, 0.0 }
0x5261   : > { %v5452_v17 = vpop.permute.xlu0 %5451 }
0x5262   : > { %v5454_v0 = vsel %vm1793_vm11, %v5450_v46, %v5452_v17  ;;  %v2664_v46 = vmul.f32 %v8275_v4, %v2651_v33  ;;  %v3604_v17 = vadd.f32 %v3600_v3, %v8252_v26  ;;  %v3609_v33 = vmax.f32 %v3605_v11, 0.0 }
0x5263   : > { %v5458_v18 = vsel %vm832_vm0, %v5454_v0, 0.0  ;;  %v2647_v0 = vmax.f32 %v2643_v59, 0.0 }
0x5264   : > { %v5459_v19 = vadd.f32 %v5458_v18, %v5457_v57  ;;  %v2652_v57 = vmin.f32 %v2644_v14, 0.0  ;;  %v3612_v37 = vmin.f32 %v3604_v17, 0.0 }
0x5266   : > { %5460 = vadd.xlane.f32.xlu0 %v5459_v19 }
0x527c   : > { %2626 = vperm.xlu0 %6057, %v1467_v30  }
0x52ef   : > { %v5461_v42 = vpop.xlane.xlu0 %5460 }
0x52f0   : > { %v5462_v60 = vrot.slane %v5461_v42, 4 }
0x52f2   : > { %v5463_v32 = vadd.f32 %v5462_v60, %v5461_v42  ;;  %v4539_v60 = vmul.f32 %v4538_v28, %v7888_v53 }
0x52f4   : > { %v5464_v51 = vrot.slane %v5463_v32, 2  ;;  %v4543_v29 = vmul.f32 %v4539_v60, %v8250_v23 }
0x52f6   : > { %v5465_v45 = vadd.f32 %v5464_v51, %v5463_v32  ;;  %v2668_v32 = vadd.f32 %v2664_v46, %v2647_v0  ;;  %v2665_v51 = vmul.f32 %v8275_v4, %v2652_v57  ;;  %v4547_v22 = vadd.f32 %v4543_v29, %v8252_v26 }
0x52f7   : > { %v8269_v34 = vpop.permute.xlu0 %2626 }
0x52f8   : > { %v5466_v1 = vrot.slane %v5465_v45, 1  ;;  %v2631_v52 = vmul.f32 %v8269_v34, %v2617_v48  ;;  %v2632_v43 = vmul.f32 %v8269_v34, %v2618_v36  ;;  %v3602_v35 = vmul.f32 %v3598_v16, %v8269_v34 }
0x52f9   : > { %v3603_v25 = vmul.f32 %v3599_v39, %v8269_v34  ;;  %v4545_v19 = vmul.f32 %v4541_v56, %v8269_v34  ;;  %v4546_v48 = vmul.f32 %v4542_v63, %v8269_v34  ;;  %v2669_v44 = vadd.f32 %v2665_v51, %v2648_v12 }
0x52fa   : > { %v5467_v31 = vadd.f32 %v5466_v1, %v5465_v45  ;;  %v2645_v50 = vadd.f32 %v8257_v10, %v2631_v52  ;;  %v2646_v38 = vadd.f32 %v8257_v10, %v2632_v43  ;;  %v3606_v7 = vadd.f32 %v3602_v35, %v8257_v10 }
0x52fb   : > { %v3607_v18 = vadd.f32 %v3603_v25, %v8257_v10  ;;  %v4549_v61 = vadd.f32 %v4545_v19, %v8257_v10  ;;  %v3616_v16 = vmul.f32 %v3612_v37, %v8275_v4  ;;  %v3608_v45 = vmax.f32 %v3604_v17, 0.0 }
0x52fc   : > { %5913 = vpush %v5467_v31  ;;  %v2653_v24 = vmin.f32 %v2645_v50, 0.0  ;;  %v2654_v41 = vmin.f32 %v2646_v38, 0.0  ;;  %v2649_v30 = vmax.f32 %v2645_v50, 0.0  ;;  %v3614_v42 = vmin.f32 %v3606_v7, 0.0 }
0x52fd   : > { %v2650_v6 = vmax.f32 %v2646_v38, 0.0  ;;  %v3615_v53 = vmin.f32 %v3607_v18, 0.0  ;;  %v3610_v55 = vmax.f32 %v3606_v7, 0.0  ;;  %v4550_v21 = vadd.f32 %v4546_v48, %v8257_v10 }
0x52fe   : > { %v2666_v13 = vmul.f32 %v8275_v4, %v2653_v24  ;;  %v2667_v5 = vmul.f32 %v8275_v4, %v2654_v41  ;;  %v3618_v36 = vmul.f32 %v3614_v42, %v8275_v4  ;;  %v4557_v52 = vmin.f32 %v4549_v61, 0.0 }
0x52ff   : > { %v3619_v1 = vmul.f32 %v3615_v53, %v8275_v4  ;;  %v4544_v43 = vmul.f32 %v4540_v15, %v8250_v23  ;;  %v3620_v62 = vadd.f32 %v3616_v16, %v3608_v45  ;;  %v3611_v28 = vmax.f32 %v3607_v18, 0.0 }
0x5300   : > { %v2670_v40 = vadd.f32 %v2666_v13, %v2649_v30  ;;  %v2671_v27 = vadd.f32 %v2667_v5, %v2650_v6  ;;  %v3622_v54 = vadd.f32 %v3618_v36, %v3610_v55  ;;  %v3617_v35 = vmul.f32 %v3613_v20, %v8275_v4 }
0x5301   : > { %v4555_v14 = vmin.f32 %v4547_v22, 0.0  ;;  %v4548_v3 = vadd.f32 %v4544_v43, %v8252_v26  ;;  %v3623_v31 = vadd.f32 %v3619_v1, %v3611_v28  ;;  %v4561_v50 = vmul.f32 %v4557_v52, %v8275_v4 }
0x5302   : > { %v2672_v59 = vpack.c.bf16 %v2670_v40, %v2668_v32  ;;  %v2673_v39 = vpack.c.bf16 %v2671_v27, %v2669_v44  ;;  %v3624_v25 = vpack.c.bf16 %v3622_v54, %v3620_v62  ;;  %v4558_v38 = vmin.f32 %v4550_v21, 0.0  ;;  %v6121_v54 = vld [vmem:[#allocation2] sm:$0xff] }
0x5303   : > { %v3621_v7 = vadd.f32 %v3617_v35, %v3609_v33  ;;  %v4553_v56 = vmax.f32 %v4549_v61, 0.0  ;;  %v4559_v47 = vmul.f32 %v4555_v14, %v8275_v4  ;;  %v4551_v24 = vmax.f32 %v4547_v22, 0.0  ;;  %v1472_v14 = vld [vmem:[%s8437_s26] sm:$0xff] }
0x5304   : > { %2681 = vrot.lane.b32.xlu1 %v2672_v59, %s8697_s1  ;;  %v4556_v17 = vmin.f32 %v4548_v3, 0.0  ;;  %v4562_v0 = vmul.f32 %v4558_v38, %v8275_v4  ;;  %v4554_v18 = vmax.f32 %v4550_v21, 0.0  ;;  %v4552_v13 = vmax.f32 %v4548_v3, 0.0 }
0x5305   : > { %v3625_v46 = vpack.c.bf16 %v3623_v31, %v3621_v7  ;;  %v4565_v41 = vadd.f32 %v4561_v50, %v4553_v56  ;;  %v4563_v57 = vadd.f32 %v4559_v47, %v4551_v24 }
0x5306   : > { %v4560_v19 = vmul.f32 %v4556_v17, %v8275_v4  ;;  %v4566_v5 = vadd.f32 %v4562_v0, %v4554_v18 }
0x5307   : > { %v4567_v30 = vpack.c.bf16 %v4565_v41, %v4563_v57  ;;  %v8825_v41 = vld [vmem:[#allocation17_spill] sm:$0xff] }
0x5308   : > { %2683 = vrot.lane.b32.xlu1 %v2673_v39, %s8697_s1  ;;  %v4564_v42 = vadd.f32 %v4560_v19, %v4552_v13 }
0x530a   : > { %v4568_v60 = vpack.c.bf16 %v4566_v5, %v4564_v42 }
0x530c   : > { %3628 = vrot.lane.b32.xlu1 %v3624_v25, %s8697_s1  ;;  %v8824_v25 = vld [vmem:[#allocation55_spill] sm:$0xff] }
0x5310   : > { %3630 = vrot.lane.b32.xlu1 %v3625_v46, %s8697_s1 }
0x5314   : > { %4571 = vrot.lane.b32.xlu1 %v4567_v30, %s8697_s1 }
0x5318   : > { %4573 = vrot.lane.b32.xlu1 %v4568_v60, %s8697_s1 }
0x532d   : > { %s5914_s18 = spop %5913 }
0x532e   : > { %s5471_s2 = smul.f32 0.0009765625, %s5914_s18 }
0x5330   : > { %s5472_s12 = sadd.f32 1e-08, %s5471_s2 }
0x5332   : > { %v5473_v63 = vstv %s5472_s12 }
0x5333   : > { %6109 = vrsqrt.f32 %v5473_v63 }
0x5340   : > { %v6110_v11 = vpop.eup %6109 }
0x5341   : > { %5915 = vpush %v6110_v11 }
0x5372   : > { %s5916_s14 = spop %5915 }
0x5373   : > { %v5476_v32 = vstv %s5916_s14 }
0x5374   : > { %v5477_v40 = vmul.f32 %v5476_v32, %v8223_v49  ;;  %v5478_v6 = vmul.f32 %v5476_v32, %v8225_v8  ;;  %v5479_v51 = vmul.f32 %v5476_v32, %v8230_v2  ;;  %v5480_v12 = vmul.f32 %v5476_v32, %v8235_v9 }
0x5376   : > { %v5481_v37 = vmul.f32 %v5477_v40, %v8250_v23  ;;  %v5482_v61 = vmul.f32 %v5478_v6, %v8250_v23  ;;  %v5483_v48 = vmul.f32 %v5479_v51, %v8269_v34  ;;  %v5484_v59 = vmul.f32 %v5480_v12, %v8269_v34  ;;  %v2682_v27 = vpop.permute.xlu1 %2681  ;;  %v8826_v40 = vld [vmem:[#allocation56_spill] sm:$0xff] }
0x5378   : > { %v5485_v36 = vadd.f32 %v5481_v37, %v8252_v26  ;;  %v5486_v53 = vadd.f32 %v5482_v61, %v8252_v26  ;;  %v5487_v49 = vadd.f32 %v5483_v48, %v8257_v10  ;;  %v5488_v8 = vadd.f32 %v5484_v59, %v8257_v10  ;;  %v1471_v26 = vld [vmem:[%s8436_s25] sm:$0xf] }
0x537a   : > { %v5489_v2 = vmax.f32 %v5485_v36, 0.0  ;;  %v2684_v29 = vpop.permute.xlu1 %2683  ;;  %v5493_v9 = vmin.f32 %v5485_v36, 0.0  ;;  %v5494_v15 = vmin.f32 %v5486_v53, 0.0  ;;  %v5495_v44 = vmin.f32 %v5487_v49, 0.0 }
0x537b   : > { %v5496_v23 = vmin.f32 %v5488_v8, 0.0  ;;  %v5490_v55 = vmax.f32 %v5486_v53, 0.0  ;;  %v5491_v16 = vmax.f32 %v5487_v49, 0.0  ;;  %v5492_v45 = vmax.f32 %v5488_v8, 0.0 }
0x537c   : > { %v2686_v34 = vsel %vm1793_vm11, %v2682_v27, %v2684_v29  ;;  %v5498_v20 = vmul.f32 %v5494_v15, %v8275_v4  ;;  %v5497_v22 = vmul.f32 %v5493_v9, %v8275_v4  ;;  %v5499_v21 = vmul.f32 %v5495_v44, %v8275_v4 }
0x537d   : > { %5731 = vmatpush3.bf16.msra.mxu0 %v2686_v34  ;;  %v5500_v10 = vmul.f32 %v5496_v23, %v8275_v4 }
0x537e   : > { %v3629_v39 = vpop.permute.xlu1 %3628  ;;  %5742 = vmatprep.subr.bf16.mxu0 %v6121_v54  ;;  %v5502_v1 = vadd.f32 %v5498_v20, %v5490_v55  ;;  %v5501_v43 = vadd.f32 %v5497_v22, %v5489_v2  ;;  %v5503_v62 = vadd.f32 %v5499_v21, %v5491_v16 }
0x537f   : > { %v5504_v52 = vadd.f32 %v5500_v10, %v5492_v45 }
0x5380   : > { %5733 = vmatmul.mubr.msk.bf16.vlgmr.msra.gmra.mxu0 %vm2688_vm2, %v1471_v26  ;;  %v5505_v35 = vpack.c.bf16 %v5503_v62, %v5501_v43 }
0x5381   : > { %v5506_v28 = vpack.c.bf16 %v5504_v52, %v5502_v1  ;;  %5744 = vmatprep.mubr.msk.bf16.mxu0 %vm6187_vm8, %v6121_v54 }
0x5382   : > { %v3631_v33 = vpop.permute.xlu1 %3630  ;;  %5509 = vrot.lane.b32.xlu1 %v5505_v35, %s8697_s1 }
0x5383   : > { %5511 = vrot.lane.b32.xlu0 %v5506_v28, %s8697_s1  ;;  %v3632_v4 = vsel %vm1793_vm11, %v3629_v39, %v3631_v33  ;;  %s819_s1 = sand.u32 1, %s6174_s6  }
0x5384   : > { %5743 = vmatpush3.bf16.msra.mxu0 %v3632_v4  ;;  %s5643_s15 = sshll.u32 %s819_s1, 4  ;;  %s5566_s3 = scalar_lea.sflag [#allocation9], %s819_s1 }
0x5385   : > { %5754 = vmatprep.subr.bf16.mxu0 %v6121_v54  ;;  %s8360_s19 = scalar_lea.vmem [#allocation8], %s5643_s15 }
0x5386   : > { %v4572_v3 = vpop.permute.xlu1 %4571  ;;  %2676 = vperm.xlu1 %6056, %v1472_v14   ;;  %s5580_s29 = sshll.u32 %s8360_s19, 4  ;;  %s5581_s29 = int_to_ptr.vmem [resolvable:$true] %s5580_s29 }
0x5387   : > { %3675 = vrot.lane.b32.xlu0 %v8824_v25, %s8635_s10  ;;  %s6122_s18 = scalar_lea.vmem %s5581_s29, 256 }
0x5388   : > { %5745 = vmatmul.mubr.msk.bf16.vlgmr.msra.gmra.mxu0 %vm2688_vm2, %v1471_v26  ;;  %p6123_p11 = scmp.ne.s32.totalorder %s5581_s29, %s6122_s18 }
0x5389   : > { %5756 = vmatprep.mubr.msk.bf16.mxu0 %vm6187_vm8, %v6121_v54 }
0x538a   : > { %v4574_v31 = vpop.permute.xlu1 %4573  ;;  %5556 = vrot.lane.b32.xlu1 %v7870_v58, %s8635_s10  ;;  %p6124_p12 = pnand %p6123_p11, %p6405_p5 }
0x538b   : > { %v4575_v50 = vsel %vm1793_vm11, %v4572_v3, %v4574_v31 }
0x538c   : > { %5755 = vmatpush3.bf16.msra.mxu0 %v4575_v50  ;;  %p6125_p13 = pneg %p6124_p12 }
0x538d   : > { %5766 = vmatprep.subr.bf16.mxu0 %v6121_v54 }
0x5390   : > { %5757 = vmatmul.mubr.msk.bf16.vlgmr.msra.gmra.mxu0 %vm2688_vm2, %v1471_v26 }
0x5391   : > { %5768 = vmatprep.mubr.msk.bf16.mxu0 %vm6187_vm8, %v6121_v54 }
0x53f4   : > { %v5510_v7 = vpop.permute.xlu1 %5509 }
0x53f5   : > { %v5512_v38 = vpop.permute.xlu0 %5511 }
0x53f6   : > { %v5513_v56 = vsel %vm1793_vm11, %v5510_v7, %v5512_v38 }
0x53f7   : > { %5767 = vmatpush3.bf16.msra.mxu0 %v5513_v56 }
0x53f9   : > { %v3676_v30 = vpop.permute.xlu0 %3675 }
0x53fa   : > { %5769 = vmatmul.mubr.msk.bf16.vlgmr.msra.gmra.mxu0 %vm2688_vm2, %v1471_v26 }
0x5401   : > { %v2677_v47 = vpop.permute.xlu1 %2676 }
0x5405   : > { %v5557_v48 = vpop.permute.xlu1 %5556 }
0x5440   : > { %v2726_v58 = vpop.f32.mrf.mxu0 }
0x5441   : > { %v2727_v24 = vadd.f32 %v2726_v58, %v2677_v47 }
0x5442   : > { %v5734_v46 = vpop.f32.mrf.mxu0 }
0x5443   : > { %v2732_v17 = vadd.f32 %v2727_v24, %v8825_v41 }
0x5444   : > { %v2729_v0 = vpop.f32.mrf.mxu0 }
0x5445   : > { %2733 = vst.msk [vmem:[%s8360_s19] sm:$0xff] %vm832_vm0, %v2732_v17 }
0x5446   : > { %v5735_v57 = vpop.f32.mrf.mxu0 }
0x5448   : > { %v3668_v18 = vpop.f32.mrf.mxu0 }
0x5449   : > { %v3669_v19 = vadd.f32 %v3668_v18, %v2677_v47 }
0x544a   : > { %v5746_v13 = vpop.f32.mrf.mxu0 }
0x544b   : > { %v3678_v5 = vadd.f32 %v3676_v30, %v3669_v19 }
0x544c   : > { %v3671_v42 = vpop.f32.mrf.mxu0 }
0x544d   : > { %3680 = vrot.lane.b32.xlu0 %v3678_v5, %s8635_s10 }
0x544e   : > { %v5747_v60 = vpop.f32.mrf.mxu0 }
0x5450   : > { %v4611_v63 = vpop.f32.mrf.mxu0 }
0x5451   : > { %v4612_v11 = vadd.f32 %v4611_v63, %v2677_v47 }
0x5452   : > { %v5758_v32 = vpop.f32.mrf.mxu0 }
0x5453   : > { %v4617_v6 = vadd.f32 %v4612_v11, %v8826_v40 }
0x5454   : > { %v4614_v51 = vpop.f32.mrf.mxu0 }
0x5455   : > { %4618 = vst.msk [vmem:[%s8360_s19 + $0x8] sm:$0xff] %vm832_vm0, %v4617_v6 }
0x5456   : > { %v5759_v12 = vpop.f32.mrf.mxu0 }
0x54ba   : > { %v5549_v37 = vpop.f32.mrf.mxu0 }
0x54bb   : > { %v5550_v61 = vadd.f32 %v5549_v37, %v2677_v47 }
0x54bc   : > { %v5770_v59 = vpop.f32.mrf.mxu0 }
0x54bd   : > { %v5559_v27 = vadd.f32 %v5557_v48, %v5550_v61 }
0x54be   : > { %v5552_v36 = vpop.f32.mrf.mxu0 }
0x54bf   : > { %v3681_v53 = vpop.permute.xlu0 %3680  ;;  %5561 = vrot.lane.b32.xlu1 %v5559_v27, %s8635_s10  ;;  %s6211_s10 = smov [#allocation8]  }
0x54c0   : > { %3683 = vst.msk [vmem:[%s8360_s19] sm:$0xff] %vm830_vm9, %v3681_v53  ;;  %v5771_v49 = vpop.f32.mrf.mxu0  ;;  %s6126_s2 = sshll.u32 %s6211_s10, 4  ;;  %s6127_s2 = int_to_ptr.vmem [resolvable:$false] %s6126_s2 }
0x54c1   : > { %s6128_s17 = scalar_lea.vmem %s6127_s2, 512  ;;  %p6129_p0 = scmp.lt.s32.totalorder %s5581_s29, %s6127_s2 }
0x54c2   : > { %p6130_p1 = scmp.lt.s32.totalorder %s6128_s17, %s6122_s18 }
0x54c4   : > { %p6131_p2 = por %p6130_p1, %p6129_p0 }
0x54c6   : > { %p6132_p3 = pnand %p6131_p2, %p6125_p13 }
0x5531   : > { %v5562_v8 = vpop.permute.xlu1 %5561 }
0x5532   : > { %5564 = vst.msk [vmem:[%s8360_s19 + $0x8] sm:$0xff] %vm830_vm9, %v5562_v8 }
0x5533   : > { %6135 = shalt.err (!%p6132_p3)
}
0x5534   : > { %s6136_s12 = scalar_lea.hbm %s8376_s11, 256  ;;  %s6140_s24 = scalar_lea.hbm %s8438_s27, 512 }
0x5535   : > { %p6137_p4 = scmp.ne.s32.totalorder %s8376_s11, %s6136_s12  ;;  %p6141_p9 = scmp.lt.s32.totalorder %s8376_s11, %s8438_s27 }
0x5536   : > { %p6142_p10 = scmp.lt.s32.totalorder %s6140_s24, %s6136_s12 }
0x5537   : > { %p6138_p7 = pnand %p6137_p4, %p6405_p5 }
0x5538   : > { %p6143_p11 = por %p6142_p10, %p6141_p9 }
0x5539   : > { %p6139_p8 = pneg %p6138_p7 }
0x553b   : > { %p6144_p12 = pnand %p6143_p11, %p6139_p8 }
0x553d   : > { %6147 = shalt.err (!%p6144_p12)
}
0x553e   : > { %5917 = dma.vmem_to_hbm [thread:$0]  (%p6405_p5), %s5581_s29, 256, %s8376_s11, %s5566_s3  }
0x553f PF: > { %p5923_p13 = scmp.ge.s32.totalorder %s6182_s13, 2  ;;  %s5592_s15 = sand.u32 1, %s6170_s8  }
0x5540   : > { %s5593_s19 = scalar_lea.sflag [#allocation9], %s5592_s15 }
0x5541   : > { %p5920_p0 = pnand %p5923_p13, %p6409_p6 }
0x5543   : > { %p5921_p1 = pneg %p5920_p0 }
0x5545   : > { %6165 = dma.done.wait (%p5921_p1), %s5593_s19, 256  }
0x5546   : > { %6167 = vsyncadd (%p5921_p1), %s5593_s19, 4294967040  ;;  %s8828_s13 = sld [smem:[#allocation12_spill]]  ;;  %s8831_s8 = smov %s6174_s6 }
0x5547   : > { %s8829_s20 = sld [smem:[#allocation11_spill]] }
0x5548   : > { %s8830_s12 = sld [smem:[#allocation13_spill]] }
0x554c   : > { %p47_p2 = scmp.ge.s32.totalorder %s8828_s13, 4  }
0x554d   : > { %s8832_s6 = smov %s8829_s20 }
0x554e   :  { %49 = sbr.rel (!%p47_p2) target bundleno = 30 (0x1e), region = 163 }
0x5553   :  { %5598 = vsyncpa [#allocation9], 1 }
0x5554   :  { %5600 = vsyncpa [#allocation9 + $0x1], 1 }

</bundles_post_ra>
